<compile_context>
chip_gen: v5e
topology: v5e:2x2
jax: 0.10.0
libtpu: 0.0.40
codegen_flags: <defaults>
</compile_context>

<pallas_src>
import functools

import jax
import jax.numpy as jnp
from jax.experimental import pallas as pl
from jax.experimental.pallas import tpu as pltpu


def _round_up(x, m):
    return (x + m - 1) // m * m


# --------------------------------------------------------------------------
# Pallas kernels
# --------------------------------------------------------------------------
def _matmul_bias_kernel(x_ref, w_ref, b_ref, o_ref, *, activation):
    """o = activation(x @ w + b).  x:(TM,K) bf16, w:(K,N) bf16, b:(1,N) f32."""
    acc = jnp.dot(x_ref[...], w_ref[...], preferred_element_type=jnp.float32)
    acc = acc + b_ref[...]
    if activation == "tanh":
        acc = jnp.tanh(acc)
    elif activation == "relu":
        acc = jnp.maximum(acc, 0.0)
    o_ref[...] = acc.astype(o_ref.dtype)


def _bn_stats_kernel(x_ref, sums_ref):
    """Accumulate per-channel [sum; sum_sq] over row tiles into sums_ref (2,C)."""
    @pl.when(pl.program_id(0) == 0)
    def _():
        sums_ref[...] = jnp.zeros_like(sums_ref)

    x = x_ref[...].astype(jnp.float32)
    part = jnp.concatenate(
        [jnp.sum(x, axis=0, keepdims=True),
         jnp.sum(x * x, axis=0, keepdims=True)], axis=0)
    sums_ref[...] += part


def _bn_apply_kernel(x_ref, ss_ref, o_ref, *, relu):
    """y = x*scale + shift (+ReLU).  ss:(2,C) = [scale; shift]."""
    x = x_ref[...].astype(jnp.float32)
    ss = ss_ref[...]
    y = x * ss[0:1, :] + ss[1:2, :]
    if relu:
        y = jnp.maximum(y, 0.0)
    o_ref[...] = y.astype(o_ref.dtype)


# --------------------------------------------------------------------------
# Pallas wrappers
# --------------------------------------------------------------------------
def pallas_matmul_bias(x, w, b, activation="none", *, tile_m=512,
                       out_dtype=jnp.float32):
    """activation(x @ w + b), bf16 operands, M-tiled 'parallel' grid."""
    M, K = x.shape
    K2, N = w.shape
    assert K == K2
    xb = x.astype(jnp.bfloat16)
    wb = w.astype(jnp.bfloat16)
    b2 = b.reshape(1, N).astype(jnp.float32)

    tile_m = min(tile_m, _round_up(M, 8))
    m_pad = _round_up(M, tile_m)
    if m_pad != M:
        xb = jnp.pad(xb, ((0, m_pad - M), (0, 0)))
    grid = (m_pad // tile_m,)

    kern = functools.partial(_matmul_bias_kernel, activation=activation)
    out = pl.pallas_call(
        kern,
        out_shape=jax.ShapeDtypeStruct((m_pad, N), out_dtype),
        grid=grid,
        in_specs=[
            pl.BlockSpec((tile_m, K), lambda i: (i, 0)),
            pl.BlockSpec((K, N), lambda i: (0, 0)),
            pl.BlockSpec((1, N), lambda i: (0, 0)),
        ],
        out_specs=pl.BlockSpec((tile_m, N), lambda i: (i, 0)),
        compiler_params=pltpu.CompilerParams(
            dimension_semantics=("parallel",)),
    )(xb, wb, b2)
    return out[:M] if m_pad != M else out


def pallas_batchnorm(x_nhwc, gamma, beta, relu, *, eps=1e-5, tile_r=512,
                     out_dtype=jnp.bfloat16):
    """Training-mode (biased-variance) BatchNorm over N*H*W per channel, +ReLU."""
    N, H, W, C = x_nhwc.shape
    R = N * H * W
    x2 = x_nhwc.reshape(R, C)

    tile_r = min(tile_r, _round_up(R, 8))
    r_pad = _round_up(R, tile_r)
    if r_pad != R:
        # zero rows do not perturb sum / sum-of-squares; divide by true R below
        x2 = jnp.pad(x2, ((0, r_pad - R), (0, 0)))
    grid = (r_pad // tile_r,)

    sums = pl.pallas_call(
        _bn_stats_kernel,
        out_shape=jax.ShapeDtypeStruct((2, C), jnp.float32),
        grid=grid,
        in_specs=[pl.BlockSpec((tile_r, C), lambda i: (i, 0))],
        out_specs=pl.BlockSpec((2, C), lambda i: (0, 0)),
        compiler_params=pltpu.CompilerParams(
            dimension_semantics=("arbitrary",)),
    )(x2)

    mean = sums[0] / R
    var = jnp.maximum(sums[1] / R - mean * mean, 0.0)   # biased var (torch train)
    scale = gamma.astype(jnp.float32) * jax.lax.rsqrt(var + eps)
    shift = beta.astype(jnp.float32) - mean * scale
    ss = jnp.stack([scale, shift], axis=0)              # (2, C)

    kern = functools.partial(_bn_apply_kernel, relu=relu)
    y = pl.pallas_call(
        kern,
        out_shape=jax.ShapeDtypeStruct((r_pad, C), out_dtype),
        grid=grid,
        in_specs=[
            pl.BlockSpec((tile_r, C), lambda i: (i, 0)),
            pl.BlockSpec((2, C), lambda i: (0, 0)),
        ],
        out_specs=pl.BlockSpec((tile_r, C), lambda i: (i, 0)),
        compiler_params=pltpu.CompilerParams(
            dimension_semantics=("parallel",)),
    )(x2, ss)
    return y[:R].reshape(N, H, W, C)


# --------------------------------------------------------------------------
# ConvTranspose2d
# --------------------------------------------------------------------------
# TODO(synk): shifted-view im2col / pixel-shuffle interleave stay as XLA glue;
# only the hot matmul (+bias, +activation) runs inside Pallas.
def _im2col(x_nhwc, k):
    """pad-1 then k*k shifted views -> (N*H*W, k*k*Cin), offset-major ordering."""
    N, H, W, Cin = x_nhwc.shape
    xp = jnp.pad(x_nhwc, ((0, 0), (1, 1), (1, 1), (0, 0)))
    pat = jnp.concatenate(
        [xp[:, u:u + H, v:v + W, :] for u in range(k) for v in range(k)],
        axis=-1)
    return pat.reshape(N * H * W, k * k * Cin)


def conv_transpose2d_s2_pallas(x_nhwc, w_torch, bias):
    """ConvTranspose2d(k=4, s=2, p=1) via sub-pixel decomposition (no zero-insert).

    out[n, 2m+dy, 2w+dx, co] = sum_{u,v,ci} xp[n, m+u, w+v, ci]
                               * W[ci, co, 3-2u+dy, 3-2v+dx]   (taps outside [0,4) are 0)
    """
    N, H, W, Cin = x_nhwc.shape
    Cout = w_torch.shape[1]

    pat = _im2col(x_nhwc, 3)                               # (N*H*W, 9*Cin)

    wf = w_torch.astype(jnp.float32)
    zeros = jnp.zeros((Cin, Cout), jnp.float32)
    rows = []
    for u in range(3):
        for v in range(3):
            cols = []
            for dy in range(2):
                for dx in range(2):
                    ky, kx = 3 - 2 * u + dy, 3 - 2 * v + dx
                    cols.append(wf[:, :, ky, kx]
                                if (0 <= ky < 4 and 0 <= kx < 4) else zeros)
            rows.append(jnp.concatenate(cols, axis=1))     # (Cin, 4*Cout)
    w_mat = jnp.concatenate(rows, axis=0)                  # (9*Cin, 4*Cout)
    b_mat = jnp.tile(bias.astype(jnp.float32), 4)          # (4*Cout,)

    out4 = pallas_matmul_bias(pat, w_mat, b_mat)           # (N*H*W, 4*Cout) f32
    out4 = out4.reshape(N, H, W, 2, 2, Cout)
    out = jnp.transpose(out4, (0, 1, 3, 2, 4, 5)).reshape(N, 2 * H, 2 * W, Cout)
    return out


def conv_transpose2d_s1_pallas(x_nhwc, w_torch, bias, activation="none",
                               cout_pad=128):
    """ConvTranspose2d(k=3, s=1, p=1) == 3x3 conv with flipped kernel.

    Cout is zero-padded to `cout_pad` so the matmul output block is lane-dense;
    the real columns are sliced off afterwards.
    """
    N, H, W, Cin = x_nhwc.shape
    Cout = w_torch.shape[1]
    k = w_torch.shape[2]

    pat = _im2col(x_nhwc, k)                               # (N*H*W, k*k*Cin)

    wf = w_torch[:, :, ::-1, ::-1].astype(jnp.float32)     # spatial flip
    w_mat = jnp.transpose(wf, (2, 3, 0, 1)).reshape(k * k * Cin, Cout)
    Np = max(cout_pad, Cout)
    w_mat = jnp.pad(w_mat, ((0, 0), (0, Np - Cout)))
    b_mat = jnp.pad(bias.astype(jnp.float32), (0, Np - Cout))

    out = pallas_matmul_bias(pat, w_mat, b_mat, activation=activation)
    return out[:, :Cout].reshape(N, H, W, Cout)


# --------------------------------------------------------------------------
# Generator forward
# --------------------------------------------------------------------------
def generator_forward(z, params, *, init_size):
    B = z.shape[0]

    # dense: Linear(latent_dim -> 128*init_size^2)
    h = pallas_matmul_bias(z, params["dense_w"], params["dense_b"])  # (B, 128*s*s)

    # view(B, 128, s, s) in NCHW, then channels-last for the conv path
    x = jnp.transpose(h.reshape(B, 128, init_size, init_size), (0, 2, 3, 1))

    # conv_1: BN(128) -> ConvT(128->64, k4 s2 p1) -> BN(64) -> ReLU
    x = pallas_batchnorm(x, params["bn1_g"], params["bn1_b"], relu=False)
    x = conv_transpose2d_s2_pallas(x, params["ct1_w"], params["ct1_b"])
    x = pallas_batchnorm(x, params["bn2_g"], params["bn2_b"], relu=True)

    # conv_2: ConvT(64->64, k4 s2 p1) -> BN(64) -> ReLU
    x = conv_transpose2d_s2_pallas(x, params["ct2_w"], params["ct2_b"])
    x = pallas_batchnorm(x, params["bn3_g"], params["bn3_b"], relu=True)

    # conv_3: ConvT(64->1, k3 s1 p1) -> Tanh (fused into the matmul epilogue)
    x = conv_transpose2d_s1_pallas(x, params["ct3_w"], params["ct3_b"],
                                   activation="tanh")

    # back to NCHW to match PyTorch output convention
    return jnp.transpose(x, (0, 3, 1, 2))                            # (B,1,H,W)


def init_params(key, latent_dim, init_size):
    ks = jax.random.split(key, 8)
    d_out = 128 * init_size * init_size
    scale = 0.05
    return {
        "dense_w": jax.random.normal(ks[0], (latent_dim, d_out), jnp.float32) * scale,
        "dense_b": jax.random.normal(ks[1], (d_out,), jnp.float32) * scale,
        "bn1_g": jnp.ones((128,), jnp.float32),
        "bn1_b": jnp.zeros((128,), jnp.float32),
        "ct1_w": jax.random.normal(ks[2], (128, 64, 4, 4), jnp.float32) * scale,
        "ct1_b": jax.random.normal(ks[3], (64,), jnp.float32) * scale,
        "bn2_g": jnp.ones((64,), jnp.float32),
        "bn2_b": jnp.zeros((64,), jnp.float32),
        "ct2_w": jax.random.normal(ks[4], (64, 64, 4, 4), jnp.float32) * scale,
        "ct2_b": jax.random.normal(ks[5], (64,), jnp.float32) * scale,
        "bn3_g": jnp.ones((64,), jnp.float32),
        "bn3_b": jnp.zeros((64,), jnp.float32),
        "ct3_w": jax.random.normal(ks[6], (64, 1, 3, 3), jnp.float32) * scale,
        "ct3_b": jax.random.normal(ks[7], (1,), jnp.float32) * scale,
    }


if __name__ == "__main__":
    # small config: img_size=16 -> init_size=4; latent_dim=32; batch=2
    img_size = 16
    init_size = img_size // 4
    latent_dim = 32
    batch = 2

    key = jax.random.PRNGKey(0)
    k_param, k_z = jax.random.split(key)
    params = init_params(k_param, latent_dim, init_size)
    z = jax.random.normal(k_z, (batch, latent_dim), jnp.float32)

    fwd = jax.jit(functools.partial(generator_forward, init_size=init_size))
    out = fwd(z, params)
    jax.block_until_ready(out)

    assert out.shape == (batch, 1, img_size, img_size), out.shape
    assert bool(jnp.all(jnp.isfinite(out)))
    print("KERNEL_OK")
</pallas_src>

<mosaic_0001>
module attributes {stable_mosaic.version = 11 : i64} {
  func.func @_matmul_bias_kernel(%arg0: i32, %arg1: memref<8x32xbf16, #tpu.memory_space<vmem>>, %arg2: memref<32x2048xbf16, #tpu.memory_space<vmem>>, %arg3: memref<1x2048xf32, #tpu.memory_space<vmem>>, %arg4: memref<8x2048xf32, #tpu.memory_space<vmem>>) attributes {dimension_semantics = [#tpu.dimension_semantics<parallel>], iteration_bounds = array<i64: 1>, scalar_prefetch = 0 : i64, scratch_operands = 0 : i64, tpu.core_type = #tpu.core_type<tc>, window_params = [{transform_indices = @transform_0, window_bounds = array<i64: 8, 32>}, {pipeline_mode = #tpu.pipeline_mode<synchronous>, transform_indices = @transform_1, window_bounds = array<i64: 32, 2048>}, {pipeline_mode = #tpu.pipeline_mode<synchronous>, transform_indices = @transform_2, window_bounds = array<i64: 1, 2048>}, {transform_indices = @transform_3, window_bounds = array<i64: 8, 2048>}]} {
    %c0 = arith.constant 0 : index
    %c0_0 = arith.constant 0 : index
    %0 = vector.load %arg1[%c0, %c0_0] : memref<8x32xbf16, #tpu.memory_space<vmem>>, vector<8x32xbf16>
    %c0_1 = arith.constant 0 : index
    %c0_2 = arith.constant 0 : index
    %1 = vector.load %arg2[%c0_1, %c0_2] : memref<32x2048xbf16, #tpu.memory_space<vmem>>, vector<32x2048xbf16>
    %cst = arith.constant dense<0.000000e+00> : vector<8x2048xf32>
    %2 = tpu.matmul %0, %1, %cst {dimension_numbers = #tpu.dot_dimension_numbers<[1], [0], [0], [1], [0, 0, 1, 1], [], []>} : vector<8x32xbf16>, vector<32x2048xbf16>, vector<8x2048xf32> -> vector<8x2048xf32>
    %c0_3 = arith.constant 0 : index
    %c0_4 = arith.constant 0 : index
    %3 = vector.load %arg3[%c0_3, %c0_4] : memref<1x2048xf32, #tpu.memory_space<vmem>>, vector<1x2048xf32>
    %4 = vector.broadcast %3 : vector<1x2048xf32> to vector<8x2048xf32>
    %5 = arith.addf %2, %4 : vector<8x2048xf32>
    %c0_5 = arith.constant 0 : index
    %c0_6 = arith.constant 0 : index
    %6 = vector.load %arg4[%c0_5, %c0_6] : memref<8x2048xf32, #tpu.memory_space<vmem>>, vector<8x2048xf32>
    tpu.vector_store %arg4[%c0_5, %c0_6], %5 {strides = array<i32>} : memref<8x2048xf32, #tpu.memory_space<vmem>>, vector<8x2048xf32>,
    return
  }
  func.func @transform_0(%arg0: i32) -> (i32, i32) {
    %c0_i32 = arith.constant 0 : i32
    %c0_i32_0 = arith.constant 0 : i32
    return %arg0, %c0_i32 : i32, i32
  }
  func.func @transform_1(%arg0: i32) -> (i32, i32) {
    %c0_i32 = arith.constant 0 : i32
    %c0_i32_0 = arith.constant 0 : i32
    %c0_i32_1 = arith.constant 0 : i32
    return %c0_i32, %c0_i32_0 : i32, i32
  }
  func.func @transform_2(%arg0: i32) -> (i32, i32) {
    %c0_i32 = arith.constant 0 : i32
    %c0_i32_0 = arith.constant 0 : i32
    %c0_i32_1 = arith.constant 0 : i32
    return %c0_i32, %c0_i32_0 : i32, i32
  }
  func.func @transform_3(%arg0: i32) -> (i32, i32) {
    %c0_i32 = arith.constant 0 : i32
    %c0_i32_0 = arith.constant 0 : i32
    return %arg0, %c0_i32 : i32, i32
  }
}

module attributes {stable_mosaic.version = 11 : i64} {
  func.func @_bn_stats_kernel(%arg0: i32, %arg1: memref<32x128xf32, #tpu.memory_space<vmem>>, %arg2: memref<2x128xf32, #tpu.memory_space<vmem>>) attributes {dimension_semantics = [#tpu.dimension_semantics<arbitrary>], iteration_bounds = array<i64: 1>, scalar_prefetch = 0 : i64, scratch_operands = 0 : i64, tpu.core_type = #tpu.core_type<tc>, window_params = [{transform_indices = @transform_0, window_bounds = array<i64: 32, 128>}, {pipeline_mode = #tpu.pipeline_mode<synchronous>, transform_indices = @transform_1, window_bounds = array<i64: 2, 128>}]} {
    %c0_i32 = arith.constant 0 : i32
    %0 = arith.cmpi eq, %arg0, %c0_i32 : i32
    %1 = arith.extui %0 : i1 to i32
    %c0_i32_0 = arith.constant 0 : i32
    %2 = arith.cmpi ne, %1, %c0_i32_0 : i32
    scf.if %2 {
      %cst_7 = arith.constant 0.000000e+00 : f32
      %13 = vector.broadcast %cst_7 : f32 to vector<2x128xf32>
      %c0_8 = arith.constant 0 : index
      %c0_9 = arith.constant 0 : index
      %14 = vector.load %arg2[%c0_8, %c0_9] : memref<2x128xf32, #tpu.memory_space<vmem>>, vector<2x128xf32>
      tpu.vector_store %arg2[%c0_8, %c0_9], %13 {strides = array<i32>} : memref<2x128xf32, #tpu.memory_space<vmem>>, vector<2x128xf32>,
    } else {
    }
    %c0 = arith.constant 0 : index
    %c0_1 = arith.constant 0 : index
    %3 = vector.load %arg1[%c0, %c0_1] : memref<32x128xf32, #tpu.memory_space<vmem>>, vector<32x128xf32>
    %cst = arith.constant dense<0.000000e+00> : vector<128xf32>
    %4 = vector.multi_reduction <add>, %3, %cst [0] : vector<32x128xf32> to vector<128xf32>
    %5 = vector.shape_cast %4 : vector<128xf32> to vector<1x128xf32>
    %6 = arith.mulf %3, %3 : vector<32x128xf32>
    %cst_2 = arith.constant dense<0.000000e+00> : vector<128xf32>
    %7 = vector.multi_reduction <add>, %6, %cst_2 [0] : vector<32x128xf32> to vector<128xf32>
    %8 = vector.shape_cast %7 : vector<128xf32> to vector<1x128xf32>
    %9 = tpu.concatenate %5, %8 in 0 : vector<1x128xf32>, vector<1x128xf32> -> vector<2x128xf32>
    %c0_3 = arith.constant 0 : index
    %c0_4 = arith.constant 0 : index
    %10 = vector.load %arg2[%c0_3, %c0_4] : memref<2x128xf32, #tpu.memory_space<vmem>>, vector<2x128xf32>
    %11 = arith.addf %10, %9 : vector<2x128xf32>
    %c0_5 = arith.constant 0 : index
    %c0_6 = arith.constant 0 : index
    %12 = vector.load %arg2[%c0_5, %c0_6] : memref<2x128xf32, #tpu.memory_space<vmem>>, vector<2x128xf32>
    tpu.vector_store %arg2[%c0_5, %c0_6], %11 {strides = array<i32>} : memref<2x128xf32, #tpu.memory_space<vmem>>, vector<2x128xf32>,
    return
  }
  func.func @transform_0(%arg0: i32) -> (i32, i32) {
    %c0_i32 = arith.constant 0 : i32
    %c0_i32_0 = arith.constant 0 : i32
    return %arg0, %c0_i32 : i32, i32
  }
  func.func @transform_1(%arg0: i32) -> (i32, i32) {
    %c0_i32 = arith.constant 0 : i32
    %c0_i32_0 = arith.constant 0 : i32
    %c0_i32_1 = arith.constant 0 : i32
    return %c0_i32, %c0_i32_0 : i32, i32
  }
}

module attributes {stable_mosaic.version = 11 : i64} {
  func.func @_bn_apply_kernel(%arg0: i32, %arg1: memref<32x128xf32, #tpu.memory_space<vmem>>, %arg2: memref<2x128xf32, #tpu.memory_space<vmem>>, %arg3: memref<32x128xbf16, #tpu.memory_space<vmem>>) attributes {dimension_semantics = [#tpu.dimension_semantics<parallel>], iteration_bounds = array<i64: 1>, scalar_prefetch = 0 : i64, scratch_operands = 0 : i64, tpu.core_type = #tpu.core_type<tc>, window_params = [{transform_indices = @transform_0, window_bounds = array<i64: 32, 128>}, {pipeline_mode = #tpu.pipeline_mode<synchronous>, transform_indices = @transform_1, window_bounds = array<i64: 2, 128>}, {transform_indices = @transform_2, window_bounds = array<i64: 32, 128>}]} {
    %c0 = arith.constant 0 : index
    %c0_0 = arith.constant 0 : index
    %0 = vector.load %arg1[%c0, %c0_0] : memref<32x128xf32, #tpu.memory_space<vmem>>, vector<32x128xf32>
    %c0_1 = arith.constant 0 : index
    %c0_2 = arith.constant 0 : index
    %1 = vector.load %arg2[%c0_1, %c0_2] : memref<2x128xf32, #tpu.memory_space<vmem>>, vector<2x128xf32>
    %2 = vector.extract_strided_slice %1 {offsets = [0, 0], sizes = [1, 128], strides = [1, 1]} : vector<2x128xf32> to vector<1x128xf32>
    %3 = vector.broadcast %2 : vector<1x128xf32> to vector<32x128xf32>
    %4 = arith.mulf %0, %3 : vector<32x128xf32>
    %5 = vector.extract_strided_slice %1 {offsets = [1, 0], sizes = [1, 128], strides = [1, 1]} : vector<2x128xf32> to vector<1x128xf32>
    %6 = vector.broadcast %5 : vector<1x128xf32> to vector<32x128xf32>
    %7 = arith.addf %4, %6 : vector<32x128xf32>
    %8 = arith.truncf %7 : vector<32x128xf32> to vector<32x128xbf16>
    %c0_3 = arith.constant 0 : index
    %c0_4 = arith.constant 0 : index
    %9 = vector.load %arg3[%c0_3, %c0_4] : memref<32x128xbf16, #tpu.memory_space<vmem>>, vector<32x128xbf16>
    tpu.vector_store %arg3[%c0_3, %c0_4], %8 {strides = array<i32>} : memref<32x128xbf16, #tpu.memory_space<vmem>>, vector<32x128xbf16>,
    return
  }
  func.func @transform_0(%arg0: i32) -> (i32, i32) {
    %c0_i32 = arith.constant 0 : i32
    %c0_i32_0 = arith.constant 0 : i32
    return %arg0, %c0_i32 : i32, i32
  }
  func.func @transform_1(%arg0: i32) -> (i32, i32) {
    %c0_i32 = arith.constant 0 : i32
    %c0_i32_0 = arith.constant 0 : i32
    %c0_i32_1 = arith.constant 0 : i32
    return %c0_i32, %c0_i32_0 : i32, i32
  }
  func.func @transform_2(%arg0: i32) -> (i32, i32) {
    %c0_i32 = arith.constant 0 : i32
    %c0_i32_0 = arith.constant 0 : i32
    return %arg0, %c0_i32 : i32, i32
  }
}

module attributes {stable_mosaic.version = 11 : i64} {
  func.func @_matmul_bias_kernel(%arg0: i32, %arg1: memref<32x1152xbf16, #tpu.memory_space<vmem>>, %arg2: memref<1152x256xbf16, #tpu.memory_space<vmem>>, %arg3: memref<1x256xf32, #tpu.memory_space<vmem>>, %arg4: memref<32x256xf32, #tpu.memory_space<vmem>>) attributes {dimension_semantics = [#tpu.dimension_semantics<parallel>], iteration_bounds = array<i64: 1>, scalar_prefetch = 0 : i64, scratch_operands = 0 : i64, tpu.core_type = #tpu.core_type<tc>, window_params = [{transform_indices = @transform_0, window_bounds = array<i64: 32, 1152>}, {pipeline_mode = #tpu.pipeline_mode<synchronous>, transform_indices = @transform_1, window_bounds = array<i64: 1152, 256>}, {pipeline_mode = #tpu.pipeline_mode<synchronous>, transform_indices = @transform_2, window_bounds = array<i64: 1, 256>}, {transform_indices = @transform_3, window_bounds = array<i64: 32, 256>}]} {
    %c0 = arith.constant 0 : index
    %c0_0 = arith.constant 0 : index
    %0 = vector.load %arg1[%c0, %c0_0] : memref<32x1152xbf16, #tpu.memory_space<vmem>>, vector<32x1152xbf16>
    %c0_1 = arith.constant 0 : index
    %c0_2 = arith.constant 0 : index
    %1 = vector.load %arg2[%c0_1, %c0_2] : memref<1152x256xbf16, #tpu.memory_space<vmem>>, vector<1152x256xbf16>
    %cst = arith.constant dense<0.000000e+00> : vector<32x256xf32>
    %2 = tpu.matmul %0, %1, %cst {dimension_numbers = #tpu.dot_dimension_numbers<[1], [0], [0], [1], [0, 0, 1, 1], [], []>} : vector<32x1152xbf16>, vector<1152x256xbf16>, vector<32x256xf32> -> vector<32x256xf32>
    %c0_3 = arith.constant 0 : index
    %c0_4 = arith.constant 0 : index
    %3 = vector.load %arg3[%c0_3, %c0_4] : memref<1x256xf32, #tpu.memory_space<vmem>>, vector<1x256xf32>
    %4 = vector.broadcast %3 : vector<1x256xf32> to vector<32x256xf32>
    %5 = arith.addf %2, %4 : vector<32x256xf32>
    %c0_5 = arith.constant 0 : index
    %c0_6 = arith.constant 0 : index
    %6 = vector.load %arg4[%c0_5, %c0_6] : memref<32x256xf32, #tpu.memory_space<vmem>>, vector<32x256xf32>
    tpu.vector_store %arg4[%c0_5, %c0_6], %5 {strides = array<i32>} : memref<32x256xf32, #tpu.memory_space<vmem>>, vector<32x256xf32>,
    return
  }
  func.func @transform_0(%arg0: i32) -> (i32, i32) {
    %c0_i32 = arith.constant 0 : i32
    %c0_i32_0 = arith.constant 0 : i32
    return %arg0, %c0_i32 : i32, i32
  }
  func.func @transform_1(%arg0: i32) -> (i32, i32) {
    %c0_i32 = arith.constant 0 : i32
    %c0_i32_0 = arith.constant 0 : i32
    %c0_i32_1 = arith.constant 0 : i32
    return %c0_i32, %c0_i32_0 : i32, i32
  }
  func.func @transform_2(%arg0: i32) -> (i32, i32) {
    %c0_i32 = arith.constant 0 : i32
    %c0_i32_0 = arith.constant 0 : i32
    %c0_i32_1 = arith.constant 0 : i32
    return %c0_i32, %c0_i32_0 : i32, i32
  }
  func.func @transform_3(%arg0: i32) -> (i32, i32) {
    %c0_i32 = arith.constant 0 : i32
    %c0_i32_0 = arith.constant 0 : i32
    return %arg0, %c0_i32 : i32, i32
  }
}

module attributes {stable_mosaic.version = 11 : i64} {
  func.func @_bn_apply_kernel(%arg0: i32, %arg1: memref<128x64xf32, #tpu.memory_space<vmem>>, %arg2: memref<2x64xf32, #tpu.memory_space<vmem>>, %arg3: memref<128x64xbf16, #tpu.memory_space<vmem>>) attributes {dimension_semantics = [#tpu.dimension_semantics<parallel>], iteration_bounds = array<i64: 1>, scalar_prefetch = 0 : i64, scratch_operands = 0 : i64, tpu.core_type = #tpu.core_type<tc>, window_params = [{transform_indices = @transform_0, window_bounds = array<i64: 128, 64>}, {pipeline_mode = #tpu.pipeline_mode<synchronous>, transform_indices = @transform_1, window_bounds = array<i64: 2, 64>}, {transform_indices = @transform_2, window_bounds = array<i64: 128, 64>}]} {
    %c0 = arith.constant 0 : index
    %c0_0 = arith.constant 0 : index
    %0 = vector.load %arg1[%c0, %c0_0] : memref<128x64xf32, #tpu.memory_space<vmem>>, vector<128x64xf32>
    %c0_1 = arith.constant 0 : index
    %c0_2 = arith.constant 0 : index
    %1 = vector.load %arg2[%c0_1, %c0_2] : memref<2x64xf32, #tpu.memory_space<vmem>>, vector<2x64xf32>
    %2 = vector.extract_strided_slice %1 {offsets = [0, 0], sizes = [1, 64], strides = [1, 1]} : vector<2x64xf32> to vector<1x64xf32>
    %3 = vector.broadcast %2 : vector<1x64xf32> to vector<128x64xf32>
    %4 = arith.mulf %0, %3 : vector<128x64xf32>
    %5 = vector.extract_strided_slice %1 {offsets = [1, 0], sizes = [1, 64], strides = [1, 1]} : vector<2x64xf32> to vector<1x64xf32>
    %6 = vector.broadcast %5 : vector<1x64xf32> to vector<128x64xf32>
    %7 = arith.addf %4, %6 : vector<128x64xf32>
    %cst = arith.constant 0.000000e+00 : f32
    %8 = vector.broadcast %cst : f32 to vector<128x64xf32>
    %9 = arith.maximumf %7, %8 : vector<128x64xf32>
    %10 = arith.truncf %9 : vector<128x64xf32> to vector<128x64xbf16>
    %c0_3 = arith.constant 0 : index
    %c0_4 = arith.constant 0 : index
    %11 = vector.load %arg3[%c0_3, %c0_4] : memref<128x64xbf16, #tpu.memory_space<vmem>>, vector<128x64xbf16>
    tpu.vector_store %arg3[%c0_3, %c0_4], %10 {strides = array<i32>} : memref<128x64xbf16, #tpu.memory_space<vmem>>, vector<128x64xbf16>,
    return
  }
  func.func @transform_0(%arg0: i32) -> (i32, i32) {
    %c0_i32 = arith.constant 0 : i32
    %c0_i32_0 = arith.constant 0 : i32
    return %arg0, %c0_i32 : i32, i32
  }
  func.func @transform_1(%arg0: i32) -> (i32, i32) {
    %c0_i32 = arith.constant 0 : i32
    %c0_i32_0 = arith.constant 0 : i32
    %c0_i32_1 = arith.constant 0 : i32
    return %c0_i32, %c0_i32_0 : i32, i32
  }
  func.func @transform_2(%arg0: i32) -> (i32, i32) {
    %c0_i32 = arith.constant 0 : i32
    %c0_i32_0 = arith.constant 0 : i32
    return %arg0, %c0_i32 : i32, i32
  }
}

module attributes {stable_mosaic.version = 11 : i64} {
  func.func @_bn_stats_kernel(%arg0: i32, %arg1: memref<128x64xf32, #tpu.memory_space<vmem>>, %arg2: memref<2x64xf32, #tpu.memory_space<vmem>>) attributes {dimension_semantics = [#tpu.dimension_semantics<arbitrary>], iteration_bounds = array<i64: 1>, scalar_prefetch = 0 : i64, scratch_operands = 0 : i64, tpu.core_type = #tpu.core_type<tc>, window_params = [{transform_indices = @transform_0, window_bounds = array<i64: 128, 64>}, {pipeline_mode = #tpu.pipeline_mode<synchronous>, transform_indices = @transform_1, window_bounds = array<i64: 2, 64>}]} {
    %c0_i32 = arith.constant 0 : i32
    %0 = arith.cmpi eq, %arg0, %c0_i32 : i32
    %1 = arith.extui %0 : i1 to i32
    %c0_i32_0 = arith.constant 0 : i32
    %2 = arith.cmpi ne, %1, %c0_i32_0 : i32
    scf.if %2 {
      %cst_7 = arith.constant 0.000000e+00 : f32
      %13 = vector.broadcast %cst_7 : f32 to vector<2x64xf32>
      %c0_8 = arith.constant 0 : index
      %c0_9 = arith.constant 0 : index
      %14 = vector.load %arg2[%c0_8, %c0_9] : memref<2x64xf32, #tpu.memory_space<vmem>>, vector<2x64xf32>
      tpu.vector_store %arg2[%c0_8, %c0_9], %13 {strides = array<i32>} : memref<2x64xf32, #tpu.memory_space<vmem>>, vector<2x64xf32>,
    } else {
    }
    %c0 = arith.constant 0 : index
    %c0_1 = arith.constant 0 : index
    %3 = vector.load %arg1[%c0, %c0_1] : memref<128x64xf32, #tpu.memory_space<vmem>>, vector<128x64xf32>
    %cst = arith.constant dense<0.000000e+00> : vector<64xf32>
    %4 = vector.multi_reduction <add>, %3, %cst [0] : vector<128x64xf32> to vector<64xf32>
    %5 = vector.shape_cast %4 : vector<64xf32> to vector<1x64xf32>
    %6 = arith.mulf %3, %3 : vector<128x64xf32>
    %cst_2 = arith.constant dense<0.000000e+00> : vector<64xf32>
    %7 = vector.multi_reduction <add>, %6, %cst_2 [0] : vector<128x64xf32> to vector<64xf32>
    %8 = vector.shape_cast %7 : vector<64xf32> to vector<1x64xf32>
    %9 = tpu.concatenate %5, %8 in 0 : vector<1x64xf32>, vector<1x64xf32> -> vector<2x64xf32>
    %c0_3 = arith.constant 0 : index
    %c0_4 = arith.constant 0 : index
    %10 = vector.load %arg2[%c0_3, %c0_4] : memref<2x64xf32, #tpu.memory_space<vmem>>, vector<2x64xf32>
    %11 = arith.addf %10, %9 : vector<2x64xf32>
    %c0_5 = arith.constant 0 : index
    %c0_6 = arith.constant 0 : index
    %12 = vector.load %arg2[%c0_5, %c0_6] : memref<2x64xf32, #tpu.memory_space<vmem>>, vector<2x64xf32>
    tpu.vector_store %arg2[%c0_5, %c0_6], %11 {strides = array<i32>} : memref<2x64xf32, #tpu.memory_space<vmem>>, vector<2x64xf32>,
    return
  }
  func.func @transform_0(%arg0: i32) -> (i32, i32) {
    %c0_i32 = arith.constant 0 : i32
    %c0_i32_0 = arith.constant 0 : i32
    return %arg0, %c0_i32 : i32, i32
  }
  func.func @transform_1(%arg0: i32) -> (i32, i32) {
    %c0_i32 = arith.constant 0 : i32
    %c0_i32_0 = arith.constant 0 : i32
    %c0_i32_1 = arith.constant 0 : i32
    return %c0_i32, %c0_i32_0 : i32, i32
  }
}

module attributes {stable_mosaic.version = 11 : i64} {
  func.func @_bn_stats_kernel(%arg0: i32, %arg1: memref<512x64xf32, #tpu.memory_space<vmem>>, %arg2: memref<2x64xf32, #tpu.memory_space<vmem>>) attributes {dimension_semantics = [#tpu.dimension_semantics<arbitrary>], iteration_bounds = array<i64: 1>, scalar_prefetch = 0 : i64, scratch_operands = 0 : i64, tpu.core_type = #tpu.core_type<tc>, window_params = [{transform_indices = @transform_0, window_bounds = array<i64: 512, 64>}, {pipeline_mode = #tpu.pipeline_mode<synchronous>, transform_indices = @transform_1, window_bounds = array<i64: 2, 64>}]} {
    %c0_i32 = arith.constant 0 : i32
    %0 = arith.cmpi eq, %arg0, %c0_i32 : i32
    %1 = arith.extui %0 : i1 to i32
    %c0_i32_0 = arith.constant 0 : i32
    %2 = arith.cmpi ne, %1, %c0_i32_0 : i32
    scf.if %2 {
      %cst_7 = arith.constant 0.000000e+00 : f32
      %13 = vector.broadcast %cst_7 : f32 to vector<2x64xf32>
      %c0_8 = arith.constant 0 : index
      %c0_9 = arith.constant 0 : index
      %14 = vector.load %arg2[%c0_8, %c0_9] : memref<2x64xf32, #tpu.memory_space<vmem>>, vector<2x64xf32>
      tpu.vector_store %arg2[%c0_8, %c0_9], %13 {strides = array<i32>} : memref<2x64xf32, #tpu.memory_space<vmem>>, vector<2x64xf32>,
    } else {
    }
    %c0 = arith.constant 0 : index
    %c0_1 = arith.constant 0 : index
    %3 = vector.load %arg1[%c0, %c0_1] : memref<512x64xf32, #tpu.memory_space<vmem>>, vector<512x64xf32>
    %cst = arith.constant dense<0.000000e+00> : vector<64xf32>
    %4 = vector.multi_reduction <add>, %3, %cst [0] : vector<512x64xf32> to vector<64xf32>
    %5 = vector.shape_cast %4 : vector<64xf32> to vector<1x64xf32>
    %6 = arith.mulf %3, %3 : vector<512x64xf32>
    %cst_2 = arith.constant dense<0.000000e+00> : vector<64xf32>
    %7 = vector.multi_reduction <add>, %6, %cst_2 [0] : vector<512x64xf32> to vector<64xf32>
    %8 = vector.shape_cast %7 : vector<64xf32> to vector<1x64xf32>
    %9 = tpu.concatenate %5, %8 in 0 : vector<1x64xf32>, vector<1x64xf32> -> vector<2x64xf32>
    %c0_3 = arith.constant 0 : index
    %c0_4 = arith.constant 0 : index
    %10 = vector.load %arg2[%c0_3, %c0_4] : memref<2x64xf32, #tpu.memory_space<vmem>>, vector<2x64xf32>
    %11 = arith.addf %10, %9 : vector<2x64xf32>
    %c0_5 = arith.constant 0 : index
    %c0_6 = arith.constant 0 : index
    %12 = vector.load %arg2[%c0_5, %c0_6] : memref<2x64xf32, #tpu.memory_space<vmem>>, vector<2x64xf32>
    tpu.vector_store %arg2[%c0_5, %c0_6], %11 {strides = array<i32>} : memref<2x64xf32, #tpu.memory_space<vmem>>, vector<2x64xf32>,
    return
  }
  func.func @transform_0(%arg0: i32) -> (i32, i32) {
    %c0_i32 = arith.constant 0 : i32
    %c0_i32_0 = arith.constant 0 : i32
    return %arg0, %c0_i32 : i32, i32
  }
  func.func @transform_1(%arg0: i32) -> (i32, i32) {
    %c0_i32 = arith.constant 0 : i32
    %c0_i32_0 = arith.constant 0 : i32
    %c0_i32_1 = arith.constant 0 : i32
    return %c0_i32, %c0_i32_0 : i32, i32
  }
}

module attributes {stable_mosaic.version = 11 : i64} {
  func.func @_matmul_bias_kernel(%arg0: i32, %arg1: memref<128x576xbf16, #tpu.memory_space<vmem>>, %arg2: memref<576x256xbf16, #tpu.memory_space<vmem>>, %arg3: memref<1x256xf32, #tpu.memory_space<vmem>>, %arg4: memref<128x256xf32, #tpu.memory_space<vmem>>) attributes {dimension_semantics = [#tpu.dimension_semantics<parallel>], iteration_bounds = array<i64: 1>, scalar_prefetch = 0 : i64, scratch_operands = 0 : i64, tpu.core_type = #tpu.core_type<tc>, window_params = [{transform_indices = @transform_0, window_bounds = array<i64: 128, 576>}, {pipeline_mode = #tpu.pipeline_mode<synchronous>, transform_indices = @transform_1, window_bounds = array<i64: 576, 256>}, {pipeline_mode = #tpu.pipeline_mode<synchronous>, transform_indices = @transform_2, window_bounds = array<i64: 1, 256>}, {transform_indices = @transform_3, window_bounds = array<i64: 128, 256>}]} {
    %c0 = arith.constant 0 : index
    %c0_0 = arith.constant 0 : index
    %0 = vector.load %arg1[%c0, %c0_0] : memref<128x576xbf16, #tpu.memory_space<vmem>>, vector<128x576xbf16>
    %c0_1 = arith.constant 0 : index
    %c0_2 = arith.constant 0 : index
    %1 = vector.load %arg2[%c0_1, %c0_2] : memref<576x256xbf16, #tpu.memory_space<vmem>>, vector<576x256xbf16>
    %cst = arith.constant dense<0.000000e+00> : vector<128x256xf32>
    %2 = tpu.matmul %0, %1, %cst {dimension_numbers = #tpu.dot_dimension_numbers<[1], [0], [0], [1], [0, 0, 1, 1], [], []>} : vector<128x576xbf16>, vector<576x256xbf16>, vector<128x256xf32> -> vector<128x256xf32>
    %c0_3 = arith.constant 0 : index
    %c0_4 = arith.constant 0 : index
    %3 = vector.load %arg3[%c0_3, %c0_4] : memref<1x256xf32, #tpu.memory_space<vmem>>, vector<1x256xf32>
    %4 = vector.broadcast %3 : vector<1x256xf32> to vector<128x256xf32>
    %5 = arith.addf %2, %4 : vector<128x256xf32>
    %c0_5 = arith.constant 0 : index
    %c0_6 = arith.constant 0 : index
    %6 = vector.load %arg4[%c0_5, %c0_6] : memref<128x256xf32, #tpu.memory_space<vmem>>, vector<128x256xf32>
    tpu.vector_store %arg4[%c0_5, %c0_6], %5 {strides = array<i32>} : memref<128x256xf32, #tpu.memory_space<vmem>>, vector<128x256xf32>,
    return
  }
  func.func @transform_0(%arg0: i32) -> (i32, i32) {
    %c0_i32 = arith.constant 0 : i32
    %c0_i32_0 = arith.constant 0 : i32
    return %arg0, %c0_i32 : i32, i32
  }
  func.func @transform_1(%arg0: i32) -> (i32, i32) {
    %c0_i32 = arith.constant 0 : i32
    %c0_i32_0 = arith.constant 0 : i32
    %c0_i32_1 = arith.constant 0 : i32
    return %c0_i32, %c0_i32_0 : i32, i32
  }
  func.func @transform_2(%arg0: i32) -> (i32, i32) {
    %c0_i32 = arith.constant 0 : i32
    %c0_i32_0 = arith.constant 0 : i32
    %c0_i32_1 = arith.constant 0 : i32
    return %c0_i32, %c0_i32_0 : i32, i32
  }
  func.func @transform_3(%arg0: i32) -> (i32, i32) {
    %c0_i32 = arith.constant 0 : i32
    %c0_i32_0 = arith.constant 0 : i32
    return %arg0, %c0_i32 : i32, i32
  }
}

module attributes {stable_mosaic.version = 11 : i64} {
  func.func @_bn_apply_kernel(%arg0: i32, %arg1: memref<512x64xf32, #tpu.memory_space<vmem>>, %arg2: memref<2x64xf32, #tpu.memory_space<vmem>>, %arg3: memref<512x64xbf16, #tpu.memory_space<vmem>>) attributes {dimension_semantics = [#tpu.dimension_semantics<parallel>], iteration_bounds = array<i64: 1>, scalar_prefetch = 0 : i64, scratch_operands = 0 : i64, tpu.core_type = #tpu.core_type<tc>, window_params = [{transform_indices = @transform_0, window_bounds = array<i64: 512, 64>}, {pipeline_mode = #tpu.pipeline_mode<synchronous>, transform_indices = @transform_1, window_bounds = array<i64: 2, 64>}, {transform_indices = @transform_2, window_bounds = array<i64: 512, 64>}]} {
    %c0 = arith.constant 0 : index
    %c0_0 = arith.constant 0 : index
    %0 = vector.load %arg1[%c0, %c0_0] : memref<512x64xf32, #tpu.memory_space<vmem>>, vector<512x64xf32>
    %c0_1 = arith.constant 0 : index
    %c0_2 = arith.constant 0 : index
    %1 = vector.load %arg2[%c0_1, %c0_2] : memref<2x64xf32, #tpu.memory_space<vmem>>, vector<2x64xf32>
    %2 = vector.extract_strided_slice %1 {offsets = [0, 0], sizes = [1, 64], strides = [1, 1]} : vector<2x64xf32> to vector<1x64xf32>
    %3 = vector.broadcast %2 : vector<1x64xf32> to vector<512x64xf32>
    %4 = arith.mulf %0, %3 : vector<512x64xf32>
    %5 = vector.extract_strided_slice %1 {offsets = [1, 0], sizes = [1, 64], strides = [1, 1]} : vector<2x64xf32> to vector<1x64xf32>
    %6 = vector.broadcast %5 : vector<1x64xf32> to vector<512x64xf32>
    %7 = arith.addf %4, %6 : vector<512x64xf32>
    %cst = arith.constant 0.000000e+00 : f32
    %8 = vector.broadcast %cst : f32 to vector<512x64xf32>
    %9 = arith.maximumf %7, %8 : vector<512x64xf32>
    %10 = arith.truncf %9 : vector<512x64xf32> to vector<512x64xbf16>
    %c0_3 = arith.constant 0 : index
    %c0_4 = arith.constant 0 : index
    %11 = vector.load %arg3[%c0_3, %c0_4] : memref<512x64xbf16, #tpu.memory_space<vmem>>, vector<512x64xbf16>
    tpu.vector_store %arg3[%c0_3, %c0_4], %10 {strides = array<i32>} : memref<512x64xbf16, #tpu.memory_space<vmem>>, vector<512x64xbf16>,
    return
  }
  func.func @transform_0(%arg0: i32) -> (i32, i32) {
    %c0_i32 = arith.constant 0 : i32
    %c0_i32_0 = arith.constant 0 : i32
    return %arg0, %c0_i32 : i32, i32
  }
  func.func @transform_1(%arg0: i32) -> (i32, i32) {
    %c0_i32 = arith.constant 0 : i32
    %c0_i32_0 = arith.constant 0 : i32
    %c0_i32_1 = arith.constant 0 : i32
    return %c0_i32, %c0_i32_0 : i32, i32
  }
  func.func @transform_2(%arg0: i32) -> (i32, i32) {
    %c0_i32 = arith.constant 0 : i32
    %c0_i32_0 = arith.constant 0 : i32
    return %arg0, %c0_i32 : i32, i32
  }
}

module attributes {stable_mosaic.version = 11 : i64} {
  func.func @_matmul_bias_kernel(%arg0: i32, %arg1: memref<512x576xbf16, #tpu.memory_space<vmem>>, %arg2: memref<576x128xbf16, #tpu.memory_space<vmem>>, %arg3: memref<1x128xf32, #tpu.memory_space<vmem>>, %arg4: memref<512x128xf32, #tpu.memory_space<vmem>>) attributes {dimension_semantics = [#tpu.dimension_semantics<parallel>], iteration_bounds = array<i64: 1>, scalar_prefetch = 0 : i64, scratch_operands = 0 : i64, tpu.core_type = #tpu.core_type<tc>, window_params = [{transform_indices = @transform_0, window_bounds = array<i64: 512, 576>}, {pipeline_mode = #tpu.pipeline_mode<synchronous>, transform_indices = @transform_1, window_bounds = array<i64: 576, 128>}, {pipeline_mode = #tpu.pipeline_mode<synchronous>, transform_indices = @transform_2, window_bounds = array<i64: 1, 128>}, {transform_indices = @transform_3, window_bounds = array<i64: 512, 128>}]} {
    %c0 = arith.constant 0 : index
    %c0_0 = arith.constant 0 : index
    %0 = vector.load %arg1[%c0, %c0_0] : memref<512x576xbf16, #tpu.memory_space<vmem>>, vector<512x576xbf16>
    %c0_1 = arith.constant 0 : index
    %c0_2 = arith.constant 0 : index
    %1 = vector.load %arg2[%c0_1, %c0_2] : memref<576x128xbf16, #tpu.memory_space<vmem>>, vector<576x128xbf16>
    %cst = arith.constant dense<0.000000e+00> : vector<512x128xf32>
    %2 = tpu.matmul %0, %1, %cst {dimension_numbers = #tpu.dot_dimension_numbers<[1], [0], [0], [1], [0, 0, 1, 1], [], []>} : vector<512x576xbf16>, vector<576x128xbf16>, vector<512x128xf32> -> vector<512x128xf32>
    %c0_3 = arith.constant 0 : index
    %c0_4 = arith.constant 0 : index
    %3 = vector.load %arg3[%c0_3, %c0_4] : memref<1x128xf32, #tpu.memory_space<vmem>>, vector<1x128xf32>
    %4 = vector.broadcast %3 : vector<1x128xf32> to vector<512x128xf32>
    %5 = arith.addf %2, %4 : vector<512x128xf32>
    %6 = math.tanh %5 : vector<512x128xf32>
    %c0_5 = arith.constant 0 : index
    %c0_6 = arith.constant 0 : index
    %7 = vector.load %arg4[%c0_5, %c0_6] : memref<512x128xf32, #tpu.memory_space<vmem>>, vector<512x128xf32>
    tpu.vector_store %arg4[%c0_5, %c0_6], %6 {strides = array<i32>} : memref<512x128xf32, #tpu.memory_space<vmem>>, vector<512x128xf32>,
    return
  }
  func.func @transform_0(%arg0: i32) -> (i32, i32) {
    %c0_i32 = arith.constant 0 : i32
    %c0_i32_0 = arith.constant 0 : i32
    return %arg0, %c0_i32 : i32, i32
  }
  func.func @transform_1(%arg0: i32) -> (i32, i32) {
    %c0_i32 = arith.constant 0 : i32
    %c0_i32_0 = arith.constant 0 : i32
    %c0_i32_1 = arith.constant 0 : i32
    return %c0_i32, %c0_i32_0 : i32, i32
  }
  func.func @transform_2(%arg0: i32) -> (i32, i32) {
    %c0_i32 = arith.constant 0 : i32
    %c0_i32_0 = arith.constant 0 : i32
    %c0_i32_1 = arith.constant 0 : i32
    return %c0_i32, %c0_i32_0 : i32, i32
  }
  func.func @transform_3(%arg0: i32) -> (i32, i32) {
    %c0_i32 = arith.constant 0 : i32
    %c0_i32_0 = arith.constant 0 : i32
    return %arg0, %c0_i32 : i32, i32
  }
}

</mosaic_0001>

<bundles_post_ra>
// kernel: generator_forward.11
= control target key start
LH: loop header
LB: loop body
LE: loop exit
PB: predicated region body
PF: predicated region fallthrough
CT: control target
= control target key end

     0   :  { %v49_v0 = vmov 0.0   ;;  %vm39_vm0 = vcmask 1040384   ;;  %s81_s1 = inlined_call_operand.vmem [shape: f32[2,128], index: 1, kind: output, shape index: {}]   ;;  %s82_s0 = inlined_call_operand.vmem [shape: f32[32,128], index: 0, kind: input, shape index: {}]  }
   0x1   :  { %12 = vst [vmem:[%s81_s1] sm:$0x3] %v49_v0  ;;  %v13_v1 = vld [vmem:[%s82_s0] sm:$0xff]  ;;  %v14_v2 = vld [vmem:[%s82_s0 + $0x8] sm:$0xff]  ;;  %v15_v3 = vld [vmem:[%s82_s0 + $0x10] sm:$0xff] }
   0x2   :  { %v16_v4 = vld [vmem:[%s82_s0 + $0x18] sm:$0xff]  ;;  %v17_v5 = vadd.f32 %v14_v2, %v13_v1  ;;  %v26_v6 = vmul.f32 %v13_v1, %v13_v1  ;;  %v27_v7 = vmul.f32 %v14_v2, %v14_v2  ;;  %v28_v8 = vmul.f32 %v15_v3, %v15_v3 }
   0x3   :  { %v29_v10 = vmul.f32 %v16_v4, %v16_v4 }
   0x4   :  { %v18_v9 = vadd.f32 %v17_v5, %v15_v3  ;;  %v30_v11 = vadd.f32 %v27_v7, %v26_v6 }
   0x6   :  { %v19_v12 = vadd.f32 %v18_v9, %v16_v4  ;;  %v31_v13 = vadd.f32 %v30_v11, %v28_v8 }
   0x8   :  { %v20_v14 = vrot.slane %v19_v12, 4  ;;  %v32_v15 = vadd.f32 %v31_v13, %v29_v10  ;;  %v41_v27 = vld [vmem:[%s81_s1] sm:$0x3] }
   0xa   :  { %v21_v16 = vadd.f32 %v20_v14, %v19_v12  ;;  %v33_v17 = vrot.slane %v32_v15, 4 }
   0xc   :  { %v22_v18 = vrot.slane %v21_v16, 2  ;;  %v34_v19 = vadd.f32 %v33_v17, %v32_v15 }
   0xe   :  { %v23_v20 = vadd.f32 %v22_v18, %v21_v16  ;;  %v35_v21 = vrot.slane %v34_v19, 2 }
  0x10   :  { %v24_v22 = vrot.slane %v23_v20, 1  ;;  %v36_v23 = vadd.f32 %v35_v21, %v34_v19 }
  0x12   :  { %v25_v24 = vadd.f32 %v24_v22, %v23_v20  ;;  %v37_v25 = vrot.slane %v36_v23, 1 }
  0x14   :  { %v38_v26 = vadd.f32 %v37_v25, %v36_v23 }
  0x16   :  { %v40_v28 = vsel %vm39_vm0, %v25_v24, %v38_v26 }
  0x17   :  { %v42_v29 = vadd.f32 %v41_v27, %v40_v28 }
  0x19   :  { %43 = vst [vmem:[%s81_s1] sm:$0x3] %v42_v29 }

// kernel: generator_forward.10
= control target key start
LH: loop header
LB: loop body
LE: loop exit
PB: predicated region body
PF: predicated region fallthrough
CT: control target
= control target key end

     0   :  { %vm244_vm0 = vcmask 261120   ;;  %s955_s1 = inlined_call_operand.vmem [shape: bf16[32,2048], index: 1, kind: input, shape index: {}]   ;;  %s956_s0 = inlined_call_operand.vmem [shape: bf16[8,32], index: 0, kind: input, shape index: {}]   ;;  %s957_s2 = inlined_call_operand.vmem [shape: f32[1,2048], index: 2, kind: input, shape index: {}]   ;;  %s958_s3 = inlined_call_operand.vmem [shape: f32[8,2048], index: 3, kind: output, shape index: {}]  }
   0x1   :  { %v542_v0 = vld [vmem:[%s955_s1 + $0x80] sm:$0xf]  ;;  %v636_v2 = vld [vmem:[%s955_s1 + $0x84] sm:$0xf]  ;;  %v550_v5 = vld [vmem:[%s955_s1 + $0x88] sm:$0xf] }
   0x2   :  { %v644_v1 = vld [vmem:[%s955_s1 + $0xbc] sm:$0xf0]  ;;  %v544_v4 = vld [vmem:[%s955_s1 + $0xc0] sm:$0xf0]  ;;  %v645_v6 = vld [vmem:[%s955_s1 + $0xc4] sm:$0xf0] }
   0x3   :  { %v543_v3 = vor.u32 %v644_v1, %v542_v0  ;;  %v547_v7 = vor.u32 %v636_v2, %v544_v4  ;;  %v551_v8 = vor.u32 %v645_v6, %v550_v5  ;;  %v637_v9 = vld [vmem:[%s955_s1 + $0x8c] sm:$0xf]  ;;  %v478_v11 = vld [vmem:[%s955_s1] sm:$0xf]  ;;  %v620_v14 = vld [vmem:[%s955_s1 + $0x4] sm:$0xf] }
   0x4   :  { %v552_v10 = vld [vmem:[%s955_s1 + $0xc8] sm:$0xf0]  ;;  %v628_v13 = vld [vmem:[%s955_s1 + $0x3c] sm:$0xf0]  ;;  %v480_v15 = vld [vmem:[%s955_s1 + $0x40] sm:$0xf0] }
   0x5   :  { %254 = vmatpush.bf16.msra.mxu0 %v543_v3  ;;  %v555_v12 = vor.u32 %v637_v9, %v552_v10  ;;  %267 = vmatpush.bf16.msra.mxu1 %v547_v7  ;;  %v479_v16 = vor.u32 %v628_v13, %v478_v11  ;;  %v483_v17 = vor.u32 %v620_v14, %v480_v15  ;;  %v486_v18 = vld [vmem:[%s955_s1 + $0x8] sm:$0xf]  ;;  %v621_v20 = vld [vmem:[%s955_s1 + $0xc] sm:$0xf]  ;;  %v723_v23 = vld [vmem:[%s956_s0] sm:$0xf] }
   0x6   :  { %280 = vmatpush.bf16.msra.mxu2 %v551_v8  ;;  %v629_v19 = vld [vmem:[%s955_s1 + $0x44] sm:$0xf0]  ;;  %v488_v22 = vld [vmem:[%s955_s1 + $0x48] sm:$0xf0]  ;;  %v566_v24 = vld [vmem:[%s955_s1 + $0x98] sm:$0xf] }
   0x7   :  { %293 = vmatpush.bf16.msra.mxu3 %v555_v12  ;;  %v487_v21 = vor.u32 %v629_v19, %v486_v18  ;;  %v491_v25 = vor.u32 %v621_v20, %v488_v22  ;;  %v647_v26 = vld [vmem:[%s955_s1 + $0xd4] sm:$0xf0]  ;;  %v639_v27 = vld [vmem:[%s955_s1 + $0x9c] sm:$0xf]  ;;  %v558_v31 = vld [vmem:[%s955_s1 + $0x90] sm:$0xf] }
   0x8   :  { %v568_v28 = vld [vmem:[%s955_s1 + $0xd8] sm:$0xf0]  ;;  %v567_v29 = vor.u32 %v647_v26, %v566_v24  ;;  %v646_v32 = vld [vmem:[%s955_s1 + $0xcc] sm:$0xf0]  ;;  %v638_v33 = vld [vmem:[%s955_s1 + $0x94] sm:$0xf] }
   0x9   :  { %255 = vmatpush.bf16.msra.mxu0 %v479_v16  ;;  %v571_v30 = vor.u32 %v639_v27, %v568_v28  ;;  %268 = vmatpush.bf16.msra.mxu1 %v483_v17  ;;  %v559_v34 = vor.u32 %v646_v32, %v558_v31  ;;  %v560_v35 = vld [vmem:[%s955_s1 + $0xd0] sm:$0xf0]  ;;  %v502_v36 = vld [vmem:[%s955_s1 + $0x18] sm:$0xf]  ;;  %v623_v40 = vld [vmem:[%s955_s1 + $0x1c] sm:$0xf] }
   0xa   :  { %281 = vmatpush.bf16.msra.mxu2 %v487_v21  ;;  %v631_v37 = vld [vmem:[%s955_s1 + $0x54] sm:$0xf0]  ;;  %v563_v38 = vor.u32 %v638_v33, %v560_v35  ;;  %v504_v41 = vld [vmem:[%s955_s1 + $0x58] sm:$0xf0]  ;;  %v494_v42 = vld [vmem:[%s955_s1 + $0x10] sm:$0xf] }
   0xb   :  { %294 = vmatpush.bf16.msra.mxu3 %v491_v25  ;;  %v503_v39 = vor.u32 %v631_v37, %v502_v36  ;;  %v507_v43 = vor.u32 %v623_v40, %v504_v41  ;;  %v630_v44 = vld [vmem:[%s955_s1 + $0x4c] sm:$0xf0]  ;;  %v622_v45 = vld [vmem:[%s955_s1 + $0x14] sm:$0xf]  ;;  %v582_v47 = vld [vmem:[%s955_s1 + $0xa8] sm:$0xf] }
   0xc   :  { %604 = vmatmul.msk.bf16.vlgmr.msra.gmra.mxu0 %vm244_vm0, %v723_v23  ;;  %v496_v46 = vld [vmem:[%s955_s1 + $0x50] sm:$0xf0]  ;;  %605 = vmatmul.msk.bf16.vlgmr.msra.gmra.mxu1 %vm244_vm0, %v723_v23  ;;  %v649_v48 = vld [vmem:[%s955_s1 + $0xe4] sm:$0xf0]  ;;  %v641_v49 = vld [vmem:[%s955_s1 + $0xac] sm:$0xf]  ;;  %v495_v50 = vor.u32 %v630_v44, %v494_v42 }
   0xd   :  { %606 = vmatmul.msk.bf16.vlgmr.msra.gmra.mxu2 %vm244_vm0, %v723_v23  ;;  %306 = vmatpush.bf16.msrb.mxu0 %v559_v34  ;;  %v583_v51 = vor.u32 %v649_v48, %v582_v47  ;;  %v584_v52 = vld [vmem:[%s955_s1 + $0xe8] sm:$0xf0]  ;;  %v574_v53 = vld [vmem:[%s955_s1 + $0xa0] sm:$0xf]  ;;  %v499_v55 = vor.u32 %v622_v45, %v496_v46  ;;  %v640_v58 = vld [vmem:[%s955_s1 + $0xa4] sm:$0xf] }
   0xe   :  { %332 = vmatpush.bf16.msrb.mxu2 %v567_v29  ;;  %607 = vmatmul.msk.bf16.vlgmr.msra.gmra.mxu3 %vm244_vm0, %v723_v23  ;;  %v648_v54 = vld [vmem:[%s955_s1 + $0xdc] sm:$0xf0]  ;;  %v587_v56 = vor.u32 %v641_v49, %v584_v52  ;;  %v576_v59 = vld [vmem:[%s955_s1 + $0xe0] sm:$0xf0]  ;;  %v518_v60 = vld [vmem:[%s955_s1 + $0x28] sm:$0xf] }
   0xf   :  { %345 = vmatpush.bf16.msrb.mxu3 %v571_v30  ;;  %319 = vmatpush.bf16.msrb.mxu1 %v563_v38  ;;  %v575_v57 = vor.u32 %v648_v54, %v574_v53  ;;  %v579_v61 = vor.u32 %v640_v58, %v576_v59  ;;  %v633_v62 = vld [vmem:[%s955_s1 + $0x64] sm:$0xf0]  ;;  %v625_v63 = vld [vmem:[%s955_s1 + $0x2c] sm:$0xf]  ;;  %v510_v3 = vld [vmem:[%s955_s1 + $0x20] sm:$0xf] }
  0x10   :  { %v520_v0 = vld [vmem:[%s955_s1 + $0x68] sm:$0xf0]  ;;  %v519_v1 = vor.u32 %v633_v62, %v518_v60  ;;  %v632_v4 = vld [vmem:[%s955_s1 + $0x5c] sm:$0xf0]  ;;  %v624_v5 = vld [vmem:[%s955_s1 + $0x24] sm:$0xf] }
  0x11   :  { %v523_v2 = vor.u32 %v625_v63, %v520_v0  ;;  %307 = vmatpush.bf16.msrb.mxu0 %v495_v50  ;;  %v512_v6 = vld [vmem:[%s955_s1 + $0x60] sm:$0xf0]  ;;  %v511_v7 = vor.u32 %v632_v4, %v510_v3  ;;  %v598_v9 = vld [vmem:[%s955_s1 + $0xb8] sm:$0xf]  ;;  %v643_v11 = vld [vmem:[%s955_s1 + $0xbc] sm:$0xf] }
  0x12   :  { %333 = vmatpush.bf16.msrb.mxu2 %v503_v39  ;;  %v515_v8 = vor.u32 %v624_v5, %v512_v6  ;;  %v651_v10 = vld [vmem:[%s955_s1 + $0xf4] sm:$0xf0]  ;;  %v600_v12 = vld [vmem:[%s955_s1 + $0xf8] sm:$0xf0]  ;;  %v590_v13 = vld [vmem:[%s955_s1 + $0xb0] sm:$0xf] }
  0x13   :  { %346 = vmatpush.bf16.msrb.mxu3 %v507_v43  ;;  %320 = vmatpush.bf16.msrb.mxu1 %v499_v55  ;;  %v650_v14 = vld [vmem:[%s955_s1 + $0xec] sm:$0xf0]  ;;  %v642_v15 = vld [vmem:[%s955_s1 + $0xb4] sm:$0xf]  ;;  %v599_v17 = vor.u32 %v651_v10, %v598_v9  ;;  %v603_v18 = vor.u32 %v643_v11, %v600_v12  ;;  %v534_v20 = vld [vmem:[%s955_s1 + $0x38] sm:$0xf] }
  0x14   :  { %v592_v16 = vld [vmem:[%s955_s1 + $0xf0] sm:$0xf0]  ;;  %v591_v19 = vor.u32 %v650_v14, %v590_v13  ;;  %v635_v21 = vld [vmem:[%s955_s1 + $0x74] sm:$0xf0]  ;;  %v627_v22 = vld [vmem:[%s955_s1 + $0x3c] sm:$0xf] }
  0x15   :  { %358 = vmatpush.bf16.msra.mxu0 %v575_v57  ;;  %v595_v24 = vor.u32 %v642_v15, %v592_v16  ;;  %v536_v25 = vld [vmem:[%s955_s1 + $0x78] sm:$0xf0]  ;;  %v526_v26 = vld [vmem:[%s955_s1 + $0x30] sm:$0xf]  ;;  %v626_v28 = vld [vmem:[%s955_s1 + $0x34] sm:$0xf]  ;;  %v535_v30 = vor.u32 %v635_v21, %v534_v20 }
  0x16   :  { %384 = vmatpush.bf16.msra.mxu2 %v583_v51  ;;  %v634_v27 = vld [vmem:[%s955_s1 + $0x6c] sm:$0xf0]  ;;  %v528_v29 = vld [vmem:[%s955_s1 + $0x70] sm:$0xf0]  ;;  %v539_v31 = vor.u32 %v627_v22, %v536_v25  ;;  %v48_v34 = vld [vmem:[%s957_s2] sm:$0xff] }
  0x17   :  { %397 = vmatpush.bf16.msra.mxu3 %v587_v56  ;;  %371 = vmatpush.bf16.msra.mxu1 %v579_v61  ;;  %v527_v32 = vor.u32 %v634_v27, %v526_v26  ;;  %v531_v33 = vor.u32 %v626_v28, %v528_v29  ;;  %v52_v35 = vperm.slane %v48_v34, 0  ;;  %v53_v36 = vperm.slane %v48_v34, 1  ;;  %v49_v0 = vld [vmem:[%s957_s2 + $0x8] sm:$0xff] }
  0x18   :  { %v54_v41 = vperm.slane %v48_v34, 2  ;;  %v56_v48 = vperm.slane %v48_v34, 4  ;;  %v57_v49 = vperm.slane %v48_v34, 5  ;;  %v58_v56 = vperm.slane %v48_v34, 6 }
  0x19   :  { %359 = vmatpush.bf16.msra.mxu0 %v511_v7  ;;  %v59_v57 = vperm.slane %v48_v34, 7  ;;  %v62_v9 = vperm.slane %v49_v0, 2  ;;  %v63_v10 = vperm.slane %v49_v0, 3  ;;  %v66_v26 = vperm.slane %v49_v0, 6 }
  0x1a   :  { %385 = vmatpush.bf16.msra.mxu2 %v519_v1  ;;  %v60_v1 = vperm.slane %v49_v0, 0  ;;  %v67_v27 = vperm.slane %v49_v0, 7 }
  0x1b   :  { %398 = vmatpush.bf16.msra.mxu3 %v523_v2  ;;  %372 = vmatpush.bf16.msra.mxu1 %v515_v8  ;;  %v61_v2 = vperm.slane %v49_v0, 1 }
  0x1c   :  { %608 = vmatmul.msk.bf16.vlgmr.msrb.gmra.mxu0 %vm244_vm0, %v723_v23  ;;  %609 = vmatmul.msk.bf16.vlgmr.msrb.gmra.mxu1 %vm244_vm0, %v723_v23 }
  0x1d   :  { %610 = vmatmul.msk.bf16.vlgmr.msrb.gmra.mxu2 %vm244_vm0, %v723_v23  ;;  %410 = vmatpush.bf16.msrb.mxu0 %v591_v19 }
  0x1e   :  { %611 = vmatmul.msk.bf16.vlgmr.msrb.gmra.mxu3 %vm244_vm0, %v723_v23  ;;  %436 = vmatpush.bf16.msrb.mxu2 %v599_v17  ;;  %v64_v17 = vperm.slane %v49_v0, 4 }
  0x1f   :  { %449 = vmatpush.bf16.msrb.mxu3 %v603_v18  ;;  %423 = vmatpush.bf16.msrb.mxu1 %v595_v24  ;;  %v65_v18 = vperm.slane %v49_v0, 5 }
  0x21   :  { %411 = vmatpush.bf16.msrb.mxu0 %v527_v32 }
  0x22   :  { %437 = vmatpush.bf16.msrb.mxu2 %v535_v30 }
  0x23   :  { %450 = vmatpush.bf16.msrb.mxu3 %v539_v31  ;;  %424 = vmatpush.bf16.msrb.mxu1 %v531_v33 }
  0x2c   :  { %612 = vmatmul.msk.bf16.vlgmr.msra.gmra.mxu0 %vm244_vm0, %v723_v23  ;;  %613 = vmatmul.msk.bf16.vlgmr.msra.gmra.mxu1 %vm244_vm0, %v723_v23 }
  0x2d   :  { %614 = vmatmul.msk.bf16.vlgmr.msra.gmra.mxu2 %vm244_vm0, %v723_v23 }
  0x2e   :  { %615 = vmatmul.msk.bf16.vlgmr.msra.gmra.mxu3 %vm244_vm0, %v723_v23 }
  0x3c   :  { %616 = vmatmul.msk.bf16.vlgmr.msrb.gmra.mxu0 %vm244_vm0, %v723_v23  ;;  %617 = vmatmul.msk.bf16.vlgmr.msrb.gmra.mxu1 %vm244_vm0, %v723_v23 }
  0x3d   :  { %618 = vmatmul.msk.bf16.vlgmr.msrb.gmra.mxu2 %vm244_vm0, %v723_v23 }
  0x3e   :  { %619 = vmatmul.msk.bf16.vlgmr.msrb.gmra.mxu3 %vm244_vm0, %v723_v23  ;;  %v55_v23 = vperm.slane %v48_v34, 3 }
  0x89   :  { %v257_v37 = vpop.f32.mrf.mxu0  ;;  %v270_v39 = vpop.f32.mrf.mxu1 }
  0x8a   :  { %v258_v38 = vadd.f32 %v257_v37, %v52_v35  ;;  %v271_v40 = vadd.f32 %v270_v39, %v53_v36 }
  0x8c   :  { %456 = vst [vmem:[%s958_s3] sm:$0xff] %v258_v38 }
  0x8d   :  { %457 = vst [vmem:[%s958_s3 + $0x8] sm:$0xff] %v271_v40 }
  0x90   :  { %v283_v42 = vpop.f32.mrf.mxu2 }
  0x91   :  { %v284_v43 = vadd.f32 %v283_v42, %v54_v41  ;;  %v296_v44 = vpop.f32.mrf.mxu3  ;;  %v259_v45 = vpop.f32.mrf.mxu0 }
  0x92   :  { %v297_v46 = vadd.f32 %v296_v44, %v55_v23  ;;  %v272_v47 = vpop.f32.mrf.mxu1 }
  0x93   :  { %458 = vst [vmem:[%s958_s3 + $0x10] sm:$0xff] %v284_v43 }
  0x94   :  { %459 = vst [vmem:[%s958_s3 + $0x18] sm:$0xff] %v297_v46 }
  0x98   :  { %v285_v50 = vpop.f32.mrf.mxu2 }
  0x99   :  { %v298_v51 = vpop.f32.mrf.mxu3  ;;  %v309_v52 = vpop.f32.mrf.mxu0 }
  0x9a   :  { %v310_v53 = vadd.f32 %v309_v52, %v56_v48  ;;  %v322_v54 = vpop.f32.mrf.mxu1 }
  0x9b   :  { %v323_v55 = vadd.f32 %v322_v54, %v57_v49 }
  0x9c   :  { %460 = vst [vmem:[%s958_s3 + $0x20] sm:$0xff] %v310_v53 }
  0x9d   :  { %461 = vst [vmem:[%s958_s3 + $0x28] sm:$0xff] %v323_v55 }
  0xa0   :  { %v335_v58 = vpop.f32.mrf.mxu2 }
  0xa1   :  { %v336_v59 = vadd.f32 %v335_v58, %v58_v56  ;;  %v348_v60 = vpop.f32.mrf.mxu3  ;;  %v311_v61 = vpop.f32.mrf.mxu0 }
  0xa2   :  { %v349_v62 = vadd.f32 %v348_v60, %v59_v57  ;;  %v324_v63 = vpop.f32.mrf.mxu1 }
  0xa3   :  { %462 = vst [vmem:[%s958_s3 + $0x30] sm:$0xff] %v336_v59 }
  0xa4   :  { %463 = vst [vmem:[%s958_s3 + $0x38] sm:$0xff] %v349_v62 }
  0xa8   :  { %v337_v3 = vpop.f32.mrf.mxu2 }
  0xa9   :  { %v350_v4 = vpop.f32.mrf.mxu3  ;;  %v361_v5 = vpop.f32.mrf.mxu0 }
  0xaa   :  { %v362_v6 = vadd.f32 %v361_v5, %v60_v1  ;;  %v374_v7 = vpop.f32.mrf.mxu1 }
  0xab   :  { %v375_v8 = vadd.f32 %v374_v7, %v61_v2 }
  0xac   :  { %464 = vst [vmem:[%s958_s3 + $0x40] sm:$0xff] %v362_v6 }
  0xad   :  { %465 = vst [vmem:[%s958_s3 + $0x48] sm:$0xff] %v375_v8 }
  0xb0   :  { %v387_v11 = vpop.f32.mrf.mxu2 }
  0xb1   :  { %v388_v12 = vadd.f32 %v387_v11, %v62_v9  ;;  %v400_v13 = vpop.f32.mrf.mxu3  ;;  %v363_v14 = vpop.f32.mrf.mxu0 }
  0xb2   :  { %v401_v15 = vadd.f32 %v400_v13, %v63_v10  ;;  %v376_v16 = vpop.f32.mrf.mxu1 }
  0xb3   :  { %466 = vst [vmem:[%s958_s3 + $0x50] sm:$0xff] %v388_v12 }
  0xb4   :  { %467 = vst [vmem:[%s958_s3 + $0x58] sm:$0xff] %v401_v15 }
  0xb8   :  { %v389_v19 = vpop.f32.mrf.mxu2 }
  0xb9   :  { %v402_v20 = vpop.f32.mrf.mxu3  ;;  %v413_v21 = vpop.f32.mrf.mxu0 }
  0xba   :  { %v414_v22 = vadd.f32 %v413_v21, %v64_v17  ;;  %v426_v24 = vpop.f32.mrf.mxu1 }
  0xbb   :  { %v427_v25 = vadd.f32 %v426_v24, %v65_v18 }
  0xbc   :  { %468 = vst [vmem:[%s958_s3 + $0x60] sm:$0xff] %v414_v22 }
  0xbd   :  { %469 = vst [vmem:[%s958_s3 + $0x68] sm:$0xff] %v427_v25 }
  0xc0   :  { %v439_v28 = vpop.f32.mrf.mxu2 }
  0xc1   :  { %v440_v29 = vadd.f32 %v439_v28, %v66_v26  ;;  %v452_v30 = vpop.f32.mrf.mxu3  ;;  %v415_v31 = vpop.f32.mrf.mxu0 }
  0xc2   :  { %v453_v32 = vadd.f32 %v452_v30, %v67_v27  ;;  %v428_v33 = vpop.f32.mrf.mxu1 }
  0xc3   :  { %470 = vst [vmem:[%s958_s3 + $0x70] sm:$0xff] %v440_v29 }
  0xc4   :  { %471 = vst [vmem:[%s958_s3 + $0x78] sm:$0xff] %v453_v32 }
  0xc8   :  { %v441_v34 = vpop.f32.mrf.mxu2 }
  0xc9   :  { %v454_v35 = vpop.f32.mrf.mxu3 }

// kernel: generator_forward.12
= control target key start
LH: loop header
LB: loop body
LE: loop exit
PB: predicated region body
PF: predicated region fallthrough
CT: control target
= control target key end

     0   :  { %s85_s0 = inlined_call_operand.vmem [shape: f32[32,128], index: 0, kind: input, shape index: {}]   ;;  %s86_s1 = inlined_call_operand.vmem [shape: f32[2,128], index: 1, kind: input, shape index: {}]   ;;  %s87_s2 = inlined_call_operand.vmem [shape: bf16[32,128], index: 2, kind: output, shape index: {}]  }
   0x1   :  { %v11_v0 = vld [vmem:[%s85_s0] sm:$0xff]  ;;  %v12_v1 = vld [vmem:[%s85_s0 + $0x8] sm:$0xff]  ;;  %v13_v5 = vld [vmem:[%s85_s0 + $0x10] sm:$0xff] }
   0x2   :  { %v15_v2 = vld [vmem:[%s86_s1] sm:$0x3]  ;;  %v14_v6 = vld [vmem:[%s85_s0 + $0x18] sm:$0xff] }
   0x3   :  { %v16_v3 = vperm.slane %v15_v2, 0  ;;  %v21_v4 = vperm.slane %v15_v2, 1 }
   0x5   :  { %v17_v7 = vmul.f32 %v16_v3, %v11_v0  ;;  %v18_v8 = vmul.f32 %v16_v3, %v12_v1  ;;  %v19_v9 = vmul.f32 %v16_v3, %v13_v5  ;;  %v20_v10 = vmul.f32 %v16_v3, %v14_v6 }
   0x7   :  { %v22_v11 = vadd.f32 %v21_v4, %v17_v7  ;;  %v23_v12 = vadd.f32 %v21_v4, %v18_v8  ;;  %v24_v13 = vadd.f32 %v21_v4, %v19_v9  ;;  %v25_v14 = vadd.f32 %v21_v4, %v20_v10 }
   0x9   :  { %v41_v15 = vpack.c.bf16 %v23_v12, %v22_v11  ;;  %v46_v16 = vpack.c.bf16 %v25_v14, %v24_v13 }
   0xb   :  { %42 = vst [vmem:[%s87_s2] sm:$0xff] %v41_v15  }
   0xc   :  { %48 = vst [vmem:[%s87_s2 + $0x8] sm:$0xff] %v46_v16  }

// kernel: tile.13
= control target key start
LH: loop header
LB: loop body
LE: loop exit
PB: predicated region body
PF: predicated region fallthrough
CT: control target
= control target key end

     0   :  { %s22_s0 = inlined_call_operand.vmem [shape: f32[64], index: 0, kind: input, shape index: {}]   ;;  %s23_s1 = inlined_call_operand.vmem [shape: f32[4,64], index: 1, kind: output, shape index: {}]  }
   0x1   :  { %v4_v0 = vld [vmem:[%s22_s0] ss:$0 sm:$0xff] }
   0x2   :  { %5 = vst [vmem:[%s23_s1] sm:$0xf] %v4_v0 }

// kernel: tile.14
= control target key start
LH: loop header
LB: loop body
LE: loop exit
PB: predicated region body
PF: predicated region fallthrough
CT: control target
= control target key end

     0   :  { %s6_s8 = smov 3  ;;  %vm8_vm0 = vcmask 523264   ;;  %s31_s9 = smov 64   ;;  %vm15_vm1 = vcmask 1048064   ;;  %s51_s0 = inlined_call_operand.vmem [shape: f32[4,64], index: 0, kind: input, shape index: {}]   ;;  %s52_s1 = inlined_call_operand.vmem [shape: f32[1,256], index: 1, kind: output, shape index: {}]  }
   0x1   :  { %v4_v0 = vld [vmem:[%s51_s0] sm:$0xf]  ;;  %s11_s0 = smov 3 }
   0x2   :  { %5 = vst [vmem:[#allocation1] sm:$0xf] %v4_v0 }
   0x9   :  { %v12_v1 = vld [vmem:[#allocation1 + $0x1] ss:$2 sm:%s11_s0]   ;;  %v7_v2 = vld [vmem:[#allocation1] ss:$2 sm:%s6_s8]  }
   0xa   :  { %13 = vrot.lane.b32.xlu0 %v12_v1, %s31_s9  ;;  %9 = vst.msk [vmem:[#allocation0] ss:$8 sm:$0x3] %vm8_vm0, %v7_v2  }
  0x7c   :  { %v14_v3 = vpop.permute.xlu0 %13  }
  0x7d   :  { %16 = vst.msk [vmem:[#allocation0] ss:$8 sm:$0x3] %vm15_vm1, %v14_v3  }
  0x84   :  { %v19_v4 = vld [vmem:[#allocation0] sm:$0x1]  ;;  %v24_v5 = vld [vmem:[#allocation0 + $0x8] sm:$0x1] }
  0x85   :  { %22 = vst [vmem:[%s52_s1] sm:$0x1] %v19_v4 }
  0x86   :  { %29 = vst [vmem:[%s52_s1 + $0x1] sm:$0x1] %v24_v5 }

// kernel: generator_forward.15
= control target key start
LH: loop header
LB: loop body
LE: loop exit
PB: predicated region body
PF: predicated region fallthrough
CT: control target
= control target key end

     0   :  { %vm94_vm0 = vcmask 519168   ;;  %s263_s0 = inlined_call_operand.vmem [shape: f32[128,64], index: 0, kind: input, shape index: {}]   ;;  %s264_s1 = inlined_call_operand.vmem [shape: f32[2,64], index: 1, kind: input, shape index: {}]   ;;  %s265_s2 = inlined_call_operand.vmem [shape: bf16[128,64], index: 2, kind: output, shape index: {}]  }
   0x1   :  { %v11_v0 = vld [vmem:[%s263_s0] sm:$0xff]  ;;  %v12_v2 = vld [vmem:[%s263_s0 + $0x8] sm:$0xff]  ;;  %v13_v5 = vld [vmem:[%s263_s0 + $0x10] sm:$0xff] }
   0x2   :  { %v27_v1 = vld [vmem:[%s264_s1] sm:$0x3]  ;;  %v14_v6 = vld [vmem:[%s263_s0 + $0x18] sm:$0xff]  ;;  %v16_v8 = vld [vmem:[%s263_s0 + $0x28] sm:$0xff] }
   0x3   :  { %v28_v3 = vperm.slane %v27_v1, 0  ;;  %v139_v4 = vperm.slane %v27_v1, 1  ;;  %v15_v7 = vld [vmem:[%s263_s0 + $0x20] sm:$0xff]  ;;  %v17_v9 = vld [vmem:[%s263_s0 + $0x30] sm:$0xff]  ;;  %v18_v10 = vld [vmem:[%s263_s0 + $0x38] sm:$0xff] }
   0x4   :  { %v19_v27 = vld [vmem:[%s263_s0 + $0x40] sm:$0xff]  ;;  %v20_v32 = vld [vmem:[%s263_s0 + $0x48] sm:$0xff]  ;;  %v21_v33 = vld [vmem:[%s263_s0 + $0x50] sm:$0xff] }
   0x5   :  { %v29_v11 = vmul.f32 %v28_v3, %v11_v0  ;;  %v30_v12 = vmul.f32 %v28_v3, %v12_v2  ;;  %v31_v13 = vmul.f32 %v28_v3, %v13_v5  ;;  %v32_v14 = vmul.f32 %v28_v3, %v14_v6  ;;  %v22_v38 = vld [vmem:[%s263_s0 + $0x58] sm:$0xff]  ;;  %v23_v39 = vld [vmem:[%s263_s0 + $0x60] sm:$0xff]  ;;  %v24_v44 = vld [vmem:[%s263_s0 + $0x68] sm:$0xff] }
   0x6   :  { %v33_v15 = vmul.f32 %v28_v3, %v15_v7  ;;  %v34_v16 = vmul.f32 %v28_v3, %v16_v8  ;;  %v35_v17 = vmul.f32 %v28_v3, %v17_v9  ;;  %v36_v18 = vmul.f32 %v28_v3, %v18_v10  ;;  %v25_v45 = vld [vmem:[%s263_s0 + $0x70] sm:$0xff]  ;;  %v26_v46 = vld [vmem:[%s263_s0 + $0x78] sm:$0xff] }
   0x7   :  { %v46_v19 = vadd.f32 %v139_v4, %v29_v11  ;;  %v47_v20 = vadd.f32 %v139_v4, %v30_v12  ;;  %v48_v21 = vadd.f32 %v139_v4, %v31_v13  ;;  %v49_v22 = vadd.f32 %v139_v4, %v32_v14 }
   0x8   :  { %v50_v23 = vadd.f32 %v139_v4, %v33_v15  ;;  %v51_v24 = vadd.f32 %v139_v4, %v34_v16  ;;  %v52_v25 = vadd.f32 %v139_v4, %v35_v17  ;;  %v53_v26 = vadd.f32 %v139_v4, %v36_v18 }
   0x9   :  { %v62_v28 = vmax.f32 %v46_v19, 0.0  ;;  %v63_v29 = vmax.f32 %v47_v20, 0.0  ;;  %v64_v30 = vmax.f32 %v48_v21, 0.0  ;;  %v65_v31 = vmax.f32 %v49_v22, 0.0 }
   0xa   :  { %v66_v34 = vmax.f32 %v50_v23, 0.0  ;;  %v67_v35 = vmax.f32 %v51_v24, 0.0  ;;  %v68_v36 = vmax.f32 %v52_v25, 0.0  ;;  %v69_v37 = vmax.f32 %v53_v26, 0.0 }
   0xb   :  { %v78_v40 = vpack.c.bf16 %v62_v28, %v62_v28  ;;  %v79_v41 = vpack.c.bf16 %v63_v29, %v63_v29  ;;  %v80_v42 = vpack.c.bf16 %v64_v30, %v64_v30  ;;  %v81_v43 = vpack.c.bf16 %v65_v31, %v65_v31 }
   0xc   :  { %v82_v47 = vpack.c.bf16 %v66_v34, %v66_v34  ;;  %v83_v48 = vpack.c.bf16 %v67_v35, %v67_v35  ;;  %v84_v49 = vpack.c.bf16 %v68_v36, %v68_v36  ;;  %v85_v50 = vpack.c.bf16 %v69_v37, %v69_v37 }
   0xd   :  { %95 = vst.msk [vmem:[%s265_s2] sm:$0xf] %vm94_vm0, %v78_v40  ;;  %v37_v51 = vmul.f32 %v28_v3, %v19_v27  ;;  %v38_v52 = vmul.f32 %v28_v3, %v20_v32  ;;  %v39_v53 = vmul.f32 %v28_v3, %v21_v33  ;;  %v40_v54 = vmul.f32 %v28_v3, %v22_v38 }
   0xe   :  { %96 = vst.msk [vmem:[%s265_s2 + $0x4] sm:$0xf] %vm94_vm0, %v79_v41  ;;  %v41_v55 = vmul.f32 %v28_v3, %v23_v39  ;;  %v42_v56 = vmul.f32 %v28_v3, %v24_v44  ;;  %v43_v57 = vmul.f32 %v28_v3, %v25_v45  ;;  %v44_v58 = vmul.f32 %v28_v3, %v26_v46 }
   0xf   :  { %97 = vst.msk [vmem:[%s265_s2 + $0x8] sm:$0xf] %vm94_vm0, %v80_v42  ;;  %v54_v59 = vadd.f32 %v139_v4, %v37_v51  ;;  %v55_v60 = vadd.f32 %v139_v4, %v38_v52  ;;  %v56_v61 = vadd.f32 %v139_v4, %v39_v53  ;;  %v57_v62 = vadd.f32 %v139_v4, %v40_v54 }
  0x10   :  { %98 = vst.msk [vmem:[%s265_s2 + $0xc] sm:$0xf] %vm94_vm0, %v81_v43  ;;  %v58_v63 = vadd.f32 %v139_v4, %v41_v55  ;;  %v59_v0 = vadd.f32 %v139_v4, %v42_v56  ;;  %v60_v1 = vadd.f32 %v139_v4, %v43_v57  ;;  %v61_v2 = vadd.f32 %v139_v4, %v44_v58 }
  0x11   :  { %99 = vst.msk [vmem:[%s265_s2 + $0x10] sm:$0xf] %vm94_vm0, %v82_v47  ;;  %v70_v3 = vmax.f32 %v54_v59, 0.0  ;;  %v71_v5 = vmax.f32 %v55_v60, 0.0  ;;  %v72_v6 = vmax.f32 %v56_v61, 0.0  ;;  %v73_v7 = vmax.f32 %v57_v62, 0.0 }
  0x12   :  { %100 = vst.msk [vmem:[%s265_s2 + $0x14] sm:$0xf] %vm94_vm0, %v83_v48  ;;  %v74_v8 = vmax.f32 %v58_v63, 0.0  ;;  %v75_v9 = vmax.f32 %v59_v0, 0.0  ;;  %v76_v12 = vmax.f32 %v60_v1, 0.0  ;;  %v77_v14 = vmax.f32 %v61_v2, 0.0 }
  0x13   :  { %101 = vst.msk [vmem:[%s265_s2 + $0x18] sm:$0xf] %vm94_vm0, %v84_v49  ;;  %v86_v4 = vpack.c.bf16 %v70_v3, %v70_v3  ;;  %v87_v10 = vpack.c.bf16 %v71_v5, %v71_v5  ;;  %v88_v11 = vpack.c.bf16 %v72_v6, %v72_v6  ;;  %v89_v13 = vpack.c.bf16 %v73_v7, %v73_v7 }
  0x14   :  { %102 = vst.msk [vmem:[%s265_s2 + $0x1c] sm:$0xf] %vm94_vm0, %v85_v50  ;;  %v90_v15 = vpack.c.bf16 %v74_v8, %v74_v8  ;;  %v91_v16 = vpack.c.bf16 %v75_v9, %v75_v9  ;;  %v92_v17 = vpack.c.bf16 %v76_v12, %v76_v12  ;;  %v93_v18 = vpack.c.bf16 %v77_v14, %v77_v14 }
  0x15   :  { %103 = vst.msk [vmem:[%s265_s2 + $0x20] sm:$0xf] %vm94_vm0, %v86_v4 }
  0x16   :  { %104 = vst.msk [vmem:[%s265_s2 + $0x24] sm:$0xf] %vm94_vm0, %v87_v10 }
  0x17   :  { %105 = vst.msk [vmem:[%s265_s2 + $0x28] sm:$0xf] %vm94_vm0, %v88_v11 }
  0x18   :  { %106 = vst.msk [vmem:[%s265_s2 + $0x2c] sm:$0xf] %vm94_vm0, %v89_v13 }
  0x19   :  { %107 = vst.msk [vmem:[%s265_s2 + $0x30] sm:$0xf] %vm94_vm0, %v90_v15 }
  0x1a   :  { %108 = vst.msk [vmem:[%s265_s2 + $0x34] sm:$0xf] %vm94_vm0, %v91_v16 }
  0x1b   :  { %109 = vst.msk [vmem:[%s265_s2 + $0x38] sm:$0xf] %vm94_vm0, %v92_v17 }
  0x1c   :  { %110 = vst.msk [vmem:[%s265_s2 + $0x3c] sm:$0xf] %vm94_vm0, %v93_v18 }

// kernel: generator_forward.14
= control target key start
LH: loop header
LB: loop body
LE: loop exit
PB: predicated region body
PF: predicated region fallthrough
CT: control target
= control target key end

     0   :  { %vm12_vm0 = vcmask 517120   ;;  %vm30_vm1 = vcmask 523264   ;;  %v132_v0 = vmov 0.0   ;;  %vm121_vm2 = vcmask 1040384   ;;  %s234_s0 = inlined_call_operand.vmem [shape: f32[128,64], index: 0, kind: input, shape index: {}]   ;;  %s235_s1 = inlined_call_operand.vmem [shape: f32[2,64], index: 1, kind: output, shape index: {}]  }
   0x1   :  { %13 = vst.msk [vmem:[%s235_s1] sm:$0x3] %vm12_vm0, %v132_v0  ;;  %v14_v1 = vld [vmem:[%s234_s0] sm:$0xff]  ;;  %v15_v2 = vld [vmem:[%s234_s0 + $0x8] sm:$0xff]  ;;  %v16_v3 = vld [vmem:[%s234_s0 + $0x10] sm:$0xff] }
   0x2   :  { %v31_v4 = vsel %vm30_vm1, %v14_v1, 0.0  ;;  %v32_v5 = vsel %vm30_vm1, %v15_v2, 0.0  ;;  %v34_v6 = vsel %vm30_vm1, %v16_v3, 0.0  ;;  %v17_v7 = vld [vmem:[%s234_s0 + $0x18] sm:$0xff]  ;;  %v18_v10 = vld [vmem:[%s234_s0 + $0x20] sm:$0xff]  ;;  %v19_v13 = vld [vmem:[%s234_s0 + $0x28] sm:$0xff]  ;;  %v68_v15 = vmul.f32 %v14_v1, %v14_v1 }
   0x3   :  { %v33_v8 = vadd.f32 %v32_v5, %v31_v4  ;;  %v36_v9 = vsel %vm30_vm1, %v17_v7, 0.0  ;;  %v38_v12 = vsel %vm30_vm1, %v18_v10, 0.0  ;;  %v69_v16 = vmul.f32 %v15_v2, %v15_v2  ;;  %v20_v19 = vld [vmem:[%s234_s0 + $0x30] sm:$0xff]  ;;  %v21_v24 = vld [vmem:[%s234_s0 + $0x38] sm:$0xff]  ;;  %v22_v31 = vld [vmem:[%s234_s0 + $0x40] sm:$0xff] }
   0x4   :  { %v70_v17 = vmul.f32 %v16_v3, %v16_v3  ;;  %v40_v18 = vsel %vm30_vm1, %v19_v13, 0.0  ;;  %v71_v21 = vmul.f32 %v17_v7, %v17_v7  ;;  %v42_v22 = vsel %vm30_vm1, %v20_v19, 0.0  ;;  %v23_v37 = vld [vmem:[%s234_s0 + $0x48] sm:$0xff]  ;;  %v24_v43 = vld [vmem:[%s234_s0 + $0x50] sm:$0xff]  ;;  %v25_v49 = vld [vmem:[%s234_s0 + $0x58] sm:$0xff] }
   0x5   :  { %v35_v11 = vadd.f32 %v34_v6, %v33_v8  ;;  %v72_v23 = vmul.f32 %v18_v10, %v18_v10  ;;  %v84_v26 = vsel %vm30_vm1, %v68_v15, 0.0  ;;  %v85_v27 = vsel %vm30_vm1, %v69_v16, 0.0  ;;  %v26_v55 = vld [vmem:[%s234_s0 + $0x60] sm:$0xff]  ;;  %v27_v61 = vld [vmem:[%s234_s0 + $0x68] sm:$0xff]  ;;  %v28_v3 = vld [vmem:[%s234_s0 + $0x70] sm:$0xff] }
   0x6   :  { %v87_v28 = vsel %vm30_vm1, %v70_v17, 0.0  ;;  %v44_v29 = vsel %vm30_vm1, %v21_v24, 0.0  ;;  %v86_v30 = vadd.f32 %v85_v27, %v84_v26  ;;  %v73_v33 = vmul.f32 %v19_v13, %v19_v13 }
   0x7   :  { %v37_v14 = vadd.f32 %v36_v9, %v35_v11  ;;  %v89_v34 = vsel %vm30_vm1, %v71_v21, 0.0  ;;  %v46_v35 = vsel %vm30_vm1, %v22_v31, 0.0  ;;  %v74_v39 = vmul.f32 %v20_v19, %v20_v19  ;;  %v29_v9 = vld [vmem:[%s234_s0 + $0x78] sm:$0xff] }
   0x8   :  { %v88_v36 = vadd.f32 %v87_v28, %v86_v30  ;;  %v91_v40 = vsel %vm30_vm1, %v72_v23, 0.0  ;;  %v48_v41 = vsel %vm30_vm1, %v23_v37, 0.0  ;;  %v75_v45 = vmul.f32 %v21_v24, %v21_v24 }
   0x9   :  { %v39_v20 = vadd.f32 %v38_v12, %v37_v14  ;;  %v93_v46 = vsel %vm30_vm1, %v73_v33, 0.0  ;;  %v50_v47 = vsel %vm30_vm1, %v24_v43, 0.0  ;;  %v76_v51 = vmul.f32 %v22_v31, %v22_v31 }
   0xa   :  { %v90_v42 = vadd.f32 %v89_v34, %v88_v36  ;;  %v95_v52 = vsel %vm30_vm1, %v74_v39, 0.0  ;;  %v52_v53 = vsel %vm30_vm1, %v25_v49, 0.0  ;;  %v77_v57 = vmul.f32 %v23_v37, %v23_v37 }
   0xb   :  { %v41_v25 = vadd.f32 %v40_v18, %v39_v20  ;;  %v97_v58 = vsel %vm30_vm1, %v75_v45, 0.0  ;;  %v54_v59 = vsel %vm30_vm1, %v26_v55, 0.0  ;;  %v78_v63 = vmul.f32 %v24_v43, %v24_v43  ;;  %v123_v43 = vld [vmem:[%s235_s1] sm:$0x3] }
   0xc   :  { %v92_v48 = vadd.f32 %v91_v40, %v90_v42  ;;  %v99_v0 = vsel %vm30_vm1, %v76_v51, 0.0  ;;  %v56_v1 = vsel %vm30_vm1, %v27_v61, 0.0  ;;  %v79_v5 = vmul.f32 %v25_v49, %v25_v49 }
   0xd   :  { %v43_v32 = vadd.f32 %v42_v22, %v41_v25  ;;  %v101_v6 = vsel %vm30_vm1, %v77_v57, 0.0  ;;  %v58_v7 = vsel %vm30_vm1, %v28_v3, 0.0  ;;  %v80_v11 = vmul.f32 %v26_v55, %v26_v55 }
   0xe   :  { %v94_v54 = vadd.f32 %v93_v46, %v92_v48  ;;  %v103_v12 = vsel %vm30_vm1, %v78_v63, 0.0  ;;  %v60_v13 = vsel %vm30_vm1, %v29_v9, 0.0  ;;  %v81_v16 = vmul.f32 %v27_v61, %v27_v61 }
   0xf   :  { %v45_v38 = vadd.f32 %v44_v29, %v43_v32  ;;  %v105_v17 = vsel %vm30_vm1, %v79_v5, 0.0  ;;  %v82_v20 = vmul.f32 %v28_v3, %v28_v3  ;;  %v107_v21 = vsel %vm30_vm1, %v80_v11, 0.0 }
  0x10   :  { %v96_v60 = vadd.f32 %v95_v52, %v94_v54  ;;  %v83_v24 = vmul.f32 %v29_v9, %v29_v9  ;;  %v109_v25 = vsel %vm30_vm1, %v81_v16, 0.0 }
  0x11   :  { %v47_v44 = vadd.f32 %v46_v35, %v45_v38  ;;  %v111_v28 = vsel %vm30_vm1, %v82_v20, 0.0 }
  0x12   :  { %v98_v2 = vadd.f32 %v97_v58, %v96_v60  ;;  %v113_v30 = vsel %vm30_vm1, %v83_v24, 0.0 }
  0x13   :  { %v49_v50 = vadd.f32 %v48_v41, %v47_v44 }
  0x14   :  { %v100_v8 = vadd.f32 %v99_v0, %v98_v2 }
  0x15   :  { %v51_v56 = vadd.f32 %v50_v47, %v49_v50 }
  0x16   :  { %v102_v14 = vadd.f32 %v101_v6, %v100_v8 }
  0x17   :  { %v53_v62 = vadd.f32 %v52_v53, %v51_v56 }
  0x18   :  { %v104_v18 = vadd.f32 %v103_v12, %v102_v14 }
  0x19   :  { %v55_v4 = vadd.f32 %v54_v59, %v53_v62 }
  0x1a   :  { %v106_v22 = vadd.f32 %v105_v17, %v104_v18 }
  0x1b   :  { %v57_v10 = vadd.f32 %v56_v1, %v55_v4 }
  0x1c   :  { %v108_v26 = vadd.f32 %v107_v21, %v106_v22 }
  0x1d   :  { %v59_v15 = vadd.f32 %v58_v7, %v57_v10 }
  0x1e   :  { %v110_v29 = vadd.f32 %v109_v25, %v108_v26 }
  0x1f   :  { %v61_v19 = vadd.f32 %v60_v13, %v59_v15 }
  0x20   :  { %v112_v32 = vadd.f32 %v111_v28, %v110_v29 }
  0x21   :  { %v62_v23 = vrot.slane %v61_v19, 4 }
  0x22   :  { %v114_v33 = vadd.f32 %v113_v30, %v112_v32 }
  0x23   :  { %v63_v27 = vadd.f32 %v62_v23, %v61_v19 }
  0x24   :  { %v115_v35 = vrot.slane %v114_v33, 4 }
  0x25   :  { %v64_v31 = vrot.slane %v63_v27, 2 }
  0x26   :  { %v116_v36 = vadd.f32 %v115_v35, %v114_v33 }
  0x27   :  { %v65_v34 = vadd.f32 %v64_v31, %v63_v27 }
  0x28   :  { %v117_v38 = vrot.slane %v116_v36, 2 }
  0x29   :  { %v66_v37 = vrot.slane %v65_v34, 1 }
  0x2a   :  { %v118_v39 = vadd.f32 %v117_v38, %v116_v36 }
  0x2b   :  { %v67_v40 = vadd.f32 %v66_v37, %v65_v34 }
  0x2c   :  { %v119_v41 = vrot.slane %v118_v39, 1 }
  0x2e   :  { %v120_v42 = vadd.f32 %v119_v41, %v118_v39 }
  0x30   :  { %v122_v44 = vsel %vm121_vm2, %v67_v40, %v120_v42 }
  0x31   :  { %v124_v45 = vadd.f32 %v123_v43, %v122_v44 }
  0x33   :  { %126 = vst.msk [vmem:[%s235_s1] sm:$0x3] %vm12_vm0, %v124_v45 }

// kernel: generator_forward.13
= control target key start
LH: loop header
LB: loop body
LE: loop exit
PB: predicated region body
PF: predicated region fallthrough
CT: control target
= control target key end

     0   :  { %s3271_s1 = inlined_call_operand.vmem [shape: bf16[1152,256], index: 1, kind: input, shape index: {}]   ;;  %s3272_s0 = inlined_call_operand.vmem [shape: bf16[32,1152], index: 0, kind: input, shape index: {}]   ;;  %s3273_s2 = inlined_call_operand.vmem [shape: f32[1,256], index: 2, kind: input, shape index: {}]   ;;  %s3274_s3 = inlined_call_operand.vmem [shape: f32[32,256], index: 3, kind: output, shape index: {}]  }
   0x1   :  { %v1480_v0 = vld [vmem:[%s3271_s1 + $0x70] sm:$0xf]  ;;  %v2031_v1 = vld [vmem:[%s3271_s1 + $0x74] sm:$0xf0]  ;;  %v1472_v11 = vld [vmem:[%s3271_s1 + $0x60] sm:$0xf] }
   0x2   :  { %v1544_v2 = vld [vmem:[%s3271_s1 + $0xf0] sm:$0xf]  ;;  %v1481_v3 = vor.u32 %v2031_v1, %v1480_v0  ;;  %v2047_v4 = vld [vmem:[%s3271_s1 + $0xf4] sm:$0xf0]  ;;  %v2029_v13 = vld [vmem:[%s3271_s1 + $0x64] sm:$0xf0] }
   0x3   :  { %v1608_v5 = vld [vmem:[%s3271_s1 + $0x170] sm:$0xf]  ;;  %v2063_v6 = vld [vmem:[%s3271_s1 + $0x174] sm:$0xf0]  ;;  %v1545_v7 = vor.u32 %v2047_v4, %v1544_v2  ;;  %v1536_v14 = vld [vmem:[%s3271_s1 + $0xe0] sm:$0xf]  ;;  %v1473_v16 = vor.u32 %v2029_v13, %v1472_v11 }
   0x4   :  { %v1609_v8 = vor.u32 %v2063_v6, %v1608_v5  ;;  %v1672_v9 = vld [vmem:[%s3271_s1 + $0x1f0] sm:$0xf]  ;;  %v2079_v10 = vld [vmem:[%s3271_s1 + $0x1f4] sm:$0xf0]  ;;  %996 = vmatpush.bf16.msra.mxu0 %v1481_v3  ;;  %v2045_v15 = vld [vmem:[%s3271_s1 + $0xe4] sm:$0xf0] }
   0x5   :  { %v1673_v12 = vor.u32 %v2079_v10, %v1672_v9  ;;  %1015 = vmatpush.bf16.msra.mxu1 %v1545_v7  ;;  %v1537_v17 = vor.u32 %v2045_v15, %v1536_v14  ;;  %v1600_v18 = vld [vmem:[%s3271_s1 + $0x160] sm:$0xf]  ;;  %v2061_v19 = vld [vmem:[%s3271_s1 + $0x164] sm:$0xf0]  ;;  %v1464_v23 = vld [vmem:[%s3271_s1 + $0x50] sm:$0xf] }
   0x6   :  { %1034 = vmatpush.bf16.msra.mxu2 %v1609_v8  ;;  %v1664_v20 = vld [vmem:[%s3271_s1 + $0x1e0] sm:$0xf]  ;;  %v1601_v21 = vor.u32 %v2061_v19, %v1600_v18  ;;  %v2077_v22 = vld [vmem:[%s3271_s1 + $0x1e4] sm:$0xf0]  ;;  %v2027_v24 = vld [vmem:[%s3271_s1 + $0x54] sm:$0xf0] }
   0x7   :  { %1053 = vmatpush.bf16.msra.mxu3 %v1673_v12  ;;  %v1665_v25 = vor.u32 %v2077_v22, %v1664_v20  ;;  %v1528_v26 = vld [vmem:[%s3271_s1 + $0xd0] sm:$0xf]  ;;  %v2043_v27 = vld [vmem:[%s3271_s1 + $0xd4] sm:$0xf0]  ;;  %v1465_v29 = vor.u32 %v2027_v24, %v1464_v23  ;;  %v1456_v35 = vld [vmem:[%s3271_s1 + $0x40] sm:$0xf] }
   0x8   :  { %v1592_v28 = vld [vmem:[%s3271_s1 + $0x150] sm:$0xf]  ;;  %997 = vmatpush.bf16.msra.mxu0 %v1473_v16  ;;  %v2059_v30 = vld [vmem:[%s3271_s1 + $0x154] sm:$0xf0]  ;;  %v1529_v33 = vor.u32 %v2043_v27, %v1528_v26  ;;  %v2025_v36 = vld [vmem:[%s3271_s1 + $0x44] sm:$0xf0] }
   0x9   :  { %v1656_v31 = vld [vmem:[%s3271_s1 + $0x1d0] sm:$0xf]  ;;  %v2075_v32 = vld [vmem:[%s3271_s1 + $0x1d4] sm:$0xf0]  ;;  %1016 = vmatpush.bf16.msra.mxu1 %v1537_v17  ;;  %v1593_v34 = vor.u32 %v2059_v30, %v1592_v28  ;;  %v1520_v37 = vld [vmem:[%s3271_s1 + $0xc0] sm:$0xf]  ;;  %v1457_v44 = vor.u32 %v2025_v36, %v1456_v35 }
   0xa   :  { %1035 = vmatpush.bf16.msra.mxu2 %v1601_v21  ;;  %v1657_v38 = vor.u32 %v2075_v32, %v1656_v31  ;;  %v2041_v39 = vld [vmem:[%s3271_s1 + $0xc4] sm:$0xf0]  ;;  %v1584_v40 = vld [vmem:[%s3271_s1 + $0x140] sm:$0xf]  ;;  %v1448_v47 = vld [vmem:[%s3271_s1 + $0x30] sm:$0xf] }
   0xb   :  { %1054 = vmatpush.bf16.msra.mxu3 %v1665_v25  ;;  %v2057_v41 = vld [vmem:[%s3271_s1 + $0x144] sm:$0xf0]  ;;  %v1648_v42 = vld [vmem:[%s3271_s1 + $0x1c0] sm:$0xf]  ;;  %v1521_v45 = vor.u32 %v2041_v39, %v1520_v37  ;;  %v2023_v48 = vld [vmem:[%s3271_s1 + $0x34] sm:$0xf0] }
   0xc   :  { %v2073_v43 = vld [vmem:[%s3271_s1 + $0x1c4] sm:$0xf0]  ;;  %998 = vmatpush.bf16.msra.mxu0 %v1465_v29  ;;  %v1585_v46 = vor.u32 %v2057_v41, %v1584_v40  ;;  %v1512_v49 = vld [vmem:[%s3271_s1 + $0xb0] sm:$0xf]  ;;  %v2039_v51 = vld [vmem:[%s3271_s1 + $0xb4] sm:$0xf0]  ;;  %v1449_v56 = vor.u32 %v2023_v48, %v1448_v47 }
   0xd   :  { %1017 = vmatpush.bf16.msra.mxu1 %v1529_v33  ;;  %v1649_v50 = vor.u32 %v2073_v43, %v1648_v42  ;;  %v1576_v52 = vld [vmem:[%s3271_s1 + $0x130] sm:$0xf]  ;;  %v2055_v53 = vld [vmem:[%s3271_s1 + $0x134] sm:$0xf0]  ;;  %v1513_v57 = vor.u32 %v2039_v51, %v1512_v49  ;;  %v1440_v59 = vld [vmem:[%s3271_s1 + $0x20] sm:$0xf] }
   0xe   :  { %1036 = vmatpush.bf16.msra.mxu2 %v1593_v34  ;;  %v1640_v54 = vld [vmem:[%s3271_s1 + $0x1b0] sm:$0xf]  ;;  %v2071_v55 = vld [vmem:[%s3271_s1 + $0x1b4] sm:$0xf0]  ;;  %v1577_v58 = vor.u32 %v2055_v53, %v1576_v52  ;;  %v2021_v60 = vld [vmem:[%s3271_s1 + $0x24] sm:$0xf0] }
   0xf   :  { %1055 = vmatpush.bf16.msra.mxu3 %v1657_v38  ;;  %v1504_v61 = vld [vmem:[%s3271_s1 + $0xa0] sm:$0xf]  ;;  %v1641_v62 = vor.u32 %v2071_v55, %v1640_v54  ;;  %v2037_v63 = vld [vmem:[%s3271_s1 + $0xa4] sm:$0xf0]  ;;  %v1441_v4 = vor.u32 %v2021_v60, %v1440_v59  ;;  %v1432_v7 = vld [vmem:[%s3271_s1 + $0x10] sm:$0xf] }
  0x10   :  { %999 = vmatpush.bf16.msra.mxu0 %v1457_v44  ;;  %v1568_v0 = vld [vmem:[%s3271_s1 + $0x120] sm:$0xf]  ;;  %v2053_v1 = vld [vmem:[%s3271_s1 + $0x124] sm:$0xf0]  ;;  %v1505_v5 = vor.u32 %v2037_v63, %v1504_v61  ;;  %v2019_v8 = vld [vmem:[%s3271_s1 + $0x14] sm:$0xf0] }
  0x11   :  { %1018 = vmatpush.bf16.msra.mxu1 %v1521_v45  ;;  %v1632_v2 = vld [vmem:[%s3271_s1 + $0x1a0] sm:$0xf]  ;;  %v2069_v3 = vld [vmem:[%s3271_s1 + $0x1a4] sm:$0xf0]  ;;  %v1569_v6 = vor.u32 %v2053_v1, %v1568_v0  ;;  %v1496_v9 = vld [vmem:[%s3271_s1 + $0x90] sm:$0xf]  ;;  %v1433_v17 = vor.u32 %v2019_v8, %v1432_v7 }
  0x12   :  { %1037 = vmatpush.bf16.msra.mxu2 %v1585_v46  ;;  %v1633_v10 = vor.u32 %v2069_v3, %v1632_v2  ;;  %v2035_v11 = vld [vmem:[%s3271_s1 + $0x94] sm:$0xf0]  ;;  %v1560_v12 = vld [vmem:[%s3271_s1 + $0x110] sm:$0xf]  ;;  %v1424_v16 = vld [vmem:[%s3271_s1] sm:$0xf] }
  0x13   :  { %1056 = vmatpush.bf16.msra.mxu3 %v1649_v50  ;;  %v2051_v13 = vld [vmem:[%s3271_s1 + $0x114] sm:$0xf0]  ;;  %v1624_v14 = vld [vmem:[%s3271_s1 + $0x190] sm:$0xf]  ;;  %v2017_v18 = vld [vmem:[%s3271_s1 + $0x4] sm:$0xf0]  ;;  %v1497_v21 = vor.u32 %v2035_v11, %v1496_v9 }
  0x14   :  { %1000 = vmatpush.bf16.msra.mxu0 %v1449_v56  ;;  %v2067_v15 = vld [vmem:[%s3271_s1 + $0x194] sm:$0xf0]  ;;  %v1488_v19 = vld [vmem:[%s3271_s1 + $0x80] sm:$0xf]  ;;  %v2033_v20 = vld [vmem:[%s3271_s1 + $0x84] sm:$0xf0]  ;;  %v1561_v22 = vor.u32 %v2051_v13, %v1560_v12  ;;  %v1425_v34 = vor.u32 %v2017_v18, %v1424_v16 }
  0x15   :  { %1019 = vmatpush.bf16.msra.mxu1 %v1513_v57  ;;  %v1552_v23 = vld [vmem:[%s3271_s1 + $0x100] sm:$0xf]  ;;  %v2049_v24 = vld [vmem:[%s3271_s1 + $0x104] sm:$0xf0]  ;;  %v1625_v26 = vor.u32 %v2067_v15, %v1624_v14  ;;  %v2002_v29 = vld [vmem:[%s3272_s0 + $0x20] sm:$0xf0]  ;;  %v1489_v38 = vor.u32 %v2033_v20, %v1488_v19 }
  0x16   :  { %1038 = vmatpush.bf16.msra.mxu2 %v1577_v58  ;;  %v1616_v25 = vld [vmem:[%s3271_s1 + $0x180] sm:$0xf]  ;;  %v2065_v27 = vld [vmem:[%s3271_s1 + $0x184] sm:$0xf0]  ;;  %v1998_v30 = vld [vmem:[%s3272_s0 + $0x4] sm:$0xf]  ;;  %v1553_v39 = vor.u32 %v2049_v24, %v1552_v23 }
  0x17   :  { %1057 = vmatpush.bf16.msra.mxu3 %v1641_v62  ;;  %v1352_v28 = vld [vmem:[%s3272_s0] sm:$0xf]  ;;  %v1354_v31 = vld [vmem:[%s3272_s0 + $0x24] sm:$0xf0]  ;;  %v1864_v32 = vld [vmem:[%s3271_s1 + $0x370] sm:$0xf]  ;;  %v1617_v43 = vor.u32 %v2065_v27, %v1616_v25 }
  0x18   :  { %1001 = vmatpush.bf16.msra.mxu0 %v1441_v4  ;;  %v2127_v33 = vld [vmem:[%s3271_s1 + $0x374] sm:$0xf0]  ;;  %v1360_v35 = vld [vmem:[%s3272_s0 + $0x8] sm:$0xf]  ;;  %v1800_v36 = vld [vmem:[%s3271_s1 + $0x2f0] sm:$0xf]  ;;  %v2433_v48 = vor.u32 %v2002_v29, %v1352_v28  ;;  %v2444_v53 = vor.u32 %v1998_v30, %v1354_v31 }
  0x19   :  { %1020 = vmatpush.bf16.msra.mxu1 %v1505_v5  ;;  %v2111_v37 = vld [vmem:[%s3271_s1 + $0x2f4] sm:$0xf0]  ;;  %v2003_v40 = vld [vmem:[%s3272_s0 + $0x28] sm:$0xf0]  ;;  %v1362_v42 = vld [vmem:[%s3272_s0 + $0x2c] sm:$0xf0]  ;;  %v1865_v44 = vor.u32 %v2127_v33, %v1864_v32 }
  0x1a   :  { %1039 = vmatpush.bf16.msra.mxu2 %v1569_v6  ;;  %v1999_v41 = vld [vmem:[%s3272_s0 + $0xc] sm:$0xf]  ;;  %v1736_v45 = vld [vmem:[%s3271_s1 + $0x270] sm:$0xf]  ;;  %v2095_v46 = vld [vmem:[%s3271_s1 + $0x274] sm:$0xf0]  ;;  %v1801_v49 = vor.u32 %v2111_v37, %v1800_v36  ;;  %v2446_v54 = vor.u32 %v2003_v40, %v1360_v35 }
  0x1b   :  { %1058 = vmatpush.bf16.msra.mxu3 %v1633_v10  ;;  %v1928_v47 = vld [vmem:[%s3271_s1 + $0x3f0] sm:$0xf]  ;;  %v2143_v50 = vld [vmem:[%s3271_s1 + $0x3f4] sm:$0xf0]  ;;  %v1856_v51 = vld [vmem:[%s3271_s1 + $0x360] sm:$0xf]  ;;  %v2454_v57 = vor.u32 %v1999_v41, %v1362_v42  ;;  %v1737_v58 = vor.u32 %v2095_v46, %v1736_v45 }
  0x1c   :  { %1002 = vmatpush.bf16.msra.mxu0 %v1433_v17  ;;  %v2125_v52 = vld [vmem:[%s3271_s1 + $0x364] sm:$0xf0]  ;;  %v1792_v55 = vld [vmem:[%s3271_s1 + $0x2e0] sm:$0xf]  ;;  %v1929_v59 = vor.u32 %v2143_v50, %v1928_v47  ;;  %v1848_v2 = vld [vmem:[%s3271_s1 + $0x350] sm:$0xf] }
  0x1d   :  { %1021 = vmatpush.bf16.msra.mxu1 %v1497_v21  ;;  %v2109_v56 = vld [vmem:[%s3271_s1 + $0x2e4] sm:$0xf0]  ;;  %v1857_v60 = vor.u32 %v2125_v52, %v1856_v51  ;;  %v1728_v61 = vld [vmem:[%s3271_s1 + $0x260] sm:$0xf]  ;;  %v2123_v3 = vld [vmem:[%s3271_s1 + $0x354] sm:$0xf0] }
  0x1e   :  { %1040 = vmatpush.bf16.msra.mxu2 %v1561_v22  ;;  %v2093_v62 = vld [vmem:[%s3271_s1 + $0x264] sm:$0xf0]  ;;  %v1920_v63 = vld [vmem:[%s3271_s1 + $0x3e0] sm:$0xf]  ;;  %v1793_v0 = vor.u32 %v2109_v56, %v1792_v55  ;;  %v1784_v4 = vld [vmem:[%s3271_s1 + $0x2d0] sm:$0xf]  ;;  %v1849_v8 = vor.u32 %v2123_v3, %v1848_v2 }
  0x1f   :  { %1059 = vmatpush.bf16.msra.mxu3 %v1625_v26  ;;  %v2141_v1 = vld [vmem:[%s3271_s1 + $0x3e4] sm:$0xf0]  ;;  %v2107_v5 = vld [vmem:[%s3271_s1 + $0x2d4] sm:$0xf0]  ;;  %v1729_v6 = vor.u32 %v2093_v62, %v1728_v61  ;;  %v1720_v9 = vld [vmem:[%s3271_s1 + $0x250] sm:$0xf] }
  0x20   :  { %1003 = vmatpush.bf16.msra.mxu0 %v1425_v34  ;;  %v1921_v7 = vor.u32 %v2141_v1, %v1920_v63  ;;  %v2091_v10 = vld [vmem:[%s3271_s1 + $0x254] sm:$0xf0]  ;;  %v1912_v11 = vld [vmem:[%s3271_s1 + $0x3d0] sm:$0xf]  ;;  %v1785_v12 = vor.u32 %v2107_v5, %v1784_v4  ;;  %v1840_v14 = vld [vmem:[%s3271_s1 + $0x340] sm:$0xf] }
  0x21   :  { %1022 = vmatpush.bf16.msra.mxu1 %v1489_v38  ;;  %v2139_v13 = vld [vmem:[%s3271_s1 + $0x3d4] sm:$0xf0]  ;;  %v2121_v15 = vld [vmem:[%s3271_s1 + $0x344] sm:$0xf0]  ;;  %v1776_v16 = vld [vmem:[%s3271_s1 + $0x2c0] sm:$0xf]  ;;  %v1721_v18 = vor.u32 %v2091_v10, %v1720_v9 }
  0x22   :  { %1041 = vmatpush.bf16.msra.mxu2 %v1553_v39  ;;  %v2105_v17 = vld [vmem:[%s3271_s1 + $0x2c4] sm:$0xf0]  ;;  %v1712_v19 = vld [vmem:[%s3271_s1 + $0x240] sm:$0xf]  ;;  %v1913_v22 = vor.u32 %v2139_v13, %v1912_v11  ;;  %v1841_v23 = vor.u32 %v2121_v15, %v1840_v14  ;;  %v2011_v26 = vld [vmem:[%s3272_s0 + $0x68] sm:$0xf0] }
  0x23   :  { %1060 = vmatpush.bf16.msra.mxu3 %v1617_v43  ;;  %1004 = vmatmul.bf16.vlgmr.msra.gmra.mxu0 %v2433_v48  ;;  %v2089_v20 = vld [vmem:[%s3271_s1 + $0x244] sm:$0xf0]  ;;  %v1904_v21 = vld [vmem:[%s3271_s1 + $0x3c0] sm:$0xf]  ;;  %v1777_v27 = vor.u32 %v2105_v17, %v1776_v16  ;;  %v2007_v28 = vld [vmem:[%s3272_s0 + $0x4c] sm:$0xf] }
  0x24   :  { %1023 = vmatmul.bf16.vlgmr.msra.gmra.mxu1 %v2444_v53  ;;  %1072 = vmatpush.bf16.msrb.mxu0 %v1737_v58  ;;  %v2137_v24 = vld [vmem:[%s3271_s1 + $0x3c4] sm:$0xf0]  ;;  %v1390_v29 = vld [vmem:[%s3272_s0 + $0x6c] sm:$0xf0]  ;;  %v2119_v31 = vld [vmem:[%s3271_s1 + $0x334] sm:$0xf0]  ;;  %v1713_v35 = vor.u32 %v2089_v20, %v1712_v19 }
  0x25   :  { %1091 = vmatpush.bf16.msrb.mxu1 %v1801_v49  ;;  %1042 = vmatmul.bf16.vlgmr.msra.gmra.mxu2 %v2446_v54  ;;  %v1388_v25 = vld [vmem:[%s3272_s0 + $0x48] sm:$0xf]  ;;  %v1832_v30 = vld [vmem:[%s3271_s1 + $0x330] sm:$0xf]  ;;  %v2103_v34 = vld [vmem:[%s3271_s1 + $0x2b4] sm:$0xf0]  ;;  %v1905_v39 = vor.u32 %v2137_v24, %v1904_v21  ;;  %v2576_v50 = vor.u32 %v2007_v28, %v1390_v29 }
  0x26   :  { %1110 = vmatpush.bf16.msrb.mxu2 %v1865_v44  ;;  %1061 = vmatmul.bf16.vlgmr.msra.gmra.mxu3 %v2454_v57  ;;  %v1396_v32 = vld [vmem:[%s3272_s0 + $0x50] sm:$0xf]  ;;  %v2012_v36 = vld [vmem:[%s3272_s0 + $0x70] sm:$0xf0]  ;;  %v1398_v38 = vld [vmem:[%s3272_s0 + $0x74] sm:$0xf0]  ;;  %v1833_v40 = vor.u32 %v2119_v31, %v1832_v30  ;;  %v2565_v44 = vor.u32 %v2011_v26, %v1388_v25 }
  0x27   :  { %1129 = vmatpush.bf16.msrb.mxu3 %v1929_v59  ;;  %v1768_v33 = vld [vmem:[%s3271_s1 + $0x2b0] sm:$0xf]  ;;  %v2008_v37 = vld [vmem:[%s3272_s0 + $0x54] sm:$0xf]  ;;  %v2087_v42 = vld [vmem:[%s3271_s1 + $0x234] sm:$0xf0]  ;;  %v2578_v51 = vor.u32 %v2012_v36, %v1396_v32 }
  0x28   :  { %1073 = vmatpush.bf16.msrb.mxu0 %v1729_v6  ;;  %v1704_v41 = vld [vmem:[%s3271_s1 + $0x230] sm:$0xf]  ;;  %v1769_v45 = vor.u32 %v2103_v34, %v1768_v33  ;;  %v2135_v46 = vld [vmem:[%s3271_s1 + $0x3b4] sm:$0xf0]  ;;  %v1824_v47 = vld [vmem:[%s3271_s1 + $0x320] sm:$0xf]  ;;  %v2586_v56 = vor.u32 %v2008_v37, %v1398_v38 }
  0x29   :  { %1092 = vmatpush.bf16.msrb.mxu1 %v1793_v0  ;;  %v1896_v43 = vld [vmem:[%s3271_s1 + $0x3b0] sm:$0xf]  ;;  %v2117_v49 = vld [vmem:[%s3271_s1 + $0x324] sm:$0xf0]  ;;  %v1760_v52 = vld [vmem:[%s3271_s1 + $0x2a0] sm:$0xf]  ;;  %v1705_v58 = vor.u32 %v2087_v42, %v1704_v41 }
  0x2a   :  { %1111 = vmatpush.bf16.msrb.mxu2 %v1857_v60  ;;  %v2101_v55 = vld [vmem:[%s3271_s1 + $0x2a4] sm:$0xf0]  ;;  %v1897_v59 = vor.u32 %v2135_v46, %v1896_v43  ;;  %v1825_v60 = vor.u32 %v2117_v49, %v1824_v47  ;;  %v1696_v61 = vld [vmem:[%s3271_s1 + $0x220] sm:$0xf]  ;;  %v1816_v2 = vld [vmem:[%s3271_s1 + $0x310] sm:$0xf] }
  0x2b   :  { %1130 = vmatpush.bf16.msrb.mxu3 %v1921_v7  ;;  %v2085_v62 = vld [vmem:[%s3271_s1 + $0x224] sm:$0xf0]  ;;  %v1888_v63 = vld [vmem:[%s3271_s1 + $0x3a0] sm:$0xf]  ;;  %v1761_v0 = vor.u32 %v2101_v55, %v1760_v52  ;;  %v2115_v3 = vld [vmem:[%s3271_s1 + $0x314] sm:$0xf0] }
  0x2c   :  { %1074 = vmatpush.bf16.msrb.mxu0 %v1721_v18  ;;  %v2133_v1 = vld [vmem:[%s3271_s1 + $0x3a4] sm:$0xf0]  ;;  %v1752_v4 = vld [vmem:[%s3271_s1 + $0x290] sm:$0xf]  ;;  %v2099_v5 = vld [vmem:[%s3271_s1 + $0x294] sm:$0xf0]  ;;  %v1697_v6 = vor.u32 %v2085_v62, %v1696_v61  ;;  %v1817_v9 = vor.u32 %v2115_v3, %v1816_v2 }
  0x2d   :  { %1093 = vmatpush.bf16.msrb.mxu1 %v1785_v12  ;;  %v1688_v7 = vld [vmem:[%s3271_s1 + $0x210] sm:$0xf]  ;;  %v2083_v10 = vld [vmem:[%s3271_s1 + $0x214] sm:$0xf0]  ;;  %v1753_v13 = vor.u32 %v2099_v5, %v1752_v4  ;;  %v1808_v14 = vld [vmem:[%s3271_s1 + $0x300] sm:$0xf] }
  0x2e   :  { %1112 = vmatpush.bf16.msrb.mxu2 %v1849_v8  ;;  %v1889_v8 = vor.u32 %v2133_v1, %v1888_v63  ;;  %v1880_v11 = vld [vmem:[%s3271_s1 + $0x390] sm:$0xf]  ;;  %v2131_v12 = vld [vmem:[%s3271_s1 + $0x394] sm:$0xf0]  ;;  %v2113_v15 = vld [vmem:[%s3271_s1 + $0x304] sm:$0xf0]  ;;  %v1689_v20 = vor.u32 %v2083_v10, %v1688_v7 }
  0x2f   :  { %1131 = vmatpush.bf16.msrb.mxu3 %v1913_v22  ;;  %v1744_v16 = vld [vmem:[%s3271_s1 + $0x280] sm:$0xf]  ;;  %v2097_v17 = vld [vmem:[%s3271_s1 + $0x284] sm:$0xf0]  ;;  %v2046_v18 = vld [vmem:[%s3271_s1 + $0xf4] sm:$0xf]  ;;  %v1881_v24 = vor.u32 %v2131_v12, %v1880_v11  ;;  %v1809_v25 = vor.u32 %v2113_v15, %v1808_v14 }
  0x30   :  { %1075 = vmatpush.bf16.msrb.mxu0 %v1713_v35  ;;  %v1546_v19 = vld [vmem:[%s3271_s1 + $0xf8] sm:$0xf0]  ;;  %v1680_v21 = vld [vmem:[%s3271_s1 + $0x200] sm:$0xf]  ;;  %v2030_v22 = vld [vmem:[%s3271_s1 + $0x74] sm:$0xf]  ;;  %v1745_v29 = vor.u32 %v2097_v17, %v1744_v16 }
  0x31   :  { %1094 = vmatpush.bf16.msrb.mxu1 %v1777_v27  ;;  %v2081_v26 = vld [vmem:[%s3271_s1 + $0x204] sm:$0xf0]  ;;  %v1872_v27 = vld [vmem:[%s3271_s1 + $0x380] sm:$0xf]  ;;  %v1368_v30 = vld [vmem:[%s3272_s0 + $0x10] sm:$0xf]  ;;  %v1549_v34 = vor.u32 %v2046_v18, %v1546_v19 }
  0x32   :  { %1113 = vmatpush.bf16.msrb.mxu2 %v1841_v23  ;;  %v1482_v23 = vld [vmem:[%s3271_s1 + $0x78] sm:$0xf0]  ;;  %v2129_v28 = vld [vmem:[%s3271_s1 + $0x384] sm:$0xf0]  ;;  %v2004_v31 = vld [vmem:[%s3272_s0 + $0x30] sm:$0xf0]  ;;  %v1681_v42 = vor.u32 %v2081_v26, %v1680_v21 }
  0x33   :  { %1132 = vmatpush.bf16.msrb.mxu3 %v1905_v39  ;;  %1009 = vmatmul.bf16.gmra.mxu0 %v2565_v44  ;;  %v2000_v32 = vld [vmem:[%s3272_s0 + $0x14] sm:$0xf]  ;;  %v1370_v33 = vld [vmem:[%s3272_s0 + $0x34] sm:$0xf0]  ;;  %v1992_v35 = vld [vmem:[%s3271_s1 + $0x470] sm:$0xf]  ;;  %v1485_v38 = vor.u32 %v2030_v22, %v1482_v23  ;;  %v1873_v47 = vor.u32 %v2129_v28, %v1872_v27 }
  0x34   :  { %1028 = vmatmul.bf16.gmra.mxu1 %v2576_v50  ;;  %1076 = vmatpush.bf16.msrb.mxu0 %v1705_v58  ;;  %v2159_v36 = vld [vmem:[%s3271_s1 + $0x474] sm:$0xf0]  ;;  %v2062_v37 = vld [vmem:[%s3271_s1 + $0x174] sm:$0xf]  ;;  %v1610_v39 = vld [vmem:[%s3271_s1 + $0x178] sm:$0xf0]  ;;  %v2723_v1 = vor.u32 %v2000_v32, %v1370_v33 }
  0x35   :  { %1095 = vmatpush.bf16.msrb.mxu1 %v1769_v45  ;;  %1047 = vmatmul.bf16.gmra.mxu2 %v2578_v51  ;;  %v1538_v41 = vld [vmem:[%s3271_s1 + $0xe8] sm:$0xf0]  ;;  %v1376_v43 = vld [vmem:[%s3272_s0 + $0x18] sm:$0xf]  ;;  %v2005_v45 = vld [vmem:[%s3272_s0 + $0x38] sm:$0xf0]  ;;  %v1993_v52 = vor.u32 %v2159_v36, %v1992_v35 }
  0x36   :  { %1114 = vmatpush.bf16.msrb.mxu2 %v1833_v40  ;;  %1066 = vmatmul.bf16.gmra.mxu3 %v2586_v56  ;;  %v2044_v40 = vld [vmem:[%s3271_s1 + $0xe4] sm:$0xf]  ;;  %v2001_v46 = vld [vmem:[%s3272_s0 + $0x1c] sm:$0xf]  ;;  %v1378_v49 = vld [vmem:[%s3272_s0 + $0x3c] sm:$0xf0]  ;;  %v2734_v5 = vor.u32 %v2005_v45, %v1376_v43 }
  0x37   :  { %1133 = vmatpush.bf16.msrb.mxu3 %v1897_v59  ;;  %v1984_v55 = vld [vmem:[%s3271_s1 + $0x460] sm:$0xf]  ;;  %v2157_v58 = vld [vmem:[%s3271_s1 + $0x464] sm:$0xf0]  ;;  %v1613_v59 = vor.u32 %v2062_v37, %v1610_v39  ;;  %v2028_v61 = vld [vmem:[%s3271_s1 + $0x64] sm:$0xf] }
  0x38   :  { %1077 = vmatpush.bf16.msrb.mxu0 %v1697_v6  ;;  %v1474_v62 = vld [vmem:[%s3271_s1 + $0x68] sm:$0xf0]  ;;  %v2060_v63 = vld [vmem:[%s3271_s1 + $0x164] sm:$0xf]  ;;  %v2042_v3 = vld [vmem:[%s3271_s1 + $0xd4] sm:$0xf]  ;;  %v2736_v6 = vor.u32 %v2001_v46, %v1378_v49  ;;  %v1985_v7 = vor.u32 %v2157_v58, %v1984_v55 }
  0x39   :  { %1096 = vmatpush.bf16.msrb.mxu1 %v1761_v0  ;;  %v2721_v0 = vor.u32 %v2004_v31, %v1368_v30  ;;  %v1602_v2 = vld [vmem:[%s3271_s1 + $0x168] sm:$0xf0]  ;;  %v1530_v4 = vld [vmem:[%s3271_s1 + $0xd8] sm:$0xf0]  ;;  %v2155_v10 = vld [vmem:[%s3271_s1 + $0x454] sm:$0xf0] }
  0x3a   :  { %1115 = vmatpush.bf16.msrb.mxu2 %v1825_v60  ;;  %v1541_v60 = vor.u32 %v2044_v40, %v1538_v41  ;;  %v1605_v11 = vor.u32 %v2060_v63, %v1602_v2  ;;  %v1533_v12 = vor.u32 %v2042_v3, %v1530_v4  ;;  %v1466_v14 = vld [vmem:[%s3271_s1 + $0x58] sm:$0xf0]  ;;  %v2058_v15 = vld [vmem:[%s3271_s1 + $0x154] sm:$0xf]  ;;  %v2040_v17 = vld [vmem:[%s3271_s1 + $0xc4] sm:$0xf] }
  0x3b   :  { %1134 = vmatpush.bf16.msrb.mxu3 %v1889_v8  ;;  %v1477_v8 = vor.u32 %v2028_v61, %v1474_v62  ;;  %v1594_v16 = vld [vmem:[%s3271_s1 + $0x158] sm:$0xf0]  ;;  %v1522_v18 = vld [vmem:[%s3271_s1 + $0xc8] sm:$0xf0]  ;;  %v1968_v21 = vld [vmem:[%s3271_s1 + $0x440] sm:$0xf] }
  0x3c   :  { %1078 = vmatpush.bf16.msrb.mxu0 %v1689_v20  ;;  %v2153_v22 = vld [vmem:[%s3271_s1 + $0x444] sm:$0xf0]  ;;  %v1597_v23 = vor.u32 %v2058_v15, %v1594_v16  ;;  %v1458_v26 = vld [vmem:[%s3271_s1 + $0x48] sm:$0xf0]  ;;  %v2056_v27 = vld [vmem:[%s3271_s1 + $0x144] sm:$0xf] }
  0x3d   :  { %1097 = vmatpush.bf16.msrb.mxu1 %v1753_v13  ;;  %v2026_v13 = vld [vmem:[%s3271_s1 + $0x54] sm:$0xf]  ;;  %v1586_v28 = vld [vmem:[%s3271_s1 + $0x148] sm:$0xf0]  ;;  %v1514_v30 = vld [vmem:[%s3271_s1 + $0xb8] sm:$0xf0]  ;;  %v1969_v31 = vor.u32 %v2153_v22, %v1968_v21 }
  0x3e   :  { %1116 = vmatpush.bf16.msrb.mxu2 %v1817_v9  ;;  %v1976_v9 = vld [vmem:[%s3271_s1 + $0x450] sm:$0xf]  ;;  %v1469_v20 = vor.u32 %v2026_v13, %v1466_v14  ;;  %v1589_v35 = vor.u32 %v2056_v27, %v1586_v28  ;;  %v1404_v36 = vld [vmem:[%s3272_s0 + $0x58] sm:$0xf]  ;;  %v2013_v37 = vld [vmem:[%s3272_s0 + $0x78] sm:$0xf0] }
  0x3f   :  { %1135 = vmatpush.bf16.msrb.mxu3 %v1881_v24  ;;  %v1977_v19 = vor.u32 %v2155_v10, %v1976_v9  ;;  %v1525_v24 = vor.u32 %v2040_v17, %v1522_v18  ;;  %v1960_v33 = vld [vmem:[%s3271_s1 + $0x430] sm:$0xf]  ;;  %v1406_v39 = vld [vmem:[%s3272_s0 + $0x7c] sm:$0xf0]  ;;  %v2022_v41 = vld [vmem:[%s3271_s1 + $0x34] sm:$0xf] }
  0x40   :  { %1079 = vmatpush.bf16.msrb.mxu0 %v1681_v42  ;;  %v1450_v42 = vld [vmem:[%s3271_s1 + $0x38] sm:$0xf0]  ;;  %v2054_v43 = vld [vmem:[%s3271_s1 + $0x134] sm:$0xf]  ;;  %v2036_v46 = vld [vmem:[%s3271_s1 + $0xa4] sm:$0xf] }
  0x41   :  { %1098 = vmatpush.bf16.msrb.mxu1 %v1745_v29  ;;  %v2038_v29 = vld [vmem:[%s3271_s1 + $0xb4] sm:$0xf]  ;;  %v1578_v45 = vld [vmem:[%s3271_s1 + $0x138] sm:$0xf0]  ;;  %v1412_v49 = vld [vmem:[%s3272_s0 + $0x60] sm:$0xf] }
  0x42   :  { %1117 = vmatpush.bf16.msrb.mxu2 %v1809_v25  ;;  %v2024_v25 = vld [vmem:[%s3271_s1 + $0x44] sm:$0xf]  ;;  %v1517_v40 = vor.u32 %v2038_v29, %v1514_v30  ;;  %v1414_v58 = vld [vmem:[%s3272_s0 + $0x84] sm:$0xf0]  ;;  %v1952_v61 = vld [vmem:[%s3271_s1 + $0x420] sm:$0xf]  ;;  %v1581_v63 = vor.u32 %v2054_v43, %v1578_v45 }
  0x43   :  { %1136 = vmatpush.bf16.msrb.mxu3 %v1873_v47  ;;  %1080 = vmatmul.bf16.vlgmr.msrb.gmra.mxu0 %v2721_v0  ;;  %v1461_v32 = vor.u32 %v2024_v25, %v1458_v26  ;;  %v1506_v47 = vld [vmem:[%s3271_s1 + $0xa8] sm:$0xf0]  ;;  %v2010_v55 = vld [vmem:[%s3272_s0 + $0x64] sm:$0xf]  ;;  %v2149_v62 = vld [vmem:[%s3271_s1 + $0x424] sm:$0xf0] }
  0x44   :  { %1148 = vmatpush.bf16.msra.mxu0 %v1993_v52  ;;  %1099 = vmatmul.bf16.vlgmr.msrb.gmra.mxu1 %v2723_v1  ;;  %v2014_v52 = vld [vmem:[%s3272_s0 + $0x80] sm:$0xf0]  ;;  %v1509_v2 = vor.u32 %v2036_v46, %v1506_v47  ;;  %v1442_v4 = vld [vmem:[%s3271_s1 + $0x28] sm:$0xf0]  ;;  %v2868_v14 = vor.u32 %v2010_v55, %v1414_v58  ;;  %v1953_v15 = vor.u32 %v2149_v62, %v1952_v61  ;;  %v1944_v17 = vld [vmem:[%s3271_s1 + $0x410] sm:$0xf] }
  0x45   :  { %1167 = vmatpush.bf16.msra.mxu1 %v1485_v38  ;;  %1118 = vmatmul.bf16.vlgmr.msrb.gmra.mxu2 %v2734_v5  ;;  %v2009_v38 = vld [vmem:[%s3272_s0 + $0x5c] sm:$0xf]  ;;  %v2020_v3 = vld [vmem:[%s3271_s1 + $0x24] sm:$0xf]  ;;  %v1570_v10 = vld [vmem:[%s3271_s1 + $0x128] sm:$0xf0]  ;;  %v2866_v13 = vor.u32 %v2014_v52, %v1412_v49 }
  0x46   :  { %1186 = vmatpush.bf16.msra.mxu2 %v1549_v34  ;;  %1137 = vmatmul.bf16.vlgmr.msrb.gmra.mxu3 %v2736_v6  ;;  %v2151_v34 = vld [vmem:[%s3271_s1 + $0x434] sm:$0xf0]  ;;  %v2855_v9 = vor.u32 %v2009_v38, %v1406_v39  ;;  %v1445_v16 = vor.u32 %v2020_v3, %v1442_v4  ;;  %v2018_v21 = vld [vmem:[%s3271_s1 + $0x14] sm:$0xf]  ;;  %v1434_v22 = vld [vmem:[%s3271_s1 + $0x18] sm:$0xf0] }
  0x47   :  { %1205 = vmatpush.bf16.msra.mxu3 %v1613_v59  ;;  %v1961_v59 = vor.u32 %v2151_v34, %v1960_v33  ;;  %v2147_v18 = vld [vmem:[%s3271_s1 + $0x414] sm:$0xf0]  ;;  %v2032_v25 = vld [vmem:[%s3271_s1 + $0x84] sm:$0xf]  ;;  %v1490_v26 = vld [vmem:[%s3271_s1 + $0x88] sm:$0xf0]  ;;  %v1437_v30 = vor.u32 %v2018_v21, %v1434_v22 }
  0x48   :  { %1149 = vmatpush.bf16.msra.mxu0 %v1985_v7  ;;  %v2052_v7 = vld [vmem:[%s3271_s1 + $0x124] sm:$0xf]  ;;  %v2110_v27 = vld [vmem:[%s3271_s1 + $0x2f4] sm:$0xf]  ;;  %v1802_v28 = vld [vmem:[%s3271_s1 + $0x2f8] sm:$0xf0]  ;;  %v1945_v29 = vor.u32 %v2147_v18, %v1944_v17 }
  0x49   :  { %1168 = vmatpush.bf16.msra.mxu1 %v1477_v8  ;;  %v2853_v8 = vor.u32 %v2013_v37, %v1404_v36  ;;  %v2016_v33 = vld [vmem:[%s3271_s1 + $0x4] sm:$0xf]  ;;  %v1426_v36 = vld [vmem:[%s3271_s1 + $0x8] sm:$0xf0]  ;;  %v1805_v39 = vor.u32 %v2110_v27, %v1802_v28  ;;  %v1738_v43 = vld [vmem:[%s3271_s1 + $0x278] sm:$0xf0] }
  0x4a   :  { %1187 = vmatpush.bf16.msra.mxu2 %v1541_v60  ;;  %v1453_v60 = vor.u32 %v2022_v41, %v1450_v42  ;;  %v2048_v37 = vld [vmem:[%s3271_s1 + $0x104] sm:$0xf]  ;;  %v1554_v38 = vld [vmem:[%s3271_s1 + $0x108] sm:$0xf0]  ;;  %v1674_v41 = vld [vmem:[%s3271_s1 + $0x1f8] sm:$0xf0]  ;;  %v1429_v49 = vor.u32 %v2016_v33, %v1426_v36 }
  0x4b   :  { %1206 = vmatpush.bf16.msra.mxu3 %v1605_v11  ;;  %v2034_v11 = vld [vmem:[%s3271_s1 + $0x94] sm:$0xf]  ;;  %v1866_v46 = vld [vmem:[%s3271_s1 + $0x378] sm:$0xf0]  ;;  %v2108_v52 = vld [vmem:[%s3271_s1 + $0x2e4] sm:$0xf]  ;;  %v1557_v58 = vor.u32 %v2048_v37, %v1554_v38 }
  0x4c   :  { %1150 = vmatpush.bf16.msra.mxu0 %v1977_v19  ;;  %v1573_v19 = vor.u32 %v2052_v7, %v1570_v10  ;;  %v2094_v42 = vld [vmem:[%s3271_s1 + $0x274] sm:$0xf]  ;;  %v1794_v55 = vld [vmem:[%s3271_s1 + $0x2e8] sm:$0xf0]  ;;  %v2076_v62 = vld [vmem:[%s3271_s1 + $0x1e4] sm:$0xf] }
  0x4d   :  { %1169 = vmatpush.bf16.msra.mxu1 %v1469_v20  ;;  %v2126_v45 = vld [vmem:[%s3271_s1 + $0x374] sm:$0xf]  ;;  %v2006_v3 = vld [vmem:[%s3272_s0 + $0x40] sm:$0xf0]  ;;  %v1797_v4 = vor.u32 %v2108_v52, %v1794_v55  ;;  %v1730_v10 = vld [vmem:[%s3271_s1 + $0x268] sm:$0xf0] }
  0x4e   :  { %1188 = vmatpush.bf16.msra.mxu2 %v1533_v12  ;;  %v1498_v12 = vld [vmem:[%s3271_s1 + $0x98] sm:$0xf0]  ;;  %v1869_v61 = vor.u32 %v2126_v45, %v1866_v46  ;;  %v2092_v7 = vld [vmem:[%s3271_s1 + $0x264] sm:$0xf]  ;;  %v2122_v27 = vld [vmem:[%s3271_s1 + $0x354] sm:$0xf] }
  0x4f   :  { %1207 = vmatpush.bf16.msra.mxu3 %v1597_v23  ;;  %v1501_v20 = vor.u32 %v2034_v11, %v1498_v12  ;;  %v2050_v23 = vld [vmem:[%s3271_s1 + $0x114] sm:$0xf]  ;;  %v2124_v12 = vld [vmem:[%s3271_s1 + $0x364] sm:$0xf]  ;;  %v1786_v18 = vld [vmem:[%s3271_s1 + $0x2d8] sm:$0xf0]  ;;  %v1733_v21 = vor.u32 %v2092_v7, %v1730_v10 }
  0x50   :  { %1151 = vmatpush.bf16.msra.mxu0 %v1969_v31  ;;  %v1936_v31 = vld [vmem:[%s3271_s1 + $0x400] sm:$0xf]  ;;  %v1850_v28 = vld [vmem:[%s3271_s1 + $0x358] sm:$0xf0]  ;;  %v2102_v38 = vld [vmem:[%s3271_s1 + $0x2b4] sm:$0xf] }
  0x51   :  { %1170 = vmatpush.bf16.msra.mxu1 %v1461_v32  ;;  %v2145_v32 = vld [vmem:[%s3271_s1 + $0x404] sm:$0xf0]  ;;  %v2086_v45 = vld [vmem:[%s3271_s1 + $0x234] sm:$0xf]  ;;  %v1706_v46 = vld [vmem:[%s3271_s1 + $0x238] sm:$0xf0] }
  0x52   :  { %1189 = vmatpush.bf16.msra.mxu2 %v1525_v24  ;;  %v1562_v24 = vld [vmem:[%s3271_s1 + $0x118] sm:$0xf0]  ;;  %v1937_v47 = vor.u32 %v2145_v32, %v1936_v31  ;;  %v2072_v31 = vld [vmem:[%s3271_s1 + $0x1c4] sm:$0xf]  ;;  %v1650_v32 = vld [vmem:[%s3271_s1 + $0x1c8] sm:$0xf0] }
  0x53   :  { %1208 = vmatpush.bf16.msra.mxu3 %v1589_v35  ;;  %1085 = vmatmul.bf16.gmra.mxu0 %v2853_v8  ;;  %v1565_v34 = vor.u32 %v2050_v23, %v1562_v24  ;;  %v1493_v35 = vor.u32 %v2032_v25, %v1490_v26  ;;  %v2090_v23 = vld [vmem:[%s3271_s1 + $0x254] sm:$0xf]  ;;  %v1722_v24 = vld [vmem:[%s3271_s1 + $0x258] sm:$0xf0]  ;;  %v1653_v37 = vor.u32 %v2072_v31, %v1650_v32  ;;  %v1698_v7 = vld [vmem:[%s3271_s1 + $0x228] sm:$0xf0] }
  0x54   :  { %1152 = vmatpush.bf16.msra.mxu0 %v1961_v59  ;;  %1104 = vmatmul.bf16.gmra.mxu1 %v2855_v9  ;;  %v1725_v33 = vor.u32 %v2090_v23, %v1722_v24  ;;  %v2118_v52 = vld [vmem:[%s3271_s1 + $0x334] sm:$0xf]  ;;  %v1834_v55 = vld [vmem:[%s3271_s1 + $0x338] sm:$0xf0]  ;;  %v1746_v31 = vld [vmem:[%s3271_s1 + $0x288] sm:$0xf0] }
  0x55   :  { %1171 = vmatpush.bf16.msra.mxu1 %v1453_v60  ;;  %1123 = vmatmul.bf16.gmra.mxu2 %v2866_v13  ;;  %v1741_v60 = vor.u32 %v2094_v42, %v1738_v43  ;;  %v2082_v24 = vld [vmem:[%s3271_s1 + $0x214] sm:$0xf]  ;;  %v2064_v32 = vld [vmem:[%s3271_s1 + $0x184] sm:$0xf] }
  0x56   :  { %1190 = vmatpush.bf16.msra.mxu2 %v1517_v40  ;;  %1142 = vmatmul.bf16.gmra.mxu3 %v2868_v14  ;;  %v2078_v40 = vld [vmem:[%s3271_s1 + $0x1f4] sm:$0xf] }
  0x57   :  { %1209 = vmatpush.bf16.msra.mxu3 %v1581_v63  ;;  %v1677_v59 = vor.u32 %v2078_v40, %v1674_v41  ;;  %v1666_v63 = vld [vmem:[%s3271_s1 + $0x1e8] sm:$0xf0]  ;;  %v2070_v40 = vld [vmem:[%s3271_s1 + $0x1b4] sm:$0xf]  ;;  %v1642_v41 = vld [vmem:[%s3271_s1 + $0x1b8] sm:$0xf0] }
  0x58   :  { %1153 = vmatpush.bf16.msra.mxu0 %v1953_v15  ;;  %v1669_v11 = vor.u32 %v2076_v62, %v1666_v63  ;;  %v1858_v15 = vld [vmem:[%s3271_s1 + $0x368] sm:$0xf0]  ;;  %v1420_v62 = vld [vmem:[%s3272_s0 + $0x68] sm:$0xf] }
  0x59   :  { %1172 = vmatpush.bf16.msra.mxu1 %v1445_v16  ;;  %v2106_v16 = vld [vmem:[%s3271_s1 + $0x2d4] sm:$0xf]  ;;  %v1861_v22 = vor.u32 %v2124_v12, %v1858_v15  ;;  %v2015_v63 = vld [vmem:[%s3272_s0 + $0x88] sm:$0xf0]  ;;  %v2116_v12 = vld [vmem:[%s3271_s1 + $0x324] sm:$0xf] }
  0x5a   :  { %1191 = vmatpush.bf16.msra.mxu2 %v1509_v2  ;;  %v1384_v2 = vld [vmem:[%s3272_s0 + $0x20] sm:$0xf]  ;;  %v1789_v25 = vor.u32 %v2106_v16, %v1786_v18  ;;  %v1826_v15 = vld [vmem:[%s3271_s1 + $0x328] sm:$0xf0]  ;;  %v2098_v16 = vld [vmem:[%s3271_s1 + $0x294] sm:$0xf]  ;;  %v3081_v18 = vor.u32 %v2015_v63, %v1420_v62 }
  0x5b   :  { %1210 = vmatpush.bf16.msra.mxu3 %v1573_v19  ;;  %v2973_v17 = vor.u32 %v2006_v3, %v1384_v2  ;;  %v2074_v19 = vld [vmem:[%s3271_s1 + $0x1d4] sm:$0xf]  ;;  %v1709_v2 = vor.u32 %v2086_v45, %v1706_v46  ;;  %v1837_v3 = vor.u32 %v2118_v52, %v1834_v55  ;;  %v1829_v23 = vor.u32 %v2116_v12, %v1826_v15  ;;  %v1986_v52 = vld [vmem:[%s3271_s1 + $0x468] sm:$0xf0] }
  0x5c   :  { %1154 = vmatpush.bf16.msra.mxu0 %v1945_v29  ;;  %v2104_v29 = vld [vmem:[%s3271_s1 + $0x2c4] sm:$0xf] }
  0x5d   :  { %1173 = vmatpush.bf16.msra.mxu1 %v1437_v30  ;;  %v1778_v30 = vld [vmem:[%s3271_s1 + $0x2c8] sm:$0xf0] }
  0x5e   :  { %1192 = vmatpush.bf16.msra.mxu2 %v1501_v20  ;;  %v1658_v20 = vld [vmem:[%s3271_s1 + $0x1d8] sm:$0xf0]  ;;  %v1781_v36 = vor.u32 %v2104_v29, %v1778_v30  ;;  %v2096_v30 = vld [vmem:[%s3271_s1 + $0x284] sm:$0xf] }
  0x5f   :  { %1211 = vmatpush.bf16.msra.mxu3 %v1565_v34  ;;  %v1661_v26 = vor.u32 %v2074_v19, %v1658_v20  ;;  %v2088_v34 = vld [vmem:[%s3271_s1 + $0x244] sm:$0xf]  ;;  %v1754_v19 = vld [vmem:[%s3271_s1 + $0x298] sm:$0xf0]  ;;  %v2066_v20 = vld [vmem:[%s3271_s1 + $0x194] sm:$0xf] }
  0x60   :  { %1155 = vmatpush.bf16.msra.mxu0 %v1937_v47  ;;  %v1818_v29 = vld [vmem:[%s3271_s1 + $0x318] sm:$0xf0] }
  0x61   :  { %1174 = vmatpush.bf16.msra.mxu1 %v1429_v49  ;;  %v1645_v49 = vor.u32 %v2070_v40, %v1642_v41  ;;  %v1994_v40 = vld [vmem:[%s3271_s1 + $0x478] sm:$0xf0]  ;;  %v2140_v41 = vld [vmem:[%s3271_s1 + $0x3e4] sm:$0xf] }
  0x62   :  { %1193 = vmatpush.bf16.msra.mxu2 %v1493_v35  ;;  %v1714_v35 = vld [vmem:[%s3271_s1 + $0x248] sm:$0xf0] }
  0x63   :  { %1212 = vmatpush.bf16.msra.mxu3 %v1557_v58  ;;  %1156 = vmatmul.bf16.vlgmr.msra.gmra.mxu0 %v2973_v17  ;;  %v1717_v42 = vor.u32 %v2088_v34, %v1714_v35  ;;  %v2100_v58 = vld [vmem:[%s3271_s1 + $0x2a4] sm:$0xf] }
  0x64   :  { %1224 = vmatpush.bf16.msrb.mxu0 %v1677_v59  ;;  %1175 = vmatmul.bf16.vlgmr.msra.gmra.mxu1 %v2433_v48  ;;  %v1853_v48 = vor.u32 %v2122_v27, %v1850_v28  ;;  %v1762_v59 = vld [vmem:[%s3271_s1 + $0x2a8] sm:$0xf0]  ;;  %v2114_v28 = vld [vmem:[%s3271_s1 + $0x314] sm:$0xf] }
  0x65   :  { %1243 = vmatpush.bf16.msrb.mxu1 %v1741_v60  ;;  %1194 = vmatmul.bf16.vlgmr.msra.gmra.mxu2 %v2444_v53  ;;  %v2120_v53 = vld [vmem:[%s3271_s1 + $0x344] sm:$0xf]  ;;  %v1765_v10 = vor.u32 %v2100_v58, %v1762_v59  ;;  %v1821_v35 = vor.u32 %v2114_v28, %v1818_v29  ;;  %v2138_v58 = vld [vmem:[%s3271_s1 + $0x3d4] sm:$0xf]  ;;  %v1914_v59 = vld [vmem:[%s3271_s1 + $0x3d8] sm:$0xf0] }
  0x66   :  { %1262 = vmatpush.bf16.msrb.mxu2 %v1805_v39  ;;  %1213 = vmatmul.bf16.vlgmr.msra.gmra.mxu3 %v2446_v54  ;;  %v1842_v54 = vld [vmem:[%s3271_s1 + $0x348] sm:$0xf0]  ;;  %v1770_v39 = vld [vmem:[%s3271_s1 + $0x2b8] sm:$0xf0]  ;;  %v2068_v60 = vld [vmem:[%s3271_s1 + $0x1a4] sm:$0xf]  ;;  %v1917_v62 = vor.u32 %v2138_v58, %v1914_v59 }
  0x67   :  { %1281 = vmatpush.bf16.msrb.mxu3 %v1869_v61  ;;  %v1845_v43 = vor.u32 %v2120_v53, %v1842_v54  ;;  %v1773_v47 = vor.u32 %v2102_v38, %v1770_v39  ;;  %v1634_v61 = vld [vmem:[%s3271_s1 + $0x1a8] sm:$0xf0]  ;;  %v2112_v53 = vld [vmem:[%s3271_s1 + $0x304] sm:$0xf]  ;;  %v2158_v39 = vld [vmem:[%s3271_s1 + $0x474] sm:$0xf] }
  0x68   :  { %1225 = vmatpush.bf16.msrb.mxu0 %v1669_v11  ;;  %v1637_v11 = vor.u32 %v2068_v60, %v1634_v61  ;;  %v1810_v54 = vld [vmem:[%s3271_s1 + $0x308] sm:$0xf0]  ;;  %v1997_v46 = vor.u32 %v2158_v39, %v1994_v40  ;;  %v2154_v60 = vld [vmem:[%s3271_s1 + $0x454] sm:$0xf]  ;;  %v1978_v61 = vld [vmem:[%s3271_s1 + $0x458] sm:$0xf0] }
  0x69   :  { %1244 = vmatpush.bf16.msrb.mxu1 %v1733_v21  ;;  %v1626_v21 = vld [vmem:[%s3271_s1 + $0x198] sm:$0xf0]  ;;  %v1813_v45 = vor.u32 %v2112_v53, %v1810_v54  ;;  %v1981_v63 = vor.u32 %v2154_v60, %v1978_v61 }
  0x6a   :  { %1263 = vmatpush.bf16.msrb.mxu2 %v1797_v4  ;;  %v2084_v4 = vld [vmem:[%s3271_s1 + $0x224] sm:$0xf]  ;;  %v1629_v27 = vor.u32 %v2066_v20, %v1626_v21  ;;  %v1954_v21 = vld [vmem:[%s3271_s1 + $0x428] sm:$0xf0] }
  0x6b   :  { %1282 = vmatpush.bf16.msrb.mxu3 %v1861_v22  ;;  %v1701_v22 = vor.u32 %v2084_v4, %v1698_v7  ;;  %v2152_v4 = vld [vmem:[%s3271_s1 + $0x444] sm:$0xf]  ;;  %v1970_v7 = vld [vmem:[%s3271_s1 + $0x448] sm:$0xf0] }
  0x6c   :  { %1226 = vmatpush.bf16.msrb.mxu0 %v1661_v26  ;;  %v1757_v26 = vor.u32 %v2098_v16, %v1754_v19  ;;  %v2132_v16 = vld [vmem:[%s3271_s1 + $0x3a4] sm:$0xf]  ;;  %v1890_v19 = vld [vmem:[%s3271_s1 + $0x3a8] sm:$0xf0] }
  0x6d   :  { %1245 = vmatpush.bf16.msrb.mxu1 %v1725_v33  ;;  %v1618_v33 = vld [vmem:[%s3271_s1 + $0x188] sm:$0xf0]  ;;  %v2148_v20 = vld [vmem:[%s3271_s1 + $0x424] sm:$0xf] }
  0x6e   :  { %1264 = vmatpush.bf16.msrb.mxu2 %v1789_v25  ;;  %v1690_v25 = vld [vmem:[%s3271_s1 + $0x218] sm:$0xf0] }
  0x6f   :  { %1283 = vmatpush.bf16.msrb.mxu3 %v1853_v48  ;;  %v1930_v48 = vld [vmem:[%s3271_s1 + $0x3f8] sm:$0xf0]  ;;  %v1693_v34 = vor.u32 %v2082_v24, %v1690_v25  ;;  %v2130_v24 = vld [vmem:[%s3271_s1 + $0x394] sm:$0xf] }
  0x70   :  { %1227 = vmatpush.bf16.msrb.mxu0 %v1653_v37  ;;  %v1682_v37 = vld [vmem:[%s3271_s1 + $0x208] sm:$0xf0]  ;;  %v1882_v25 = vld [vmem:[%s3271_s1 + $0x398] sm:$0xf0] }
  0x71   :  { %1246 = vmatpush.bf16.msrb.mxu1 %v1717_v42  ;;  %v1922_v42 = vld [vmem:[%s3271_s1 + $0x3e8] sm:$0xf0]  ;;  %v1885_v28 = vor.u32 %v2130_v24, %v1882_v25 }
  0x72   :  { %1265 = vmatpush.bf16.msrb.mxu2 %v1781_v36  ;;  %v2080_v36 = vld [vmem:[%s3271_s1 + $0x204] sm:$0xf] }
  0x73   :  { %1284 = vmatpush.bf16.msrb.mxu3 %v1845_v43  ;;  %1161 = vmatmul.bf16.gmra.mxu0 %v3081_v18  ;;  %v1685_v43 = vor.u32 %v2080_v36, %v1682_v37 }
  0x74   :  { %1228 = vmatpush.bf16.msrb.mxu0 %v1645_v49  ;;  %1180 = vmatmul.bf16.gmra.mxu1 %v2565_v44  ;;  %v2142_v44 = vld [vmem:[%s3271_s1 + $0x3f4] sm:$0xf]  ;;  %v2156_v49 = vld [vmem:[%s3271_s1 + $0x464] sm:$0xf] }
  0x75   :  { %1247 = vmatpush.bf16.msrb.mxu1 %v1709_v2  ;;  %1199 = vmatmul.bf16.gmra.mxu2 %v2576_v50  ;;  %v1749_v50 = vor.u32 %v2096_v30, %v1746_v31  ;;  %v1933_v38 = vor.u32 %v2142_v44, %v1930_v48  ;;  %v1989_v55 = vor.u32 %v2156_v49, %v1986_v52  ;;  %v2136_v2 = vld [vmem:[%s3271_s1 + $0x3c4] sm:$0xf]  ;;  %v1874_v31 = vld [vmem:[%s3271_s1 + $0x388] sm:$0xf0] }
  0x76   :  { %1266 = vmatpush.bf16.msrb.mxu2 %v1773_v47  ;;  %1218 = vmatmul.bf16.gmra.mxu3 %v2578_v51  ;;  %v1621_v51 = vor.u32 %v2064_v32, %v1618_v33  ;;  %v1925_v47 = vor.u32 %v2140_v41, %v1922_v42  ;;  %v2128_v30 = vld [vmem:[%s3271_s1 + $0x384] sm:$0xf]  ;;  %v1938_v33 = vld [vmem:[%s3271_s1 + $0x408] sm:$0xf0] }
  0x77   :  { %1285 = vmatpush.bf16.msrb.mxu3 %v1837_v3  ;;  %v1906_v3 = vld [vmem:[%s3271_s1 + $0x3c8] sm:$0xf0]  ;;  %v2144_v32 = vld [vmem:[%s3271_s1 + $0x404] sm:$0xf]  ;;  %v1877_v44 = vor.u32 %v2128_v30, %v1874_v31 }
  0x78   :  { %1229 = vmatpush.bf16.msrb.mxu0 %v1637_v11  ;;  %v1898_v11 = vld [vmem:[%s3271_s1 + $0x3b8] sm:$0xf0] }
  0x79   :  { %1248 = vmatpush.bf16.msrb.mxu1 %v1701_v22  ;;  %v1893_v22 = vor.u32 %v2132_v16, %v1890_v19 }
  0x7a   :  { %1267 = vmatpush.bf16.msrb.mxu2 %v1765_v10  ;;  %v1909_v10 = vor.u32 %v2136_v2, %v1906_v3 }
  0x7b   :  { %1286 = vmatpush.bf16.msrb.mxu3 %v1829_v23  ;;  %v1957_v23 = vor.u32 %v2148_v20, %v1954_v21 }
  0x7c   :  { %1230 = vmatpush.bf16.msrb.mxu0 %v1629_v27  ;;  %v1946_v27 = vld [vmem:[%s3271_s1 + $0x418] sm:$0xf0] }
  0x7d   :  { %1249 = vmatpush.bf16.msrb.mxu1 %v1693_v34 }
  0x7e   :  { %1268 = vmatpush.bf16.msrb.mxu2 %v1757_v26  ;;  %v2146_v26 = vld [vmem:[%s3271_s1 + $0x414] sm:$0xf] }
  0x7f   :  { %1287 = vmatpush.bf16.msrb.mxu3 %v1821_v35  ;;  %v1949_v29 = vor.u32 %v2146_v26, %v1946_v27 }
  0x80   :  { %1231 = vmatpush.bf16.msrb.mxu0 %v1621_v51 }
  0x81   :  { %1250 = vmatpush.bf16.msrb.mxu1 %v1685_v43 }
  0x82   :  { %1269 = vmatpush.bf16.msrb.mxu2 %v1749_v50 }
  0x83   :  { %1288 = vmatpush.bf16.msrb.mxu3 %v1813_v45  ;;  %1232 = vmatmul.bf16.vlgmr.msrb.gmra.mxu0 %v2454_v57  ;;  %v1973_v57 = vor.u32 %v2152_v4, %v1970_v7 }
  0x84   :  { %1300 = vmatpush.bf16.msra.mxu0 %v1933_v38  ;;  %1251 = vmatmul.bf16.vlgmr.msrb.gmra.mxu1 %v2721_v0  ;;  %v2134_v0 = vld [vmem:[%s3271_s1 + $0x3b4] sm:$0xf] }
  0x85   :  { %1319 = vmatpush.bf16.msra.mxu1 %v1997_v46  ;;  %1270 = vmatmul.bf16.vlgmr.msrb.gmra.mxu2 %v2723_v1  ;;  %v2150_v1 = vld [vmem:[%s3271_s1 + $0x434] sm:$0xf]  ;;  %v1901_v12 = vor.u32 %v2134_v0, %v1898_v11 }
  0x86   :  { %2160 = vmatpush.bf16.msra.mxu2 %v1933_v38  ;;  %1289 = vmatmul.bf16.vlgmr.msrb.gmra.mxu3 %v2734_v5  ;;  %v1962_v5 = vld [vmem:[%s3271_s1 + $0x438] sm:$0xf0] }
  0x87   :  { %2168 = vmatpush.bf16.msra.mxu3 %v1997_v46  ;;  %v1965_v15 = vor.u32 %v2150_v1, %v1962_v5 }
  0x88   :  { %1301 = vmatpush.bf16.msra.mxu0 %v1925_v47 }
  0x89   :  { %1320 = vmatpush.bf16.msra.mxu1 %v1989_v55 }
  0x8a   :  { %2161 = vmatpush.bf16.msra.mxu2 %v1925_v47 }
  0x8b   :  { %2169 = vmatpush.bf16.msra.mxu3 %v1989_v55 }
  0x8c   :  { %1302 = vmatpush.bf16.msra.mxu0 %v1917_v62 }
  0x8d   :  { %1321 = vmatpush.bf16.msra.mxu1 %v1981_v63 }
  0x8e   :  { %2162 = vmatpush.bf16.msra.mxu2 %v1917_v62 }
  0x8f   :  { %2170 = vmatpush.bf16.msra.mxu3 %v1981_v63 }
  0x90   :  { %1303 = vmatpush.bf16.msra.mxu0 %v1909_v10 }
  0x91   :  { %1322 = vmatpush.bf16.msra.mxu1 %v1973_v57 }
  0x92   :  { %2163 = vmatpush.bf16.msra.mxu2 %v1909_v10 }
  0x93   :  { %2171 = vmatpush.bf16.msra.mxu3 %v1973_v57  ;;  %1237 = vmatmul.bf16.gmra.mxu0 %v2586_v56  ;;  %v1941_v56 = vor.u32 %v2144_v32, %v1938_v33 }
  0x94   :  { %1304 = vmatpush.bf16.msra.mxu0 %v1901_v12  ;;  %1256 = vmatmul.bf16.gmra.mxu1 %v2853_v8 }
  0x95   :  { %1323 = vmatpush.bf16.msra.mxu1 %v1965_v15  ;;  %1275 = vmatmul.bf16.gmra.mxu2 %v2855_v9 }
  0x96   :  { %2164 = vmatpush.bf16.msra.mxu2 %v1901_v12  ;;  %1294 = vmatmul.bf16.gmra.mxu3 %v2866_v13 }
  0x97   :  { %2172 = vmatpush.bf16.msra.mxu3 %v1965_v15 }
  0x98   :  { %1305 = vmatpush.bf16.msra.mxu0 %v1893_v22 }
  0x99   :  { %1324 = vmatpush.bf16.msra.mxu1 %v1957_v23 }
  0x9a   :  { %2165 = vmatpush.bf16.msra.mxu2 %v1893_v22 }
  0x9b   :  { %2173 = vmatpush.bf16.msra.mxu3 %v1957_v23 }
  0x9c   :  { %1306 = vmatpush.bf16.msra.mxu0 %v1885_v28 }
  0x9d   :  { %1325 = vmatpush.bf16.msra.mxu1 %v1949_v29 }
  0x9e   :  { %2166 = vmatpush.bf16.msra.mxu2 %v1885_v28 }
  0x9f   :  { %2174 = vmatpush.bf16.msra.mxu3 %v1949_v29 }
  0xa0   :  { %1307 = vmatpush.bf16.msra.mxu0 %v1877_v44  ;;  %v1005_v8 = vpop.f32.mrf.mxu0 }
  0xa1   :  { %1326 = vmatpush.bf16.msra.mxu1 %v1941_v56  ;;  %v1024_v48 = vpop.f32.mrf.mxu1 }
  0xa2   :  { %2167 = vmatpush.bf16.msra.mxu2 %v1877_v44 }
  0xa3   :  { %2175 = vmatpush.bf16.msra.mxu3 %v1941_v56  ;;  %1308 = vmatmul.bf16.vlgmr.msra.gmra.mxu0 %v2736_v6 }
  0xa4   :  { %1327 = vmatmul.bf16.vlgmr.msra.gmra.mxu1 %v2973_v17 }
  0xa5   :  { %1313 = vmatmul.bf16.vlgmr.msra.gmra.mxu2 %v2868_v14  ;;  %v3243_v14 = vld [vmem:[%s3273_s2] sm:$0x3] }
  0xa6   :  { %1332 = vmatmul.bf16.vlgmr.msra.gmra.mxu3 %v3081_v18  ;;  %v180_v41 = vperm.slane %v3243_v14, 0 }
  0xa8   :  { %v1043_v9 = vpop.f32.mrf.mxu2  ;;  %v1007_v34 = vpop.f32.mrf.mxu0  ;;  %v1006_v42 = vadd.f32 %v1005_v8, %v180_v41 }
  0xa9   :  { %v1062_v13 = vpop.f32.mrf.mxu3  ;;  %v1026_v35 = vpop.f32.mrf.mxu1  ;;  %v1008_v61 = vadd.f32 %v1007_v34, %v180_v41 }
  0xaa   :  { %v1025_v49 = vadd.f32 %v1024_v48, %v1006_v42 }
  0xab   :  { %v1027_v63 = vadd.f32 %v1026_v35, %v1008_v61 }
  0xac   :  { %v1044_v52 = vadd.f32 %v1043_v9, %v1025_v49  ;;  %v181_v49 = vperm.slane %v3243_v14, 1 }
  0xae   :  { %v1063_v62 = vadd.f32 %v1062_v13, %v1044_v52 }
  0xb0   :  { %v1045_v36 = vpop.f32.mrf.mxu2  ;;  %v1010_v51 = vpop.f32.mrf.mxu0 }
  0xb1   :  { %v1064_v50 = vpop.f32.mrf.mxu3  ;;  %v1029_v37 = vpop.f32.mrf.mxu1  ;;  %v1046_v3 = vadd.f32 %v1045_v36, %v1027_v63  ;;  %v1011_v4 = vadd.f32 %v1010_v51, %v180_v41 }
  0xb3   :  { %v1065_v1 = vadd.f32 %v1064_v50, %v1046_v3  ;;  %v1030_v5 = vadd.f32 %v1029_v37, %v1011_v4 }
  0xb8   :  { %v1048_v53 = vpop.f32.mrf.mxu2  ;;  %v1012_v38 = vpop.f32.mrf.mxu0 }
  0xb9   :  { %v1067_v54 = vpop.f32.mrf.mxu3  ;;  %v1031_v39 = vpop.f32.mrf.mxu1  ;;  %v1049_v16 = vadd.f32 %v1048_v53, %v1030_v5  ;;  %v1013_v24 = vadd.f32 %v1012_v38, %v180_v41 }
  0xbb   :  { %v1068_v27 = vadd.f32 %v1067_v54, %v1049_v16  ;;  %v1032_v29 = vadd.f32 %v1031_v39, %v1013_v24 }
  0xc0   :  { %v1050_v40 = vpop.f32.mrf.mxu2  ;;  %v1081_v17 = vpop.f32.mrf.mxu0 }
  0xc1   :  { %v1069_v6 = vpop.f32.mrf.mxu3  ;;  %v1100_v18 = vpop.f32.mrf.mxu1  ;;  %v1082_v2 = vadd.f32 %v1081_v17, %v1063_v62  ;;  %v1051_v31 = vadd.f32 %v1050_v40, %v1032_v29 }
  0xc3   :  { %v1101_v11 = vadd.f32 %v1100_v18, %v1082_v2  ;;  %v1070_v13 = vadd.f32 %v1069_v6, %v1051_v31 }
  0xc8   :  { %v1119_v43 = vpop.f32.mrf.mxu2  ;;  %v1083_v46 = vpop.f32.mrf.mxu0 }
  0xc9   :  { %v1138_v45 = vpop.f32.mrf.mxu3  ;;  %v1102_v47 = vpop.f32.mrf.mxu1  ;;  %v1120_v12 = vadd.f32 %v1119_v43, %v1101_v11  ;;  %v1084_v15 = vadd.f32 %v1083_v46, %v1065_v1 }
  0xcb   :  { %v1139_v19 = vadd.f32 %v1138_v45, %v1120_v12  ;;  %v1103_v25 = vadd.f32 %v1102_v47, %v1084_v15 }
  0xd0   :  { %v1121_v55 = vpop.f32.mrf.mxu2  ;;  %v1086_v59 = vpop.f32.mrf.mxu0 }
  0xd1   :  { %v1140_v58 = vpop.f32.mrf.mxu3  ;;  %v1105_v60 = vpop.f32.mrf.mxu1  ;;  %v1122_v28 = vadd.f32 %v1121_v55, %v1103_v25  ;;  %v1087_v30 = vadd.f32 %v1086_v59, %v1068_v27 }
  0xd3   :  { %v1141_v32 = vadd.f32 %v1140_v58, %v1122_v28  ;;  %v1106_v48 = vadd.f32 %v1105_v60, %v1087_v30 }
  0xd8   :  { %v1124_v7 = vpop.f32.mrf.mxu2  ;;  %v1088_v57 = vpop.f32.mrf.mxu0 }
  0xd9   :  { %v1143_v10 = vpop.f32.mrf.mxu3  ;;  %v1107_v0 = vpop.f32.mrf.mxu1  ;;  %v1125_v34 = vadd.f32 %v1124_v7, %v1106_v48  ;;  %v1089_v35 = vadd.f32 %v1088_v57, %v1070_v13 }
  0xdb   :  { %v1144_v36 = vadd.f32 %v1143_v10, %v1125_v34  ;;  %v1108_v54 = vadd.f32 %v1107_v0, %v1089_v35 }
  0xe0   :  { %v1126_v20 = vpop.f32.mrf.mxu2  ;;  %v1157_v22 = vpop.f32.mrf.mxu0 }
  0xe1   :  { %v1145_v21 = vpop.f32.mrf.mxu3  ;;  %v1176_v23 = vpop.f32.mrf.mxu1  ;;  %v1158_v26 = vadd.f32 %v1157_v22, %v1139_v19  ;;  %v1127_v39 = vadd.f32 %v1126_v20, %v1108_v54 }
  0xe2   :  { %v1177_v60 = vadd.f32 %v1176_v23, %v181_v49 }
  0xe3   :  { %1338 = vst [vmem:[%s3274_s3] sm:$0xff] %v1158_v26  ;;  %v1146_v40 = vadd.f32 %v1145_v21, %v1127_v39 }
  0xe8   :  { %v1195_v33 = vpop.f32.mrf.mxu2  ;;  %v1159_v56 = vpop.f32.mrf.mxu0 }
  0xe9   :  { %v1214_v44 = vpop.f32.mrf.mxu3  ;;  %v1178_v8 = vpop.f32.mrf.mxu1  ;;  %v1160_v9 = vadd.f32 %v1159_v56, %v1141_v32  ;;  %v1196_v61 = vadd.f32 %v1195_v33, %v1177_v60 }
  0xea   :  { %v1179_v10 = vadd.f32 %v1178_v8, %v181_v49 }
  0xeb   :  { %1340 = vst [vmem:[%s3274_s3 + $0x10] sm:$0xff] %v1160_v9  ;;  %v1215_v7 = vadd.f32 %v1214_v44, %v1196_v61 }
  0xf0   :  { %v1197_v50 = vpop.f32.mrf.mxu2  ;;  %v1162_v37 = vpop.f32.mrf.mxu0 }
  0xf1   :  { %v1216_v51 = vpop.f32.mrf.mxu3  ;;  %v1181_v53 = vpop.f32.mrf.mxu1  ;;  %v1163_v38 = vadd.f32 %v1162_v37, %v1144_v36  ;;  %v1198_v11 = vadd.f32 %v1197_v50, %v1179_v10 }
  0xf2   :  { %v1182_v4 = vadd.f32 %v1181_v53, %v181_v49 }
  0xf3   :  { %1342 = vst [vmem:[%s3274_s3 + $0x20] sm:$0xff] %v1163_v38  ;;  %v1217_v19 = vadd.f32 %v1216_v51, %v1198_v11 }
  0xf8   :  { %v1200_v6 = vpop.f32.mrf.mxu2  ;;  %v1164_v18 = vpop.f32.mrf.mxu0 }
  0xf9   :  { %v1219_v17 = vpop.f32.mrf.mxu3  ;;  %v1183_v41 = vpop.f32.mrf.mxu1  ;;  %v1165_v42 = vadd.f32 %v1164_v18, %v1146_v40  ;;  %v1201_v0 = vadd.f32 %v1200_v6, %v1182_v4 }
  0xfa   :  { %v1184_v21 = vadd.f32 %v1183_v41, %v181_v49 }
  0xfb   :  { %1344 = vst [vmem:[%s3274_s3 + $0x30] sm:$0xff] %v1165_v42  ;;  %v1220_v16 = vadd.f32 %v1219_v17, %v1201_v0 }
 0x100   :  { %v1202_v43 = vpop.f32.mrf.mxu2  ;;  %v1233_v46 = vpop.f32.mrf.mxu0 }
 0x101   :  { %v1221_v45 = vpop.f32.mrf.mxu3  ;;  %v1252_v47 = vpop.f32.mrf.mxu1  ;;  %v1234_v57 = vadd.f32 %v1233_v46, %v1215_v7  ;;  %v1203_v24 = vadd.f32 %v1202_v43, %v1184_v21 }
 0x103   :  { %v1253_v15 = vadd.f32 %v1252_v47, %v1234_v57  ;;  %v1222_v33 = vadd.f32 %v1221_v45, %v1203_v24 }
 0x108   :  { %v1271_v52 = vpop.f32.mrf.mxu2  ;;  %v1235_v58 = vpop.f32.mrf.mxu0 }
 0x109   :  { %v1290_v55 = vpop.f32.mrf.mxu3  ;;  %v1254_v59 = vpop.f32.mrf.mxu1  ;;  %v1272_v20 = vadd.f32 %v1271_v52, %v1253_v15  ;;  %v1236_v23 = vadd.f32 %v1235_v58, %v1217_v19 }
 0x10b   :  { %v1291_v25 = vadd.f32 %v1290_v55, %v1272_v20  ;;  %v1255_v31 = vadd.f32 %v1254_v59, %v1236_v23 }
 0x110   :  { %v1273_v62 = vpop.f32.mrf.mxu2  ;;  %v1238_v2 = vpop.f32.mrf.mxu0 }
 0x111   :  { %v1292_v63 = vpop.f32.mrf.mxu3  ;;  %v1257_v3 = vpop.f32.mrf.mxu1  ;;  %v1239_v22 = vadd.f32 %v1238_v2, %v1220_v16  ;;  %v1274_v56 = vadd.f32 %v1273_v62, %v1255_v31 }
 0x113   :  { %v1258_v28 = vadd.f32 %v1257_v3, %v1239_v22  ;;  %v1293_v13 = vadd.f32 %v1292_v63, %v1274_v56 }
 0x118   :  { %v1276_v1 = vpop.f32.mrf.mxu2  ;;  %v1240_v12 = vpop.f32.mrf.mxu0 }
 0x119   :  { %v1295_v5 = vpop.f32.mrf.mxu3  ;;  %v1259_v14 = vpop.f32.mrf.mxu1  ;;  %v1277_v44 = vadd.f32 %v1276_v1, %v1258_v28  ;;  %v1241_v48 = vadd.f32 %v1240_v12, %v1222_v33 }
 0x11b   :  { %v1296_v9 = vadd.f32 %v1295_v5, %v1277_v44  ;;  %v1260_v36 = vadd.f32 %v1259_v14, %v1241_v48 }
 0x120   :  { %v1278_v26 = vpop.f32.mrf.mxu2  ;;  %v1309_v29 = vpop.f32.mrf.mxu0 }
 0x121   :  { %v1297_v27 = vpop.f32.mrf.mxu3  ;;  %v1328_v30 = vpop.f32.mrf.mxu1  ;;  %v1310_v32 = vadd.f32 %v1309_v29, %v1291_v25  ;;  %v1279_v53 = vadd.f32 %v1278_v26, %v1260_v36 }
 0x123   :  { %v1329_v8 = vadd.f32 %v1328_v30, %v1310_v32  ;;  %v1298_v40 = vadd.f32 %v1297_v27, %v1279_v53 }
 0x125   :  { %1339 = vst [vmem:[%s3274_s3 + $0x8] sm:$0xff] %v1329_v8 }
 0x128   :  { %v1314_v34 = vpop.f32.mrf.mxu2  ;;  %v1311_v51 = vpop.f32.mrf.mxu0 }
 0x129   :  { %v1333_v35 = vpop.f32.mrf.mxu3  ;;  %v1315_v50 = vadd.f32 %v1314_v34, %v1296_v9  ;;  %v1312_v37 = vadd.f32 %v1311_v51, %v1293_v13  ;;  %v1330_v38 = vpop.f32.mrf.mxu1 }
 0x12b   :  { %v1334_v54 = vadd.f32 %v1333_v35, %v1315_v50  ;;  %v1331_v39 = vadd.f32 %v1330_v38, %v1312_v37 }
 0x12d   :  { %1343 = vst [vmem:[%s3274_s3 + $0x28] sm:$0xff] %v1334_v54 }
 0x12e   :  { %1341 = vst [vmem:[%s3274_s3 + $0x18] sm:$0xff] %v1331_v39 }
 0x130   :  { %v1316_v6 = vpop.f32.mrf.mxu2 }
 0x131   :  { %v1317_v17 = vadd.f32 %v1316_v6, %v1298_v40  ;;  %v1335_v18 = vpop.f32.mrf.mxu3 }
 0x133   :  { %v1336_v41 = vadd.f32 %v1335_v18, %v1317_v17 }
 0x135   :  { %1345 = vst [vmem:[%s3274_s3 + $0x38] sm:$0xff] %v1336_v41 }

// kernel: generator_forward.17
= control target key start
LH: loop header
LB: loop body
LE: loop exit
PB: predicated region body
PF: predicated region fallthrough
CT: control target
= control target key end

     0   :  { %vm12_vm0 = vcmask 517120   ;;  %vm78_vm1 = vcmask 523264   ;;  %v420_v0 = vmov 0.0   ;;  %vm409_vm2 = vcmask 1040384   ;;  %s762_s0 = inlined_call_operand.vmem [shape: f32[512,64], index: 0, kind: input, shape index: {}]   ;;  %s763_s1 = inlined_call_operand.vmem [shape: f32[2,64], index: 1, kind: output, shape index: {}]  }
   0x1   :  { %13 = vst.msk [vmem:[%s763_s1] sm:$0x3] %vm12_vm0, %v420_v0  ;;  %v14_v1 = vld [vmem:[%s762_s0] sm:$0xff]  ;;  %v15_v2 = vld [vmem:[%s762_s0 + $0x8] sm:$0xff]  ;;  %v16_v3 = vld [vmem:[%s762_s0 + $0x10] sm:$0xff] }
   0x2   :  { %v79_v4 = vsel %vm78_vm1, %v14_v1, 0.0  ;;  %v80_v5 = vsel %vm78_vm1, %v15_v2, 0.0  ;;  %v82_v6 = vsel %vm78_vm1, %v16_v3, 0.0  ;;  %v17_v7 = vld [vmem:[%s762_s0 + $0x18] sm:$0xff]  ;;  %v18_v10 = vld [vmem:[%s762_s0 + $0x20] sm:$0xff]  ;;  %v19_v13 = vld [vmem:[%s762_s0 + $0x28] sm:$0xff]  ;;  %v212_v21 = vmul.f32 %v14_v1, %v14_v1 }
   0x3   :  { %v81_v8 = vadd.f32 %v80_v5, %v79_v4  ;;  %v84_v9 = vsel %vm78_vm1, %v17_v7, 0.0  ;;  %v86_v12 = vsel %vm78_vm1, %v18_v10, 0.0  ;;  %v88_v15 = vsel %vm78_vm1, %v19_v13, 0.0  ;;  %v20_v16 = vld [vmem:[%s762_s0 + $0x30] sm:$0xff]  ;;  %v21_v19 = vld [vmem:[%s762_s0 + $0x38] sm:$0xff]  ;;  %v22_v25 = vld [vmem:[%s762_s0 + $0x40] sm:$0xff] }
   0x4   :  { %v90_v18 = vsel %vm78_vm1, %v20_v16, 0.0  ;;  %v92_v22 = vsel %vm78_vm1, %v21_v19, 0.0  ;;  %v213_v23 = vmul.f32 %v15_v2, %v15_v2  ;;  %v214_v24 = vmul.f32 %v16_v3, %v16_v3  ;;  %v23_v29 = vld [vmem:[%s762_s0 + $0x48] sm:$0xff]  ;;  %v24_v36 = vld [vmem:[%s762_s0 + $0x50] sm:$0xff]  ;;  %v25_v42 = vld [vmem:[%s762_s0 + $0x58] sm:$0xff] }
   0x5   :  { %v83_v11 = vadd.f32 %v82_v6, %v81_v8  ;;  %v94_v27 = vsel %vm78_vm1, %v22_v25, 0.0  ;;  %v215_v28 = vmul.f32 %v17_v7, %v17_v7  ;;  %v276_v31 = vsel %vm78_vm1, %v212_v21, 0.0  ;;  %v26_v48 = vld [vmem:[%s762_s0 + $0x60] sm:$0xff]  ;;  %v27_v54 = vld [vmem:[%s762_s0 + $0x68] sm:$0xff]  ;;  %v28_v60 = vld [vmem:[%s762_s0 + $0x70] sm:$0xff] }
   0x6   :  { %v96_v32 = vsel %vm78_vm1, %v23_v29, 0.0  ;;  %v216_v33 = vmul.f32 %v18_v10, %v18_v10  ;;  %v277_v34 = vsel %vm78_vm1, %v213_v23, 0.0  ;;  %v279_v35 = vsel %vm78_vm1, %v214_v24, 0.0  ;;  %v29_v2 = vld [vmem:[%s762_s0 + $0x78] sm:$0xff]  ;;  %v30_v8 = vld [vmem:[%s762_s0 + $0x80] sm:$0xff] }
   0x7   :  { %v85_v14 = vadd.f32 %v84_v9, %v83_v11  ;;  %v278_v38 = vadd.f32 %v277_v34, %v276_v31  ;;  %v98_v39 = vsel %vm78_vm1, %v24_v36, 0.0  ;;  %v217_v40 = vmul.f32 %v19_v13, %v19_v13 }
   0x8   :  { %v281_v41 = vsel %vm78_vm1, %v215_v28, 0.0  ;;  %v100_v45 = vsel %vm78_vm1, %v25_v42, 0.0  ;;  %v218_v46 = vmul.f32 %v20_v16, %v20_v16  ;;  %v283_v47 = vsel %vm78_vm1, %v216_v33, 0.0 }
   0x9   :  { %v87_v17 = vadd.f32 %v86_v12, %v85_v14  ;;  %v280_v44 = vadd.f32 %v279_v35, %v278_v38  ;;  %v102_v51 = vsel %vm78_vm1, %v26_v48, 0.0  ;;  %v219_v52 = vmul.f32 %v21_v19, %v21_v19  ;;  %v31_v14 = vld [vmem:[%s762_s0 + $0x88] sm:$0xff] }
   0xa   :  { %v285_v53 = vsel %vm78_vm1, %v217_v40, 0.0  ;;  %v104_v57 = vsel %vm78_vm1, %v27_v54, 0.0  ;;  %v220_v58 = vmul.f32 %v22_v25, %v22_v25  ;;  %v287_v59 = vsel %vm78_vm1, %v218_v46, 0.0  ;;  %v35_v38 = vld [vmem:[%s762_s0 + $0xa8] sm:$0xff] }
   0xb   :  { %v89_v20 = vadd.f32 %v88_v15, %v87_v17  ;;  %v282_v50 = vadd.f32 %v281_v41, %v280_v44  ;;  %v106_v63 = vsel %vm78_vm1, %v28_v60, 0.0  ;;  %v221_v0 = vmul.f32 %v23_v29, %v23_v29  ;;  %v36_v44 = vld [vmem:[%s762_s0 + $0xb0] sm:$0xff] }
   0xc   :  { %v289_v1 = vsel %vm78_vm1, %v219_v52, 0.0  ;;  %v108_v5 = vsel %vm78_vm1, %v29_v2, 0.0  ;;  %v222_v6 = vmul.f32 %v24_v36, %v24_v36  ;;  %v291_v7 = vsel %vm78_vm1, %v220_v58, 0.0 }
   0xd   :  { %v91_v26 = vadd.f32 %v90_v18, %v89_v20  ;;  %v284_v56 = vadd.f32 %v283_v47, %v282_v50  ;;  %v110_v11 = vsel %vm78_vm1, %v30_v8, 0.0  ;;  %v223_v12 = vmul.f32 %v25_v42, %v25_v42  ;;  %v32_v20 = vld [vmem:[%s762_s0 + $0x90] sm:$0xff]  ;;  %v37_v50 = vld [vmem:[%s762_s0 + $0xb8] sm:$0xff] }
   0xe   :  { %v293_v13 = vsel %vm78_vm1, %v221_v0, 0.0  ;;  %v112_v17 = vsel %vm78_vm1, %v31_v14, 0.0  ;;  %v224_v18 = vmul.f32 %v26_v48, %v26_v48  ;;  %v295_v19 = vsel %vm78_vm1, %v222_v6, 0.0 }
   0xf   :  { %v93_v30 = vadd.f32 %v92_v22, %v91_v26  ;;  %v286_v62 = vadd.f32 %v285_v53, %v284_v56  ;;  %v114_v23 = vsel %vm78_vm1, %v32_v20, 0.0  ;;  %v225_v24 = vmul.f32 %v27_v54, %v27_v54  ;;  %v33_v26 = vld [vmem:[%s762_s0 + $0x98] sm:$0xff]  ;;  %v38_v56 = vld [vmem:[%s762_s0 + $0xc0] sm:$0xff] }
  0x10   :  { %v297_v25 = vsel %vm78_vm1, %v223_v12, 0.0  ;;  %v116_v29 = vsel %vm78_vm1, %v33_v26, 0.0  ;;  %v299_v31 = vsel %vm78_vm1, %v224_v18, 0.0  ;;  %v227_v36 = vmul.f32 %v29_v2, %v29_v2 }
  0x11   :  { %v95_v37 = vadd.f32 %v94_v27, %v93_v30  ;;  %v288_v4 = vadd.f32 %v287_v59, %v286_v62  ;;  %v226_v30 = vmul.f32 %v28_v60, %v28_v60  ;;  %v120_v41 = vsel %vm78_vm1, %v35_v38, 0.0  ;;  %v39_v62 = vld [vmem:[%s762_s0 + $0xc8] sm:$0xff] }
  0x12   :  { %v228_v42 = vmul.f32 %v30_v8, %v30_v8  ;;  %v122_v47 = vsel %vm78_vm1, %v36_v44, 0.0  ;;  %v229_v48 = vmul.f32 %v31_v14, %v31_v14  ;;  %v124_v53 = vsel %vm78_vm1, %v37_v50, 0.0 }
  0x13   :  { %v97_v43 = vadd.f32 %v96_v32, %v95_v37  ;;  %v290_v10 = vadd.f32 %v289_v1, %v288_v4  ;;  %v34_v32 = vld [vmem:[%s762_s0 + $0xa0] sm:$0xff]  ;;  %v301_v37 = vsel %vm78_vm1, %v225_v24, 0.0  ;;  %v230_v54 = vmul.f32 %v32_v20, %v32_v20  ;;  %v40_v4 = vld [vmem:[%s762_s0 + $0xd0] sm:$0xff] }
  0x14   :  { %v118_v35 = vsel %vm78_vm1, %v34_v32, 0.0  ;;  %v126_v59 = vsel %vm78_vm1, %v38_v56, 0.0  ;;  %v231_v60 = vmul.f32 %v33_v26, %v33_v26  ;;  %v128_v1 = vsel %vm78_vm1, %v39_v62, 0.0 }
  0x15   :  { %v99_v49 = vadd.f32 %v98_v39, %v97_v43  ;;  %v292_v16 = vadd.f32 %v291_v7, %v290_v10  ;;  %v303_v43 = vsel %vm78_vm1, %v226_v30, 0.0  ;;  %v232_v2 = vmul.f32 %v34_v32, %v34_v32  ;;  %v41_v10 = vld [vmem:[%s762_s0 + $0xd8] sm:$0xff] }
  0x16   :  { %v130_v7 = vsel %vm78_vm1, %v40_v4, 0.0  ;;  %v233_v8 = vmul.f32 %v35_v38, %v35_v38  ;;  %v234_v14 = vmul.f32 %v36_v44, %v36_v44  ;;  %v235_v20 = vmul.f32 %v37_v50, %v37_v50 }
  0x17   :  { %v101_v55 = vadd.f32 %v100_v45, %v99_v49  ;;  %v294_v22 = vadd.f32 %v293_v13, %v292_v16  ;;  %v305_v49 = vsel %vm78_vm1, %v227_v36, 0.0  ;;  %v132_v13 = vsel %vm78_vm1, %v41_v10, 0.0  ;;  %v42_v16 = vld [vmem:[%s762_s0 + $0xe0] sm:$0xff] }
  0x18   :  { %v236_v26 = vmul.f32 %v38_v56, %v38_v56  ;;  %v237_v32 = vmul.f32 %v39_v62, %v39_v62  ;;  %v238_v38 = vmul.f32 %v40_v4, %v40_v4  ;;  %v239_v44 = vmul.f32 %v41_v10, %v41_v10 }
  0x19   :  { %v103_v61 = vadd.f32 %v102_v51, %v101_v55  ;;  %v296_v28 = vadd.f32 %v295_v19, %v294_v22  ;;  %v307_v55 = vsel %vm78_vm1, %v228_v42, 0.0  ;;  %v134_v19 = vsel %vm78_vm1, %v42_v16, 0.0  ;;  %v43_v22 = vld [vmem:[%s762_s0 + $0xe8] sm:$0xff] }
  0x1a   :  { %v240_v50 = vmul.f32 %v42_v16, %v42_v16  ;;  %v241_v56 = vmul.f32 %v43_v22, %v43_v22 }
  0x1b   :  { %v105_v3 = vadd.f32 %v104_v57, %v103_v61  ;;  %v298_v34 = vadd.f32 %v297_v25, %v296_v28  ;;  %v309_v61 = vsel %vm78_vm1, %v229_v48, 0.0  ;;  %v136_v25 = vsel %vm78_vm1, %v43_v22, 0.0  ;;  %v44_v28 = vld [vmem:[%s762_s0 + $0xf0] sm:$0xff] }
  0x1c   :  { %v242_v62 = vmul.f32 %v44_v28, %v44_v28 }
  0x1d   :  { %v107_v9 = vadd.f32 %v106_v63, %v105_v3  ;;  %v300_v40 = vadd.f32 %v299_v31, %v298_v34  ;;  %v311_v3 = vsel %vm78_vm1, %v230_v54, 0.0  ;;  %v138_v31 = vsel %vm78_vm1, %v44_v28, 0.0  ;;  %v45_v34 = vld [vmem:[%s762_s0 + $0xf8] sm:$0xff] }
  0x1e   :  { %v243_v4 = vmul.f32 %v45_v34, %v45_v34 }
  0x1f   :  { %v109_v15 = vadd.f32 %v108_v5, %v107_v9  ;;  %v302_v46 = vadd.f32 %v301_v37, %v300_v40  ;;  %v313_v9 = vsel %vm78_vm1, %v231_v60, 0.0  ;;  %v140_v37 = vsel %vm78_vm1, %v45_v34, 0.0  ;;  %v46_v40 = vld [vmem:[%s762_s0 + $0x100] sm:$0xff] }
  0x20   :  { %v244_v10 = vmul.f32 %v46_v40, %v46_v40 }
  0x21   :  { %v111_v21 = vadd.f32 %v110_v11, %v109_v15  ;;  %v304_v52 = vadd.f32 %v303_v43, %v302_v46  ;;  %v315_v15 = vsel %vm78_vm1, %v232_v2, 0.0  ;;  %v142_v43 = vsel %vm78_vm1, %v46_v40, 0.0  ;;  %v47_v46 = vld [vmem:[%s762_s0 + $0x108] sm:$0xff] }
  0x22   :  { %v245_v16 = vmul.f32 %v47_v46, %v47_v46 }
  0x23   :  { %v113_v27 = vadd.f32 %v112_v17, %v111_v21  ;;  %v306_v58 = vadd.f32 %v305_v49, %v304_v52  ;;  %v317_v21 = vsel %vm78_vm1, %v233_v8, 0.0  ;;  %v144_v49 = vsel %vm78_vm1, %v47_v46, 0.0  ;;  %v48_v52 = vld [vmem:[%s762_s0 + $0x110] sm:$0xff] }
  0x24   :  { %v246_v22 = vmul.f32 %v48_v52, %v48_v52 }
  0x25   :  { %v115_v33 = vadd.f32 %v114_v23, %v113_v27  ;;  %v308_v0 = vadd.f32 %v307_v55, %v306_v58  ;;  %v319_v27 = vsel %vm78_vm1, %v234_v14, 0.0  ;;  %v146_v55 = vsel %vm78_vm1, %v48_v52, 0.0  ;;  %v49_v58 = vld [vmem:[%s762_s0 + $0x118] sm:$0xff] }
  0x26   :  { %v247_v28 = vmul.f32 %v49_v58, %v49_v58 }
  0x27   :  { %v117_v39 = vadd.f32 %v116_v29, %v115_v33  ;;  %v310_v6 = vadd.f32 %v309_v61, %v308_v0  ;;  %v321_v33 = vsel %vm78_vm1, %v235_v20, 0.0  ;;  %v148_v61 = vsel %vm78_vm1, %v49_v58, 0.0  ;;  %v50_v0 = vld [vmem:[%s762_s0 + $0x120] sm:$0xff] }
  0x28   :  { %v248_v34 = vmul.f32 %v50_v0, %v50_v0 }
  0x29   :  { %v119_v45 = vadd.f32 %v118_v35, %v117_v39  ;;  %v312_v12 = vadd.f32 %v311_v3, %v310_v6  ;;  %v323_v39 = vsel %vm78_vm1, %v236_v26, 0.0  ;;  %v150_v3 = vsel %vm78_vm1, %v50_v0, 0.0  ;;  %v51_v6 = vld [vmem:[%s762_s0 + $0x128] sm:$0xff] }
  0x2a   :  { %v249_v40 = vmul.f32 %v51_v6, %v51_v6 }
  0x2b   :  { %v121_v51 = vadd.f32 %v120_v41, %v119_v45  ;;  %v314_v18 = vadd.f32 %v313_v9, %v312_v12  ;;  %v325_v45 = vsel %vm78_vm1, %v237_v32, 0.0  ;;  %v152_v9 = vsel %vm78_vm1, %v51_v6, 0.0  ;;  %v52_v12 = vld [vmem:[%s762_s0 + $0x130] sm:$0xff] }
  0x2c   :  { %v250_v46 = vmul.f32 %v52_v12, %v52_v12 }
  0x2d   :  { %v123_v57 = vadd.f32 %v122_v47, %v121_v51  ;;  %v316_v24 = vadd.f32 %v315_v15, %v314_v18  ;;  %v327_v51 = vsel %vm78_vm1, %v238_v38, 0.0  ;;  %v154_v15 = vsel %vm78_vm1, %v52_v12, 0.0  ;;  %v53_v18 = vld [vmem:[%s762_s0 + $0x138] sm:$0xff] }
  0x2e   :  { %v251_v52 = vmul.f32 %v53_v18, %v53_v18 }
  0x2f   :  { %v125_v63 = vadd.f32 %v124_v53, %v123_v57  ;;  %v318_v30 = vadd.f32 %v317_v21, %v316_v24  ;;  %v329_v57 = vsel %vm78_vm1, %v239_v44, 0.0  ;;  %v156_v21 = vsel %vm78_vm1, %v53_v18, 0.0  ;;  %v54_v24 = vld [vmem:[%s762_s0 + $0x140] sm:$0xff] }
  0x30   :  { %v252_v58 = vmul.f32 %v54_v24, %v54_v24 }
  0x31   :  { %v127_v5 = vadd.f32 %v126_v59, %v125_v63  ;;  %v320_v36 = vadd.f32 %v319_v27, %v318_v30  ;;  %v331_v63 = vsel %vm78_vm1, %v240_v50, 0.0  ;;  %v158_v27 = vsel %vm78_vm1, %v54_v24, 0.0  ;;  %v55_v30 = vld [vmem:[%s762_s0 + $0x148] sm:$0xff] }
  0x32   :  { %v253_v0 = vmul.f32 %v55_v30, %v55_v30 }
  0x33   :  { %v129_v11 = vadd.f32 %v128_v1, %v127_v5  ;;  %v322_v42 = vadd.f32 %v321_v33, %v320_v36  ;;  %v333_v5 = vsel %vm78_vm1, %v241_v56, 0.0  ;;  %v160_v33 = vsel %vm78_vm1, %v55_v30, 0.0  ;;  %v56_v36 = vld [vmem:[%s762_s0 + $0x150] sm:$0xff] }
  0x34   :  { %v254_v6 = vmul.f32 %v56_v36, %v56_v36 }
  0x35   :  { %v131_v17 = vadd.f32 %v130_v7, %v129_v11  ;;  %v324_v48 = vadd.f32 %v323_v39, %v322_v42  ;;  %v335_v11 = vsel %vm78_vm1, %v242_v62, 0.0  ;;  %v162_v39 = vsel %vm78_vm1, %v56_v36, 0.0  ;;  %v57_v42 = vld [vmem:[%s762_s0 + $0x158] sm:$0xff] }
  0x36   :  { %v255_v12 = vmul.f32 %v57_v42, %v57_v42 }
  0x37   :  { %v133_v23 = vadd.f32 %v132_v13, %v131_v17  ;;  %v326_v54 = vadd.f32 %v325_v45, %v324_v48  ;;  %v337_v17 = vsel %vm78_vm1, %v243_v4, 0.0  ;;  %v164_v45 = vsel %vm78_vm1, %v57_v42, 0.0  ;;  %v58_v48 = vld [vmem:[%s762_s0 + $0x160] sm:$0xff] }
  0x38   :  { %v256_v18 = vmul.f32 %v58_v48, %v58_v48 }
  0x39   :  { %v135_v29 = vadd.f32 %v134_v19, %v133_v23  ;;  %v328_v60 = vadd.f32 %v327_v51, %v326_v54  ;;  %v339_v23 = vsel %vm78_vm1, %v244_v10, 0.0  ;;  %v166_v51 = vsel %vm78_vm1, %v58_v48, 0.0  ;;  %v59_v54 = vld [vmem:[%s762_s0 + $0x168] sm:$0xff] }
  0x3a   :  { %v257_v24 = vmul.f32 %v59_v54, %v59_v54 }
  0x3b   :  { %v137_v35 = vadd.f32 %v136_v25, %v135_v29  ;;  %v330_v2 = vadd.f32 %v329_v57, %v328_v60  ;;  %v341_v29 = vsel %vm78_vm1, %v245_v16, 0.0  ;;  %v168_v57 = vsel %vm78_vm1, %v59_v54, 0.0  ;;  %v60_v60 = vld [vmem:[%s762_s0 + $0x170] sm:$0xff] }
  0x3c   :  { %v258_v30 = vmul.f32 %v60_v60, %v60_v60 }
  0x3d   :  { %v139_v41 = vadd.f32 %v138_v31, %v137_v35  ;;  %v332_v8 = vadd.f32 %v331_v63, %v330_v2  ;;  %v343_v35 = vsel %vm78_vm1, %v246_v22, 0.0  ;;  %v170_v63 = vsel %vm78_vm1, %v60_v60, 0.0  ;;  %v61_v2 = vld [vmem:[%s762_s0 + $0x178] sm:$0xff] }
  0x3e   :  { %v259_v36 = vmul.f32 %v61_v2, %v61_v2 }
  0x3f   :  { %v141_v47 = vadd.f32 %v140_v37, %v139_v41  ;;  %v334_v14 = vadd.f32 %v333_v5, %v332_v8  ;;  %v345_v41 = vsel %vm78_vm1, %v247_v28, 0.0  ;;  %v172_v5 = vsel %vm78_vm1, %v61_v2, 0.0  ;;  %v62_v8 = vld [vmem:[%s762_s0 + $0x180] sm:$0xff] }
  0x40   :  { %v260_v42 = vmul.f32 %v62_v8, %v62_v8 }
  0x41   :  { %v143_v53 = vadd.f32 %v142_v43, %v141_v47  ;;  %v336_v20 = vadd.f32 %v335_v11, %v334_v14  ;;  %v347_v47 = vsel %vm78_vm1, %v248_v34, 0.0  ;;  %v174_v11 = vsel %vm78_vm1, %v62_v8, 0.0  ;;  %v63_v14 = vld [vmem:[%s762_s0 + $0x188] sm:$0xff] }
  0x42   :  { %v261_v48 = vmul.f32 %v63_v14, %v63_v14 }
  0x43   :  { %v145_v59 = vadd.f32 %v144_v49, %v143_v53  ;;  %v338_v26 = vadd.f32 %v337_v17, %v336_v20  ;;  %v349_v53 = vsel %vm78_vm1, %v249_v40, 0.0  ;;  %v176_v17 = vsel %vm78_vm1, %v63_v14, 0.0  ;;  %v64_v20 = vld [vmem:[%s762_s0 + $0x190] sm:$0xff] }
  0x44   :  { %v262_v54 = vmul.f32 %v64_v20, %v64_v20 }
  0x45   :  { %v147_v1 = vadd.f32 %v146_v55, %v145_v59  ;;  %v340_v32 = vadd.f32 %v339_v23, %v338_v26  ;;  %v351_v59 = vsel %vm78_vm1, %v250_v46, 0.0  ;;  %v178_v23 = vsel %vm78_vm1, %v64_v20, 0.0  ;;  %v65_v26 = vld [vmem:[%s762_s0 + $0x198] sm:$0xff] }
  0x46   :  { %v263_v60 = vmul.f32 %v65_v26, %v65_v26 }
  0x47   :  { %v149_v7 = vadd.f32 %v148_v61, %v147_v1  ;;  %v342_v38 = vadd.f32 %v341_v29, %v340_v32  ;;  %v353_v1 = vsel %vm78_vm1, %v251_v52, 0.0  ;;  %v180_v29 = vsel %vm78_vm1, %v65_v26, 0.0  ;;  %v66_v32 = vld [vmem:[%s762_s0 + $0x1a0] sm:$0xff] }
  0x48   :  { %v264_v2 = vmul.f32 %v66_v32, %v66_v32 }
  0x49   :  { %v151_v13 = vadd.f32 %v150_v3, %v149_v7  ;;  %v344_v44 = vadd.f32 %v343_v35, %v342_v38  ;;  %v355_v7 = vsel %vm78_vm1, %v252_v58, 0.0  ;;  %v182_v35 = vsel %vm78_vm1, %v66_v32, 0.0  ;;  %v67_v38 = vld [vmem:[%s762_s0 + $0x1a8] sm:$0xff] }
  0x4a   :  { %v265_v8 = vmul.f32 %v67_v38, %v67_v38 }
  0x4b   :  { %v153_v19 = vadd.f32 %v152_v9, %v151_v13  ;;  %v346_v50 = vadd.f32 %v345_v41, %v344_v44  ;;  %v357_v13 = vsel %vm78_vm1, %v253_v0, 0.0  ;;  %v184_v41 = vsel %vm78_vm1, %v67_v38, 0.0  ;;  %v68_v44 = vld [vmem:[%s762_s0 + $0x1b0] sm:$0xff] }
  0x4c   :  { %v266_v14 = vmul.f32 %v68_v44, %v68_v44 }
  0x4d   :  { %v155_v25 = vadd.f32 %v154_v15, %v153_v19  ;;  %v348_v56 = vadd.f32 %v347_v47, %v346_v50  ;;  %v359_v19 = vsel %vm78_vm1, %v254_v6, 0.0  ;;  %v186_v47 = vsel %vm78_vm1, %v68_v44, 0.0  ;;  %v69_v50 = vld [vmem:[%s762_s0 + $0x1b8] sm:$0xff] }
  0x4e   :  { %v267_v20 = vmul.f32 %v69_v50, %v69_v50 }
  0x4f   :  { %v157_v31 = vadd.f32 %v156_v21, %v155_v25  ;;  %v350_v62 = vadd.f32 %v349_v53, %v348_v56  ;;  %v361_v25 = vsel %vm78_vm1, %v255_v12, 0.0  ;;  %v188_v53 = vsel %vm78_vm1, %v69_v50, 0.0  ;;  %v70_v56 = vld [vmem:[%s762_s0 + $0x1c0] sm:$0xff] }
  0x50   :  { %v268_v26 = vmul.f32 %v70_v56, %v70_v56 }
  0x51   :  { %v159_v37 = vadd.f32 %v158_v27, %v157_v31  ;;  %v352_v4 = vadd.f32 %v351_v59, %v350_v62  ;;  %v363_v31 = vsel %vm78_vm1, %v256_v18, 0.0  ;;  %v190_v59 = vsel %vm78_vm1, %v70_v56, 0.0  ;;  %v71_v62 = vld [vmem:[%s762_s0 + $0x1c8] sm:$0xff] }
  0x52   :  { %v269_v32 = vmul.f32 %v71_v62, %v71_v62 }
  0x53   :  { %v161_v43 = vadd.f32 %v160_v33, %v159_v37  ;;  %v354_v10 = vadd.f32 %v353_v1, %v352_v4  ;;  %v365_v37 = vsel %vm78_vm1, %v257_v24, 0.0  ;;  %v192_v1 = vsel %vm78_vm1, %v71_v62, 0.0  ;;  %v72_v4 = vld [vmem:[%s762_s0 + $0x1d0] sm:$0xff] }
  0x54   :  { %v270_v38 = vmul.f32 %v72_v4, %v72_v4 }
  0x55   :  { %v163_v49 = vadd.f32 %v162_v39, %v161_v43  ;;  %v356_v16 = vadd.f32 %v355_v7, %v354_v10  ;;  %v367_v43 = vsel %vm78_vm1, %v258_v30, 0.0  ;;  %v194_v7 = vsel %vm78_vm1, %v72_v4, 0.0  ;;  %v73_v10 = vld [vmem:[%s762_s0 + $0x1d8] sm:$0xff] }
  0x57   :  { %v165_v55 = vadd.f32 %v164_v45, %v163_v49  ;;  %v358_v22 = vadd.f32 %v357_v13, %v356_v16  ;;  %v369_v49 = vsel %vm78_vm1, %v259_v36, 0.0  ;;  %v196_v13 = vsel %vm78_vm1, %v73_v10, 0.0  ;;  %v74_v16 = vld [vmem:[%s762_s0 + $0x1e0] sm:$0xff] }
  0x59   :  { %v167_v61 = vadd.f32 %v166_v51, %v165_v55  ;;  %v360_v28 = vadd.f32 %v359_v19, %v358_v22  ;;  %v371_v55 = vsel %vm78_vm1, %v260_v42, 0.0  ;;  %v198_v19 = vsel %vm78_vm1, %v74_v16, 0.0  ;;  %v75_v22 = vld [vmem:[%s762_s0 + $0x1e8] sm:$0xff] }
  0x5a   :  { %v271_v42 = vmul.f32 %v73_v10, %v73_v10 }
  0x5b   :  { %v169_v3 = vadd.f32 %v168_v57, %v167_v61  ;;  %v362_v34 = vadd.f32 %v361_v25, %v360_v28  ;;  %v373_v61 = vsel %vm78_vm1, %v261_v48, 0.0  ;;  %v200_v25 = vsel %vm78_vm1, %v75_v22, 0.0  ;;  %v76_v28 = vld [vmem:[%s762_s0 + $0x1f0] sm:$0xff] }
  0x5c   :  { %v393_v50 = vsel %vm78_vm1, %v271_v42, 0.0 }
  0x5d   :  { %v171_v9 = vadd.f32 %v170_v63, %v169_v3  ;;  %v364_v40 = vadd.f32 %v363_v31, %v362_v34  ;;  %v375_v3 = vsel %vm78_vm1, %v262_v54, 0.0  ;;  %v202_v31 = vsel %vm78_vm1, %v76_v28, 0.0  ;;  %v77_v34 = vld [vmem:[%s762_s0 + $0x1f8] sm:$0xff] }
  0x5e   :  { %v275_v56 = vmul.f32 %v77_v34, %v77_v34 }
  0x5f   :  { %v173_v15 = vadd.f32 %v172_v5, %v171_v9  ;;  %v366_v46 = vadd.f32 %v365_v37, %v364_v40  ;;  %v377_v9 = vsel %vm78_vm1, %v263_v60, 0.0  ;;  %v204_v37 = vsel %vm78_vm1, %v77_v34, 0.0 }
  0x60   :  { %v401_v62 = vsel %vm78_vm1, %v275_v56, 0.0 }
  0x61   :  { %v175_v21 = vadd.f32 %v174_v11, %v173_v15  ;;  %v368_v52 = vadd.f32 %v367_v43, %v366_v46  ;;  %v379_v15 = vsel %vm78_vm1, %v264_v2, 0.0  ;;  %v389_v43 = vsel %vm78_vm1, %v269_v32, 0.0 }
  0x62   :  { %v272_v46 = vmul.f32 %v74_v16, %v74_v16 }
  0x63   :  { %v177_v27 = vadd.f32 %v176_v17, %v175_v21  ;;  %v370_v58 = vadd.f32 %v369_v49, %v368_v52  ;;  %v381_v21 = vsel %vm78_vm1, %v265_v8, 0.0  ;;  %v273_v49 = vmul.f32 %v75_v22, %v75_v22 }
  0x64   :  { %v395_v54 = vsel %vm78_vm1, %v272_v46, 0.0 }
  0x65   :  { %v179_v33 = vadd.f32 %v178_v23, %v177_v27  ;;  %v372_v0 = vadd.f32 %v371_v55, %v370_v58  ;;  %v383_v27 = vsel %vm78_vm1, %v266_v14, 0.0 }
  0x67   :  { %v181_v39 = vadd.f32 %v180_v29, %v179_v33  ;;  %v374_v6 = vadd.f32 %v373_v61, %v372_v0  ;;  %v385_v33 = vsel %vm78_vm1, %v267_v20, 0.0 }
  0x69   :  { %v183_v45 = vadd.f32 %v182_v35, %v181_v39  ;;  %v376_v12 = vadd.f32 %v375_v3, %v374_v6  ;;  %v387_v39 = vsel %vm78_vm1, %v268_v26, 0.0 }
  0x6b   :  { %v185_v51 = vadd.f32 %v184_v41, %v183_v45  ;;  %v378_v18 = vadd.f32 %v377_v9, %v376_v12 }
  0x6d   :  { %v187_v57 = vadd.f32 %v186_v47, %v185_v51  ;;  %v380_v24 = vadd.f32 %v379_v15, %v378_v18  ;;  %v391_v47 = vsel %vm78_vm1, %v270_v38, 0.0 }
  0x6f   :  { %v189_v63 = vadd.f32 %v188_v53, %v187_v57  ;;  %v382_v30 = vadd.f32 %v381_v21, %v380_v24  ;;  %v274_v53 = vmul.f32 %v76_v28, %v76_v28  ;;  %v397_v57 = vsel %vm78_vm1, %v273_v49, 0.0 }
  0x71   :  { %v191_v5 = vadd.f32 %v190_v59, %v189_v63  ;;  %v384_v36 = vadd.f32 %v383_v27, %v382_v30  ;;  %v399_v60 = vsel %vm78_vm1, %v274_v53, 0.0 }
  0x73   :  { %v193_v11 = vadd.f32 %v192_v1, %v191_v5  ;;  %v386_v41 = vadd.f32 %v385_v33, %v384_v36 }
  0x75   :  { %v195_v17 = vadd.f32 %v194_v7, %v193_v11  ;;  %v388_v45 = vadd.f32 %v387_v39, %v386_v41  ;;  %v411_v11 = vld [vmem:[%s763_s1] sm:$0x3] }
  0x77   :  { %v197_v23 = vadd.f32 %v196_v13, %v195_v17  ;;  %v390_v48 = vadd.f32 %v389_v43, %v388_v45 }
  0x79   :  { %v199_v29 = vadd.f32 %v198_v19, %v197_v23  ;;  %v392_v52 = vadd.f32 %v391_v47, %v390_v48 }
  0x7b   :  { %v201_v35 = vadd.f32 %v200_v25, %v199_v29  ;;  %v394_v55 = vadd.f32 %v393_v50, %v392_v52 }
  0x7d   :  { %v203_v40 = vadd.f32 %v202_v31, %v201_v35  ;;  %v396_v59 = vadd.f32 %v395_v54, %v394_v55 }
  0x7f   :  { %v205_v44 = vadd.f32 %v204_v37, %v203_v40  ;;  %v398_v61 = vadd.f32 %v397_v57, %v396_v59 }
  0x81   :  { %v206_v51 = vrot.slane %v205_v44, 4  ;;  %v400_v0 = vadd.f32 %v399_v60, %v398_v61 }
  0x83   :  { %v207_v58 = vadd.f32 %v206_v51, %v205_v44  ;;  %v402_v1 = vadd.f32 %v401_v62, %v400_v0 }
  0x85   :  { %v208_v63 = vrot.slane %v207_v58, 2  ;;  %v403_v3 = vrot.slane %v402_v1, 4 }
  0x87   :  { %v209_v2 = vadd.f32 %v208_v63, %v207_v58  ;;  %v404_v4 = vadd.f32 %v403_v3, %v402_v1 }
  0x89   :  { %v210_v5 = vrot.slane %v209_v2, 1  ;;  %v405_v6 = vrot.slane %v404_v4, 2 }
  0x8b   :  { %v406_v7 = vadd.f32 %v405_v6, %v404_v4  ;;  %v211_v8 = vadd.f32 %v210_v5, %v209_v2 }
  0x8d   :  { %v407_v9 = vrot.slane %v406_v7, 1 }
  0x8f   :  { %v408_v10 = vadd.f32 %v407_v9, %v406_v7 }
  0x91   :  { %v410_v12 = vsel %vm409_vm2, %v211_v8, %v408_v10 }
  0x92   :  { %v412_v13 = vadd.f32 %v411_v11, %v410_v12 }
  0x94   :  { %414 = vst.msk [vmem:[%s763_s1] sm:$0x3] %vm12_vm0, %v412_v13 }

// kernel: generator_forward.16
= control target key start
LH: loop header
LB: loop body
LE: loop exit
PB: predicated region body
PF: predicated region fallthrough
CT: control target
= control target key end

     0   :  { %vm701_vm0 = vcmask 523264   ;;  %s2971_s1 = inlined_call_operand.vmem [shape: bf16[576,256], index: 1, kind: input, shape index: {}]   ;;  %s2972_s0 = inlined_call_operand.vmem [shape: bf16[128,576], index: 0, kind: input, shape index: {}]   ;;  %s2973_s2 = inlined_call_operand.vmem [shape: f32[1,256], index: 2, kind: input, shape index: {}]   ;;  %s2974_s3 = inlined_call_operand.vmem [shape: f32[128,256], index: 3, kind: output, shape index: {}]  }
   0x1   :  { %v1470_v0 = vld [vmem:[%s2971_s1 + $0x70] sm:$0xf]  ;;  %v1771_v1 = vld [vmem:[%s2971_s1 + $0x74] sm:$0xf0]  ;;  %v1462_v5 = vld [vmem:[%s2971_s1 + $0x60] sm:$0xf] }
   0x2   :  { %v1534_v2 = vld [vmem:[%s2971_s1 + $0xf0] sm:$0xf]  ;;  %v1471_v3 = vor.u32 %v1771_v1, %v1470_v0  ;;  %v1787_v4 = vld [vmem:[%s2971_s1 + $0xf4] sm:$0xf0]  ;;  %v1769_v6 = vld [vmem:[%s2971_s1 + $0x64] sm:$0xf0] }
   0x3   :  { %v1535_v7 = vor.u32 %v1787_v4, %v1534_v2  ;;  %v1526_v8 = vld [vmem:[%s2971_s1 + $0xe0] sm:$0xf]  ;;  %v1785_v9 = vld [vmem:[%s2971_s1 + $0xe4] sm:$0xf0]  ;;  %v1463_v10 = vor.u32 %v1769_v6, %v1462_v5  ;;  %v1454_v12 = vld [vmem:[%s2971_s1 + $0x50] sm:$0xf] }
   0x4   :  { %1828 = vmatpush.bf16.msra.mxu2 %v1471_v3  ;;  %726 = vmatpush.bf16.msra.mxu0 %v1471_v3  ;;  %v1527_v11 = vor.u32 %v1785_v9, %v1526_v8  ;;  %v1767_v13 = vld [vmem:[%s2971_s1 + $0x54] sm:$0xf0]  ;;  %v1518_v14 = vld [vmem:[%s2971_s1 + $0xd0] sm:$0xf]  ;;  %v1446_v18 = vld [vmem:[%s2971_s1 + $0x40] sm:$0xf] }
   0x5   :  { %1836 = vmatpush.bf16.msra.mxu3 %v1535_v7  ;;  %775 = vmatpush.bf16.msra.mxu1 %v1535_v7  ;;  %v1783_v15 = vld [vmem:[%s2971_s1 + $0xd4] sm:$0xf0]  ;;  %v1455_v16 = vor.u32 %v1767_v13, %v1454_v12  ;;  %v1765_v19 = vld [vmem:[%s2971_s1 + $0x44] sm:$0xf0]  ;;  %v1510_v20 = vld [vmem:[%s2971_s1 + $0xc0] sm:$0xf] }
   0x6   :  { %v1519_v17 = vor.u32 %v1783_v15, %v1518_v14  ;;  %v1781_v21 = vld [vmem:[%s2971_s1 + $0xc4] sm:$0xf0]  ;;  %v1447_v22 = vor.u32 %v1765_v19, %v1446_v18  ;;  %v1438_v24 = vld [vmem:[%s2971_s1 + $0x30] sm:$0xf]  ;;  %v1763_v25 = vld [vmem:[%s2971_s1 + $0x34] sm:$0xf0] }
   0x7   :  { %v1511_v23 = vor.u32 %v1781_v21, %v1510_v20  ;;  %v1502_v26 = vld [vmem:[%s2971_s1 + $0xb0] sm:$0xf]  ;;  %v1779_v27 = vld [vmem:[%s2971_s1 + $0xb4] sm:$0xf0]  ;;  %v1439_v28 = vor.u32 %v1763_v25, %v1438_v24  ;;  %v1430_v30 = vld [vmem:[%s2971_s1 + $0x20] sm:$0xf] }
   0x8   :  { %1829 = vmatpush.bf16.msra.mxu2 %v1463_v10  ;;  %727 = vmatpush.bf16.msra.mxu0 %v1463_v10  ;;  %v1503_v29 = vor.u32 %v1779_v27, %v1502_v26  ;;  %v1761_v31 = vld [vmem:[%s2971_s1 + $0x24] sm:$0xf0]  ;;  %v1494_v32 = vld [vmem:[%s2971_s1 + $0xa0] sm:$0xf]  ;;  %v1422_v36 = vld [vmem:[%s2971_s1 + $0x10] sm:$0xf] }
   0x9   :  { %1837 = vmatpush.bf16.msra.mxu3 %v1527_v11  ;;  %776 = vmatpush.bf16.msra.mxu1 %v1527_v11  ;;  %v1777_v33 = vld [vmem:[%s2971_s1 + $0xa4] sm:$0xf0]  ;;  %v1431_v34 = vor.u32 %v1761_v31, %v1430_v30  ;;  %v1759_v37 = vld [vmem:[%s2971_s1 + $0x14] sm:$0xf0]  ;;  %v1486_v38 = vld [vmem:[%s2971_s1 + $0x90] sm:$0xf] }
   0xa   :  { %v1495_v35 = vor.u32 %v1777_v33, %v1494_v32  ;;  %v1775_v39 = vld [vmem:[%s2971_s1 + $0x94] sm:$0xf0]  ;;  %v1423_v40 = vor.u32 %v1759_v37, %v1422_v36  ;;  %v1414_v41 = vld [vmem:[%s2971_s1] sm:$0xf]  ;;  %v1757_v43 = vld [vmem:[%s2971_s1 + $0x4] sm:$0xf0] }
   0xb   :  { %v1487_v42 = vor.u32 %v1775_v39, %v1486_v38  ;;  %v1478_v44 = vld [vmem:[%s2971_s1 + $0x80] sm:$0xf]  ;;  %v1773_v45 = vld [vmem:[%s2971_s1 + $0x84] sm:$0xf0]  ;;  %v1738_v47 = vld [vmem:[%s2972_s0 + $0xb0] sm:$0xf0]  ;;  %v1415_v54 = vor.u32 %v1757_v43, %v1414_v41 }
   0xc   :  { %1830 = vmatpush.bf16.msra.mxu2 %v1455_v16  ;;  %728 = vmatpush.bf16.msra.mxu0 %v1455_v16  ;;  %v1334_v46 = vld [vmem:[%s2972_s0 + $0xa0] sm:$0xf]  ;;  %v1598_v48 = vld [vmem:[%s2971_s1 + $0x170] sm:$0xf]  ;;  %v1803_v49 = vld [vmem:[%s2971_s1 + $0x174] sm:$0xf0]  ;;  %v1479_v58 = vor.u32 %v1773_v45, %v1478_v44 }
   0xd   :  { %1838 = vmatpush.bf16.msra.mxu3 %v1519_v17  ;;  %777 = vmatpush.bf16.msra.mxu1 %v1519_v17  ;;  %v1736_v50 = vld [vmem:[%s2972_s0 + $0xa4] sm:$0xf]  ;;  %v1336_v51 = vld [vmem:[%s2972_s0 + $0xb4] sm:$0xf0]  ;;  %v1662_v52 = vld [vmem:[%s2971_s1 + $0x1f0] sm:$0xf]  ;;  %v1599_v59 = vor.u32 %v1803_v49, %v1598_v48  ;;  %v2011_v3 = vor.u32 %v1738_v47, %v1334_v46 }
   0xe   :  { %v1819_v53 = vld [vmem:[%s2971_s1 + $0x1f4] sm:$0xf0]  ;;  %v1254_v55 = vld [vmem:[%s2972_s0] sm:$0xf]  ;;  %v1718_v56 = vld [vmem:[%s2972_s0 + $0x10] sm:$0xf0]  ;;  %v2024_v8 = vor.u32 %v1736_v50, %v1336_v51 }
   0xf   :  { %v1716_v57 = vld [vmem:[%s2972_s0 + $0x4] sm:$0xf]  ;;  %v1256_v60 = vld [vmem:[%s2972_s0 + $0x14] sm:$0xf0]  ;;  %v1694_v61 = vld [vmem:[%s2971_s1 + $0x230] sm:$0xf]  ;;  %v1663_v63 = vor.u32 %v1819_v53, %v1662_v52  ;;  %v2013_v4 = vor.u32 %v1718_v56, %v1254_v55 }
  0x10   :  { %1831 = vmatpush.bf16.msra.mxu2 %v1447_v22  ;;  %729 = vmatpush.bf16.msra.mxu0 %v1447_v22  ;;  %v1827_v62 = vld [vmem:[%s2971_s1 + $0x234] sm:$0xf0]  ;;  %v1590_v0 = vld [vmem:[%s2971_s1 + $0x160] sm:$0xf]  ;;  %v1801_v1 = vld [vmem:[%s2971_s1 + $0x164] sm:$0xf0]  ;;  %v2026_v10 = vor.u32 %v1716_v57, %v1256_v60 }
  0x11   :  { %1839 = vmatpush.bf16.msra.mxu3 %v1511_v23  ;;  %778 = vmatpush.bf16.msra.mxu1 %v1511_v23  ;;  %v1654_v2 = vld [vmem:[%s2971_s1 + $0x1e0] sm:$0xf]  ;;  %v1817_v5 = vld [vmem:[%s2971_s1 + $0x1e4] sm:$0xf0]  ;;  %v1770_v6 = vld [vmem:[%s2971_s1 + $0x74] sm:$0xf]  ;;  %v1695_v9 = vor.u32 %v1827_v62, %v1694_v61  ;;  %v1591_v11 = vor.u32 %v1801_v1, %v1590_v0 }
  0x12   :  { %v1472_v7 = vld [vmem:[%s2971_s1 + $0x78] sm:$0xf0]  ;;  %v1686_v12 = vld [vmem:[%s2971_s1 + $0x220] sm:$0xf]  ;;  %v1825_v13 = vld [vmem:[%s2971_s1 + $0x224] sm:$0xf0]  ;;  %v1655_v14 = vor.u32 %v1817_v5, %v1654_v2 }
  0x13   :  { %v1475_v15 = vor.u32 %v1770_v6, %v1472_v7  ;;  %v1582_v16 = vld [vmem:[%s2971_s1 + $0x150] sm:$0xf]  ;;  %v1799_v17 = vld [vmem:[%s2971_s1 + $0x154] sm:$0xf0]  ;;  %v1768_v20 = vld [vmem:[%s2971_s1 + $0x64] sm:$0xf]  ;;  %v1687_v22 = vor.u32 %v1825_v13, %v1686_v12 }
  0x14   :  { %1832 = vmatpush.bf16.msra.mxu2 %v1439_v28  ;;  %730 = vmatpush.bf16.msra.mxu0 %v1439_v28  ;;  %v1646_v18 = vld [vmem:[%s2971_s1 + $0x1d0] sm:$0xf]  ;;  %v1815_v19 = vld [vmem:[%s2971_s1 + $0x1d4] sm:$0xf0]  ;;  %v1464_v21 = vld [vmem:[%s2971_s1 + $0x68] sm:$0xf0]  ;;  %v1583_v23 = vor.u32 %v1799_v17, %v1582_v16 }
  0x15   :  { %1840 = vmatpush.bf16.msra.mxu3 %v1503_v29  ;;  %779 = vmatpush.bf16.msra.mxu1 %v1503_v29  ;;  %v1647_v24 = vor.u32 %v1815_v19, %v1646_v18  ;;  %v1467_v25 = vor.u32 %v1768_v20, %v1464_v21  ;;  %v1574_v26 = vld [vmem:[%s2971_s1 + $0x140] sm:$0xf]  ;;  %v1797_v27 = vld [vmem:[%s2971_s1 + $0x144] sm:$0xf0]  ;;  %v1766_v30 = vld [vmem:[%s2971_s1 + $0x54] sm:$0xf] }
  0x16   :  { %v1638_v28 = vld [vmem:[%s2971_s1 + $0x1c0] sm:$0xf]  ;;  %v1813_v29 = vld [vmem:[%s2971_s1 + $0x1c4] sm:$0xf0]  ;;  %v1456_v31 = vld [vmem:[%s2971_s1 + $0x58] sm:$0xf0] }
  0x17   :  { %v1678_v32 = vld [vmem:[%s2971_s1 + $0x210] sm:$0xf]  ;;  %v1823_v33 = vld [vmem:[%s2971_s1 + $0x214] sm:$0xf0]  ;;  %v1354_v36 = vld [vmem:[%s2972_s0 + $0xc8] sm:$0xf]  ;;  %v1639_v38 = vor.u32 %v1813_v29, %v1638_v28  ;;  %v1459_v39 = vor.u32 %v1766_v30, %v1456_v31 }
  0x18   :  { %1833 = vmatpush.bf16.msra.mxu2 %v1431_v34  ;;  %731 = vmatpush.bf16.msra.mxu0 %v1431_v34  ;;  %v1575_v34 = vor.u32 %v1797_v27, %v1574_v26  ;;  %v1743_v37 = vld [vmem:[%s2972_s0 + $0xd8] sm:$0xf0]  ;;  %v1795_v41 = vld [vmem:[%s2971_s1 + $0x134] sm:$0xf0]  ;;  %v1764_v44 = vld [vmem:[%s2971_s1 + $0x44] sm:$0xf] }
  0x19   :  { %1841 = vmatpush.bf16.msra.mxu3 %v1495_v35  ;;  %780 = vmatpush.bf16.msra.mxu1 %v1495_v35  ;;  %v1679_v35 = vor.u32 %v1823_v33, %v1678_v32  ;;  %v1811_v43 = vld [vmem:[%s2971_s1 + $0x1b4] sm:$0xf0]  ;;  %v1448_v45 = vld [vmem:[%s2971_s1 + $0x48] sm:$0xf0]  ;;  %v1274_v47 = vld [vmem:[%s2972_s0 + $0x28] sm:$0xf] }
  0x1a   :  { %v1741_v46 = vld [vmem:[%s2972_s0 + $0xcc] sm:$0xf]  ;;  %v1723_v48 = vld [vmem:[%s2972_s0 + $0x38] sm:$0xf0]  ;;  %v1356_v49 = vld [vmem:[%s2972_s0 + $0xdc] sm:$0xf0] }
  0x1b   :  { %v1721_v50 = vld [vmem:[%s2972_s0 + $0x2c] sm:$0xf]  ;;  %v1276_v51 = vld [vmem:[%s2972_s0 + $0x3c] sm:$0xf0]  ;;  %v1793_v56 = vld [vmem:[%s2971_s1 + $0x124] sm:$0xf0] }
  0x1c   :  { %1834 = vmatpush.bf16.msra.mxu2 %v1423_v40  ;;  %732 = vmatpush.bf16.msra.mxu0 %v1423_v40  ;;  %v1566_v40 = vld [vmem:[%s2971_s1 + $0x130] sm:$0xf]  ;;  %v1558_v55 = vld [vmem:[%s2971_s1 + $0x120] sm:$0xf]  ;;  %v1809_v60 = vld [vmem:[%s2971_s1 + $0x1a4] sm:$0xf0]  ;;  %v2146_v0 = vor.u32 %v1721_v50, %v1276_v51 }
  0x1d   :  { %1842 = vmatpush.bf16.msra.mxu3 %v1487_v42  ;;  %781 = vmatpush.bf16.msra.mxu1 %v1487_v42  ;;  %v1630_v42 = vld [vmem:[%s2971_s1 + $0x1b0] sm:$0xf]  ;;  %v1567_v52 = vor.u32 %v1795_v41, %v1566_v40  ;;  %v1622_v57 = vld [vmem:[%s2971_s1 + $0x1a0] sm:$0xf]  ;;  %v1762_v61 = vld [vmem:[%s2971_s1 + $0x34] sm:$0xf]  ;;  %v1559_v1 = vor.u32 %v1793_v56, %v1558_v55 }
  0x1e   :  { %v1631_v53 = vor.u32 %v1811_v43, %v1630_v42  ;;  %v1440_v62 = vld [vmem:[%s2971_s1 + $0x38] sm:$0xf0]  ;;  %v1623_v2 = vor.u32 %v1809_v60, %v1622_v57  ;;  %v1550_v6 = vld [vmem:[%s2971_s1 + $0x110] sm:$0xf]  ;;  %v1791_v7 = vld [vmem:[%s2971_s1 + $0x114] sm:$0xf0] }
  0x1f   :  { %v1443_v5 = vor.u32 %v1762_v61, %v1440_v62  ;;  %v1807_v12 = vld [vmem:[%s2971_s1 + $0x194] sm:$0xf0]  ;;  %v1542_v16 = vld [vmem:[%s2971_s1 + $0x100] sm:$0xf]  ;;  %v1789_v18 = vld [vmem:[%s2971_s1 + $0x104] sm:$0xf0] }
  0x20   :  { %1835 = vmatpush.bf16.msra.mxu2 %v1415_v54  ;;  %733 = vmatpush.bf16.msra.mxu0 %v1415_v54  ;;  %v1451_v54 = vor.u32 %v1764_v44, %v1448_v45  ;;  %v1606_v19 = vld [vmem:[%s2971_s1 + $0x180] sm:$0xf]  ;;  %v1805_v20 = vld [vmem:[%s2971_s1 + $0x184] sm:$0xf0]  ;;  %v1424_v26 = vld [vmem:[%s2971_s1 + $0x18] sm:$0xf0] }
  0x21   :  { %1843 = vmatpush.bf16.msra.mxu3 %v1479_v58  ;;  %782 = vmatpush.bf16.msra.mxu1 %v1479_v58  ;;  %v2131_v58 = vor.u32 %v1743_v37, %v1354_v36  ;;  %v1670_v21 = vld [vmem:[%s2971_s1 + $0x200] sm:$0xf]  ;;  %v1607_v27 = vor.u32 %v1805_v20, %v1606_v19  ;;  %v1374_v29 = vld [vmem:[%s2972_s0 + $0xf0] sm:$0xf]  ;;  %v1748_v30 = vld [vmem:[%s2972_s0 + $0x100] sm:$0xf0] }
  0x22   :  { %v1294_v31 = vld [vmem:[%s2972_s0 + $0x50] sm:$0xf]  ;;  %v1728_v32 = vld [vmem:[%s2972_s0 + $0x60] sm:$0xf0]  ;;  %v1746_v33 = vld [vmem:[%s2972_s0 + $0xf4] sm:$0xf]  ;;  %v2218_v37 = vor.u32 %v1748_v30, %v1374_v29 }
  0x23   :  { %754 = vmatmul.bf16.vlgmr.msra.gmra.mxu2 %v2011_v3  ;;  %734 = vmatmul.bf16.vlgmr.msra.gmra.mxu0 %v2013_v4  ;;  %v1296_v36 = vld [vmem:[%s2972_s0 + $0x64] sm:$0xf0]  ;;  %v1756_v41 = vld [vmem:[%s2971_s1 + $0x4] sm:$0xf]  ;;  %v1416_v42 = vld [vmem:[%s2971_s1 + $0x8] sm:$0xf0] }
  0x24   :  { %824 = vmatpush.bf16.msrb.mxu2 %v1599_v59  ;;  %803 = vmatmul.bf16.vlgmr.msra.gmra.mxu3 %v2024_v8  ;;  %v2133_v59 = vor.u32 %v1723_v48, %v1274_v47  ;;  %v1419_v43 = vor.u32 %v1756_v41, %v1416_v42  ;;  %v1786_v44 = vld [vmem:[%s2971_s1 + $0xf4] sm:$0xf]  ;;  %v1536_v45 = vld [vmem:[%s2971_s1 + $0xf8] sm:$0xf0]  ;;  %v1394_v56 = vld [vmem:[%s2972_s0 + $0x118] sm:$0xf] }
  0x25   :  { %873 = vmatpush.bf16.msrb.mxu3 %v1663_v63  ;;  %926 = vmatpush.bf16.msrb.mxu0 %v1695_v9  ;;  %v2144_v63 = vor.u32 %v1741_v46, %v1356_v49  ;;  %v1614_v9 = vld [vmem:[%s2971_s1 + $0x190] sm:$0xf]  ;;  %v1539_v46 = vor.u32 %v1786_v44, %v1536_v45  ;;  %v1802_v47 = vld [vmem:[%s2971_s1 + $0x174] sm:$0xf]  ;;  %v1600_v48 = vld [vmem:[%s2971_s1 + $0x178] sm:$0xf0] }
  0x26   :  { %783 = vmatmul.bf16.vlgmr.msra.gmra.mxu1 %v2026_v10  ;;  %v1615_v13 = vor.u32 %v1807_v12, %v1614_v9  ;;  %v1818_v49 = vld [vmem:[%s2971_s1 + $0x1f4] sm:$0xf]  ;;  %v1603_v50 = vor.u32 %v1802_v47, %v1600_v48  ;;  %v1664_v51 = vld [vmem:[%s2971_s1 + $0x1f8] sm:$0xf0]  ;;  %v1753_v57 = vld [vmem:[%s2972_s0 + $0x128] sm:$0xf0] }
  0x27   :  { %971 = vmatpush.bf16.msrb.mxu1 %v1475_v15  ;;  %v1432_v15 = vld [vmem:[%s2971_s1 + $0x28] sm:$0xf0]  ;;  %v1314_v60 = vld [vmem:[%s2972_s0 + $0x78] sm:$0xf]  ;;  %v1751_v62 = vld [vmem:[%s2972_s0 + $0x11c] sm:$0xf] }
  0x28   :  { %825 = vmatpush.bf16.msrb.mxu2 %v1591_v11  ;;  %v1551_v11 = vor.u32 %v1791_v7, %v1550_v6  ;;  %v1733_v61 = vld [vmem:[%s2972_s0 + $0x88] sm:$0xf0]  ;;  %v2284_v6 = vor.u32 %v1753_v57, %v1394_v56  ;;  %v1784_v12 = vld [vmem:[%s2971_s1 + $0xe4] sm:$0xf]  ;;  %v1782_v30 = vld [vmem:[%s2971_s1 + $0xd4] sm:$0xf] }
  0x29   :  { %874 = vmatpush.bf16.msrb.mxu3 %v1655_v14  ;;  %927 = vmatpush.bf16.msrb.mxu0 %v1687_v22  ;;  %v1760_v14 = vld [vmem:[%s2971_s1 + $0x24] sm:$0xf]  ;;  %v1821_v22 = vld [vmem:[%s2971_s1 + $0x204] sm:$0xf0]  ;;  %v2286_v7 = vor.u32 %v1733_v61, %v1314_v60  ;;  %v1282_v45 = vld [vmem:[%s2972_s0 + $0x30] sm:$0xf] }
  0x2a   :  { %v1435_v17 = vor.u32 %v1760_v14, %v1432_v15  ;;  %v1800_v14 = vld [vmem:[%s2971_s1 + $0x164] sm:$0xf]  ;;  %v1290_v47 = vld [vmem:[%s2972_s0 + $0x38] sm:$0xf]  ;;  %v1725_v48 = vld [vmem:[%s2972_s0 + $0x48] sm:$0xf0] }
  0x2b   :  { %972 = vmatpush.bf16.msrb.mxu1 %v1467_v25  ;;  %v1671_v25 = vor.u32 %v1821_v22, %v1670_v21  ;;  %v1262_v21 = vld [vmem:[%s2972_s0 + $0x8] sm:$0xf]  ;;  %v1719_v22 = vld [vmem:[%s2972_s0 + $0x18] sm:$0xf0]  ;;  %v1796_v56 = vld [vmem:[%s2971_s1 + $0x144] sm:$0xf] }
  0x2c   :  { %826 = vmatpush.bf16.msrb.mxu2 %v1583_v23  ;;  %v1758_v23 = vld [vmem:[%s2971_s1 + $0x14] sm:$0xf]  ;;  %v1576_v60 = vld [vmem:[%s2971_s1 + $0x148] sm:$0xf0]  ;;  %v1812_v61 = vld [vmem:[%s2971_s1 + $0x1c4] sm:$0xf] }
  0x2d   :  { %875 = vmatpush.bf16.msrb.mxu3 %v1647_v24  ;;  %928 = vmatpush.bf16.msrb.mxu0 %v1679_v35  ;;  %v1543_v24 = vor.u32 %v1789_v18, %v1542_v16  ;;  %v1427_v28 = vor.u32 %v1758_v23, %v1424_v26  ;;  %v1726_v35 = vld [vmem:[%s2972_s0 + $0x54] sm:$0xf]  ;;  %v1592_v16 = vld [vmem:[%s2971_s1 + $0x168] sm:$0xf0]  ;;  %v1270_v23 = vld [vmem:[%s2972_s0 + $0x10] sm:$0xf] }
  0x2e   :  { %v2224_v40 = vor.u32 %v1726_v35, %v1296_v36  ;;  %v1656_v18 = vld [vmem:[%s2971_s1 + $0x1e8] sm:$0xf0]  ;;  %v1595_v19 = vor.u32 %v1800_v14, %v1592_v16  ;;  %v1264_v26 = vld [vmem:[%s2972_s0 + $0x1c] sm:$0xf0]  ;;  %v1814_v35 = vld [vmem:[%s2971_s1 + $0x1d4] sm:$0xf] }
  0x2f   :  { %973 = vmatpush.bf16.msrb.mxu1 %v1459_v39  ;;  %v1648_v36 = vld [vmem:[%s2971_s1 + $0x1d8] sm:$0xf0] }
  0x30   :  { %827 = vmatpush.bf16.msrb.mxu2 %v1575_v34  ;;  %v1376_v34 = vld [vmem:[%s2972_s0 + $0x104] sm:$0xf0]  ;;  %v1651_v42 = vor.u32 %v1814_v35, %v1648_v36  ;;  %v1727_v14 = vld [vmem:[%s2972_s0 + $0x5c] sm:$0xf]  ;;  %v1324_v35 = vld [vmem:[%s2972_s0 + $0x94] sm:$0xf0] }
  0x31   :  { %876 = vmatpush.bf16.msrb.mxu3 %v1639_v38  ;;  %929 = vmatpush.bf16.msrb.mxu0 %v1671_v25  ;;  %v2220_v38 = vor.u32 %v1728_v32, %v1294_v31  ;;  %v2222_v39 = vor.u32 %v1746_v33, %v1376_v34  ;;  %v1717_v25 = vld [vmem:[%s2972_s0 + $0xc] sm:$0xf]  ;;  %v1520_v31 = vld [vmem:[%s2971_s1 + $0xd8] sm:$0xf0]  ;;  %v1798_v32 = vld [vmem:[%s2971_s1 + $0x154] sm:$0xf] }
  0x32   :  { %v2336_v29 = vor.u32 %v1717_v25, %v1264_v26  ;;  %v1523_v33 = vor.u32 %v1782_v30, %v1520_v31  ;;  %v1584_v34 = vld [vmem:[%s2971_s1 + $0x158] sm:$0xf0]  ;;  %v1322_v25 = vld [vmem:[%s2972_s0 + $0x80] sm:$0xf]  ;;  %v1810_v26 = vld [vmem:[%s2971_s1 + $0x1b4] sm:$0xf] }
  0x33   :  { %974 = vmatpush.bf16.msrb.mxu1 %v1451_v54  ;;  %759 = vmatmul.bf16.gmra.mxu2 %v2131_v58  ;;  %v1667_v54 = vor.u32 %v1818_v49, %v1664_v51  ;;  %v1587_v41 = vor.u32 %v1798_v32, %v1584_v34  ;;  %v1722_v49 = vld [vmem:[%s2972_s0 + $0x34] sm:$0xf]  ;;  %v1330_v31 = vld [vmem:[%s2972_s0 + $0x88] sm:$0xf]  ;;  %v1735_v32 = vld [vmem:[%s2972_s0 + $0x98] sm:$0xf0] }
  0x34   :  { %828 = vmatpush.bf16.msrb.mxu2 %v1567_v52  ;;  %739 = vmatmul.bf16.gmra.mxu0 %v2133_v59  ;;  %v1826_v52 = vld [vmem:[%s2971_s1 + $0x234] sm:$0xf]  ;;  %v1732_v34 = vld [vmem:[%s2972_s0 + $0x84] sm:$0xf] }
  0x35   :  { %877 = vmatpush.bf16.msrb.mxu3 %v1631_v53  ;;  %v1696_v53 = vld [vmem:[%s2971_s1 + $0x238] sm:$0xf0]  ;;  %1118 = vmatpush.bf16.msra.mxu0 %v1667_v54  ;;  %v1780_v54 = vld [vmem:[%s2971_s1 + $0xc4] sm:$0xf]  ;;  %v1734_v30 = vld [vmem:[%s2972_s0 + $0x90] sm:$0xf0] }
  0x36   :  { %808 = vmatmul.bf16.gmra.mxu3 %v2144_v63  ;;  %788 = vmatmul.bf16.gmra.mxu1 %v2146_v0  ;;  %v1699_v55 = vor.u32 %v1826_v52, %v1696_v53  ;;  %v2387_v52 = vor.u32 %v1725_v48, %v1290_v47  ;;  %v2479_v36 = vor.u32 %v1734_v30, %v1322_v25  ;;  %v1792_v47 = vld [vmem:[%s2971_s1 + $0x124] sm:$0xf] }
  0x37   :  { %975 = vmatpush.bf16.msrb.mxu1 %v1443_v5  ;;  %v1316_v5 = vld [vmem:[%s2972_s0 + $0x8c] sm:$0xf0] }
  0x38   :  { %829 = vmatpush.bf16.msrb.mxu2 %v1559_v1  ;;  %v1396_v1 = vld [vmem:[%s2972_s0 + $0x12c] sm:$0xf0] }
  0x39   :  { %878 = vmatpush.bf16.msrb.mxu3 %v1623_v2  ;;  %v1731_v2 = vld [vmem:[%s2972_s0 + $0x7c] sm:$0xf]  ;;  %v2288_v9 = vor.u32 %v1751_v62, %v1396_v1  ;;  %v1640_v62 = vld [vmem:[%s2971_s1 + $0x1c8] sm:$0xf0]  ;;  %v1579_v1 = vor.u32 %v1796_v56, %v1576_v60  ;;  %v1740_v60 = vld [vmem:[%s2972_s0 + $0xc0] sm:$0xf0] }
  0x3a   :  { %v1739_v56 = vld [vmem:[%s2972_s0 + $0xb8] sm:$0xf0] }
  0x3b   :  { %976 = vmatpush.bf16.msrb.mxu1 %v1435_v17  ;;  %v1816_v17 = vld [vmem:[%s2971_s1 + $0x1e4] sm:$0xf] }
  0x3c   :  { %830 = vmatpush.bf16.msrb.mxu2 %v1551_v11  ;;  %v2290_v11 = vor.u32 %v1731_v2, %v1316_v5  ;;  %v1659_v20 = vor.u32 %v1816_v17, %v1656_v18  ;;  %v1643_v2 = vor.u32 %v1812_v61, %v1640_v62  ;;  %v1729_v5 = vld [vmem:[%s2972_s0 + $0x68] sm:$0xf0] }
  0x3d   :  { %879 = vmatpush.bf16.msrb.mxu3 %v1615_v13  ;;  %v1528_v13 = vld [vmem:[%s2971_s1 + $0xe8] sm:$0xf0] }
  0x3e   :  { %v1531_v15 = vor.u32 %v1784_v12, %v1528_v13  ;;  %1119 = vmatpush.bf16.msra.mxu0 %v1659_v20  ;;  %v1310_v12 = vld [vmem:[%s2972_s0 + $0x60] sm:$0xf]  ;;  %v1730_v13 = vld [vmem:[%s2972_s0 + $0x70] sm:$0xf0]  ;;  %v1504_v20 = vld [vmem:[%s2971_s1 + $0xb8] sm:$0xf0] }
  0x3f   :  { %977 = vmatpush.bf16.msrb.mxu1 %v1427_v28  ;;  %v2434_v17 = vor.u32 %v1730_v13, %v1310_v12  ;;  %v1737_v62 = vld [vmem:[%s2972_s0 + $0xac] sm:$0xf] }
  0x40   :  { %831 = vmatpush.bf16.msrb.mxu2 %v1543_v24  ;;  %v1720_v24 = vld [vmem:[%s2972_s0 + $0x20] sm:$0xf0] }
  0x41   :  { %880 = vmatpush.bf16.msrb.mxu3 %v1607_v27  ;;  %v2332_v27 = vor.u32 %v1719_v22, %v1262_v21  ;;  %v2334_v28 = vor.u32 %v1720_v24, %v1270_v23  ;;  %v1794_v21 = vld [vmem:[%s2971_s1 + $0x134] sm:$0xf]  ;;  %v1568_v23 = vld [vmem:[%s2971_s1 + $0x138] sm:$0xf0] }
  0x42   :  { %1120 = vmatpush.bf16.msra.mxu0 %v1651_v42  ;;  %v1571_v24 = vor.u32 %v1794_v21, %v1568_v23  ;;  %v2483_v42 = vor.u32 %v1732_v34, %v1324_v35  ;;  %v1790_v21 = vld [vmem:[%s2971_s1 + $0x114] sm:$0xf]  ;;  %v1552_v23 = vld [vmem:[%s2971_s1 + $0x118] sm:$0xf0]  ;;  %v1744_v35 = vld [vmem:[%s2972_s0 + $0xe0] sm:$0xf0] }
  0x43   :  { %764 = vmatmul.bf16.gmra.mxu2 %v2218_v37  ;;  %978 = vmatpush.bf16.msrb.mxu1 %v1419_v43  ;;  %v1824_v43 = vld [vmem:[%s2971_s1 + $0x224] sm:$0xf]  ;;  %v1555_v25 = vor.u32 %v1790_v21, %v1552_v23  ;;  %v1616_v34 = vld [vmem:[%s2971_s1 + $0x198] sm:$0xf0] }
  0x44   :  { %744 = vmatmul.bf16.gmra.mxu0 %v2220_v38  ;;  %1020 = vmatpush.bf16.msra.mxu2 %v1539_v46  ;;  %v1724_v46 = vld [vmem:[%s2972_s0 + $0x40] sm:$0xf0] }
  0x45   :  { %1069 = vmatpush.bf16.msra.mxu3 %v1603_v50  ;;  %v1284_v50 = vld [vmem:[%s2972_s0 + $0x44] sm:$0xf0]  ;;  %v2385_v51 = vor.u32 %v1724_v46, %v1282_v45  ;;  %v1776_v45 = vld [vmem:[%s2971_s1 + $0xa4] sm:$0xf]  ;;  %v1496_v46 = vld [vmem:[%s2971_s1 + $0xa8] sm:$0xf0] }
  0x46   :  { %813 = vmatmul.bf16.gmra.mxu3 %v2222_v39  ;;  %793 = vmatmul.bf16.gmra.mxu1 %v2224_v40  ;;  %v2389_v53 = vor.u32 %v1722_v49, %v1284_v50  ;;  %v1499_v48 = vor.u32 %v1776_v45, %v1496_v46  ;;  %v1560_v49 = vld [vmem:[%s2971_s1 + $0x128] sm:$0xf0]  ;;  %v1742_v45 = vld [vmem:[%s2972_s0 + $0xd4] sm:$0xf]  ;;  %v1364_v46 = vld [vmem:[%s2972_s0 + $0xe4] sm:$0xf0] }
  0x47   :  { %1171 = vmatpush.bf16.msra.mxu1 %v1699_v55  ;;  %v1512_v55 = vld [vmem:[%s2971_s1 + $0xc8] sm:$0xf0]  ;;  %1121 = vmatpush.bf16.msra.mxu0 %v1643_v2  ;;  %v1563_v50 = vor.u32 %v1792_v47, %v1560_v49 }
  0x48   :  { %1021 = vmatpush.bf16.msra.mxu2 %v1531_v15  ;;  %v1515_v57 = vor.u32 %v1780_v54, %v1512_v55  ;;  %v1304_v15 = vld [vmem:[%s2972_s0 + $0x6c] sm:$0xf0]  ;;  %v1342_v54 = vld [vmem:[%s2972_s0 + $0xa8] sm:$0xf]  ;;  %v1808_v55 = vld [vmem:[%s2971_s1 + $0x1a4] sm:$0xf] }
  0x49   :  { %1070 = vmatpush.bf16.msra.mxu3 %v1595_v19  ;;  %v2436_v18 = vor.u32 %v1727_v14, %v1304_v15  ;;  %v1778_v19 = vld [vmem:[%s2971_s1 + $0xb4] sm:$0xf]  ;;  %v2532_v2 = vor.u32 %v1739_v56, %v1342_v54 }
  0x4a   :  { %v1507_v22 = vor.u32 %v1778_v19, %v1504_v20  ;;  %v1774_v19 = vld [vmem:[%s2971_s1 + $0x94] sm:$0xf]  ;;  %v1488_v20 = vld [vmem:[%s2971_s1 + $0x98] sm:$0xf0] }
  0x4c   :  { %1022 = vmatpush.bf16.msra.mxu2 %v1523_v33 }
  0x4d   :  { %1071 = vmatpush.bf16.msra.mxu3 %v1587_v41  ;;  %v2481_v41 = vor.u32 %v1735_v32, %v1330_v31 }
  0x50   :  { %1023 = vmatpush.bf16.msra.mxu2 %v1515_v57  ;;  %v1350_v57 = vld [vmem:[%s2972_s0 + $0xb0] sm:$0xf] }
  0x51   :  { %1072 = vmatpush.bf16.msra.mxu3 %v1579_v1  ;;  %v1344_v1 = vld [vmem:[%s2972_s0 + $0xbc] sm:$0xf0] }
  0x52   :  { %v2543_v13 = vor.u32 %v1737_v62, %v1344_v1  ;;  %v1772_v1 = vld [vmem:[%s2971_s1 + $0x84] sm:$0xf] }
  0x53   :  { %769 = vmatmul.bf16.gmra.mxu2 %v2284_v6 }
  0x54   :  { %749 = vmatmul.bf16.gmra.mxu0 %v2286_v7  ;;  %1024 = vmatpush.bf16.msra.mxu2 %v1507_v22  ;;  %v1491_v22 = vor.u32 %v1774_v19, %v1488_v20  ;;  %v1480_v19 = vld [vmem:[%s2971_s1 + $0x88] sm:$0xf0]  ;;  %v1788_v20 = vld [vmem:[%s2971_s1 + $0x104] sm:$0xf] }
  0x55   :  { %1073 = vmatpush.bf16.msra.mxu3 %v1571_v24  ;;  %v1483_v21 = vor.u32 %v1772_v1, %v1480_v19 }
  0x56   :  { %818 = vmatmul.bf16.gmra.mxu3 %v2288_v9  ;;  %798 = vmatmul.bf16.gmra.mxu1 %v2290_v11 }
  0x58   :  { %1025 = vmatpush.bf16.msra.mxu2 %v1499_v48 }
  0x59   :  { %1074 = vmatpush.bf16.msra.mxu3 %v1563_v50 }
  0x5c   :  { %1026 = vmatpush.bf16.msra.mxu2 %v1491_v22  ;;  %v1544_v22 = vld [vmem:[%s2971_s1 + $0x108] sm:$0xf0] }
  0x5d   :  { %1075 = vmatpush.bf16.msra.mxu3 %v1555_v25 }
  0x60   :  { %1027 = vmatpush.bf16.msra.mxu2 %v1483_v21 }
  0x63   :  { %832 = vmatmul.bf16.vlgmr.msrb.gmra.mxu2 %v2332_v27 }
  0x64   :  { %1700 = vmatmul.msk.bf16.vlgmr.msrb.gmra.mxu0 %vm701_vm0, %v2334_v28 }
  0x66   :  { %881 = vmatmul.bf16.vlgmr.msrb.gmra.mxu3 %v2336_v29  ;;  %979 = vmatmul.bf16.vlgmr.msrb.gmra.mxu1 %v2013_v4  ;;  %v1688_v4 = vld [vmem:[%s2971_s1 + $0x228] sm:$0xf0] }
  0x67   :  { %v1691_v44 = vor.u32 %v1824_v43, %v1688_v4  ;;  %v1822_v43 = vld [vmem:[%s2971_s1 + $0x214] sm:$0xf]  ;;  %v1680_v4 = vld [vmem:[%s2971_s1 + $0x218] sm:$0xf0] }
  0x69   :  { %1172 = vmatpush.bf16.msra.mxu1 %v1691_v44  ;;  %v1683_v44 = vor.u32 %v1822_v43, %v1680_v4  ;;  %v1370_v43 = vld [vmem:[%s2972_s0 + $0xd8] sm:$0xf]  ;;  %v1745_v4 = vld [vmem:[%s2972_s0 + $0xe8] sm:$0xf0] }
  0x6a   :  { %v2601_v54 = vor.u32 %v1745_v4, %v1370_v43  ;;  %v1749_v43 = vld [vmem:[%s2972_s0 + $0x108] sm:$0xf0]  ;;  %v1390_v4 = vld [vmem:[%s2972_s0 + $0x100] sm:$0xf] }
  0x6d   :  { %1173 = vmatpush.bf16.msra.mxu1 %v1683_v44 }
  0x73   :  { %837 = vmatmul.bf16.gmra.mxu2 %v2385_v51 }
  0x74   :  { %1701 = vmatmul.msk.bf16.gmra.mxu0 %vm701_vm0, %v2387_v52 }
  0x76   :  { %886 = vmatmul.bf16.gmra.mxu3 %v2389_v53  ;;  %984 = vmatmul.bf16.gmra.mxu1 %v2133_v59  ;;  %v1302_v59 = vld [vmem:[%s2972_s0 + $0x58] sm:$0xf] }
  0x77   :  { %v2432_v16 = vor.u32 %v1729_v5, %v1302_v59  ;;  %v2534_v59 = vor.u32 %v1740_v60, %v1350_v57  ;;  %v2539_v5 = vld [vmem:[%s2973_s2] sm:$0x3]  ;;  %v1820_v57 = vld [vmem:[%s2971_s1 + $0x204] sm:$0xf]  ;;  %v1672_v60 = vld [vmem:[%s2971_s1 + $0x208] sm:$0xf0] }
  0x78   :  { %2978 = vst [vmem:[#allocation2_spill] sm:$0xff] %v2539_v5  ;;  %v2548_v15 = vperm.slane %v2539_v5, 0  ;;  %v1675_v62 = vor.u32 %v1820_v57, %v1672_v60 }
  0x7a   :  { %1174 = vmatpush.bf16.msra.mxu1 %v1675_v62 }
  0x83   :  { %842 = vmatmul.bf16.gmra.mxu2 %v2432_v16 }
  0x84   :  { %1702 = vmatmul.msk.bf16.gmra.mxu0 %vm701_vm0, %v2434_v17 }
  0x86   :  { %891 = vmatmul.bf16.gmra.mxu3 %v2436_v18  ;;  %989 = vmatmul.bf16.gmra.mxu1 %v2220_v38  ;;  %v1632_v38 = vld [vmem:[%s2971_s1 + $0x1b8] sm:$0xf0] }
  0x87   :  { %v1635_v33 = vor.u32 %v1810_v26, %v1632_v38 }
  0x89   :  { %1122 = vmatpush.bf16.msra.mxu0 %v1635_v33  ;;  %v1806_v33 = vld [vmem:[%s2971_s1 + $0x194] sm:$0xf] }
  0x8a   :  { %v1619_v44 = vor.u32 %v1806_v33, %v1616_v34  ;;  %v1804_v34 = vld [vmem:[%s2971_s1 + $0x184] sm:$0xf] }
  0x93   :  { %847 = vmatmul.bf16.gmra.mxu2 %v2479_v36 }
  0x94   :  { %1703 = vmatmul.msk.bf16.gmra.mxu0 %vm701_vm0, %v2481_v41 }
  0x96   :  { %896 = vmatmul.bf16.gmra.mxu3 %v2483_v42  ;;  %994 = vmatmul.bf16.gmra.mxu1 %v2286_v7  ;;  %v1624_v7 = vld [vmem:[%s2971_s1 + $0x1a8] sm:$0xf0] }
  0x97   :  { %v1627_v61 = vor.u32 %v1808_v55, %v1624_v7  ;;  %v2605_v7 = vor.u32 %v1742_v45, %v1364_v46  ;;  %v1747_v46 = vld [vmem:[%s2972_s0 + $0xfc] sm:$0xf] }
  0x99   :  { %1123 = vmatpush.bf16.msra.mxu0 %v1627_v61 }
  0x9d   :  { %1124 = vmatpush.bf16.msra.mxu0 %v1619_v44  ;;  %v1750_v44 = vld [vmem:[%s2972_s0 + $0x110] sm:$0xf0] }
  0x9e   :  { %v2668_v62 = vor.u32 %v1750_v44, %v1390_v4  ;;  %v1752_v4 = vld [vmem:[%s2972_s0 + $0x124] sm:$0xf]  ;;  %v1404_v44 = vld [vmem:[%s2972_s0 + $0x134] sm:$0xf0] }
  0xa0   :  { %v2541_v12 = vpop.f32.mrf.mxu0 }
  0xa3   :  { %v2545_v14 = vpop.f32.mrf.mxu1  ;;  %852 = vmatmul.bf16.gmra.mxu2 %v2532_v2 }
  0xa4   :  { %1704 = vmatmul.msk.bf16.gmra.mxu0 %vm701_vm0, %v2534_v59 }
  0xa6   :  { %901 = vmatmul.bf16.gmra.mxu3 %v2543_v13  ;;  %999 = vmatmul.bf16.gmra.mxu1 %v2011_v3  ;;  %v755_v24 = vpop.f32.mrf.mxu2  ;;  %v1362_v3 = vld [vmem:[%s2972_s0 + $0xd0] sm:$0xf] }
  0xa7   :  { %v756_v26 = vadd.f32 %v755_v24, %v2548_v15  ;;  %v804_v38 = vpop.f32.mrf.mxu3  ;;  %v2599_v50 = vor.u32 %v1744_v35, %v1362_v3  ;;  %v1547_v24 = vor.u32 %v1788_v20, %v1544_v22  ;;  %v1608_v35 = vld [vmem:[%s2971_s1 + $0x188] sm:$0xf0] }
  0xa8   :  { %v2568_v30 = vpop.f32.mrf.mxu0  ;;  %v1611_v45 = vor.u32 %v1804_v34, %v1608_v35  ;;  %v1402_v34 = vld [vmem:[%s2972_s0 + $0x120] sm:$0xf]  ;;  %v1754_v35 = vld [vmem:[%s2972_s0 + $0x130] sm:$0xf0] }
  0xa9   :  { %v2570_v31 = vadd.f32 %v804_v38, %v756_v26  ;;  %1076 = vmatpush.bf16.msra.mxu3 %v1547_v24 }
  0xaa   :  { %1125 = vmatpush.bf16.msra.mxu0 %v1611_v45 }
  0xab   :  { %v2572_v32 = vpop.f32.mrf.mxu1 }
  0xae   :  { %v757_v47 = vpop.f32.mrf.mxu2 }
  0xaf   :  { %v758_v48 = vadd.f32 %v757_v47, %v2548_v15  ;;  %v806_v49 = vpop.f32.mrf.mxu3  ;;  %v1384_v47 = vld [vmem:[%s2972_s0 + $0x10c] sm:$0xf0] }
  0xb0   :  { %v2672_v19 = vor.u32 %v1747_v46, %v1384_v47 }
  0xb1   :  { %v2603_v55 = vpop.f32.mrf.mxu0  ;;  %v2607_v56 = vadd.f32 %v806_v49, %v758_v48 }
  0xb3   :  { %v2615_v61 = vpop.f32.mrf.mxu1  ;;  %857 = vmatmul.bf16.gmra.mxu2 %v2599_v50 }
  0xb4   :  { %1705 = vmatmul.msk.bf16.gmra.mxu0 %vm701_vm0, %v2601_v54 }
  0xb6   :  { %906 = vmatmul.bf16.gmra.mxu3 %v2605_v7  ;;  %1004 = vmatmul.bf16.gmra.mxu1 %v2131_v58  ;;  %v760_v23 = vpop.f32.mrf.mxu2  ;;  %v1382_v58 = vld [vmem:[%s2972_s0 + $0xf8] sm:$0xf] }
  0xb7   :  { %v761_v25 = vadd.f32 %v760_v23, %v2548_v15  ;;  %v2666_v60 = vor.u32 %v1749_v43, %v1382_v58  ;;  %v1755_v43 = vld [vmem:[%s2972_s0 + $0x138] sm:$0xf0] }
  0xb9   :  { %v809_v26 = vpop.f32.mrf.mxu3  ;;  %v2635_v38 = vpop.f32.mrf.mxu0 }
  0xba   :  { %v2637_v3 = vadd.f32 %v809_v26, %v761_v25 }
  0xbb   :  { %v2639_v33 = vpop.f32.mrf.mxu1 }
  0xbe   :  { %v762_v48 = vpop.f32.mrf.mxu2 }
  0xbf   :  { %v763_v49 = vadd.f32 %v762_v48, %v2548_v15  ;;  %v2709_v48 = vor.u32 %v1754_v35, %v1402_v34 }
  0xc1   :  { %v811_v57 = vpop.f32.mrf.mxu3  ;;  %v2670_v1 = vpop.f32.mrf.mxu0  ;;  %2979 = vst [vmem:[#allocation3_spill] sm:$0xff] %v2709_v48 }
  0xc2   :  { %v2674_v20 = vadd.f32 %v811_v57, %v763_v49 }
  0xc3   :  { %v2676_v21 = vpop.f32.mrf.mxu1  ;;  %862 = vmatmul.bf16.gmra.mxu2 %v2666_v60 }
  0xc4   :  { %1706 = vmatmul.msk.bf16.gmra.mxu0 %vm701_vm0, %v2668_v62 }
  0xc6   :  { %911 = vmatmul.bf16.gmra.mxu3 %v2672_v19  ;;  %1009 = vmatmul.bf16.gmra.mxu1 %v2218_v37  ;;  %v765_v22 = vpop.f32.mrf.mxu2  ;;  %v1410_v37 = vld [vmem:[%s2972_s0 + $0x128] sm:$0xf] }
  0xc7   :  { %v766_v23 = vadd.f32 %v765_v22, %v2548_v15  ;;  %v2711_v49 = vor.u32 %v1755_v43, %v1410_v37  ;;  %v2715_v22 = vor.u32 %v1752_v4, %v1404_v44 }
  0xc9   :  { %v814_v24 = vpop.f32.mrf.mxu3  ;;  %v2684_v25 = vpop.f32.mrf.mxu0  ;;  %2980 = vst [vmem:[#allocation4_spill] sm:$0xff] %v2711_v49 }
  0xca   :  { %v2686_v26 = vadd.f32 %v814_v24, %v766_v23 }
  0xcb   :  { %v2688_v58 = vpop.f32.mrf.mxu1 }
  0xce   :  { %v767_v45 = vpop.f32.mrf.mxu2 }
  0xcf   :  { %v768_v46 = vadd.f32 %v767_v45, %v2548_v15 }
  0xd1   :  { %v816_v47 = vpop.f32.mrf.mxu3  ;;  %v2713_v57 = vpop.f32.mrf.mxu0 }
  0xd2   :  { %v2717_v23 = vadd.f32 %v816_v47, %v768_v46 }
  0xd3   :  { %v2719_v24 = vpop.f32.mrf.mxu1  ;;  %867 = vmatmul.bf16.gmra.mxu2 %v2709_v48 }
  0xd4   :  { %1707 = vmatmul.msk.bf16.gmra.mxu0 %vm701_vm0, %v2711_v49  ;;  %v736_v49 = vadd.f32 %v2541_v12, %v2548_v15  ;;  %v738_v12 = vadd.f32 %v2568_v30, %v2548_v15 }
  0xd6   :  { %916 = vmatmul.bf16.gmra.mxu3 %v2715_v22  ;;  %1014 = vmatmul.bf16.gmra.mxu1 %v2284_v6  ;;  %v770_v34 = vpop.f32.mrf.mxu2 }
  0xd7   :  { %v771_v35 = vadd.f32 %v770_v34, %v2548_v15  ;;  %v785_v34 = vadd.f32 %v2545_v14, %v736_v49 }
  0xd9   :  { %v819_v37 = vpop.f32.mrf.mxu3  ;;  %v2727_v43 = vpop.f32.mrf.mxu0 }
  0xda   :  { %v2729_v4 = vadd.f32 %v819_v37, %v771_v35 }
  0xdb   :  { %v2731_v44 = vpop.f32.mrf.mxu1 }
  0xdc   :  { %2981 = vst [vmem:[#allocation5_spill] sm:$0xff] %v2729_v4 }
  0xde   :  { %v772_v45 = vpop.f32.mrf.mxu2 }
  0xdf   :  { %v773_v46 = vadd.f32 %v772_v45, %v2548_v15 }
  0xe1   :  { %v821_v47 = vpop.f32.mrf.mxu3  ;;  %v931_v5 = vpop.f32.mrf.mxu0 }
  0xe2   :  { %v2736_v48 = vadd.f32 %v821_v47, %v773_v46 }
  0xe3   :  { %v2738_v6 = vpop.f32.mrf.mxu1  ;;  %1028 = vmatmul.bf16.vlgmr.msra.gmra.mxu2 %v2026_v10 }
  0xe4   :  { %2982 = vst [vmem:[#allocation6_spill] sm:$0xff] %v2738_v6  ;;  %1126 = vmatmul.bf16.vlgmr.msra.gmra.mxu0 %v2336_v29  ;;  %v787_v29 = vadd.f32 %v2572_v32, %v738_v12 }
  0xe6   :  { %1077 = vmatmul.bf16.vlgmr.msra.gmra.mxu3 %v2332_v27  ;;  %1708 = vmatmul.msk.bf16.vlgmr.msra.gmra.mxu1 %vm701_vm0, %v2334_v28  ;;  %v833_v35 = vpop.f32.mrf.mxu2 }
  0xe7   :  { %v834_v37 = vadd.f32 %v833_v35, %v785_v34  ;;  %v741_v34 = vadd.f32 %v2603_v55, %v2548_v15 }
  0xe9   :  { %v882_v45 = vpop.f32.mrf.mxu3  ;;  %v933_v4 = vpop.f32.mrf.mxu0 }
  0xea   :  { %v883_v46 = vadd.f32 %v882_v45, %v834_v37 }
  0xeb   :  { %v2748_v47 = vpop.f32.mrf.mxu1 }
  0xec   :  { %v932_v10 = vadd.f32 %v931_v5, %v883_v46  ;;  %v790_v5 = vadd.f32 %v2615_v61, %v741_v34 }
  0xee   :  { %1216 = vst [vmem:[%s2974_s3] sm:$0xff] %v932_v10  ;;  %v835_v27 = vpop.f32.mrf.mxu2 }
  0xef   :  { %v836_v14 = vadd.f32 %v835_v27, %v787_v29  ;;  %v746_v29 = vadd.f32 %v2670_v1, %v2548_v15 }
  0xf1   :  { %v884_v28 = vpop.f32.mrf.mxu3  ;;  %v936_v49 = vpop.f32.mrf.mxu0 }
  0xf2   :  { %v885_v35 = vadd.f32 %v884_v28, %v836_v14 }
  0xf3   :  { %v2756_v6 = vpop.f32.mrf.mxu1  ;;  %1033 = vmatmul.bf16.gmra.mxu2 %v2146_v0  ;;  %v743_v0 = vadd.f32 %v2635_v38, %v2548_v15 }
  0xf4   :  { %v934_v30 = vadd.f32 %v933_v4, %v885_v35  ;;  %1131 = vmatmul.bf16.gmra.mxu0 %v2389_v53 }
  0xf5   :  { %v792_v61 = vadd.f32 %v2639_v33, %v743_v0  ;;  %v795_v33 = vadd.f32 %v2676_v21, %v746_v29 }
  0xf6   :  { %1082 = vmatmul.bf16.gmra.mxu3 %v2385_v51  ;;  %1218 = vst [vmem:[%s2974_s3 + $0x10] sm:$0xff] %v934_v30  ;;  %1709 = vmatmul.msk.bf16.gmra.mxu1 %vm701_vm0, %v2387_v52  ;;  %v838_v32 = vpop.f32.mrf.mxu2 }
  0xf7   :  { %v839_v55 = vadd.f32 %v838_v32, %v790_v5 }
  0xf9   :  { %v887_v37 = vpop.f32.mrf.mxu3  ;;  %v938_v45 = vpop.f32.mrf.mxu0 }
  0xfa   :  { %v888_v4 = vadd.f32 %v887_v37, %v839_v55  ;;  %v751_v55 = vadd.f32 %v2713_v57, %v2548_v15 }
  0xfb   :  { %v2769_v53 = vpop.f32.mrf.mxu1 }
  0xfc   :  { %v937_v51 = vadd.f32 %v936_v49, %v888_v4 }
  0xfe   :  { %1220 = vst [vmem:[%s2974_s3 + $0x20] sm:$0xff] %v937_v51  ;;  %v840_v12 = vpop.f32.mrf.mxu2 }
  0xff   :  { %v841_v46 = vadd.f32 %v840_v12, %v792_v61 }
 0x101   :  { %v889_v52 = vpop.f32.mrf.mxu3  ;;  %v941_v10 = vpop.f32.mrf.mxu0 }
 0x102   :  { %v890_v27 = vadd.f32 %v889_v52, %v841_v46 }
 0x103   :  { %v2777_v14 = vpop.f32.mrf.mxu1  ;;  %1038 = vmatmul.bf16.gmra.mxu2 %v2224_v40  ;;  %v748_v40 = vadd.f32 %v2684_v25, %v2548_v15 }
 0x104   :  { %v939_v38 = vadd.f32 %v938_v45, %v890_v27  ;;  %1136 = vmatmul.bf16.gmra.mxu0 %v2436_v18 }
 0x105   :  { %v797_v21 = vadd.f32 %v2688_v58, %v748_v40  ;;  %v800_v58 = vadd.f32 %v2719_v24, %v751_v55 }
 0x106   :  { %1087 = vmatmul.bf16.gmra.mxu3 %v2432_v16  ;;  %1222 = vst [vmem:[%s2974_s3 + $0x30] sm:$0xff] %v939_v38  ;;  %1710 = vmatmul.msk.bf16.gmra.mxu1 %vm701_vm0, %v2434_v17  ;;  %v843_v1 = vpop.f32.mrf.mxu2 }
 0x107   :  { %v844_v28 = vadd.f32 %v843_v1, %v795_v33 }
 0x109   :  { %v892_v49 = vpop.f32.mrf.mxu3  ;;  %v943_v34 = vpop.f32.mrf.mxu0 }
 0x10a   :  { %v893_v35 = vadd.f32 %v892_v49, %v844_v28 }
 0x10b   :  { %v2790_v18 = vpop.f32.mrf.mxu1 }
 0x10c   :  { %v942_v16 = vadd.f32 %v941_v10, %v893_v35 }
 0x10e   :  { %1224 = vst [vmem:[%s2974_s3 + $0x40] sm:$0xff] %v942_v16  ;;  %v845_v30 = vpop.f32.mrf.mxu2 }
 0x10f   :  { %v846_v5 = vadd.f32 %v845_v30, %v797_v21 }
 0x111   :  { %v894_v17 = vpop.f32.mrf.mxu3  ;;  %v946_v32 = vpop.f32.mrf.mxu0 }
 0x112   :  { %v895_v37 = vadd.f32 %v894_v17, %v846_v5 }
 0x113   :  { %v2798_v45 = vpop.f32.mrf.mxu1  ;;  %1043 = vmatmul.bf16.gmra.mxu2 %v2290_v11  ;;  %v753_v11 = vadd.f32 %v2727_v43, %v2548_v15 }
 0x114   :  { %v944_v25 = vadd.f32 %v943_v34, %v895_v37  ;;  %1141 = vmatmul.bf16.gmra.mxu0 %v2483_v42 }
 0x115   :  { %v802_v24 = vadd.f32 %v2731_v44, %v753_v11 }
 0x116   :  { %1092 = vmatmul.bf16.gmra.mxu3 %v2479_v36  ;;  %1226 = vst [vmem:[%s2974_s3 + $0x50] sm:$0xff] %v944_v25  ;;  %1711 = vmatmul.msk.bf16.gmra.mxu1 %vm701_vm0, %v2481_v41  ;;  %v848_v57 = vpop.f32.mrf.mxu2 }
 0x117   :  { %v849_v0 = vadd.f32 %v848_v57, %v800_v58 }
 0x119   :  { %v897_v4 = vpop.f32.mrf.mxu3  ;;  %v948_v51 = vpop.f32.mrf.mxu0 }
 0x11a   :  { %v898_v61 = vadd.f32 %v897_v4, %v849_v0 }
 0x11b   :  { %v2811_v42 = vpop.f32.mrf.mxu1 }
 0x11c   :  { %v947_v36 = vadd.f32 %v946_v32, %v898_v61  ;;  %v2984_v61 = vld [vmem:[#allocation4_spill] sm:$0xff] }
 0x11e   :  { %1228 = vst [vmem:[%s2974_s3 + $0x60] sm:$0xff] %v947_v36  ;;  %v850_v12 = vpop.f32.mrf.mxu2  ;;  %v2985_v36 = vld [vmem:[#allocation5_spill] sm:$0xff] }
 0x11f   :  { %v851_v46 = vadd.f32 %v850_v12, %v802_v24 }
 0x121   :  { %v899_v41 = vpop.f32.mrf.mxu3  ;;  %v951_v52 = vpop.f32.mrf.mxu0 }
 0x122   :  { %v900_v10 = vadd.f32 %v899_v41, %v851_v46 }
 0x123   :  { %v2817_v29 = vpop.f32.mrf.mxu1  ;;  %1048 = vmatmul.bf16.gmra.mxu2 %v2024_v8 }
 0x124   :  { %v949_v27 = vadd.f32 %v948_v51, %v900_v10  ;;  %1146 = vmatmul.bf16.gmra.mxu0 %v2543_v13 }
 0x126   :  { %1097 = vmatmul.bf16.gmra.mxu3 %v2532_v2  ;;  %1230 = vst [vmem:[%s2974_s3 + $0x70] sm:$0xff] %v949_v27  ;;  %1712 = vmatmul.msk.bf16.gmra.mxu1 %vm701_vm0, %v2534_v59  ;;  %v853_v15 = vpop.f32.mrf.mxu2 }
 0x127   :  { %v854_v43 = vadd.f32 %v853_v15, %v2570_v31 }
 0x129   :  { %v902_v44 = vpop.f32.mrf.mxu3  ;;  %v953_v38 = vpop.f32.mrf.mxu0 }
 0x12a   :  { %v903_v33 = vadd.f32 %v902_v44, %v854_v43  ;;  %v2986_v43 = vld [vmem:[#allocation2_spill] sm:$0xff] }
 0x12b   :  { %v2828_v1 = vpop.f32.mrf.mxu1  ;;  %v2886_v44 = vperm.slane %v2986_v43, 1 }
 0x12c   :  { %v952_v8 = vadd.f32 %v951_v52, %v903_v33 }
 0x12e   :  { %1232 = vst [vmem:[%s2974_s3 + $0x80] sm:$0xff] %v952_v8  ;;  %v855_v2 = vpop.f32.mrf.mxu2 }
 0x12f   :  { %v856_v13 = vadd.f32 %v855_v2, %v2607_v56  ;;  %v2987_v2 = vld [vmem:[#allocation6_spill] sm:$0xff] }
 0x131   :  { %v904_v28 = vpop.f32.mrf.mxu3  ;;  %v956_v49 = vpop.f32.mrf.mxu0 }
 0x132   :  { %v905_v34 = vadd.f32 %v904_v28, %v856_v13  ;;  %v981_v13 = vadd.f32 %v2987_v2, %v2886_v44 }
 0x133   :  { %v2834_v59 = vpop.f32.mrf.mxu1  ;;  %1053 = vmatmul.bf16.gmra.mxu2 %v2144_v63 }
 0x134   :  { %v954_v40 = vadd.f32 %v953_v38, %v905_v34  ;;  %1151 = vmatmul.bf16.gmra.mxu0 %v2605_v7 }
 0x136   :  { %1102 = vmatmul.bf16.gmra.mxu3 %v2599_v50  ;;  %1234 = vst [vmem:[%s2974_s3 + $0x90] sm:$0xff] %v954_v40  ;;  %1713 = vmatmul.msk.bf16.gmra.mxu1 %vm701_vm0, %v2601_v54  ;;  %v858_v31 = vpop.f32.mrf.mxu2 }
 0x137   :  { %v859_v56 = vadd.f32 %v858_v31, %v2637_v3 }
 0x139   :  { %v907_v35 = vpop.f32.mrf.mxu3  ;;  %v958_v16 = vpop.f32.mrf.mxu0 }
 0x13a   :  { %v908_v21 = vadd.f32 %v907_v35, %v859_v56  ;;  %v983_v35 = vadd.f32 %v2748_v47, %v2886_v44 }
 0x13b   :  { %v2845_v30 = vpop.f32.mrf.mxu1 }
 0x13c   :  { %v957_v63 = vadd.f32 %v956_v49, %v908_v21 }
 0x13e   :  { %1236 = vst [vmem:[%s2974_s3 + $0xa0] sm:$0xff] %v957_v63  ;;  %v860_v50 = vpop.f32.mrf.mxu2 }
 0x13f   :  { %v861_v7 = vadd.f32 %v860_v50, %v2674_v20 }
 0x141   :  { %v909_v5 = vpop.f32.mrf.mxu3  ;;  %v961_v17 = vpop.f32.mrf.mxu0 }
 0x142   :  { %v910_v32 = vadd.f32 %v909_v5, %v861_v7 }
 0x143   :  { %v2851_v54 = vpop.f32.mrf.mxu1  ;;  %1058 = vmatmul.bf16.gmra.mxu2 %v2222_v39 }
 0x144   :  { %v959_v55 = vadd.f32 %v958_v16, %v910_v32  ;;  %1156 = vmatmul.bf16.gmra.mxu0 %v2672_v19 }
 0x146   :  { %1107 = vmatmul.bf16.gmra.mxu3 %v2666_v60  ;;  %1238 = vst [vmem:[%s2974_s3 + $0xb0] sm:$0xff] %v959_v55  ;;  %1714 = vmatmul.msk.bf16.gmra.mxu1 %vm701_vm0, %v2668_v62  ;;  %v863_v3 = vpop.f32.mrf.mxu2  ;;  %v986_v55 = vadd.f32 %v2756_v6, %v2886_v44 }
 0x147   :  { %v864_v20 = vadd.f32 %v863_v3, %v2686_v26  ;;  %v2983_v26 = vld [vmem:[#allocation3_spill] sm:$0xff] }
 0x149   :  { %v912_v37 = vpop.f32.mrf.mxu3  ;;  %v963_v25 = vpop.f32.mrf.mxu0 }
 0x14a   :  { %v913_v58 = vadd.f32 %v912_v37, %v864_v20 }
 0x14b   :  { %v2862_v57 = vpop.f32.mrf.mxu1 }
 0x14c   :  { %v962_v39 = vadd.f32 %v961_v17, %v913_v58 }
 0x14e   :  { %1240 = vst [vmem:[%s2974_s3 + $0xc0] sm:$0xff] %v962_v39  ;;  %v865_v60 = vpop.f32.mrf.mxu2 }
 0x14f   :  { %v866_v19 = vadd.f32 %v865_v60, %v2717_v23 }
 0x151   :  { %v914_v0 = vpop.f32.mrf.mxu3  ;;  %v966_v4 = vpop.f32.mrf.mxu0 }
 0x152   :  { %v915_v51 = vadd.f32 %v914_v0, %v866_v19  ;;  %v988_v19 = vadd.f32 %v2769_v53, %v2886_v44 }
 0x153   :  { %v2868_v62 = vpop.f32.mrf.mxu1  ;;  %1063 = vmatmul.bf16.gmra.mxu2 %v2288_v9 }
 0x154   :  { %v964_v11 = vadd.f32 %v963_v25, %v915_v51  ;;  %1161 = vmatmul.bf16.gmra.mxu0 %v2715_v22 }
 0x156   :  { %1112 = vmatmul.bf16.gmra.mxu3 %v2983_v26  ;;  %1242 = vst [vmem:[%s2974_s3 + $0xd0] sm:$0xff] %v964_v11  ;;  %1715 = vmatmul.msk.bf16.gmra.mxu1 %vm701_vm0, %v2984_v61  ;;  %v868_v23 = vpop.f32.mrf.mxu2 }
 0x157   :  { %v869_v24 = vadd.f32 %v868_v23, %v2985_v36  ;;  %v991_v36 = vadd.f32 %v2777_v14, %v2886_v44 }
 0x159   :  { %v917_v12 = vpop.f32.mrf.mxu3  ;;  %v968_v46 = vpop.f32.mrf.mxu0 }
 0x15a   :  { %v918_v41 = vadd.f32 %v917_v12, %v869_v24 }
 0x15b   :  { %v2879_v52 = vpop.f32.mrf.mxu1 }
 0x15c   :  { %v967_v9 = vadd.f32 %v966_v4, %v918_v41 }
 0x15e   :  { %1244 = vst [vmem:[%s2974_s3 + $0xe0] sm:$0xff] %v967_v9  ;;  %v870_v22 = vpop.f32.mrf.mxu2 }
 0x15f   :  { %v871_v10 = vadd.f32 %v870_v22, %v2736_v48 }
 0x161   :  { %v919_v27 = vpop.f32.mrf.mxu3  ;;  %v1127_v15 = vpop.f32.mrf.mxu0 }
 0x162   :  { %v920_v38 = vadd.f32 %v919_v27, %v871_v10  ;;  %v993_v27 = vadd.f32 %v2790_v18, %v2886_v44 }
 0x163   :  { %v1176_v33 = vpop.f32.mrf.mxu1 }
 0x164   :  { %v969_v8 = vadd.f32 %v968_v46, %v920_v38 }
 0x166   :  { %1246 = vst [vmem:[%s2974_s3 + $0xf0] sm:$0xff] %v969_v8  ;;  %v1029_v28 = vpop.f32.mrf.mxu2 }
 0x167   :  { %v1030_v49 = vadd.f32 %v1029_v28, %v981_v13  ;;  %v996_v28 = vadd.f32 %v2798_v45, %v2886_v44 }
 0x169   :  { %v1078_v34 = vpop.f32.mrf.mxu3  ;;  %v1129_v40 = vpop.f32.mrf.mxu0 }
 0x16a   :  { %v1079_v48 = vadd.f32 %v1078_v34, %v1030_v49 }
 0x16b   :  { %v1178_v31 = vpop.f32.mrf.mxu1 }
 0x16c   :  { %v1128_v56 = vadd.f32 %v1127_v15, %v1079_v48 }
 0x16e   :  { %v1177_v16 = vadd.f32 %v1176_v33, %v1128_v56  ;;  %v1031_v21 = vpop.f32.mrf.mxu2 }
 0x16f   :  { %v1032_v63 = vadd.f32 %v1031_v21, %v983_v35 }
 0x170   :  { %1217 = vst [vmem:[%s2974_s3 + $0x8] sm:$0xff] %v1177_v16  ;;  %v998_v16 = vadd.f32 %v2811_v42, %v2886_v44 }
 0x171   :  { %v1080_v50 = vpop.f32.mrf.mxu3  ;;  %v1132_v7 = vpop.f32.mrf.mxu0 }
 0x172   :  { %v1081_v5 = vadd.f32 %v1080_v50, %v1032_v63 }
 0x173   :  { %v1181_v17 = vpop.f32.mrf.mxu1 }
 0x174   :  { %v1130_v32 = vadd.f32 %v1129_v40, %v1081_v5 }
 0x176   :  { %v1179_v3 = vadd.f32 %v1178_v31, %v1130_v32  ;;  %v1034_v20 = vpop.f32.mrf.mxu2 }
 0x177   :  { %v1035_v47 = vadd.f32 %v1034_v20, %v986_v55  ;;  %v1001_v55 = vadd.f32 %v2817_v29, %v2886_v44 }
 0x178   :  { %1219 = vst [vmem:[%s2974_s3 + $0x18] sm:$0xff] %v1179_v3 }
 0x179   :  { %v1083_v37 = vpop.f32.mrf.mxu3  ;;  %v1134_v25 = vpop.f32.mrf.mxu0 }
 0x17a   :  { %v1084_v58 = vadd.f32 %v1083_v37, %v1035_v47 }
 0x17b   :  { %v1183_v39 = vpop.f32.mrf.mxu1 }
 0x17c   :  { %v1133_v60 = vadd.f32 %v1132_v7, %v1084_v58 }
 0x17e   :  { %v1182_v0 = vadd.f32 %v1181_v17, %v1133_v60  ;;  %v1036_v4 = vpop.f32.mrf.mxu2  ;;  %v1003_v60 = vadd.f32 %v2828_v1, %v2886_v44 }
 0x17f   :  { %v1037_v6 = vadd.f32 %v1036_v4, %v988_v19 }
 0x180   :  { %1221 = vst [vmem:[%s2974_s3 + $0x28] sm:$0xff] %v1182_v0 }
 0x181   :  { %v1085_v51 = vpop.f32.mrf.mxu3  ;;  %v1137_v11 = vpop.f32.mrf.mxu0 }
 0x182   :  { %v1086_v26 = vadd.f32 %v1085_v51, %v1037_v6 }
 0x183   :  { %v1186_v61 = vpop.f32.mrf.mxu1 }
 0x184   :  { %v1135_v23 = vadd.f32 %v1134_v25, %v1086_v26 }
 0x186   :  { %v1184_v24 = vadd.f32 %v1183_v39, %v1135_v23  ;;  %v1039_v12 = vpop.f32.mrf.mxu2 }
 0x187   :  { %v1040_v53 = vadd.f32 %v1039_v12, %v991_v36 }
 0x188   :  { %1223 = vst [vmem:[%s2974_s3 + $0x38] sm:$0xff] %v1184_v24 }
 0x189   :  { %v1088_v46 = vpop.f32.mrf.mxu3  ;;  %v1139_v41 = vpop.f32.mrf.mxu0 }
 0x18a   :  { %v1089_v9 = vadd.f32 %v1088_v46, %v1040_v53 }
 0x18b   :  { %v1188_v22 = vpop.f32.mrf.mxu1 }
 0x18c   :  { %v1138_v10 = vadd.f32 %v1137_v11, %v1089_v9  ;;  %v1008_v9 = vadd.f32 %v2845_v30, %v2886_v44 }
 0x18e   :  { %v1187_v15 = vadd.f32 %v1186_v61, %v1138_v10  ;;  %v1041_v43 = vpop.f32.mrf.mxu2  ;;  %v1006_v61 = vadd.f32 %v2834_v59, %v2886_v44 }
 0x18f   :  { %v1042_v14 = vadd.f32 %v1041_v43, %v993_v27 }
 0x190   :  { %1225 = vst [vmem:[%s2974_s3 + $0x48] sm:$0xff] %v1187_v15 }
 0x191   :  { %v1090_v38 = vpop.f32.mrf.mxu3  ;;  %v1142_v33 = vpop.f32.mrf.mxu0 }
 0x192   :  { %v1091_v8 = vadd.f32 %v1090_v38, %v1042_v14  ;;  %v1011_v38 = vadd.f32 %v2851_v54, %v2886_v44 }
 0x193   :  { %v1191_v2 = vpop.f32.mrf.mxu1 }
 0x194   :  { %v1140_v13 = vadd.f32 %v1139_v41, %v1091_v8 }
 0x196   :  { %v1189_v49 = vadd.f32 %v1188_v22, %v1140_v13  ;;  %v1044_v34 = vpop.f32.mrf.mxu2 }
 0x197   :  { %v1045_v18 = vadd.f32 %v1044_v34, %v996_v28  ;;  %v1013_v34 = vadd.f32 %v2862_v57, %v2886_v44 }
 0x198   :  { %1227 = vst [vmem:[%s2974_s3 + $0x58] sm:$0xff] %v1189_v49 }
 0x199   :  { %v1093_v40 = vpop.f32.mrf.mxu3  ;;  %v1144_v48 = vpop.f32.mrf.mxu0 }
 0x19a   :  { %v1094_v31 = vadd.f32 %v1093_v40, %v1045_v18 }
 0x19b   :  { %v1193_v56 = vpop.f32.mrf.mxu1 }
 0x19c   :  { %v1143_v35 = vadd.f32 %v1142_v33, %v1094_v31 }
 0x19e   :  { %v1192_v21 = vadd.f32 %v1191_v2, %v1143_v35  ;;  %v1046_v63 = vpop.f32.mrf.mxu2 }
 0x19f   :  { %v1047_v45 = vadd.f32 %v1046_v63, %v998_v16 }
 0x1a0   :  { %1229 = vst [vmem:[%s2974_s3 + $0x68] sm:$0xff] %v1192_v21  ;;  %v1016_v21 = vadd.f32 %v2868_v62, %v2886_v44 }
 0x1a1   :  { %v1095_v50 = vpop.f32.mrf.mxu3  ;;  %v1147_v7 = vpop.f32.mrf.mxu0 }
 0x1a2   :  { %v1096_v5 = vadd.f32 %v1095_v50, %v1047_v45 }
 0x1a3   :  { %v1196_v17 = vpop.f32.mrf.mxu1 }
 0x1a4   :  { %v1145_v32 = vadd.f32 %v1144_v48, %v1096_v5 }
 0x1a6   :  { %v1194_v3 = vadd.f32 %v1193_v56, %v1145_v32  ;;  %v1049_v20 = vpop.f32.mrf.mxu2 }
 0x1a7   :  { %v1050_v42 = vadd.f32 %v1049_v20, %v1001_v55  ;;  %v1018_v55 = vadd.f32 %v2879_v52, %v2886_v44 }
 0x1a8   :  { %1231 = vst [vmem:[%s2974_s3 + $0x78] sm:$0xff] %v1194_v3 }
 0x1a9   :  { %v1098_v47 = vpop.f32.mrf.mxu3  ;;  %v1149_v37 = vpop.f32.mrf.mxu0 }
 0x1aa   :  { %v1099_v25 = vadd.f32 %v1098_v47, %v1050_v42 }
 0x1ab   :  { %v1198_v58 = vpop.f32.mrf.mxu1 }
 0x1ac   :  { %v1148_v39 = vadd.f32 %v1147_v7, %v1099_v25 }
 0x1ae   :  { %v1197_v19 = vadd.f32 %v1196_v17, %v1148_v39  ;;  %v1051_v0 = vpop.f32.mrf.mxu2 }
 0x1af   :  { %v1052_v29 = vadd.f32 %v1051_v0, %v1003_v60 }
 0x1b0   :  { %1233 = vst [vmem:[%s2974_s3 + $0x88] sm:$0xff] %v1197_v19 }
 0x1b1   :  { %v1100_v4 = vpop.f32.mrf.mxu3  ;;  %v1152_v6 = vpop.f32.mrf.mxu0 }
 0x1b2   :  { %v1101_v51 = vadd.f32 %v1100_v4, %v1052_v29 }
 0x1b3   :  { %v1201_v11 = vpop.f32.mrf.mxu1 }
 0x1b4   :  { %v1150_v26 = vadd.f32 %v1149_v37, %v1101_v51 }
 0x1b6   :  { %v1199_v23 = vadd.f32 %v1198_v58, %v1150_v26  ;;  %v1054_v36 = vpop.f32.mrf.mxu2 }
 0x1b7   :  { %v1055_v1 = vadd.f32 %v1054_v36, %v1006_v61 }
 0x1b8   :  { %1235 = vst [vmem:[%s2974_s3 + $0x98] sm:$0xff] %v1199_v23 }
 0x1b9   :  { %v1103_v24 = vpop.f32.mrf.mxu3  ;;  %v1154_v53 = vpop.f32.mrf.mxu0 }
 0x1ba   :  { %v1104_v12 = vadd.f32 %v1103_v24, %v1055_v1 }
 0x1bb   :  { %v1203_v41 = vpop.f32.mrf.mxu1 }
 0x1bc   :  { %v1153_v46 = vadd.f32 %v1152_v6, %v1104_v12 }
 0x1be   :  { %v1202_v22 = vadd.f32 %v1201_v11, %v1153_v46  ;;  %v1056_v10 = vpop.f32.mrf.mxu2 }
 0x1bf   :  { %v1057_v59 = vadd.f32 %v1056_v10, %v1008_v9 }
 0x1c0   :  { %1237 = vst [vmem:[%s2974_s3 + $0xa8] sm:$0xff] %v1202_v22 }
 0x1c1   :  { %v1105_v27 = vpop.f32.mrf.mxu3  ;;  %v1157_v14 = vpop.f32.mrf.mxu0 }
 0x1c2   :  { %v1106_v15 = vadd.f32 %v1105_v27, %v1057_v59 }
 0x1c3   :  { %v1206_v8 = vpop.f32.mrf.mxu1 }
 0x1c4   :  { %v1155_v43 = vadd.f32 %v1154_v53, %v1106_v15 }
 0x1c6   :  { %v1204_v33 = vadd.f32 %v1203_v41, %v1155_v43  ;;  %v1059_v2 = vpop.f32.mrf.mxu2 }
 0x1c7   :  { %v1060_v30 = vadd.f32 %v1059_v2, %v1011_v38 }
 0x1c8   :  { %1239 = vst [vmem:[%s2974_s3 + $0xb8] sm:$0xff] %v1204_v33 }
 0x1c9   :  { %v1108_v13 = vpop.f32.mrf.mxu3  ;;  %v1159_v40 = vpop.f32.mrf.mxu0 }
 0x1ca   :  { %v1109_v28 = vadd.f32 %v1108_v13, %v1060_v30 }
 0x1cb   :  { %v1208_v56 = vpop.f32.mrf.mxu1 }
 0x1cc   :  { %v1158_v49 = vadd.f32 %v1157_v14, %v1109_v28 }
 0x1ce   :  { %v1207_v18 = vadd.f32 %v1206_v8, %v1158_v49  ;;  %v1061_v48 = vpop.f32.mrf.mxu2 }
 0x1cf   :  { %v1062_v54 = vadd.f32 %v1061_v48, %v1013_v34 }
 0x1d0   :  { %1241 = vst [vmem:[%s2974_s3 + $0xc8] sm:$0xff] %v1207_v18 }
 0x1d1   :  { %v1110_v31 = vpop.f32.mrf.mxu3  ;;  %v1162_v7 = vpop.f32.mrf.mxu0 }
 0x1d2   :  { %v1111_v35 = vadd.f32 %v1110_v31, %v1062_v54 }
 0x1d3   :  { %v1211_v17 = vpop.f32.mrf.mxu1 }
 0x1d4   :  { %v1160_v16 = vadd.f32 %v1159_v40, %v1111_v35 }
 0x1d6   :  { %v1209_v63 = vadd.f32 %v1208_v56, %v1160_v16  ;;  %v1064_v45 = vpop.f32.mrf.mxu2 }
 0x1d7   :  { %v1065_v57 = vadd.f32 %v1064_v45, %v1016_v21 }
 0x1d8   :  { %1243 = vst [vmem:[%s2974_s3 + $0xd8] sm:$0xff] %v1209_v63 }
 0x1d9   :  { %v1113_v50 = vpop.f32.mrf.mxu3  ;;  %v1164_v37 = vpop.f32.mrf.mxu0 }
 0x1da   :  { %v1114_v5 = vadd.f32 %v1113_v50, %v1065_v57 }
 0x1db   :  { %v1213_v58 = vpop.f32.mrf.mxu1 }
 0x1dc   :  { %v1163_v32 = vadd.f32 %v1162_v7, %v1114_v5 }
 0x1de   :  { %v1212_v3 = vadd.f32 %v1211_v17, %v1163_v32  ;;  %v1066_v20 = vpop.f32.mrf.mxu2 }
 0x1df   :  { %v1067_v62 = vadd.f32 %v1066_v20, %v1018_v55 }
 0x1e0   :  { %1245 = vst [vmem:[%s2974_s3 + $0xe8] sm:$0xff] %v1212_v3 }
 0x1e1   :  { %v1115_v42 = vpop.f32.mrf.mxu3 }
 0x1e2   :  { %v1116_v47 = vadd.f32 %v1115_v42, %v1067_v62 }
 0x1e4   :  { %v1165_v25 = vadd.f32 %v1164_v37, %v1116_v47 }
 0x1e6   :  { %v1214_v39 = vadd.f32 %v1213_v58, %v1165_v25 }
 0x1e8   :  { %1247 = vst [vmem:[%s2974_s3 + $0xf8] sm:$0xff] %v1214_v39 }

// kernel: generator_forward.18
= control target key start
LH: loop header
LB: loop body
LE: loop exit
PB: predicated region body
PF: predicated region fallthrough
CT: control target
= control target key end

     0   :  { %vm334_vm0 = vcmask 519168   ;;  %s1001_s0 = inlined_call_operand.vmem [shape: f32[512,64], index: 0, kind: input, shape index: {}]   ;;  %s1002_s1 = inlined_call_operand.vmem [shape: f32[2,64], index: 1, kind: input, shape index: {}]   ;;  %s1003_s2 = inlined_call_operand.vmem [shape: bf16[512,64], index: 2, kind: output, shape index: {}]  }
   0x1   :  { %v11_v0 = vld [vmem:[%s1001_s0] sm:$0xff]  ;;  %v12_v2 = vld [vmem:[%s1001_s0 + $0x8] sm:$0xff]  ;;  %v13_v5 = vld [vmem:[%s1001_s0 + $0x10] sm:$0xff] }
   0x2   :  { %v75_v1 = vld [vmem:[%s1002_s1] sm:$0x3]  ;;  %v14_v6 = vld [vmem:[%s1001_s0 + $0x18] sm:$0xff]  ;;  %v16_v8 = vld [vmem:[%s1001_s0 + $0x28] sm:$0xff] }
   0x3   :  { %v427_v3 = vperm.slane %v75_v1, 0  ;;  %v429_v4 = vperm.slane %v75_v1, 1  ;;  %v15_v7 = vld [vmem:[%s1001_s0 + $0x20] sm:$0xff]  ;;  %v17_v9 = vld [vmem:[%s1001_s0 + $0x30] sm:$0xff]  ;;  %v18_v10 = vld [vmem:[%s1001_s0 + $0x38] sm:$0xff] }
   0x4   :  { %v19_v27 = vld [vmem:[%s1001_s0 + $0x40] sm:$0xff]  ;;  %v20_v32 = vld [vmem:[%s1001_s0 + $0x48] sm:$0xff]  ;;  %v21_v33 = vld [vmem:[%s1001_s0 + $0x50] sm:$0xff] }
   0x5   :  { %v77_v11 = vmul.f32 %v427_v3, %v11_v0  ;;  %v78_v12 = vmul.f32 %v427_v3, %v12_v2  ;;  %v79_v13 = vmul.f32 %v427_v3, %v13_v5  ;;  %v80_v14 = vmul.f32 %v427_v3, %v14_v6  ;;  %v22_v38 = vld [vmem:[%s1001_s0 + $0x58] sm:$0xff]  ;;  %v23_v39 = vld [vmem:[%s1001_s0 + $0x60] sm:$0xff]  ;;  %v24_v44 = vld [vmem:[%s1001_s0 + $0x68] sm:$0xff] }
   0x6   :  { %v81_v15 = vmul.f32 %v427_v3, %v15_v7  ;;  %v82_v16 = vmul.f32 %v427_v3, %v16_v8  ;;  %v83_v17 = vmul.f32 %v427_v3, %v17_v9  ;;  %v84_v18 = vmul.f32 %v427_v3, %v18_v10  ;;  %v25_v45 = vld [vmem:[%s1001_s0 + $0x70] sm:$0xff]  ;;  %v26_v46 = vld [vmem:[%s1001_s0 + $0x78] sm:$0xff]  ;;  %v27_v5 = vld [vmem:[%s1001_s0 + $0x80] sm:$0xff] }
   0x7   :  { %v142_v19 = vadd.f32 %v429_v4, %v77_v11  ;;  %v143_v20 = vadd.f32 %v429_v4, %v78_v12  ;;  %v144_v21 = vadd.f32 %v429_v4, %v79_v13  ;;  %v145_v22 = vadd.f32 %v429_v4, %v80_v14  ;;  %v28_v6 = vld [vmem:[%s1001_s0 + $0x88] sm:$0xff]  ;;  %v29_v7 = vld [vmem:[%s1001_s0 + $0x90] sm:$0xff]  ;;  %v30_v8 = vld [vmem:[%s1001_s0 + $0x98] sm:$0xff] }
   0x8   :  { %v146_v23 = vadd.f32 %v429_v4, %v81_v15  ;;  %v147_v24 = vadd.f32 %v429_v4, %v82_v16  ;;  %v148_v25 = vadd.f32 %v429_v4, %v83_v17  ;;  %v149_v26 = vadd.f32 %v429_v4, %v84_v18  ;;  %v31_v13 = vld [vmem:[%s1001_s0 + $0xa0] sm:$0xff] }
   0x9   :  { %v206_v28 = vmax.f32 %v142_v19, 0.0  ;;  %v207_v29 = vmax.f32 %v143_v20, 0.0  ;;  %v208_v30 = vmax.f32 %v144_v21, 0.0  ;;  %v209_v31 = vmax.f32 %v145_v22, 0.0  ;;  %v32_v22 = vld [vmem:[%s1001_s0 + $0xa8] sm:$0xff] }
   0xa   :  { %v210_v34 = vmax.f32 %v146_v23, 0.0  ;;  %v211_v35 = vmax.f32 %v147_v24, 0.0  ;;  %v212_v36 = vmax.f32 %v148_v25, 0.0  ;;  %v213_v37 = vmax.f32 %v149_v26, 0.0  ;;  %v33_v23 = vld [vmem:[%s1001_s0 + $0xb0] sm:$0xff]  ;;  %v34_v24 = vld [vmem:[%s1001_s0 + $0xb8] sm:$0xff] }
   0xb   :  { %v270_v40 = vpack.c.bf16 %v206_v28, %v206_v28  ;;  %v271_v41 = vpack.c.bf16 %v207_v29, %v207_v29  ;;  %v272_v42 = vpack.c.bf16 %v208_v30, %v208_v30  ;;  %v273_v43 = vpack.c.bf16 %v209_v31, %v209_v31 }
   0xc   :  { %v274_v47 = vpack.c.bf16 %v210_v34, %v210_v34  ;;  %v275_v48 = vpack.c.bf16 %v211_v35, %v211_v35  ;;  %v276_v49 = vpack.c.bf16 %v212_v36, %v212_v36  ;;  %v277_v50 = vpack.c.bf16 %v213_v37, %v213_v37 }
   0xd   :  { %335 = vst.msk [vmem:[%s1003_s2] sm:$0xf] %vm334_vm0, %v270_v40  ;;  %v85_v51 = vmul.f32 %v427_v3, %v19_v27  ;;  %v86_v52 = vmul.f32 %v427_v3, %v20_v32  ;;  %v87_v53 = vmul.f32 %v427_v3, %v21_v33  ;;  %v88_v54 = vmul.f32 %v427_v3, %v22_v38 }
   0xe   :  { %336 = vst.msk [vmem:[%s1003_s2 + $0x4] sm:$0xf] %vm334_vm0, %v271_v41  ;;  %v89_v55 = vmul.f32 %v427_v3, %v23_v39  ;;  %v90_v56 = vmul.f32 %v427_v3, %v24_v44  ;;  %v91_v57 = vmul.f32 %v427_v3, %v25_v45  ;;  %v92_v58 = vmul.f32 %v427_v3, %v26_v46  ;;  %v35_v45 = vld [vmem:[%s1001_s0 + $0xc0] sm:$0xff]  ;;  %v36_v46 = vld [vmem:[%s1001_s0 + $0xc8] sm:$0xff] }
   0xf   :  { %337 = vst.msk [vmem:[%s1003_s2 + $0x8] sm:$0xf] %vm334_vm0, %v272_v42  ;;  %v150_v59 = vadd.f32 %v429_v4, %v85_v51  ;;  %v151_v60 = vadd.f32 %v429_v4, %v86_v52  ;;  %v152_v61 = vadd.f32 %v429_v4, %v87_v53  ;;  %v153_v62 = vadd.f32 %v429_v4, %v88_v54  ;;  %v39_v53 = vld [vmem:[%s1001_s0 + $0xe0] sm:$0xff] }
  0x10   :  { %338 = vst.msk [vmem:[%s1003_s2 + $0xc] sm:$0xf] %vm334_vm0, %v273_v43  ;;  %v154_v63 = vadd.f32 %v429_v4, %v89_v55  ;;  %v155_v0 = vadd.f32 %v429_v4, %v90_v56  ;;  %v156_v1 = vadd.f32 %v429_v4, %v91_v57  ;;  %v157_v2 = vadd.f32 %v429_v4, %v92_v58 }
  0x11   :  { %339 = vst.msk [vmem:[%s1003_s2 + $0x10] sm:$0xf] %vm334_vm0, %v274_v47  ;;  %v214_v9 = vmax.f32 %v150_v59, 0.0  ;;  %v215_v10 = vmax.f32 %v151_v60, 0.0  ;;  %v216_v11 = vmax.f32 %v152_v61, 0.0  ;;  %v217_v12 = vmax.f32 %v153_v62, 0.0 }
  0x12   :  { %340 = vst.msk [vmem:[%s1003_s2 + $0x14] sm:$0xf] %vm334_vm0, %v275_v48  ;;  %v218_v14 = vmax.f32 %v154_v63, 0.0  ;;  %v219_v15 = vmax.f32 %v155_v0, 0.0  ;;  %v220_v16 = vmax.f32 %v156_v1, 0.0  ;;  %v221_v17 = vmax.f32 %v157_v2, 0.0 }
  0x13   :  { %341 = vst.msk [vmem:[%s1003_s2 + $0x18] sm:$0xf] %vm334_vm0, %v276_v49  ;;  %v278_v18 = vpack.c.bf16 %v214_v9, %v214_v9  ;;  %v279_v19 = vpack.c.bf16 %v215_v10, %v215_v10  ;;  %v280_v20 = vpack.c.bf16 %v216_v11, %v216_v11  ;;  %v281_v21 = vpack.c.bf16 %v217_v12, %v217_v12  ;;  %v37_v47 = vld [vmem:[%s1001_s0 + $0xd0] sm:$0xff]  ;;  %v38_v48 = vld [vmem:[%s1001_s0 + $0xd8] sm:$0xff]  ;;  %v40_v62 = vld [vmem:[%s1001_s0 + $0xe8] sm:$0xff] }
  0x14   :  { %342 = vst.msk [vmem:[%s1003_s2 + $0x1c] sm:$0xf] %vm334_vm0, %v277_v50  ;;  %v282_v25 = vpack.c.bf16 %v218_v14, %v218_v14  ;;  %v283_v26 = vpack.c.bf16 %v219_v15, %v219_v15  ;;  %v284_v27 = vpack.c.bf16 %v220_v16, %v220_v16  ;;  %v285_v28 = vpack.c.bf16 %v221_v17, %v221_v17  ;;  %v41_v63 = vld [vmem:[%s1001_s0 + $0xf0] sm:$0xff]  ;;  %v42_v0 = vld [vmem:[%s1001_s0 + $0xf8] sm:$0xff] }
  0x15   :  { %343 = vst.msk [vmem:[%s1003_s2 + $0x20] sm:$0xf] %vm334_vm0, %v278_v18  ;;  %v93_v29 = vmul.f32 %v427_v3, %v27_v5  ;;  %v94_v30 = vmul.f32 %v427_v3, %v28_v6  ;;  %v95_v31 = vmul.f32 %v427_v3, %v29_v7  ;;  %v96_v32 = vmul.f32 %v427_v3, %v30_v8 }
  0x16   :  { %344 = vst.msk [vmem:[%s1003_s2 + $0x24] sm:$0xf] %vm334_vm0, %v279_v19  ;;  %v97_v33 = vmul.f32 %v427_v3, %v31_v13  ;;  %v98_v34 = vmul.f32 %v427_v3, %v32_v22  ;;  %v99_v35 = vmul.f32 %v427_v3, %v33_v23  ;;  %v100_v36 = vmul.f32 %v427_v3, %v34_v24  ;;  %v43_v23 = vld [vmem:[%s1001_s0 + $0x100] sm:$0xff]  ;;  %v44_v24 = vld [vmem:[%s1001_s0 + $0x108] sm:$0xff] }
  0x17   :  { %345 = vst.msk [vmem:[%s1003_s2 + $0x28] sm:$0xf] %vm334_vm0, %v280_v20  ;;  %v158_v37 = vadd.f32 %v429_v4, %v93_v29  ;;  %v159_v38 = vadd.f32 %v429_v4, %v94_v30  ;;  %v160_v39 = vadd.f32 %v429_v4, %v95_v31  ;;  %v161_v40 = vadd.f32 %v429_v4, %v96_v32  ;;  %v47_v31 = vld [vmem:[%s1001_s0 + $0x120] sm:$0xff] }
  0x18   :  { %346 = vst.msk [vmem:[%s1003_s2 + $0x2c] sm:$0xf] %vm334_vm0, %v281_v21  ;;  %v162_v41 = vadd.f32 %v429_v4, %v97_v33  ;;  %v163_v42 = vadd.f32 %v429_v4, %v98_v34  ;;  %v164_v43 = vadd.f32 %v429_v4, %v99_v35  ;;  %v165_v44 = vadd.f32 %v429_v4, %v100_v36 }
  0x19   :  { %347 = vst.msk [vmem:[%s1003_s2 + $0x30] sm:$0xf] %vm334_vm0, %v282_v25  ;;  %v222_v49 = vmax.f32 %v158_v37, 0.0  ;;  %v223_v50 = vmax.f32 %v159_v38, 0.0  ;;  %v224_v51 = vmax.f32 %v160_v39, 0.0  ;;  %v225_v52 = vmax.f32 %v161_v40, 0.0 }
  0x1a   :  { %348 = vst.msk [vmem:[%s1003_s2 + $0x34] sm:$0xf] %vm334_vm0, %v283_v26  ;;  %v226_v54 = vmax.f32 %v162_v41, 0.0  ;;  %v227_v55 = vmax.f32 %v163_v42, 0.0  ;;  %v228_v56 = vmax.f32 %v164_v43, 0.0  ;;  %v229_v57 = vmax.f32 %v165_v44, 0.0 }
  0x1b   :  { %349 = vst.msk [vmem:[%s1003_s2 + $0x38] sm:$0xf] %vm334_vm0, %v284_v27  ;;  %v286_v58 = vpack.c.bf16 %v222_v49, %v222_v49  ;;  %v287_v59 = vpack.c.bf16 %v223_v50, %v223_v50  ;;  %v288_v60 = vpack.c.bf16 %v224_v51, %v224_v51  ;;  %v289_v61 = vpack.c.bf16 %v225_v52, %v225_v52  ;;  %v45_v25 = vld [vmem:[%s1001_s0 + $0x110] sm:$0xff]  ;;  %v46_v26 = vld [vmem:[%s1001_s0 + $0x118] sm:$0xff]  ;;  %v48_v40 = vld [vmem:[%s1001_s0 + $0x128] sm:$0xff] }
  0x1c   :  { %350 = vst.msk [vmem:[%s1003_s2 + $0x3c] sm:$0xf] %vm334_vm0, %v285_v28  ;;  %v290_v1 = vpack.c.bf16 %v226_v54, %v226_v54  ;;  %v291_v2 = vpack.c.bf16 %v227_v55, %v227_v55  ;;  %v292_v5 = vpack.c.bf16 %v228_v56, %v228_v56  ;;  %v293_v6 = vpack.c.bf16 %v229_v57, %v229_v57  ;;  %v49_v41 = vld [vmem:[%s1001_s0 + $0x130] sm:$0xff]  ;;  %v50_v42 = vld [vmem:[%s1001_s0 + $0x138] sm:$0xff] }
  0x1d   :  { %351 = vst.msk [vmem:[%s1003_s2 + $0x40] sm:$0xf] %vm334_vm0, %v286_v58  ;;  %v101_v7 = vmul.f32 %v427_v3, %v35_v45  ;;  %v102_v8 = vmul.f32 %v427_v3, %v36_v46  ;;  %v103_v9 = vmul.f32 %v427_v3, %v37_v47  ;;  %v104_v10 = vmul.f32 %v427_v3, %v38_v48 }
  0x1e   :  { %352 = vst.msk [vmem:[%s1003_s2 + $0x44] sm:$0xf] %vm334_vm0, %v287_v59  ;;  %v105_v11 = vmul.f32 %v427_v3, %v39_v53  ;;  %v106_v12 = vmul.f32 %v427_v3, %v40_v62  ;;  %v107_v13 = vmul.f32 %v427_v3, %v41_v63  ;;  %v108_v14 = vmul.f32 %v427_v3, %v42_v0  ;;  %v51_v63 = vld [vmem:[%s1001_s0 + $0x140] sm:$0xff]  ;;  %v52_v0 = vld [vmem:[%s1001_s0 + $0x148] sm:$0xff] }
  0x1f   :  { %353 = vst.msk [vmem:[%s1003_s2 + $0x48] sm:$0xf] %vm334_vm0, %v288_v60  ;;  %v166_v15 = vadd.f32 %v429_v4, %v101_v7  ;;  %v167_v16 = vadd.f32 %v429_v4, %v102_v8  ;;  %v168_v17 = vadd.f32 %v429_v4, %v103_v9  ;;  %v169_v18 = vadd.f32 %v429_v4, %v104_v10  ;;  %v55_v9 = vld [vmem:[%s1001_s0 + $0x160] sm:$0xff] }
  0x20   :  { %354 = vst.msk [vmem:[%s1003_s2 + $0x4c] sm:$0xf] %vm334_vm0, %v289_v61  ;;  %v170_v19 = vadd.f32 %v429_v4, %v105_v11  ;;  %v171_v20 = vadd.f32 %v429_v4, %v106_v12  ;;  %v172_v21 = vadd.f32 %v429_v4, %v107_v13  ;;  %v173_v22 = vadd.f32 %v429_v4, %v108_v14 }
  0x21   :  { %355 = vst.msk [vmem:[%s1003_s2 + $0x50] sm:$0xf] %vm334_vm0, %v290_v1  ;;  %v230_v27 = vmax.f32 %v166_v15, 0.0  ;;  %v231_v28 = vmax.f32 %v167_v16, 0.0  ;;  %v232_v29 = vmax.f32 %v168_v17, 0.0  ;;  %v233_v30 = vmax.f32 %v169_v18, 0.0 }
  0x22   :  { %356 = vst.msk [vmem:[%s1003_s2 + $0x54] sm:$0xf] %vm334_vm0, %v291_v2  ;;  %v234_v32 = vmax.f32 %v170_v19, 0.0  ;;  %v235_v33 = vmax.f32 %v171_v20, 0.0  ;;  %v236_v34 = vmax.f32 %v172_v21, 0.0  ;;  %v237_v35 = vmax.f32 %v173_v22, 0.0 }
  0x23   :  { %357 = vst.msk [vmem:[%s1003_s2 + $0x58] sm:$0xf] %vm334_vm0, %v292_v5  ;;  %v294_v36 = vpack.c.bf16 %v230_v27, %v230_v27  ;;  %v295_v37 = vpack.c.bf16 %v231_v28, %v231_v28  ;;  %v296_v38 = vpack.c.bf16 %v232_v29, %v232_v29  ;;  %v297_v39 = vpack.c.bf16 %v233_v30, %v233_v30  ;;  %v53_v1 = vld [vmem:[%s1001_s0 + $0x150] sm:$0xff]  ;;  %v54_v2 = vld [vmem:[%s1001_s0 + $0x158] sm:$0xff]  ;;  %v56_v18 = vld [vmem:[%s1001_s0 + $0x168] sm:$0xff] }
  0x24   :  { %358 = vst.msk [vmem:[%s1003_s2 + $0x5c] sm:$0xf] %vm334_vm0, %v293_v6  ;;  %v298_v43 = vpack.c.bf16 %v234_v32, %v234_v32  ;;  %v299_v44 = vpack.c.bf16 %v235_v33, %v235_v33  ;;  %v300_v45 = vpack.c.bf16 %v236_v34, %v236_v34  ;;  %v301_v46 = vpack.c.bf16 %v237_v35, %v237_v35  ;;  %v57_v19 = vld [vmem:[%s1001_s0 + $0x170] sm:$0xff]  ;;  %v58_v20 = vld [vmem:[%s1001_s0 + $0x178] sm:$0xff] }
  0x25   :  { %359 = vst.msk [vmem:[%s1003_s2 + $0x60] sm:$0xf] %vm334_vm0, %v294_v36  ;;  %v109_v47 = vmul.f32 %v427_v3, %v43_v23  ;;  %v110_v48 = vmul.f32 %v427_v3, %v44_v24  ;;  %v111_v49 = vmul.f32 %v427_v3, %v45_v25  ;;  %v112_v50 = vmul.f32 %v427_v3, %v46_v26 }
  0x26   :  { %360 = vst.msk [vmem:[%s1003_s2 + $0x64] sm:$0xf] %vm334_vm0, %v295_v37  ;;  %v113_v51 = vmul.f32 %v427_v3, %v47_v31  ;;  %v114_v52 = vmul.f32 %v427_v3, %v48_v40  ;;  %v115_v53 = vmul.f32 %v427_v3, %v49_v41  ;;  %v116_v54 = vmul.f32 %v427_v3, %v50_v42  ;;  %v59_v41 = vld [vmem:[%s1001_s0 + $0x180] sm:$0xff]  ;;  %v60_v42 = vld [vmem:[%s1001_s0 + $0x188] sm:$0xff] }
  0x27   :  { %361 = vst.msk [vmem:[%s1003_s2 + $0x68] sm:$0xf] %vm334_vm0, %v296_v38  ;;  %v174_v55 = vadd.f32 %v429_v4, %v109_v47  ;;  %v175_v56 = vadd.f32 %v429_v4, %v110_v48  ;;  %v176_v57 = vadd.f32 %v429_v4, %v111_v49  ;;  %v177_v58 = vadd.f32 %v429_v4, %v112_v50  ;;  %v63_v49 = vld [vmem:[%s1001_s0 + $0x1a0] sm:$0xff] }
  0x28   :  { %362 = vst.msk [vmem:[%s1003_s2 + $0x6c] sm:$0xf] %vm334_vm0, %v297_v39  ;;  %v178_v59 = vadd.f32 %v429_v4, %v113_v51  ;;  %v179_v60 = vadd.f32 %v429_v4, %v114_v52  ;;  %v180_v61 = vadd.f32 %v429_v4, %v115_v53  ;;  %v181_v62 = vadd.f32 %v429_v4, %v116_v54 }
  0x29   :  { %363 = vst.msk [vmem:[%s1003_s2 + $0x70] sm:$0xf] %vm334_vm0, %v298_v43  ;;  %v238_v5 = vmax.f32 %v174_v55, 0.0  ;;  %v239_v6 = vmax.f32 %v175_v56, 0.0  ;;  %v240_v7 = vmax.f32 %v176_v57, 0.0  ;;  %v241_v8 = vmax.f32 %v177_v58, 0.0 }
  0x2a   :  { %364 = vst.msk [vmem:[%s1003_s2 + $0x74] sm:$0xf] %vm334_vm0, %v299_v44  ;;  %v242_v10 = vmax.f32 %v178_v59, 0.0  ;;  %v243_v11 = vmax.f32 %v179_v60, 0.0  ;;  %v244_v12 = vmax.f32 %v180_v61, 0.0  ;;  %v245_v13 = vmax.f32 %v181_v62, 0.0 }
  0x2b   :  { %365 = vst.msk [vmem:[%s1003_s2 + $0x78] sm:$0xf] %vm334_vm0, %v300_v45  ;;  %v302_v14 = vpack.c.bf16 %v238_v5, %v238_v5  ;;  %v303_v15 = vpack.c.bf16 %v239_v6, %v239_v6  ;;  %v304_v16 = vpack.c.bf16 %v240_v7, %v240_v7  ;;  %v305_v17 = vpack.c.bf16 %v241_v8, %v241_v8  ;;  %v61_v43 = vld [vmem:[%s1001_s0 + $0x190] sm:$0xff]  ;;  %v62_v44 = vld [vmem:[%s1001_s0 + $0x198] sm:$0xff]  ;;  %v64_v58 = vld [vmem:[%s1001_s0 + $0x1a8] sm:$0xff] }
  0x2c   :  { %366 = vst.msk [vmem:[%s1003_s2 + $0x7c] sm:$0xf] %vm334_vm0, %v301_v46  ;;  %v306_v21 = vpack.c.bf16 %v242_v10, %v242_v10  ;;  %v307_v22 = vpack.c.bf16 %v243_v11, %v243_v11  ;;  %v308_v23 = vpack.c.bf16 %v244_v12, %v244_v12  ;;  %v309_v24 = vpack.c.bf16 %v245_v13, %v245_v13  ;;  %v65_v59 = vld [vmem:[%s1001_s0 + $0x1b0] sm:$0xff]  ;;  %v66_v60 = vld [vmem:[%s1001_s0 + $0x1b8] sm:$0xff] }
  0x2d   :  { %367 = vst.msk [vmem:[%s1003_s2 + $0x80] sm:$0xf] %vm334_vm0, %v302_v14  ;;  %v117_v25 = vmul.f32 %v427_v3, %v51_v63  ;;  %v118_v26 = vmul.f32 %v427_v3, %v52_v0  ;;  %v119_v27 = vmul.f32 %v427_v3, %v53_v1  ;;  %v120_v28 = vmul.f32 %v427_v3, %v54_v2 }
  0x2e   :  { %368 = vst.msk [vmem:[%s1003_s2 + $0x84] sm:$0xf] %vm334_vm0, %v303_v15  ;;  %v121_v29 = vmul.f32 %v427_v3, %v55_v9  ;;  %v122_v30 = vmul.f32 %v427_v3, %v56_v18  ;;  %v123_v31 = vmul.f32 %v427_v3, %v57_v19  ;;  %v124_v32 = vmul.f32 %v427_v3, %v58_v20  ;;  %v67_v19 = vld [vmem:[%s1001_s0 + $0x1c0] sm:$0xff]  ;;  %v68_v20 = vld [vmem:[%s1001_s0 + $0x1c8] sm:$0xff] }
  0x2f   :  { %369 = vst.msk [vmem:[%s1003_s2 + $0x88] sm:$0xf] %vm334_vm0, %v304_v16  ;;  %v182_v33 = vadd.f32 %v429_v4, %v117_v25  ;;  %v183_v34 = vadd.f32 %v429_v4, %v118_v26  ;;  %v184_v35 = vadd.f32 %v429_v4, %v119_v27  ;;  %v185_v36 = vadd.f32 %v429_v4, %v120_v28  ;;  %v71_v27 = vld [vmem:[%s1001_s0 + $0x1e0] sm:$0xff] }
  0x30   :  { %370 = vst.msk [vmem:[%s1003_s2 + $0x8c] sm:$0xf] %vm334_vm0, %v305_v17  ;;  %v186_v37 = vadd.f32 %v429_v4, %v121_v29  ;;  %v187_v38 = vadd.f32 %v429_v4, %v122_v30  ;;  %v188_v39 = vadd.f32 %v429_v4, %v123_v31  ;;  %v189_v40 = vadd.f32 %v429_v4, %v124_v32 }
  0x31   :  { %371 = vst.msk [vmem:[%s1003_s2 + $0x90] sm:$0xf] %vm334_vm0, %v306_v21  ;;  %v246_v45 = vmax.f32 %v182_v33, 0.0  ;;  %v247_v46 = vmax.f32 %v183_v34, 0.0  ;;  %v248_v47 = vmax.f32 %v184_v35, 0.0  ;;  %v249_v48 = vmax.f32 %v185_v36, 0.0 }
  0x32   :  { %372 = vst.msk [vmem:[%s1003_s2 + $0x94] sm:$0xf] %vm334_vm0, %v307_v22  ;;  %v250_v50 = vmax.f32 %v186_v37, 0.0  ;;  %v251_v51 = vmax.f32 %v187_v38, 0.0  ;;  %v252_v52 = vmax.f32 %v188_v39, 0.0  ;;  %v253_v53 = vmax.f32 %v189_v40, 0.0 }
  0x33   :  { %373 = vst.msk [vmem:[%s1003_s2 + $0x98] sm:$0xf] %vm334_vm0, %v308_v23  ;;  %v310_v54 = vpack.c.bf16 %v246_v45, %v246_v45  ;;  %v311_v55 = vpack.c.bf16 %v247_v46, %v247_v46  ;;  %v312_v56 = vpack.c.bf16 %v248_v47, %v248_v47  ;;  %v313_v57 = vpack.c.bf16 %v249_v48, %v249_v48  ;;  %v69_v21 = vld [vmem:[%s1001_s0 + $0x1d0] sm:$0xff]  ;;  %v70_v22 = vld [vmem:[%s1001_s0 + $0x1d8] sm:$0xff]  ;;  %v72_v36 = vld [vmem:[%s1001_s0 + $0x1e8] sm:$0xff] }
  0x34   :  { %374 = vst.msk [vmem:[%s1003_s2 + $0x9c] sm:$0xf] %vm334_vm0, %v309_v24  ;;  %v314_v61 = vpack.c.bf16 %v250_v50, %v250_v50  ;;  %v315_v62 = vpack.c.bf16 %v251_v51, %v251_v51  ;;  %v316_v63 = vpack.c.bf16 %v252_v52, %v252_v52  ;;  %v317_v0 = vpack.c.bf16 %v253_v53, %v253_v53  ;;  %v73_v37 = vld [vmem:[%s1001_s0 + $0x1f0] sm:$0xff]  ;;  %v74_v38 = vld [vmem:[%s1001_s0 + $0x1f8] sm:$0xff] }
  0x35   :  { %375 = vst.msk [vmem:[%s1003_s2 + $0xa0] sm:$0xf] %vm334_vm0, %v310_v54  ;;  %v125_v1 = vmul.f32 %v427_v3, %v59_v41  ;;  %v126_v2 = vmul.f32 %v427_v3, %v60_v42  ;;  %v127_v5 = vmul.f32 %v427_v3, %v61_v43  ;;  %v128_v6 = vmul.f32 %v427_v3, %v62_v44 }
  0x36   :  { %376 = vst.msk [vmem:[%s1003_s2 + $0xa4] sm:$0xf] %vm334_vm0, %v311_v55  ;;  %v129_v7 = vmul.f32 %v427_v3, %v63_v49  ;;  %v130_v8 = vmul.f32 %v427_v3, %v64_v58  ;;  %v131_v9 = vmul.f32 %v427_v3, %v65_v59  ;;  %v132_v10 = vmul.f32 %v427_v3, %v66_v60 }
  0x37   :  { %377 = vst.msk [vmem:[%s1003_s2 + $0xa8] sm:$0xf] %vm334_vm0, %v312_v56  ;;  %v190_v11 = vadd.f32 %v429_v4, %v125_v1  ;;  %v191_v12 = vadd.f32 %v429_v4, %v126_v2  ;;  %v192_v13 = vadd.f32 %v429_v4, %v127_v5  ;;  %v193_v14 = vadd.f32 %v429_v4, %v128_v6 }
  0x38   :  { %378 = vst.msk [vmem:[%s1003_s2 + $0xac] sm:$0xf] %vm334_vm0, %v313_v57  ;;  %v194_v15 = vadd.f32 %v429_v4, %v129_v7  ;;  %v195_v16 = vadd.f32 %v429_v4, %v130_v8  ;;  %v196_v17 = vadd.f32 %v429_v4, %v131_v9  ;;  %v197_v18 = vadd.f32 %v429_v4, %v132_v10 }
  0x39   :  { %379 = vst.msk [vmem:[%s1003_s2 + $0xb0] sm:$0xf] %vm334_vm0, %v314_v61  ;;  %v254_v23 = vmax.f32 %v190_v11, 0.0  ;;  %v255_v24 = vmax.f32 %v191_v12, 0.0  ;;  %v256_v25 = vmax.f32 %v192_v13, 0.0  ;;  %v257_v26 = vmax.f32 %v193_v14, 0.0 }
  0x3a   :  { %380 = vst.msk [vmem:[%s1003_s2 + $0xb4] sm:$0xf] %vm334_vm0, %v315_v62  ;;  %v258_v28 = vmax.f32 %v194_v15, 0.0  ;;  %v259_v29 = vmax.f32 %v195_v16, 0.0  ;;  %v260_v30 = vmax.f32 %v196_v17, 0.0  ;;  %v261_v31 = vmax.f32 %v197_v18, 0.0 }
  0x3b   :  { %381 = vst.msk [vmem:[%s1003_s2 + $0xb8] sm:$0xf] %vm334_vm0, %v316_v63  ;;  %v318_v32 = vpack.c.bf16 %v254_v23, %v254_v23  ;;  %v319_v33 = vpack.c.bf16 %v255_v24, %v255_v24  ;;  %v320_v34 = vpack.c.bf16 %v256_v25, %v256_v25  ;;  %v321_v35 = vpack.c.bf16 %v257_v26, %v257_v26 }
  0x3c   :  { %382 = vst.msk [vmem:[%s1003_s2 + $0xbc] sm:$0xf] %vm334_vm0, %v317_v0  ;;  %v322_v39 = vpack.c.bf16 %v258_v28, %v258_v28  ;;  %v323_v40 = vpack.c.bf16 %v259_v29, %v259_v29  ;;  %v324_v41 = vpack.c.bf16 %v260_v30, %v260_v30  ;;  %v325_v42 = vpack.c.bf16 %v261_v31, %v261_v31 }
  0x3d   :  { %383 = vst.msk [vmem:[%s1003_s2 + $0xc0] sm:$0xf] %vm334_vm0, %v318_v32  ;;  %v133_v43 = vmul.f32 %v427_v3, %v67_v19  ;;  %v134_v44 = vmul.f32 %v427_v3, %v68_v20  ;;  %v135_v45 = vmul.f32 %v427_v3, %v69_v21  ;;  %v136_v46 = vmul.f32 %v427_v3, %v70_v22 }
  0x3e   :  { %384 = vst.msk [vmem:[%s1003_s2 + $0xc4] sm:$0xf] %vm334_vm0, %v319_v33  ;;  %v137_v47 = vmul.f32 %v427_v3, %v71_v27  ;;  %v138_v48 = vmul.f32 %v427_v3, %v72_v36  ;;  %v139_v49 = vmul.f32 %v427_v3, %v73_v37  ;;  %v140_v50 = vmul.f32 %v427_v3, %v74_v38 }
  0x3f   :  { %385 = vst.msk [vmem:[%s1003_s2 + $0xc8] sm:$0xf] %vm334_vm0, %v320_v34  ;;  %v198_v51 = vadd.f32 %v429_v4, %v133_v43  ;;  %v199_v52 = vadd.f32 %v429_v4, %v134_v44  ;;  %v200_v53 = vadd.f32 %v429_v4, %v135_v45  ;;  %v201_v54 = vadd.f32 %v429_v4, %v136_v46 }
  0x40   :  { %386 = vst.msk [vmem:[%s1003_s2 + $0xcc] sm:$0xf] %vm334_vm0, %v321_v35  ;;  %v202_v3 = vadd.f32 %v429_v4, %v137_v47  ;;  %v203_v55 = vadd.f32 %v429_v4, %v138_v48  ;;  %v204_v56 = vadd.f32 %v429_v4, %v139_v49  ;;  %v205_v57 = vadd.f32 %v429_v4, %v140_v50 }
  0x41   :  { %387 = vst.msk [vmem:[%s1003_s2 + $0xd0] sm:$0xf] %vm334_vm0, %v322_v39  ;;  %v262_v58 = vmax.f32 %v198_v51, 0.0  ;;  %v263_v59 = vmax.f32 %v199_v52, 0.0  ;;  %v264_v60 = vmax.f32 %v200_v53, 0.0  ;;  %v265_v61 = vmax.f32 %v201_v54, 0.0 }
  0x42   :  { %388 = vst.msk [vmem:[%s1003_s2 + $0xd4] sm:$0xf] %vm334_vm0, %v323_v40  ;;  %v266_v62 = vmax.f32 %v202_v3, 0.0  ;;  %v267_v63 = vmax.f32 %v203_v55, 0.0  ;;  %v268_v2 = vmax.f32 %v204_v56, 0.0  ;;  %v269_v6 = vmax.f32 %v205_v57, 0.0 }
  0x43   :  { %389 = vst.msk [vmem:[%s1003_s2 + $0xd8] sm:$0xf] %vm334_vm0, %v324_v41  ;;  %v326_v4 = vpack.c.bf16 %v262_v58, %v262_v58  ;;  %v327_v0 = vpack.c.bf16 %v263_v59, %v263_v59  ;;  %v328_v1 = vpack.c.bf16 %v264_v60, %v264_v60  ;;  %v329_v5 = vpack.c.bf16 %v265_v61, %v265_v61 }
  0x44   :  { %390 = vst.msk [vmem:[%s1003_s2 + $0xdc] sm:$0xf] %vm334_vm0, %v325_v42  ;;  %v330_v7 = vpack.c.bf16 %v266_v62, %v266_v62  ;;  %v331_v8 = vpack.c.bf16 %v267_v63, %v267_v63  ;;  %v332_v9 = vpack.c.bf16 %v268_v2, %v268_v2  ;;  %v333_v10 = vpack.c.bf16 %v269_v6, %v269_v6 }
  0x45   :  { %391 = vst.msk [vmem:[%s1003_s2 + $0xe0] sm:$0xf] %vm334_vm0, %v326_v4 }
  0x46   :  { %392 = vst.msk [vmem:[%s1003_s2 + $0xe4] sm:$0xf] %vm334_vm0, %v327_v0 }
  0x47   :  { %393 = vst.msk [vmem:[%s1003_s2 + $0xe8] sm:$0xf] %vm334_vm0, %v328_v1 }
  0x48   :  { %394 = vst.msk [vmem:[%s1003_s2 + $0xec] sm:$0xf] %vm334_vm0, %v329_v5 }
  0x49   :  { %395 = vst.msk [vmem:[%s1003_s2 + $0xf0] sm:$0xf] %vm334_vm0, %v330_v7 }
  0x4a   :  { %396 = vst.msk [vmem:[%s1003_s2 + $0xf4] sm:$0xf] %vm334_vm0, %v331_v8 }
  0x4b   :  { %397 = vst.msk [vmem:[%s1003_s2 + $0xf8] sm:$0xf] %vm334_vm0, %v332_v9 }
  0x4c   :  { %398 = vst.msk [vmem:[%s1003_s2 + $0xfc] sm:$0xf] %vm334_vm0, %v333_v10 }

// kernel: generator_forward.19
= control target key start
LH: loop header
LB: loop body
LE: loop exit
PB: predicated region body
PF: predicated region fallthrough
CT: control target
= control target key end

     0   :  { %vm1299_vm0 = vcmask 523264   ;;  %s5123_s1 = inlined_call_operand.vmem [shape: bf16[576,128], index: 1, kind: input, shape index: {}]   ;;  %s5124_s2 = inlined_call_operand.vmem [shape: f32[1,128], index: 2, kind: input, shape index: {}]   ;;  %s5125_s0 = inlined_call_operand.vmem [shape: bf16[512,576], index: 0, kind: input, shape index: {}]   ;;  %s5126_s3 = inlined_call_operand.vmem [shape: f32[512,128], index: 3, kind: output, shape index: {}]  }
   0x1   :  { %v3356_v0 = vld [vmem:[%s5123_s1 + $0x38] sm:$0xff]  ;;  %v3355_v1 = vld [vmem:[%s5123_s1 + $0x30] sm:$0xff]  ;;  %v3354_v2 = vld [vmem:[%s5123_s1 + $0x28] sm:$0xff] }
   0x2   :  { %3385 = vmatpush.bf16.msra.mxu1 %v3356_v0  ;;  %3386 = vmatpush.bf16.msra.mxu2 %v3356_v0  ;;  %v3353_v3 = vld [vmem:[%s5123_s1 + $0x20] sm:$0xff]  ;;  %v3352_v4 = vld [vmem:[%s5123_s1 + $0x18] sm:$0xff]  ;;  %v3351_v5 = vld [vmem:[%s5123_s1 + $0x10] sm:$0xff] }
   0x3   :  { %3387 = vmatpush.bf16.msra.mxu3 %v3356_v0  ;;  %1396 = vmatpush.bf16.msra.mxu0 %v3356_v0  ;;  %v3350_v6 = vld [vmem:[%s5123_s1 + $0x8] sm:$0xff]  ;;  %v3349_v7 = vld [vmem:[%s5123_s1] sm:$0xff]  ;;  %v3231_v9 = vld [vmem:[%s5125_s0 + $0x150] sm:$0xf0] }
   0x4   :  { %v2535_v8 = vld [vmem:[%s5125_s0 + $0x140] sm:$0xf]  ;;  %v3271_v11 = vld [vmem:[%s5125_s0 + $0x290] sm:$0xf0]  ;;  %v3372_v16 = vld [vmem:[%s5123_s1 + $0xb8] sm:$0xff] }
   0x5   :  { %v2695_v10 = vld [vmem:[%s5125_s0 + $0x280] sm:$0xf]  ;;  %v3311_v13 = vld [vmem:[%s5125_s0 + $0x3d0] sm:$0xf0]  ;;  %v3380_v17 = vld [vmem:[%s5123_s1 + $0xf8] sm:$0xff]  ;;  %v2536_v18 = vor.u32 %v3231_v9, %v2535_v8 }
   0x6   :  { %3388 = vmatpush.bf16.msra.mxu1 %v3355_v1  ;;  %3389 = vmatpush.bf16.msra.mxu2 %v3355_v1  ;;  %v2855_v12 = vld [vmem:[%s5125_s0 + $0x3c0] sm:$0xf]  ;;  %v3191_v15 = vld [vmem:[%s5125_s0 + $0x10] sm:$0xf0]  ;;  %v2696_v19 = vor.u32 %v3271_v11, %v2695_v10  ;;  %v3364_v22 = vld [vmem:[%s5123_s1 + $0x78] sm:$0xff] }
   0x7   :  { %3390 = vmatpush.bf16.msra.mxu3 %v3355_v1  ;;  %1397 = vmatpush.bf16.msra.mxu0 %v3355_v1  ;;  %v2375_v14 = vld [vmem:[%s5125_s0] sm:$0xf]  ;;  %v2856_v20 = vor.u32 %v3311_v13, %v2855_v12  ;;  %v3384_v23 = vld [vmem:[%s5123_s1 + $0x118] sm:$0xff]  ;;  %v3371_v24 = vld [vmem:[%s5123_s1 + $0xb0] sm:$0xff] }
   0x8   :  { %v2376_v21 = vor.u32 %v3191_v15, %v2375_v14  ;;  %v3379_v25 = vld [vmem:[%s5123_s1 + $0xf0] sm:$0xff]  ;;  %v3370_v28 = vld [vmem:[%s5123_s1 + $0xa8] sm:$0xff]  ;;  %v3236_v32 = vld [vmem:[%s5125_s0 + $0x178] sm:$0xf0] }
   0x9   :  { %v3363_v26 = vld [vmem:[%s5123_s1 + $0x70] sm:$0xff]  ;;  %v3378_v29 = vld [vmem:[%s5123_s1 + $0xe8] sm:$0xff]  ;;  %v3276_v34 = vld [vmem:[%s5125_s0 + $0x2b8] sm:$0xf0] }
   0xa   :  { %3391 = vmatpush.bf16.msra.mxu1 %v3354_v2  ;;  %3392 = vmatpush.bf16.msra.mxu2 %v3354_v2  ;;  %v3383_v27 = vld [vmem:[%s5123_s1 + $0x110] sm:$0xff]  ;;  %v3362_v30 = vld [vmem:[%s5123_s1 + $0x68] sm:$0xff]  ;;  %v3316_v36 = vld [vmem:[%s5125_s0 + $0x3f8] sm:$0xf0] }
   0xb   :  { %3393 = vmatpush.bf16.msra.mxu3 %v3354_v2  ;;  %1398 = vmatpush.bf16.msra.mxu0 %v3354_v2  ;;  %v2555_v31 = vld [vmem:[%s5125_s0 + $0x168] sm:$0xf]  ;;  %v3196_v38 = vld [vmem:[%s5125_s0 + $0x38] sm:$0xf0]  ;;  %v3369_v43 = vld [vmem:[%s5123_s1 + $0xa0] sm:$0xff] }
   0xc   :  { %v2715_v33 = vld [vmem:[%s5125_s0 + $0x2a8] sm:$0xf]  ;;  %v2556_v39 = vor.u32 %v3236_v32, %v2555_v31  ;;  %v3377_v44 = vld [vmem:[%s5123_s1 + $0xe0] sm:$0xff]  ;;  %v2575_v46 = vld [vmem:[%s5125_s0 + $0x190] sm:$0xf] }
   0xd   :  { %v2875_v35 = vld [vmem:[%s5125_s0 + $0x3e8] sm:$0xf]  ;;  %v2716_v40 = vor.u32 %v3276_v34, %v2715_v33  ;;  %v3361_v45 = vld [vmem:[%s5123_s1 + $0x60] sm:$0xff]  ;;  %v2735_v48 = vld [vmem:[%s5125_s0 + $0x2d0] sm:$0xf] }
   0xe   :  { %3394 = vmatpush.bf16.msra.mxu1 %v3353_v3  ;;  %3395 = vmatpush.bf16.msra.mxu2 %v3353_v3  ;;  %v2395_v37 = vld [vmem:[%s5125_s0 + $0x28] sm:$0xf]  ;;  %v2876_v41 = vor.u32 %v3316_v36, %v2875_v35  ;;  %v3241_v47 = vld [vmem:[%s5125_s0 + $0x1a0] sm:$0xf0]  ;;  %v2895_v50 = vld [vmem:[%s5125_s0 + $0x410] sm:$0xf] }
   0xf   :  { %3396 = vmatpush.bf16.msra.mxu3 %v3353_v3  ;;  %1399 = vmatpush.bf16.msra.mxu0 %v3353_v3  ;;  %v2396_v42 = vor.u32 %v3196_v38, %v2395_v37  ;;  %v3281_v49 = vld [vmem:[%s5125_s0 + $0x2e0] sm:$0xf0]  ;;  %v2415_v52 = vld [vmem:[%s5125_s0 + $0x50] sm:$0xf]  ;;  %v2576_v54 = vor.u32 %v3241_v47, %v2575_v46  ;;  %v3368_v58 = vld [vmem:[%s5123_s1 + $0x98] sm:$0xff] }
  0x10   :  { %v3321_v51 = vld [vmem:[%s5125_s0 + $0x420] sm:$0xf0]  ;;  %v2736_v55 = vor.u32 %v3281_v49, %v2735_v48  ;;  %v3376_v59 = vld [vmem:[%s5123_s1 + $0xd8] sm:$0xff]  ;;  %v3382_v61 = vld [vmem:[%s5123_s1 + $0x108] sm:$0xff] }
  0x11   :  { %v3201_v53 = vld [vmem:[%s5125_s0 + $0x60] sm:$0xf0]  ;;  %v2896_v56 = vor.u32 %v3321_v51, %v2895_v50  ;;  %v3360_v60 = vld [vmem:[%s5123_s1 + $0x58] sm:$0xff]  ;;  %v3246_v63 = vld [vmem:[%s5125_s0 + $0x1c8] sm:$0xf0] }
  0x12   :  { %3397 = vmatpush.bf16.msra.mxu1 %v3352_v4  ;;  %3398 = vmatpush.bf16.msra.mxu2 %v3352_v4  ;;  %v2416_v57 = vor.u32 %v3201_v53, %v2415_v52  ;;  %v2595_v62 = vld [vmem:[%s5125_s0 + $0x1b8] sm:$0xf]  ;;  %v3286_v1 = vld [vmem:[%s5125_s0 + $0x308] sm:$0xf0]  ;;  %v3367_v10 = vld [vmem:[%s5123_s1 + $0x90] sm:$0xff] }
  0x13   :  { %3399 = vmatpush.bf16.msra.mxu3 %v3352_v4  ;;  %1400 = vmatpush.bf16.msra.mxu0 %v3352_v4  ;;  %v2755_v0 = vld [vmem:[%s5125_s0 + $0x2f8] sm:$0xf]  ;;  %v3326_v3 = vld [vmem:[%s5125_s0 + $0x448] sm:$0xf0]  ;;  %v3375_v11 = vld [vmem:[%s5123_s1 + $0xd0] sm:$0xff] }
  0x14   :  { %v2915_v2 = vld [vmem:[%s5125_s0 + $0x438] sm:$0xf]  ;;  %v3359_v12 = vld [vmem:[%s5123_s1 + $0x50] sm:$0xff]  ;;  %v2615_v13 = vld [vmem:[%s5125_s0 + $0x1e0] sm:$0xf] }
  0x15   :  { %v2435_v4 = vld [vmem:[%s5125_s0 + $0x78] sm:$0xf]  ;;  %v2916_v8 = vor.u32 %v3326_v3, %v2915_v2  ;;  %v3251_v14 = vld [vmem:[%s5125_s0 + $0x1f0] sm:$0xf0]  ;;  %v2775_v15 = vld [vmem:[%s5125_s0 + $0x320] sm:$0xf] }
  0x16   :  { %3400 = vmatpush.bf16.msra.mxu1 %v3351_v5  ;;  %3401 = vmatpush.bf16.msra.mxu2 %v3351_v5  ;;  %v2795_v31 = vld [vmem:[%s5125_s0 + $0x348] sm:$0xf]  ;;  %v3296_v32 = vld [vmem:[%s5125_s0 + $0x358] sm:$0xf0]  ;;  %v2815_v46 = vld [vmem:[%s5125_s0 + $0x370] sm:$0xf] }
  0x17   :  { %3402 = vmatpush.bf16.msra.mxu3 %v3351_v5  ;;  %1401 = vmatpush.bf16.msra.mxu0 %v3351_v5  ;;  %v3206_v5 = vld [vmem:[%s5125_s0 + $0x88] sm:$0xf0]  ;;  %v2955_v33 = vld [vmem:[%s5125_s0 + $0x488] sm:$0xf]  ;;  %v3336_v34 = vld [vmem:[%s5125_s0 + $0x498] sm:$0xf0]  ;;  %v2796_v38 = vor.u32 %v3296_v32, %v2795_v31 }
  0x18   :  { %v2436_v9 = vor.u32 %v3206_v5, %v2435_v4  ;;  %v2475_v35 = vld [vmem:[%s5125_s0 + $0xc8] sm:$0xf]  ;;  %v3216_v36 = vld [vmem:[%s5125_s0 + $0xd8] sm:$0xf0]  ;;  %v3301_v47 = vld [vmem:[%s5125_s0 + $0x380] sm:$0xf0] }
  0x19   :  { %v2975_v48 = vld [vmem:[%s5125_s0 + $0x4b0] sm:$0xf]  ;;  %v3341_v49 = vld [vmem:[%s5125_s0 + $0x4c0] sm:$0xf0]  ;;  %v2816_v53 = vor.u32 %v3301_v47, %v2815_v46  ;;  %v2377_v5 = vld [vmem:[%s5125_s0 + $0x14] sm:$0xf0] }
  0x1a   :  { %3403 = vmatpush.bf16.msra.mxu1 %v3350_v6  ;;  %3404 = vmatpush.bf16.msra.mxu2 %v3350_v6  ;;  %v2495_v50 = vld [vmem:[%s5125_s0 + $0xf0] sm:$0xf]  ;;  %v3221_v51 = vld [vmem:[%s5125_s0 + $0x100] sm:$0xf0]  ;;  %v3200_v46 = vld [vmem:[%s5125_s0 + $0x5c] sm:$0xf] }
  0x1b   :  { %3405 = vmatpush.bf16.msra.mxu3 %v3350_v6  ;;  %1402 = vmatpush.bf16.msra.mxu0 %v3350_v6  ;;  %v2596_v6 = vor.u32 %v3246_v63, %v2595_v62  ;;  %v2515_v62 = vld [vmem:[%s5125_s0 + $0x118] sm:$0xf]  ;;  %v3226_v63 = vld [vmem:[%s5125_s0 + $0x128] sm:$0xf0]  ;;  %v3189_v4 = vld [vmem:[%s5125_s0 + $0x4] sm:$0xf] }
  0x1c   :  { %v2516_v3 = vor.u32 %v3226_v63, %v2515_v62  ;;  %v2425_v47 = vld [vmem:[%s5125_s0 + $0x6c] sm:$0xf0]  ;;  %v3204_v62 = vld [vmem:[%s5125_s0 + $0x7c] sm:$0xf] }
  0x1d   :  { %v2437_v63 = vld [vmem:[%s5125_s0 + $0x8c] sm:$0xf0] }
  0x1e   :  { %3406 = vmatpush.bf16.msra.mxu1 %v3349_v7  ;;  %3407 = vmatpush.bf16.msra.mxu2 %v3349_v7 }
  0x1f   :  { %3408 = vmatpush.bf16.msra.mxu3 %v3349_v7  ;;  %1403 = vmatpush.bf16.msra.mxu0 %v3349_v7  ;;  %v2756_v7 = vor.u32 %v3286_v1, %v2755_v0 }
  0x21   :  { %1444 = vmatmul.bf16.vlgmr.msra.gmra.mxu1 %v2536_v18  ;;  %1484 = vmatmul.bf16.vlgmr.msra.gmra.mxu2 %v2696_v19  ;;  %v3331_v18 = vld [vmem:[%s5125_s0 + $0x470] sm:$0xf0]  ;;  %v2455_v19 = vld [vmem:[%s5125_s0 + $0xa0] sm:$0xf] }
  0x22   :  { %1734 = vmatpush.bf16.msrb.mxu2 %v3372_v16  ;;  %1524 = vmatmul.bf16.vlgmr.msra.gmra.mxu3 %v2856_v20  ;;  %v3291_v16 = vld [vmem:[%s5125_s0 + $0x330] sm:$0xf0] }
  0x23   :  { %1903 = vmatpush.bf16.msrb.mxu3 %v3380_v17  ;;  %1404 = vmatmul.bf16.vlgmr.msra.gmra.mxu0 %v2376_v21  ;;  %v2935_v17 = vld [vmem:[%s5125_s0 + $0x460] sm:$0xf]  ;;  %v3211_v20 = vld [vmem:[%s5125_s0 + $0xb0] sm:$0xf0]  ;;  %v2616_v21 = vor.u32 %v3251_v14, %v2615_v13 }
  0x24   :  { %1565 = vmatpush.bf16.msrb.mxu1 %v3364_v22  ;;  %2076 = vmatpush.bf16.msrb.mxu0 %v3384_v23  ;;  %v2776_v22 = vor.u32 %v3291_v16, %v2775_v15  ;;  %v2936_v23 = vor.u32 %v3331_v18, %v2935_v17 }
  0x26   :  { %1735 = vmatpush.bf16.msrb.mxu2 %v3371_v24  ;;  %v2456_v24 = vor.u32 %v3211_v20, %v2455_v19 }
  0x27   :  { %1904 = vmatpush.bf16.msrb.mxu3 %v3379_v25  ;;  %v3366_v25 = vld [vmem:[%s5123_s1 + $0x88] sm:$0xff] }
  0x28   :  { %1566 = vmatpush.bf16.msrb.mxu1 %v3363_v26  ;;  %2077 = vmatpush.bf16.msrb.mxu0 %v3383_v27  ;;  %v3374_v26 = vld [vmem:[%s5123_s1 + $0xc8] sm:$0xff] }
  0x29   :  { %v3358_v27 = vld [vmem:[%s5123_s1 + $0x48] sm:$0xff] }
  0x2a   :  { %1736 = vmatpush.bf16.msrb.mxu2 %v3370_v28  ;;  %v3381_v28 = vld [vmem:[%s5123_s1 + $0x100] sm:$0xff] }
  0x2b   :  { %1905 = vmatpush.bf16.msrb.mxu3 %v3378_v29  ;;  %v2635_v29 = vld [vmem:[%s5125_s0 + $0x208] sm:$0xf] }
  0x2c   :  { %1567 = vmatpush.bf16.msrb.mxu1 %v3362_v30  ;;  %2078 = vmatpush.bf16.msrb.mxu0 %v3382_v61  ;;  %v3256_v30 = vld [vmem:[%s5125_s0 + $0x218] sm:$0xf0]  ;;  %v3346_v61 = vld [vmem:[%s5125_s0 + $0x4e8] sm:$0xf0] }
  0x2d   :  { %v2636_v37 = vor.u32 %v3256_v30, %v2635_v29  ;;  %v3198_v29 = vld [vmem:[%s5125_s0 + $0x48] sm:$0xf0] }
  0x2e   :  { %1737 = vmatpush.bf16.msrb.mxu2 %v3369_v43  ;;  %v3357_v43 = vld [vmem:[%s5123_s1 + $0x40] sm:$0xff] }
  0x2f   :  { %1906 = vmatpush.bf16.msrb.mxu3 %v3377_v44  ;;  %v2655_v44 = vld [vmem:[%s5125_s0 + $0x230] sm:$0xf] }
  0x30   :  { %1568 = vmatpush.bf16.msrb.mxu1 %v3361_v45  ;;  %2079 = vmatpush.bf16.msrb.mxu0 %v3381_v28  ;;  %v3261_v45 = vld [vmem:[%s5125_s0 + $0x240] sm:$0xf0]  ;;  %v2411_v28 = vld [vmem:[%s5125_s0 + $0x38] sm:$0xf] }
  0x31   :  { %1449 = vmatmul.bf16.gmra.mxu1 %v2556_v39  ;;  %1489 = vmatmul.bf16.gmra.mxu2 %v2716_v40  ;;  %v2956_v39 = vor.u32 %v3336_v34, %v2955_v33  ;;  %v2476_v40 = vor.u32 %v3216_v36, %v2475_v35  ;;  %v2656_v52 = vor.u32 %v3261_v45, %v2655_v44  ;;  %v2423_v44 = vld [vmem:[%s5125_s0 + $0x58] sm:$0xf]  ;;  %v3202_v45 = vld [vmem:[%s5125_s0 + $0x68] sm:$0xf0] }
  0x32   :  { %1529 = vmatmul.bf16.gmra.mxu3 %v2876_v41  ;;  %1738 = vmatpush.bf16.msrb.mxu2 %v3368_v58  ;;  %v3365_v41 = vld [vmem:[%s5123_s1 + $0x80] sm:$0xff]  ;;  %v2835_v58 = vld [vmem:[%s5125_s0 + $0x398] sm:$0xf]  ;;  %v2412_v36 = vor.u32 %v3198_v29, %v2411_v28  ;;  %v3210_v28 = vld [vmem:[%s5125_s0 + $0xac] sm:$0xf] }
  0x33   :  { %1409 = vmatmul.bf16.gmra.mxu0 %v2396_v42  ;;  %1907 = vmatpush.bf16.msrb.mxu3 %v3376_v59  ;;  %v3373_v42 = vld [vmem:[%s5123_s1 + $0xc0] sm:$0xff]  ;;  %v3306_v59 = vld [vmem:[%s5125_s0 + $0x3a8] sm:$0xf0] }
  0x34   :  { %1569 = vmatpush.bf16.msrb.mxu1 %v3360_v60  ;;  %v2995_v60 = vld [vmem:[%s5125_s0 + $0x4d8] sm:$0xf]  ;;  %v2836_v1 = vor.u32 %v3306_v59, %v2835_v58  ;;  %v2465_v29 = vld [vmem:[%s5125_s0 + $0xbc] sm:$0xf0] }
  0x35   :  { %v2996_v2 = vor.u32 %v3346_v61, %v2995_v60 }
  0x36   :  { %1739 = vmatpush.bf16.msrb.mxu2 %v3367_v10  ;;  %v2391_v10 = vld [vmem:[%s5125_s0 + $0x10] sm:$0xf] }
  0x37   :  { %1908 = vmatpush.bf16.msrb.mxu3 %v3375_v11  ;;  %v3193_v11 = vld [vmem:[%s5125_s0 + $0x20] sm:$0xf0] }
  0x38   :  { %1570 = vmatpush.bf16.msrb.mxu1 %v3359_v12  ;;  %v2380_v12 = vor.u32 %v3189_v4, %v2377_v5  ;;  %v2392_v16 = vor.u32 %v3193_v11, %v2391_v10  ;;  %v2451_v4 = vld [vmem:[%s5125_s0 + $0x88] sm:$0xf]  ;;  %v3208_v5 = vld [vmem:[%s5125_s0 + $0x98] sm:$0xf0] }
  0x3a   :  { %1740 = vmatpush.bf16.msrb.mxu2 %v3366_v25  ;;  %v3197_v25 = vld [vmem:[%s5125_s0 + $0x40] sm:$0xf0] }
  0x3b   :  { %1909 = vmatpush.bf16.msrb.mxu3 %v3374_v26  ;;  %v3195_v26 = vld [vmem:[%s5125_s0 + $0x34] sm:$0xf] }
  0x3c   :  { %1571 = vmatpush.bf16.msrb.mxu1 %v3358_v27  ;;  %v2405_v27 = vld [vmem:[%s5125_s0 + $0x44] sm:$0xf0] }
  0x3d   :  { %v2408_v35 = vor.u32 %v3195_v26, %v2405_v27  ;;  %v2463_v26 = vld [vmem:[%s5125_s0 + $0xa8] sm:$0xf]  ;;  %v3212_v27 = vld [vmem:[%s5125_s0 + $0xb8] sm:$0xf0] }
  0x3e   :  { %1741 = vmatpush.bf16.msrb.mxu2 %v3365_v41 }
  0x3f   :  { %1910 = vmatpush.bf16.msrb.mxu3 %v3373_v42  ;;  %v3199_v42 = vld [vmem:[%s5125_s0 + $0x54] sm:$0xf] }
  0x40   :  { %1572 = vmatpush.bf16.msrb.mxu1 %v3357_v43  ;;  %v2417_v43 = vld [vmem:[%s5125_s0 + $0x64] sm:$0xf0] }
  0x41   :  { %1454 = vmatmul.bf16.gmra.mxu1 %v2576_v54  ;;  %1494 = vmatmul.bf16.gmra.mxu2 %v2736_v55  ;;  %v2976_v54 = vor.u32 %v3341_v49, %v2975_v48  ;;  %v2496_v55 = vor.u32 %v3221_v51, %v2495_v50  ;;  %v2431_v48 = vld [vmem:[%s5125_s0 + $0x60] sm:$0xf]  ;;  %v3203_v49 = vld [vmem:[%s5125_s0 + $0x70] sm:$0xf0] }
  0x42   :  { %1534 = vmatmul.bf16.gmra.mxu3 %v2896_v56  ;;  %v2675_v56 = vld [vmem:[%s5125_s0 + $0x258] sm:$0xf] }
  0x43   :  { %1414 = vmatmul.bf16.gmra.mxu0 %v2416_v57  ;;  %v3266_v57 = vld [vmem:[%s5125_s0 + $0x268] sm:$0xf0] }
  0x44   :  { %v2676_v0 = vor.u32 %v3266_v57, %v2675_v56  ;;  %v2432_v56 = vor.u32 %v3203_v49, %v2431_v48 }
  0x51   :  { %1459 = vmatmul.bf16.gmra.mxu1 %v2596_v6  ;;  %1499 = vmatmul.bf16.gmra.mxu2 %v2756_v7  ;;  %v2383_v6 = vld [vmem:[%s5125_s0 + $0x8] sm:$0xf]  ;;  %v3192_v7 = vld [vmem:[%s5125_s0 + $0x18] sm:$0xf0] }
  0x52   :  { %1539 = vmatmul.bf16.gmra.mxu3 %v2916_v8  ;;  %v3190_v8 = vld [vmem:[%s5125_s0 + $0xc] sm:$0xf]  ;;  %v2384_v13 = vor.u32 %v3192_v7, %v2383_v6 }
  0x53   :  { %1419 = vmatmul.bf16.gmra.mxu0 %v2436_v9  ;;  %v2385_v9 = vld [vmem:[%s5125_s0 + $0x1c] sm:$0xf0] }
  0x54   :  { %v2388_v15 = vor.u32 %v3190_v8, %v2385_v9  ;;  %v2440_v8 = vor.u32 %v3204_v62, %v2437_v63  ;;  %v2483_v62 = vld [vmem:[%s5125_s0 + $0xd0] sm:$0xf]  ;;  %v3217_v63 = vld [vmem:[%s5125_s0 + $0xe0] sm:$0xf0] }
  0x61   :  { %1464 = vmatmul.bf16.gmra.mxu1 %v2616_v21  ;;  %1504 = vmatmul.bf16.gmra.mxu2 %v2776_v22  ;;  %v3194_v22 = vld [vmem:[%s5125_s0 + $0x2c] sm:$0xf] }
  0x62   :  { %1544 = vmatmul.bf16.gmra.mxu3 %v2936_v23  ;;  %v2397_v23 = vld [vmem:[%s5125_s0 + $0x3c] sm:$0xf0] }
  0x63   :  { %1424 = vmatmul.bf16.gmra.mxu0 %v2456_v24  ;;  %v2403_v24 = vld [vmem:[%s5125_s0 + $0x30] sm:$0xf]  ;;  %v2400_v32 = vor.u32 %v3194_v22, %v2397_v23 }
  0x64   :  { %v2404_v33 = vor.u32 %v3197_v25, %v2403_v24  ;;  %v3209_v24 = vld [vmem:[%s5125_s0 + $0xa4] sm:$0xf]  ;;  %v2457_v25 = vld [vmem:[%s5125_s0 + $0xb4] sm:$0xf0] }
  0x71   :  { %1469 = vmatmul.bf16.gmra.mxu1 %v2636_v37  ;;  %1509 = vmatmul.bf16.gmra.mxu2 %v2796_v38 }
  0x72   :  { %1549 = vmatmul.bf16.gmra.mxu3 %v2956_v39 }
  0x73   :  { %1429 = vmatmul.bf16.gmra.mxu0 %v2476_v40 }
  0x81   :  { %1474 = vmatmul.bf16.gmra.mxu1 %v2656_v52  ;;  %1514 = vmatmul.bf16.gmra.mxu2 %v2816_v53  ;;  %v2420_v52 = vor.u32 %v3199_v42, %v2417_v43  ;;  %v2424_v53 = vor.u32 %v3202_v45, %v2423_v44  ;;  %v2460_v42 = vor.u32 %v3209_v24, %v2457_v25 }
  0x82   :  { %1554 = vmatmul.bf16.gmra.mxu3 %v2976_v54  ;;  %v2464_v43 = vor.u32 %v3212_v27, %v2463_v26  ;;  %v2468_v45 = vor.u32 %v3210_v28, %v2465_v29 }
  0x83   :  { %1434 = vmatmul.bf16.gmra.mxu0 %v2496_v55  ;;  %v2428_v55 = vor.u32 %v3200_v46, %v2425_v47 }
  0x91   :  { %1479 = vmatmul.bf16.gmra.mxu1 %v2676_v0  ;;  %1519 = vmatmul.bf16.gmra.mxu2 %v2836_v1  ;;  %v2443_v0 = vld [vmem:[%s5125_s0 + $0x80] sm:$0xf]  ;;  %v3207_v1 = vld [vmem:[%s5125_s0 + $0x90] sm:$0xf0] }
  0x92   :  { %1559 = vmatmul.bf16.gmra.mxu3 %v2996_v2  ;;  %v3205_v2 = vld [vmem:[%s5125_s0 + $0x84] sm:$0xf]  ;;  %v2444_v9 = vor.u32 %v3207_v1, %v2443_v0  ;;  %v3215_v0 = vld [vmem:[%s5125_s0 + $0xd4] sm:$0xf]  ;;  %v2485_v1 = vld [vmem:[%s5125_s0 + $0xe4] sm:$0xf0] }
  0x93   :  { %1439 = vmatmul.bf16.gmra.mxu0 %v2516_v3  ;;  %v2445_v3 = vld [vmem:[%s5125_s0 + $0x94] sm:$0xf0] }
  0x94   :  { %v2448_v11 = vor.u32 %v3205_v2, %v2445_v3  ;;  %v2491_v2 = vld [vmem:[%s5125_s0 + $0xd8] sm:$0xf]  ;;  %v3218_v3 = vld [vmem:[%s5125_s0 + $0xe8] sm:$0xf0] }
  0x95   :  { %v2492_v24 = vor.u32 %v3218_v3, %v2491_v2 }
  0x9e   :  { %v3884_v14 = vpop.f32.mrf.mxu1 }
  0xa0   :  { %v3886_v17 = vpop.f32.mrf.mxu0 }
  0xa1   :  { %1573 = vmatmul.bf16.vlgmr.msrb.gmra.mxu1 %v2380_v12  ;;  %1742 = vmatmul.bf16.vlgmr.msrb.gmra.mxu2 %v2384_v13  ;;  %v2452_v12 = vor.u32 %v3208_v5, %v2451_v4 }
  0xa2   :  { %1911 = vmatmul.bf16.vlgmr.msrb.gmra.mxu3 %v2388_v15 }
  0xa3   :  { %3157 = vmatmul.msk.bf16.vlgmr.msrb.gmra.mxu0 %vm1299_vm0, %v2392_v16 }
  0xa4   :  { %v3889_v18 = vpop.f32.mrf.mxu2 }
  0xa5   :  { %v3891_v19 = vpop.f32.mrf.mxu3 }
  0xa6   :  { %5127 = vst [vmem:[#allocation2_spill] sm:$0xff] %v3891_v19  ;;  %v3893_v20 = vpop.f32.mrf.mxu1 }
  0xa8   :  { %v3895_v21 = vpop.f32.mrf.mxu0 }
  0xac   :  { %v3921_v30 = vpop.f32.mrf.mxu2 }
  0xad   :  { %v3923_v31 = vpop.f32.mrf.mxu3 }
  0xae   :  { %5128 = vst [vmem:[#allocation3_spill] sm:$0xff] %v3923_v31  ;;  %v3925_v34 = vpop.f32.mrf.mxu1  ;;  %v4215_v31 = vld [vmem:[%s5124_s2] ss:$0 sm:$0xff] }
  0xb0   :  { %v3927_v37 = vpop.f32.mrf.mxu0 }
  0xb1   :  { %1578 = vmatmul.bf16.gmra.mxu1 %v2400_v32  ;;  %1747 = vmatmul.bf16.gmra.mxu2 %v2404_v33  ;;  %v2471_v32 = vld [vmem:[%s5125_s0 + $0xb0] sm:$0xf]  ;;  %v3213_v33 = vld [vmem:[%s5125_s0 + $0xc0] sm:$0xf0] }
  0xb2   :  { %1916 = vmatmul.bf16.gmra.mxu3 %v2408_v35  ;;  %v2472_v46 = vor.u32 %v3213_v33, %v2471_v32  ;;  %v3219_v32 = vld [vmem:[%s5125_s0 + $0xf4] sm:$0xf]  ;;  %v2497_v33 = vld [vmem:[%s5125_s0 + $0x104] sm:$0xf0] }
  0xb3   :  { %3158 = vmatmul.msk.bf16.gmra.mxu0 %vm1299_vm0, %v2412_v36 }
  0xb4   :  { %v3930_v38 = vpop.f32.mrf.mxu2 }
  0xb5   :  { %v3932_v39 = vpop.f32.mrf.mxu3 }
  0xb6   :  { %5129 = vst [vmem:[#allocation4_spill] sm:$0xff] %v3932_v39  ;;  %v3934_v40 = vpop.f32.mrf.mxu1 }
  0xb8   :  { %v3936_v41 = vpop.f32.mrf.mxu0 }
  0xbc   :  { %v3962_v50 = vpop.f32.mrf.mxu2 }
  0xbd   :  { %v3964_v51 = vpop.f32.mrf.mxu3 }
  0xbe   :  { %5130 = vst [vmem:[#allocation5_spill] sm:$0xff] %v3964_v51  ;;  %v3966_v54 = vpop.f32.mrf.mxu1 }
  0xc0   :  { %v3968_v57 = vpop.f32.mrf.mxu0 }
  0xc1   :  { %1583 = vmatmul.bf16.gmra.mxu1 %v2420_v52  ;;  %1752 = vmatmul.bf16.gmra.mxu2 %v2424_v53 }
  0xc2   :  { %1921 = vmatmul.bf16.gmra.mxu3 %v2428_v55  ;;  %v3214_v55 = vld [vmem:[%s5125_s0 + $0xcc] sm:$0xf] }
  0xc3   :  { %3159 = vmatmul.msk.bf16.gmra.mxu0 %vm1299_vm0, %v2432_v56  ;;  %v2477_v56 = vld [vmem:[%s5125_s0 + $0xdc] sm:$0xf0] }
  0xc4   :  { %v3971_v58 = vpop.f32.mrf.mxu2 }
  0xc5   :  { %v3973_v59 = vpop.f32.mrf.mxu3 }
  0xc6   :  { %5131 = vst [vmem:[#allocation6_spill] sm:$0xff] %v3973_v59  ;;  %v3975_v60 = vpop.f32.mrf.mxu1 }
  0xc8   :  { %v3977_v61 = vpop.f32.mrf.mxu0 }
  0xcc   :  { %v4003_v6 = vpop.f32.mrf.mxu2 }
  0xcd   :  { %v4005_v7 = vpop.f32.mrf.mxu3 }
  0xce   :  { %5132 = vst [vmem:[#allocation7_spill] sm:$0xff] %v4005_v7  ;;  %v4007_v10 = vpop.f32.mrf.mxu1 }
  0xd0   :  { %v4009_v13 = vpop.f32.mrf.mxu0 }
  0xd1   :  { %1588 = vmatmul.bf16.gmra.mxu1 %v2440_v8  ;;  %1757 = vmatmul.bf16.gmra.mxu2 %v2444_v9  ;;  %v2480_v8 = vor.u32 %v3214_v55, %v2477_v56  ;;  %v2484_v9 = vor.u32 %v3217_v63, %v2483_v62  ;;  %v2511_v55 = vld [vmem:[%s5125_s0 + $0x100] sm:$0xf]  ;;  %v3223_v56 = vld [vmem:[%s5125_s0 + $0x110] sm:$0xf0] }
  0xd2   :  { %1926 = vmatmul.bf16.gmra.mxu3 %v2448_v11 }
  0xd3   :  { %3160 = vmatmul.msk.bf16.gmra.mxu0 %vm1299_vm0, %v2452_v12  ;;  %v2488_v12 = vor.u32 %v3215_v0, %v2485_v1  ;;  %v2500_v0 = vor.u32 %v3219_v32, %v2497_v33  ;;  %v3224_v32 = vld [vmem:[%s5125_s0 + $0x11c] sm:$0xf]  ;;  %v2517_v33 = vld [vmem:[%s5125_s0 + $0x12c] sm:$0xf0] }
  0xd4   :  { %v4012_v15 = vpop.f32.mrf.mxu2 }
  0xd5   :  { %v4014_v16 = vpop.f32.mrf.mxu3 }
  0xd6   :  { %5133 = vst [vmem:[#allocation8_spill] sm:$0xff] %v4014_v16  ;;  %v4016_v22 = vpop.f32.mrf.mxu1 }
  0xd8   :  { %v4018_v23 = vpop.f32.mrf.mxu0 }
  0xdc   :  { %v4044_v35 = vpop.f32.mrf.mxu2 }
  0xdd   :  { %v4046_v36 = vpop.f32.mrf.mxu3 }
  0xde   :  { %5134 = vst [vmem:[#allocation9_spill] sm:$0xff] %v4046_v36  ;;  %v4048_v44 = vpop.f32.mrf.mxu1 }
  0xe0   :  { %v4050_v47 = vpop.f32.mrf.mxu0 }
  0xe1   :  { %1593 = vmatmul.bf16.gmra.mxu1 %v2460_v42  ;;  %1762 = vmatmul.bf16.gmra.mxu2 %v2464_v43  ;;  %v2503_v42 = vld [vmem:[%s5125_s0 + $0xf8] sm:$0xf]  ;;  %v3222_v43 = vld [vmem:[%s5125_s0 + $0x108] sm:$0xf0] }
  0xe2   :  { %1931 = vmatmul.bf16.gmra.mxu3 %v2468_v45  ;;  %v3220_v45 = vld [vmem:[%s5125_s0 + $0xfc] sm:$0xf]  ;;  %v2504_v1 = vor.u32 %v3222_v43, %v2503_v42  ;;  %v2523_v42 = vld [vmem:[%s5125_s0 + $0x120] sm:$0xf]  ;;  %v3227_v43 = vld [vmem:[%s5125_s0 + $0x130] sm:$0xf0] }
  0xe3   :  { %3161 = vmatmul.msk.bf16.gmra.mxu0 %vm1299_vm0, %v2472_v46  ;;  %v2505_v46 = vld [vmem:[%s5125_s0 + $0x10c] sm:$0xf0] }
  0xe4   :  { %v4053_v48 = vpop.f32.mrf.mxu2  ;;  %v2508_v3 = vor.u32 %v3220_v45, %v2505_v46  ;;  %v3225_v45 = vld [vmem:[%s5125_s0 + $0x124] sm:$0xf]  ;;  %v2525_v46 = vld [vmem:[%s5125_s0 + $0x134] sm:$0xf0] }
  0xe5   :  { %v4055_v49 = vpop.f32.mrf.mxu3 }
  0xe6   :  { %5135 = vst [vmem:[#allocation10_spill] sm:$0xff] %v4055_v49  ;;  %v4057_v52 = vpop.f32.mrf.mxu1 }
  0xe8   :  { %v4059_v53 = vpop.f32.mrf.mxu0 }
  0xec   :  { %v4085_v4 = vpop.f32.mrf.mxu2 }
  0xed   :  { %v4087_v5 = vpop.f32.mrf.mxu3 }
  0xee   :  { %5136 = vst [vmem:[#allocation11_spill] sm:$0xff] %v4087_v5  ;;  %v4089_v11 = vpop.f32.mrf.mxu1  ;;  %v2528_v5 = vor.u32 %v3225_v45, %v2525_v46  ;;  %v2551_v45 = vld [vmem:[%s5125_s0 + $0x150] sm:$0xf]  ;;  %v3233_v46 = vld [vmem:[%s5125_s0 + $0x160] sm:$0xf0] }
  0xef   :  { %v2552_v39 = vor.u32 %v3233_v46, %v2551_v45  ;;  %v1408_v45 = vadd.f32 %v4215_v31, %v3895_v21 }
  0xf0   :  { %v4091_v25 = vpop.f32.mrf.mxu0 }
  0xf1   :  { %1598 = vmatmul.bf16.gmra.mxu1 %v2480_v8  ;;  %1767 = vmatmul.bf16.gmra.mxu2 %v2484_v9  ;;  %v2512_v8 = vor.u32 %v3223_v56, %v2511_v55  ;;  %v2531_v55 = vld [vmem:[%s5125_s0 + $0x128] sm:$0xf]  ;;  %v3228_v56 = vld [vmem:[%s5125_s0 + $0x138] sm:$0xf0] }
  0xf2   :  { %1936 = vmatmul.bf16.gmra.mxu3 %v2488_v12  ;;  %v2532_v49 = vor.u32 %v3228_v56, %v2531_v55 }
  0xf3   :  { %3162 = vmatmul.msk.bf16.gmra.mxu0 %vm1299_vm0, %v2492_v24 }
  0xf4   :  { %v4094_v26 = vpop.f32.mrf.mxu2 }
  0xf5   :  { %5137 = vst [vmem:[#allocation12_spill] sm:$0xff] %v4094_v26  ;;  %v4096_v27 = vpop.f32.mrf.mxu3 }
  0xf6   :  { %5138 = vst [vmem:[#allocation13_spill] sm:$0xff] %v4096_v27  ;;  %v4098_v28 = vpop.f32.mrf.mxu1 }
  0xf8   :  { %v4100_v29 = vpop.f32.mrf.mxu0 }
  0xfc   :  { %v4126_v62 = vpop.f32.mrf.mxu2 }
  0xfd   :  { %5139 = vst [vmem:[#allocation14_spill] sm:$0xff] %v4126_v62  ;;  %v4128_v63 = vpop.f32.mrf.mxu3  ;;  %v1411_v62 = vadd.f32 %v4215_v31, %v3927_v37  ;;  %v1413_v37 = vadd.f32 %v4215_v31, %v3936_v41  ;;  %v3242_v41 = vld [vmem:[%s5125_s0 + $0x1a8] sm:$0xf0] }
  0xfe   :  { %5140 = vst [vmem:[#allocation15_spill] sm:$0xff] %v4128_v63  ;;  %v4130_v2 = vpop.f32.mrf.mxu1 }
 0x100   :  { %v4132_v9 = vpop.f32.mrf.mxu0 }
 0x101   :  { %1603 = vmatmul.bf16.gmra.mxu1 %v2500_v0  ;;  %1772 = vmatmul.bf16.gmra.mxu2 %v2504_v1 }
 0x102   :  { %1941 = vmatmul.bf16.gmra.mxu3 %v2508_v3  ;;  %v2520_v3 = vor.u32 %v3224_v32, %v2517_v33  ;;  %v3229_v32 = vld [vmem:[%s5125_s0 + $0x144] sm:$0xf]  ;;  %v2537_v33 = vld [vmem:[%s5125_s0 + $0x154] sm:$0xf0] }
 0x103   :  { %3163 = vmatmul.msk.bf16.gmra.mxu0 %vm1299_vm0, %v2512_v8  ;;  %v2524_v8 = vor.u32 %v3227_v43, %v2523_v42  ;;  %v3230_v42 = vld [vmem:[%s5125_s0 + $0x14c] sm:$0xf]  ;;  %v2545_v43 = vld [vmem:[%s5125_s0 + $0x15c] sm:$0xf0] }
 0x104   :  { %v4135_v12 = vpop.f32.mrf.mxu2  ;;  %v2548_v51 = vor.u32 %v3230_v42, %v2545_v43 }
 0x105   :  { %5141 = vst [vmem:[#allocation16_spill] sm:$0xff] %v4135_v12  ;;  %v4137_v24 = vpop.f32.mrf.mxu3 }
 0x106   :  { %5142 = vst [vmem:[#allocation17_spill] sm:$0xff] %v4137_v24  ;;  %v4139_v27 = vpop.f32.mrf.mxu1 }
 0x108   :  { %v4141_v63 = vpop.f32.mrf.mxu0 }
 0x10c   :  { %v4167_v0 = vpop.f32.mrf.mxu2 }
 0x10d   :  { %5143 = vst [vmem:[#allocation18_spill] sm:$0xff] %v4167_v0  ;;  %v4169_v1 = vpop.f32.mrf.mxu3 }
 0x10e   :  { %5144 = vst [vmem:[#allocation19_spill] sm:$0xff] %v4169_v1  ;;  %v4171_v24 = vpop.f32.mrf.mxu1 }
 0x110   :  { %v4173_v36 = vpop.f32.mrf.mxu0 }
 0x111   :  { %1608 = vmatmul.bf16.gmra.mxu1 %v2520_v3  ;;  %1777 = vmatmul.bf16.gmra.mxu2 %v2524_v8  ;;  %v2540_v3 = vor.u32 %v3229_v32, %v2537_v33 }
 0x112   :  { %1946 = vmatmul.bf16.gmra.mxu3 %v2528_v5  ;;  %v3232_v5 = vld [vmem:[%s5125_s0 + $0x158] sm:$0xf0] }
 0x113   :  { %3164 = vmatmul.msk.bf16.gmra.mxu0 %vm1299_vm0, %v2532_v49  ;;  %v2543_v49 = vld [vmem:[%s5125_s0 + $0x148] sm:$0xf] }
 0x114   :  { %v4176_v16 = vpop.f32.mrf.mxu2  ;;  %v2544_v8 = vor.u32 %v3232_v5, %v2543_v49 }
 0x115   :  { %5145 = vst [vmem:[#allocation20_spill] sm:$0xff] %v4176_v16  ;;  %v4178_v7 = vpop.f32.mrf.mxu3  ;;  %v1406_v16 = vadd.f32 %v4215_v31, %v3886_v17  ;;  %v3234_v17 = vld [vmem:[%s5125_s0 + $0x16c] sm:$0xf] }
 0x116   :  { %5146 = vst [vmem:[#allocation21_spill] sm:$0xff] %v4178_v7  ;;  %v4180_v59 = vpop.f32.mrf.mxu1 }
 0x118   :  { %v4182_v1 = vpop.f32.mrf.mxu0 }
 0x11c   :  { %v4208_v55 = vpop.f32.mrf.mxu2 }
 0x11d   :  { %5147 = vst [vmem:[#allocation22_spill] sm:$0xff] %v4208_v55  ;;  %v4210_v56 = vpop.f32.mrf.mxu3 }
 0x11e   :  { %5148 = vst [vmem:[#allocation23_spill] sm:$0xff] %v4210_v56  ;;  %v1574_v7 = vpop.f32.mrf.mxu1 }
 0x11f   :  { %v1575_v56 = vadd.f32 %v1574_v7, %v1406_v16  ;;  %v3237_v7 = vld [vmem:[%s5125_s0 + $0x180] sm:$0xf0]  ;;  %v2565_v16 = vld [vmem:[%s5125_s0 + $0x184] sm:$0xf0] }
 0x120   :  { %v2081_v19 = vpop.f32.mrf.mxu0 }
 0x121   :  { %1613 = vmatmul.bf16.gmra.mxu1 %v2540_v3  ;;  %1782 = vmatmul.bf16.gmra.mxu2 %v2544_v8  ;;  %v3238_v3 = vld [vmem:[%s5125_s0 + $0x188] sm:$0xf0] }
 0x122   :  { %1951 = vmatmul.bf16.gmra.mxu3 %v2548_v51  ;;  %v2557_v51 = vld [vmem:[%s5125_s0 + $0x17c] sm:$0xf0] }
 0x123   :  { %3165 = vmatmul.msk.bf16.gmra.mxu0 %vm1299_vm0, %v2552_v39  ;;  %v2563_v39 = vld [vmem:[%s5125_s0 + $0x170] sm:$0xf] }
 0x124   :  { %v1743_v32 = vpop.f32.mrf.mxu2 }
 0x125   :  { %v1744_v33 = vadd.f32 %v1743_v32, %v1575_v56  ;;  %v1912_v49 = vpop.f32.mrf.mxu3  ;;  %v2571_v56 = vld [vmem:[%s5125_s0 + $0x178] sm:$0xf] }
 0x126   :  { %v1576_v5 = vpop.f32.mrf.mxu1 }
 0x127   :  { %v1913_v42 = vadd.f32 %v1912_v49, %v1744_v33  ;;  %v1577_v21 = vadd.f32 %v1576_v5, %v1408_v45  ;;  %v2560_v49 = vor.u32 %v3234_v17, %v2557_v51  ;;  %v2572_v5 = vor.u32 %v3238_v3, %v2571_v56  ;;  %v2585_v3 = vld [vmem:[%s5125_s0 + $0x1ac] sm:$0xf0] }
 0x128   :  { %v2083_v43 = vpop.f32.mrf.mxu0 }
 0x129   :  { %v2082_v46 = vadd.f32 %v2081_v19, %v1913_v42  ;;  %v3235_v19 = vld [vmem:[%s5125_s0 + $0x174] sm:$0xf]  ;;  %v2564_v42 = vor.u32 %v3237_v7, %v2563_v39 }
 0x12b   :  { %3410 = vtanh.f32 %v2082_v46  ;;  %v2568_v46 = vor.u32 %v3235_v19, %v2565_v16 }
 0x12c   :  { %v1745_v8 = vpop.f32.mrf.mxu2 }
 0x12d   :  { %v1746_v32 = vadd.f32 %v1745_v8, %v1577_v21  ;;  %v1914_v33 = vpop.f32.mrf.mxu3  ;;  %v2591_v8 = vld [vmem:[%s5125_s0 + $0x1a0] sm:$0xf] }
 0x12e   :  { %v1579_v55 = vpop.f32.mrf.mxu1 }
 0x12f   :  { %v1915_v45 = vadd.f32 %v1914_v33, %v1746_v32  ;;  %v1580_v17 = vadd.f32 %v1579_v55, %v1411_v62  ;;  %v2583_v62 = vld [vmem:[%s5125_s0 + $0x198] sm:$0xf]  ;;  %v3243_v32 = vld [vmem:[%s5125_s0 + $0x1b0] sm:$0xf0] }
 0x130   :  { %v2086_v0 = vpop.f32.mrf.mxu0 }
 0x131   :  { %v3411_v12 = vpop.eup %3410  ;;  %v2084_v26 = vadd.f32 %v2083_v43, %v1915_v45  ;;  %1618 = vmatmul.bf16.gmra.mxu1 %v2560_v49  ;;  %1787 = vmatmul.bf16.gmra.mxu2 %v2564_v42 }
 0x132   :  { %2305 = vst [vmem:[%s5126_s3] sm:$0xff] %v3411_v12  ;;  %1956 = vmatmul.bf16.gmra.mxu3 %v2568_v46  ;;  %v3239_v12 = vld [vmem:[%s5125_s0 + $0x194] sm:$0xf] }
 0x133   :  { %3166 = vmatmul.msk.bf16.gmra.mxu0 %vm1299_vm0, %v2572_v5  ;;  %3412 = vtanh.f32 %v2084_v26  ;;  %v2577_v26 = vld [vmem:[%s5125_s0 + $0x1a4] sm:$0xf0]  ;;  %v2584_v5 = vor.u32 %v3242_v41, %v2583_v62 }
 0x134   :  { %v1748_v51 = vpop.f32.mrf.mxu2  ;;  %v2580_v46 = vor.u32 %v3239_v12, %v2577_v26 }
 0x135   :  { %v1749_v39 = vadd.f32 %v1748_v51, %v1580_v17  ;;  %v1917_v7 = vpop.f32.mrf.mxu3  ;;  %v2592_v51 = vor.u32 %v3243_v32, %v2591_v8  ;;  %v2597_v8 = vld [vmem:[%s5125_s0 + $0x1cc] sm:$0xf0]  ;;  %v2603_v32 = vld [vmem:[%s5125_s0 + $0x1c0] sm:$0xf] }
 0x136   :  { %v1581_v19 = vpop.f32.mrf.mxu1 }
 0x137   :  { %v1918_v21 = vadd.f32 %v1917_v7, %v1749_v39  ;;  %v1582_v55 = vadd.f32 %v1581_v19, %v1413_v37 }
 0x138   :  { %v2088_v16 = vpop.f32.mrf.mxu0 }
 0x139   :  { %v3413_v56 = vpop.eup %3412  ;;  %v2087_v43 = vadd.f32 %v2086_v0, %v1918_v21  ;;  %v3240_v0 = vld [vmem:[%s5125_s0 + $0x19c] sm:$0xf]  ;;  %v1416_v21 = vadd.f32 %v4215_v31, %v3968_v57  ;;  %v1418_v57 = vadd.f32 %v4215_v31, %v3977_v61  ;;  %v3247_v61 = vld [vmem:[%s5125_s0 + $0x1d0] sm:$0xf0] }
 0x13a   :  { %2306 = vst [vmem:[%s5126_s3 + $0x8] sm:$0xff] %v3413_v56  ;;  %v2588_v17 = vor.u32 %v3240_v0, %v2585_v3  ;;  %v3244_v3 = vld [vmem:[%s5125_s0 + $0x1bc] sm:$0xf] }
 0x13b   :  { %3414 = vtanh.f32 %v2087_v43 }
 0x13c   :  { %v1750_v33 = vpop.f32.mrf.mxu2 }
 0x13d   :  { %v1751_v49 = vadd.f32 %v1750_v33, %v1582_v55  ;;  %v1919_v42 = vpop.f32.mrf.mxu3  ;;  %v3245_v33 = vld [vmem:[%s5125_s0 + $0x1c4] sm:$0xf] }
 0x13e   :  { %v1584_v45 = vpop.f32.mrf.mxu1 }
 0x13f   :  { %v1920_v39 = vadd.f32 %v1919_v42, %v1751_v49  ;;  %v1585_v37 = vadd.f32 %v1584_v45, %v1416_v21  ;;  %v2605_v42 = vld [vmem:[%s5125_s0 + $0x1d4] sm:$0xf0] }
 0x140   :  { %v2091_v7 = vpop.f32.mrf.mxu0  ;;  %v2608_v21 = vor.u32 %v3245_v33, %v2605_v42  ;;  %v3249_v33 = vld [vmem:[%s5125_s0 + $0x1e4] sm:$0xf]  ;;  %v2623_v42 = vld [vmem:[%s5125_s0 + $0x1e8] sm:$0xf] }
 0x141   :  { %v3415_v19 = vpop.eup %3414  ;;  %v2089_v56 = vadd.f32 %v2088_v16, %v1920_v39  ;;  %1623 = vmatmul.bf16.gmra.mxu1 %v2580_v46  ;;  %1792 = vmatmul.bf16.gmra.mxu2 %v2584_v5  ;;  %v2611_v46 = vld [vmem:[%s5125_s0 + $0x1c8] sm:$0xf]  ;;  %v3248_v5 = vld [vmem:[%s5125_s0 + $0x1d8] sm:$0xf0]  ;;  %v2600_v39 = vor.u32 %v3244_v3, %v2597_v8 }
 0x142   :  { %2307 = vst [vmem:[%s5126_s3 + $0x10] sm:$0xff] %v3415_v19  ;;  %1961 = vmatmul.bf16.gmra.mxu3 %v2588_v17 }
 0x143   :  { %3167 = vmatmul.msk.bf16.gmra.mxu0 %vm1299_vm0, %v2592_v51  ;;  %3416 = vtanh.f32 %v2089_v56  ;;  %v2612_v56 = vor.u32 %v3248_v5, %v2611_v46  ;;  %v3250_v46 = vld [vmem:[%s5125_s0 + $0x1ec] sm:$0xf] }
 0x144   :  { %v1753_v43 = vpop.f32.mrf.mxu2 }
 0x145   :  { %v1754_v12 = vadd.f32 %v1753_v43, %v1585_v37  ;;  %v1922_v26 = vpop.f32.mrf.mxu3 }
 0x146   :  { %v1586_v62 = vpop.f32.mrf.mxu1 }
 0x147   :  { %v1923_v41 = vadd.f32 %v1922_v26, %v1754_v12  ;;  %v1587_v49 = vadd.f32 %v1586_v62, %v1418_v57  ;;  %v1421_v26 = vadd.f32 %v4215_v31, %v4009_v13  ;;  %v1423_v13 = vadd.f32 %v4215_v31, %v4018_v23  ;;  %v3252_v23 = vld [vmem:[%s5125_s0 + $0x1f8] sm:$0xf0] }
 0x148   :  { %v2093_v0 = vpop.f32.mrf.mxu0 }
 0x149   :  { %v3417_v55 = vpop.eup %3416  ;;  %v2092_v16 = vadd.f32 %v2091_v7, %v1923_v41  ;;  %v2604_v7 = vor.u32 %v3247_v61, %v2603_v32 }
 0x14a   :  { %2308 = vst [vmem:[%s5126_s3 + $0x18] sm:$0xff] %v3417_v55 }
 0x14b   :  { %3418 = vtanh.f32 %v2092_v16 }
 0x14c   :  { %v1755_v45 = vpop.f32.mrf.mxu2 }
 0x14d   :  { %v1756_v17 = vadd.f32 %v1755_v45, %v1587_v49  ;;  %v1924_v51 = vpop.f32.mrf.mxu3  ;;  %v2617_v49 = vld [vmem:[%s5125_s0 + $0x1f4] sm:$0xf0]  ;;  %v2625_v45 = vld [vmem:[%s5125_s0 + $0x1fc] sm:$0xf0] }
 0x14e   :  { %v1589_v19 = vpop.f32.mrf.mxu1 }
 0x14f   :  { %v1925_v37 = vadd.f32 %v1924_v51, %v1756_v17  ;;  %v1590_v41 = vadd.f32 %v1589_v19, %v1421_v26  ;;  %v2631_v17 = vld [vmem:[%s5125_s0 + $0x1f0] sm:$0xf]  ;;  %v3253_v51 = vld [vmem:[%s5125_s0 + $0x200] sm:$0xf0] }
 0x150   :  { %v2096_v43 = vpop.f32.mrf.mxu0 }
 0x151   :  { %v3419_v12 = vpop.eup %3418  ;;  %v2094_v62 = vadd.f32 %v2093_v0, %v1925_v37  ;;  %1628 = vmatmul.bf16.gmra.mxu1 %v2600_v39  ;;  %1797 = vmatmul.bf16.gmra.mxu2 %v2604_v7 }
 0x152   :  { %2309 = vst [vmem:[%s5126_s3 + $0x20] sm:$0xff] %v3419_v12  ;;  %1966 = vmatmul.bf16.gmra.mxu3 %v2608_v21  ;;  %v2620_v21 = vor.u32 %v3249_v33, %v2617_v49  ;;  %v2632_v12 = vor.u32 %v3253_v51, %v2631_v17  ;;  %v2645_v17 = vld [vmem:[%s5125_s0 + $0x224] sm:$0xf0]  ;;  %v2651_v51 = vld [vmem:[%s5125_s0 + $0x218] sm:$0xf] }
 0x153   :  { %3168 = vmatmul.msk.bf16.gmra.mxu0 %vm1299_vm0, %v2612_v56  ;;  %3420 = vtanh.f32 %v2094_v62  ;;  %v2624_v56 = vor.u32 %v3252_v23, %v2623_v42  ;;  %v3254_v42 = vld [vmem:[%s5125_s0 + $0x20c] sm:$0xf]  ;;  %v2637_v23 = vld [vmem:[%s5125_s0 + $0x21c] sm:$0xf0] }
 0x154   :  { %v1758_v55 = vpop.f32.mrf.mxu2 }
 0x155   :  { %v1759_v57 = vadd.f32 %v1758_v55, %v1590_v41  ;;  %v1927_v16 = vpop.f32.mrf.mxu3  ;;  %v1426_v55 = vadd.f32 %v4215_v31, %v4050_v47  ;;  %v1428_v47 = vadd.f32 %v4215_v31, %v4059_v53  ;;  %v3257_v53 = vld [vmem:[%s5125_s0 + $0x220] sm:$0xf0] }
 0x156   :  { %v1591_v3 = vpop.f32.mrf.mxu1 }
 0x157   :  { %v1928_v8 = vadd.f32 %v1927_v16, %v1759_v57  ;;  %v1592_v5 = vadd.f32 %v1591_v3, %v1423_v13 }
 0x158   :  { %v2098_v32 = vpop.f32.mrf.mxu0 }
 0x159   :  { %v3421_v61 = vpop.eup %3420  ;;  %v2097_v0 = vadd.f32 %v2096_v43, %v1928_v8  ;;  %v2628_v43 = vor.u32 %v3250_v46, %v2625_v45  ;;  %v2643_v46 = vld [vmem:[%s5125_s0 + $0x210] sm:$0xf] }
 0x15a   :  { %2310 = vst [vmem:[%s5126_s3 + $0x28] sm:$0xff] %v3421_v61 }
 0x15b   :  { %3422 = vtanh.f32 %v2097_v0 }
 0x15c   :  { %v1760_v39 = vpop.f32.mrf.mxu2 }
 0x15d   :  { %v1761_v7 = vadd.f32 %v1760_v39, %v1592_v5  ;;  %v1929_v19 = vpop.f32.mrf.mxu3  ;;  %v3255_v5 = vld [vmem:[%s5125_s0 + $0x214] sm:$0xf]  ;;  %v3258_v39 = vld [vmem:[%s5125_s0 + $0x228] sm:$0xf0] }
 0x15e   :  { %v1594_v37 = vpop.f32.mrf.mxu1 }
 0x15f   :  { %v1930_v26 = vadd.f32 %v1929_v19, %v1761_v7  ;;  %v1595_v16 = vadd.f32 %v1594_v37, %v1426_v55  ;;  %v2644_v37 = vor.u32 %v3257_v53, %v2643_v46  ;;  %v2663_v46 = vld [vmem:[%s5125_s0 + $0x238] sm:$0xf]  ;;  %v3260_v53 = vld [vmem:[%s5125_s0 + $0x23c] sm:$0xf] }
 0x160   :  { %v2101_v62 = vpop.f32.mrf.mxu0 }
 0x161   :  { %v3423_v41 = vpop.eup %3422  ;;  %v2099_v57 = vadd.f32 %v2098_v32, %v1930_v26  ;;  %1633 = vmatmul.bf16.gmra.mxu1 %v2620_v21  ;;  %1802 = vmatmul.bf16.gmra.mxu2 %v2624_v56  ;;  %v2640_v56 = vor.u32 %v3254_v42, %v2637_v23  ;;  %v2652_v26 = vor.u32 %v3258_v39, %v2651_v51  ;;  %v3259_v42 = vld [vmem:[%s5125_s0 + $0x234] sm:$0xf]  ;;  %v2657_v23 = vld [vmem:[%s5125_s0 + $0x244] sm:$0xf0] }
 0x162   :  { %2311 = vst [vmem:[%s5126_s3 + $0x30] sm:$0xff] %v3423_v41  ;;  %1971 = vmatmul.bf16.gmra.mxu3 %v2628_v43  ;;  %v3263_v51 = vld [vmem:[%s5125_s0 + $0x250] sm:$0xf0] }
 0x163   :  { %3169 = vmatmul.msk.bf16.gmra.mxu0 %vm1299_vm0, %v2632_v12  ;;  %3424 = vtanh.f32 %v2099_v57  ;;  %v2648_v12 = vor.u32 %v3255_v5, %v2645_v17  ;;  %v1431_v57 = vadd.f32 %v4215_v31, %v4091_v25  ;;  %v1433_v25 = vadd.f32 %v4215_v31, %v4100_v29  ;;  %v3262_v29 = vld [vmem:[%s5125_s0 + $0x248] sm:$0xf0]  ;;  %v2671_v17 = vld [vmem:[%s5125_s0 + $0x240] sm:$0xf] }
 0x164   :  { %v1763_v3 = vpop.f32.mrf.mxu2 }
 0x165   :  { %v1764_v8 = vadd.f32 %v1763_v3, %v1595_v16  ;;  %v1932_v61 = vpop.f32.mrf.mxu3 }
 0x166   :  { %v1596_v13 = vpop.f32.mrf.mxu1 }
 0x167   :  { %v1933_v0 = vadd.f32 %v1932_v61, %v1764_v8  ;;  %v1597_v45 = vadd.f32 %v1596_v13, %v1428_v47 }
 0x168   :  { %v2103_v33 = vpop.f32.mrf.mxu0 }
 0x169   :  { %v3425_v49 = vpop.eup %3424  ;;  %v2102_v32 = vadd.f32 %v2101_v62, %v1933_v0 }
 0x16a   :  { %2312 = vst [vmem:[%s5126_s3 + $0x38] sm:$0xff] %v3425_v49 }
 0x16b   :  { %3426 = vtanh.f32 %v2102_v32 }
 0x16c   :  { %v1765_v7 = vpop.f32.mrf.mxu2 }
 0x16d   :  { %v1766_v19 = vadd.f32 %v1765_v7, %v1597_v45  ;;  %v1934_v21 = vpop.f32.mrf.mxu3  ;;  %v2665_v45 = vld [vmem:[%s5125_s0 + $0x24c] sm:$0xf0] }
 0x16e   :  { %v1599_v43 = vpop.f32.mrf.mxu1 }
 0x16f   :  { %v1935_v62 = vadd.f32 %v1934_v21, %v1766_v19  ;;  %v1600_v3 = vadd.f32 %v1599_v43, %v1431_v57  ;;  %v2660_v21 = vor.u32 %v3259_v42, %v2657_v23  ;;  %v2668_v43 = vor.u32 %v3260_v53, %v2665_v45  ;;  %v2683_v42 = vld [vmem:[%s5125_s0 + $0x260] sm:$0xf]  ;;  %v3265_v23 = vld [vmem:[%s5125_s0 + $0x264] sm:$0xf]  ;;  %v2691_v53 = vld [vmem:[%s5125_s0 + $0x268] sm:$0xf] }
 0x170   :  { %v2106_v41 = vpop.f32.mrf.mxu0 }
 0x171   :  { %v3427_v55 = vpop.eup %3426  ;;  %v2104_v16 = vadd.f32 %v2103_v33, %v1935_v62  ;;  %1638 = vmatmul.bf16.gmra.mxu1 %v2640_v56  ;;  %1807 = vmatmul.bf16.gmra.mxu2 %v2644_v37  ;;  %v2664_v56 = vor.u32 %v3262_v29, %v2663_v46  ;;  %v2685_v29 = vld [vmem:[%s5125_s0 + $0x274] sm:$0xf0] }
 0x172   :  { %2313 = vst [vmem:[%s5126_s3 + $0x40] sm:$0xff] %v3427_v55  ;;  %1976 = vmatmul.bf16.gmra.mxu3 %v2648_v12  ;;  %v2672_v12 = vor.u32 %v3263_v51, %v2671_v17  ;;  %v1436_v55 = vadd.f32 %v4215_v31, %v4132_v9  ;;  %v1438_v9 = vadd.f32 %v4215_v31, %v4141_v63  ;;  %v3267_v63 = vld [vmem:[%s5125_s0 + $0x270] sm:$0xf0] }
 0x173   :  { %3170 = vmatmul.msk.bf16.gmra.mxu0 %vm1299_vm0, %v2652_v26  ;;  %3428 = vtanh.f32 %v2104_v16 }
 0x174   :  { %v1768_v8 = vpop.f32.mrf.mxu2 }
 0x175   :  { %v1769_v61 = vadd.f32 %v1768_v8, %v1600_v3  ;;  %v1937_v13 = vpop.f32.mrf.mxu3 }
 0x176   :  { %v1601_v0 = vpop.f32.mrf.mxu1 }
 0x177   :  { %v1938_v49 = vadd.f32 %v1937_v13, %v1769_v61  ;;  %v1602_v5 = vadd.f32 %v1601_v0, %v1433_v25  ;;  %v3264_v25 = vld [vmem:[%s5125_s0 + $0x25c] sm:$0xf] }
 0x178   :  { %v2108_v47 = vpop.f32.mrf.mxu0 }
 0x179   :  { %v3429_v32 = vpop.eup %3428  ;;  %v2107_v33 = vadd.f32 %v2106_v41, %v1938_v49 }
 0x17a   :  { %2314 = vst [vmem:[%s5126_s3 + $0x48] sm:$0xff] %v3429_v32 }
 0x17b   :  { %3430 = vtanh.f32 %v2107_v33  ;;  %v2677_v33 = vld [vmem:[%s5125_s0 + $0x26c] sm:$0xf0] }
 0x17c   :  { %v1770_v39 = vpop.f32.mrf.mxu2 }
 0x17d   :  { %v1771_v7 = vadd.f32 %v1770_v39, %v1602_v5  ;;  %v1939_v19 = vpop.f32.mrf.mxu3  ;;  %v3268_v5 = vld [vmem:[%s5125_s0 + $0x278] sm:$0xf0]  ;;  %v2680_v39 = vor.u32 %v3264_v25, %v2677_v33  ;;  %v2705_v33 = vld [vmem:[%s5125_s0 + $0x29c] sm:$0xf0] }
 0x17e   :  { %v1604_v37 = vpop.f32.mrf.mxu1 }
 0x17f   :  { %v1940_v26 = vadd.f32 %v1939_v19, %v1771_v7  ;;  %v1605_v16 = vadd.f32 %v1604_v37, %v1436_v55  ;;  %v2684_v7 = vor.u32 %v3267_v63, %v2683_v42  ;;  %v2711_v42 = vld [vmem:[%s5125_s0 + $0x290] sm:$0xf]  ;;  %v3273_v63 = vld [vmem:[%s5125_s0 + $0x2a0] sm:$0xf0] }
 0x180   :  { %v2111_v62 = vpop.f32.mrf.mxu0 }
 0x181   :  { %v3431_v41 = vpop.eup %3430  ;;  %v2109_v57 = vadd.f32 %v2108_v47, %v1940_v26  ;;  %1643 = vmatmul.bf16.gmra.mxu1 %v2660_v21  ;;  %1812 = vmatmul.bf16.gmra.mxu2 %v2664_v56  ;;  %v2688_v21 = vor.u32 %v3265_v23, %v2685_v29  ;;  %v2692_v56 = vor.u32 %v3268_v5, %v2691_v53 }
 0x182   :  { %2315 = vst [vmem:[%s5126_s3 + $0x50] sm:$0xff] %v3431_v41  ;;  %1981 = vmatmul.bf16.gmra.mxu3 %v2668_v43  ;;  %v1441_v26 = vadd.f32 %v4215_v31, %v4173_v36  ;;  %v1443_v36 = vadd.f32 %v4215_v31, %v4182_v1  ;;  %v3272_v1 = vld [vmem:[%s5125_s0 + $0x298] sm:$0xf0] }
 0x183   :  { %3171 = vmatmul.msk.bf16.gmra.mxu0 %vm1299_vm0, %v2672_v12  ;;  %3432 = vtanh.f32 %v2109_v57 }
 0x184   :  { %v1773_v3 = vpop.f32.mrf.mxu2 }
 0x185   :  { %v1774_v8 = vadd.f32 %v1773_v3, %v1605_v16  ;;  %v1942_v61 = vpop.f32.mrf.mxu3 }
 0x186   :  { %v1606_v13 = vpop.f32.mrf.mxu1 }
 0x187   :  { %v1943_v0 = vadd.f32 %v1942_v61, %v1774_v8  ;;  %v1607_v46 = vadd.f32 %v1606_v13, %v1438_v9  ;;  %v2703_v9 = vld [vmem:[%s5125_s0 + $0x288] sm:$0xf] }
 0x188   :  { %v2113_v49 = vpop.f32.mrf.mxu0  ;;  %v2704_v5 = vor.u32 %v3272_v1, %v2703_v9 }
 0x189   :  { %v3433_v32 = vpop.eup %3432  ;;  %v2112_v47 = vadd.f32 %v2111_v62, %v1943_v0 }
 0x18a   :  { %2316 = vst [vmem:[%s5126_s3 + $0x58] sm:$0xff] %v3433_v32  ;;  %v2697_v32 = vld [vmem:[%s5125_s0 + $0x294] sm:$0xf0] }
 0x18b   :  { %3434 = vtanh.f32 %v2112_v47  ;;  %v3270_v47 = vld [vmem:[%s5125_s0 + $0x28c] sm:$0xf] }
 0x18c   :  { %v1775_v45 = vpop.f32.mrf.mxu2 }
 0x18d   :  { %v1776_v17 = vadd.f32 %v1775_v45, %v1607_v46  ;;  %v1944_v51 = vpop.f32.mrf.mxu3 }
 0x18e   :  { %v1609_v19 = vpop.f32.mrf.mxu1 }
 0x18f   :  { %v1945_v37 = vadd.f32 %v1944_v51, %v1776_v17  ;;  %v1610_v41 = vadd.f32 %v1609_v19, %v1441_v26  ;;  %v2708_v17 = vor.u32 %v3270_v47, %v2705_v33  ;;  %v2712_v51 = vor.u32 %v3273_v63, %v2711_v42 }
 0x190   :  { %v2116_v43 = vpop.f32.mrf.mxu0 }
 0x191   :  { %v3435_v12 = vpop.eup %3434  ;;  %v2114_v62 = vadd.f32 %v2113_v49, %v1945_v37  ;;  %1648 = vmatmul.bf16.gmra.mxu1 %v2680_v39  ;;  %1817 = vmatmul.bf16.gmra.mxu2 %v2684_v7  ;;  %v3269_v49 = vld [vmem:[%s5125_s0 + $0x284] sm:$0xf] }
 0x192   :  { %2317 = vst [vmem:[%s5126_s3 + $0x60] sm:$0xff] %v3435_v12  ;;  %1986 = vmatmul.bf16.gmra.mxu3 %v2688_v21  ;;  %v2700_v53 = vor.u32 %v3269_v49, %v2697_v32  ;;  %v1446_v21 = vadd.f32 %v4215_v31, %v3884_v14  ;;  %v1448_v14 = vadd.f32 %v4215_v31, %v3893_v20  ;;  %v3277_v20 = vld [vmem:[%s5125_s0 + $0x2c0] sm:$0xf0]  ;;  %v2731_v49 = vld [vmem:[%s5125_s0 + $0x2b8] sm:$0xf] }
 0x193   :  { %3172 = vmatmul.msk.bf16.gmra.mxu0 %vm1299_vm0, %v2692_v56  ;;  %3436 = vtanh.f32 %v2114_v62  ;;  %v3278_v32 = vld [vmem:[%s5125_s0 + $0x2c8] sm:$0xf0] }
 0x194   :  { %v1778_v55 = vpop.f32.mrf.mxu2 }
 0x195   :  { %v1779_v57 = vadd.f32 %v1778_v55, %v1610_v41  ;;  %v1947_v16 = vpop.f32.mrf.mxu3 }
 0x196   :  { %v1611_v3 = vpop.f32.mrf.mxu1 }
 0x197   :  { %v1948_v8 = vadd.f32 %v1947_v16, %v1779_v57  ;;  %v1612_v25 = vadd.f32 %v1611_v3, %v1443_v36  ;;  %v3274_v3 = vld [vmem:[%s5125_s0 + $0x2ac] sm:$0xf] }
 0x198   :  { %v2118_v61 = vpop.f32.mrf.mxu0 }
 0x199   :  { %v3437_v13 = vpop.eup %3436  ;;  %v2117_v0 = vadd.f32 %v2116_v43, %v1948_v8  ;;  %v2717_v8 = vld [vmem:[%s5125_s0 + $0x2bc] sm:$0xf0] }
 0x19a   :  { %2318 = vst [vmem:[%s5126_s3 + $0x68] sm:$0xff] %v3437_v13  ;;  %v3275_v13 = vld [vmem:[%s5125_s0 + $0x2b4] sm:$0xf] }
 0x19b   :  { %3438 = vtanh.f32 %v2117_v0  ;;  %v2725_v0 = vld [vmem:[%s5125_s0 + $0x2c4] sm:$0xf0] }
 0x19c   :  { %v1780_v23 = vpop.f32.mrf.mxu2  ;;  %v2728_v63 = vor.u32 %v3275_v13, %v2725_v0 }
 0x19d   :  { %v1781_v46 = vadd.f32 %v1780_v23, %v1612_v25  ;;  %v1949_v29 = vpop.f32.mrf.mxu3  ;;  %v2720_v25 = vor.u32 %v3274_v3, %v2717_v8  ;;  %v2732_v23 = vor.u32 %v3278_v32, %v2731_v49 }
 0x19e   :  { %v1614_v45 = vpop.f32.mrf.mxu1 }
 0x19f   :  { %v1950_v39 = vadd.f32 %v1949_v29, %v1781_v46  ;;  %v1615_v37 = vadd.f32 %v1614_v45, %v1446_v21 }
 0x1a0   :  { %v2121_v7 = vpop.f32.mrf.mxu0 }
 0x1a1   :  { %v3439_v19 = vpop.eup %3438  ;;  %v2119_v56 = vadd.f32 %v2118_v61, %v1950_v39  ;;  %1653 = vmatmul.bf16.gmra.mxu1 %v2700_v53  ;;  %1822 = vmatmul.bf16.gmra.mxu2 %v2704_v5  ;;  %v2723_v61 = vld [vmem:[%s5125_s0 + $0x2b0] sm:$0xf]  ;;  %v1451_v5 = vadd.f32 %v4215_v31, %v3925_v34  ;;  %v1453_v34 = vadd.f32 %v4215_v31, %v3934_v40  ;;  %v3282_v40 = vld [vmem:[%s5125_s0 + $0x2e8] sm:$0xf0] }
 0x1a2   :  { %2319 = vst [vmem:[%s5126_s3 + $0x70] sm:$0xff] %v3439_v19  ;;  %1991 = vmatmul.bf16.gmra.mxu3 %v2708_v17  ;;  %v2724_v33 = vor.u32 %v3277_v20, %v2723_v61 }
 0x1a3   :  { %3173 = vmatmul.msk.bf16.gmra.mxu0 %vm1299_vm0, %v2712_v51  ;;  %3440 = vtanh.f32 %v2119_v56 }
 0x1a4   :  { %v1783_v43 = vpop.f32.mrf.mxu2 }
 0x1a5   :  { %v1784_v12 = vadd.f32 %v1783_v43, %v1615_v37  ;;  %v1952_v26 = vpop.f32.mrf.mxu3 }
 0x1a6   :  { %v1616_v62 = vpop.f32.mrf.mxu1 }
 0x1a7   :  { %v1953_v41 = vadd.f32 %v1952_v26, %v1784_v12  ;;  %v1617_v36 = vadd.f32 %v1616_v62, %v1448_v14  ;;  %v3279_v12 = vld [vmem:[%s5125_s0 + $0x2d4] sm:$0xf]  ;;  %v2737_v26 = vld [vmem:[%s5125_s0 + $0x2e4] sm:$0xf0]  ;;  %v2743_v62 = vld [vmem:[%s5125_s0 + $0x2d8] sm:$0xf] }
 0x1a8   :  { %v2123_v55 = vpop.f32.mrf.mxu0  ;;  %v2751_v14 = vld [vmem:[%s5125_s0 + $0x2e0] sm:$0xf]  ;;  %v2740_v20 = vor.u32 %v3279_v12, %v2737_v26  ;;  %v2744_v13 = vor.u32 %v3282_v40, %v2743_v62 }
 0x1a9   :  { %v3441_v57 = vpop.eup %3440  ;;  %v2122_v16 = vadd.f32 %v2121_v7, %v1953_v41  ;;  %v3280_v41 = vld [vmem:[%s5125_s0 + $0x2dc] sm:$0xf] }
 0x1aa   :  { %2320 = vst [vmem:[%s5126_s3 + $0x78] sm:$0xff] %v3441_v57  ;;  %v2745_v57 = vld [vmem:[%s5125_s0 + $0x2ec] sm:$0xf0] }
 0x1ab   :  { %3442 = vtanh.f32 %v2122_v16  ;;  %v3283_v16 = vld [vmem:[%s5125_s0 + $0x2f0] sm:$0xf0]  ;;  %v2748_v0 = vor.u32 %v3280_v41, %v2745_v57 }
 0x1ac   :  { %v1785_v9 = vpop.f32.mrf.mxu2  ;;  %v2752_v49 = vor.u32 %v3283_v16, %v2751_v14 }
 0x1ad   :  { %v1786_v1 = vadd.f32 %v1785_v9, %v1617_v36  ;;  %v1954_v47 = vpop.f32.mrf.mxu3 }
 0x1ae   :  { %v1619_v42 = vpop.f32.mrf.mxu1 }
 0x1af   :  { %v1955_v46 = vadd.f32 %v1954_v47, %v1786_v1  ;;  %v1620_v17 = vadd.f32 %v1619_v42, %v1451_v5  ;;  %v1456_v47 = vadd.f32 %v4215_v31, %v3966_v54  ;;  %v1458_v54 = vadd.f32 %v4215_v31, %v3975_v60  ;;  %v3287_v60 = vld [vmem:[%s5125_s0 + $0x310] sm:$0xf0] }
 0x1b0   :  { %v2126_v29 = vpop.f32.mrf.mxu0 }
 0x1b1   :  { %v3443_v53 = vpop.eup %3442  ;;  %v2124_v45 = vadd.f32 %v2123_v55, %v1955_v46  ;;  %1658 = vmatmul.bf16.gmra.mxu1 %v2720_v25  ;;  %1827 = vmatmul.bf16.gmra.mxu2 %v2724_v33 }
 0x1b2   :  { %2321 = vst [vmem:[%s5126_s3 + $0x80] sm:$0xff] %v3443_v53  ;;  %1996 = vmatmul.bf16.gmra.mxu3 %v2728_v63 }
 0x1b3   :  { %3174 = vmatmul.msk.bf16.gmra.mxu0 %vm1299_vm0, %v2732_v23  ;;  %3444 = vtanh.f32 %v2124_v45 }
 0x1b4   :  { %v1788_v51 = vpop.f32.mrf.mxu2 }
 0x1b5   :  { %v1789_v39 = vadd.f32 %v1788_v51, %v1620_v17  ;;  %v1957_v7 = vpop.f32.mrf.mxu3  ;;  %v3284_v17 = vld [vmem:[%s5125_s0 + $0x2fc] sm:$0xf]  ;;  %v2757_v51 = vld [vmem:[%s5125_s0 + $0x30c] sm:$0xf0] }
 0x1b6   :  { %v1621_v19 = vpop.f32.mrf.mxu1  ;;  %v2760_v26 = vor.u32 %v3284_v17, %v2757_v51 }
 0x1b7   :  { %v1958_v21 = vadd.f32 %v1957_v7, %v1789_v39  ;;  %v1622_v55 = vadd.f32 %v1621_v19, %v1453_v34  ;;  %v2763_v39 = vld [vmem:[%s5125_s0 + $0x300] sm:$0xf]  ;;  %v3285_v7 = vld [vmem:[%s5125_s0 + $0x304] sm:$0xf] }
 0x1b8   :  { %v2128_v56 = vpop.f32.mrf.mxu0  ;;  %v2764_v62 = vor.u32 %v3287_v60, %v2763_v39 }
 0x1b9   :  { %v3445_v37 = vpop.eup %3444  ;;  %v2127_v43 = vadd.f32 %v2126_v29, %v1958_v21  ;;  %v2765_v21 = vld [vmem:[%s5125_s0 + $0x314] sm:$0xf0] }
 0x1ba   :  { %2322 = vst [vmem:[%s5126_s3 + $0x88] sm:$0xff] %v3445_v37  ;;  %v3288_v37 = vld [vmem:[%s5125_s0 + $0x318] sm:$0xf0]  ;;  %v2768_v41 = vor.u32 %v3285_v7, %v2765_v21 }
 0x1bb   :  { %3446 = vtanh.f32 %v2127_v43 }
 0x1bc   :  { %v1790_v3 = vpop.f32.mrf.mxu2 }
 0x1bd   :  { %v1791_v8 = vadd.f32 %v1790_v3, %v1622_v55  ;;  %v1959_v61 = vpop.f32.mrf.mxu3  ;;  %v1461_v3 = vadd.f32 %v4215_v31, %v4007_v10  ;;  %v1463_v10 = vadd.f32 %v4215_v31, %v4016_v22  ;;  %v3292_v22 = vld [vmem:[%s5125_s0 + $0x338] sm:$0xf0] }
 0x1be   :  { %v1624_v36 = vpop.f32.mrf.mxu1 }
 0x1bf   :  { %v1960_v32 = vadd.f32 %v1959_v61, %v1791_v8  ;;  %v1625_v33 = vadd.f32 %v1624_v36, %v1456_v47  ;;  %v3289_v47 = vld [vmem:[%s5125_s0 + $0x324] sm:$0xf] }
 0x1c0   :  { %v2131_v9 = vpop.f32.mrf.mxu0 }
 0x1c1   :  { %v3447_v1 = vpop.eup %3446  ;;  %v2129_v25 = vadd.f32 %v2128_v56, %v1960_v32  ;;  %1663 = vmatmul.bf16.gmra.mxu1 %v2740_v20  ;;  %1832 = vmatmul.bf16.gmra.mxu2 %v2744_v13  ;;  %v2771_v56 = vld [vmem:[%s5125_s0 + $0x308] sm:$0xf] }
 0x1c2   :  { %2323 = vst [vmem:[%s5126_s3 + $0x90] sm:$0xff] %v3447_v1  ;;  %2001 = vmatmul.bf16.gmra.mxu3 %v2748_v0  ;;  %v2772_v55 = vor.u32 %v3288_v37, %v2771_v56  ;;  %v1466_v56 = vadd.f32 %v4215_v31, %v4048_v44  ;;  %v1468_v44 = vadd.f32 %v4215_v31, %v4057_v52  ;;  %v3297_v31 = vld [vmem:[%s5125_s0 + $0x360] sm:$0xf0]  ;;  %v3295_v52 = vld [vmem:[%s5125_s0 + $0x354] sm:$0xf] }
 0x1c3   :  { %3175 = vmatmul.msk.bf16.gmra.mxu0 %vm1299_vm0, %v2752_v49  ;;  %3448 = vtanh.f32 %v2129_v25  ;;  %v2777_v25 = vld [vmem:[%s5125_s0 + $0x334] sm:$0xf0] }
 0x1c4   :  { %v1793_v42 = vpop.f32.mrf.mxu2 }
 0x1c5   :  { %v1794_v63 = vadd.f32 %v1793_v42, %v1625_v33  ;;  %v1962_v23 = vpop.f32.mrf.mxu3  ;;  %v2783_v33 = vld [vmem:[%s5125_s0 + $0x328] sm:$0xf]  ;;  %v3290_v42 = vld [vmem:[%s5125_s0 + $0x32c] sm:$0xf] }
 0x1c6   :  { %v1626_v46 = vpop.f32.mrf.mxu1  ;;  %v2784_v17 = vor.u32 %v3292_v22, %v2783_v33 }
 0x1c7   :  { %v1963_v29 = vadd.f32 %v1962_v23, %v1794_v63  ;;  %v1627_v19 = vadd.f32 %v1626_v46, %v1458_v54  ;;  %v2785_v23 = vld [vmem:[%s5125_s0 + $0x33c] sm:$0xf0]  ;;  %v2791_v46 = vld [vmem:[%s5125_s0 + $0x330] sm:$0xf] }
 0x1c8   :  { %v2133_v53 = vpop.f32.mrf.mxu0  ;;  %v2788_v39 = vor.u32 %v3290_v42, %v2785_v23  ;;  %v4669_v42 = vld [vmem:[%s5124_s2] ss:$0 sm:$0xff] }
 0x1c9   :  { %v3449_v5 = vpop.eup %3448  ;;  %v2132_v45 = vadd.f32 %v2131_v9, %v1963_v29  ;;  %v3293_v29 = vld [vmem:[%s5125_s0 + $0x340] sm:$0xf0] }
 0x1ca   :  { %2324 = vst [vmem:[%s5126_s3 + $0x98] sm:$0xff] %v3449_v5  ;;  %v2792_v60 = vor.u32 %v3293_v29, %v2791_v46 }
 0x1cb   :  { %3450 = vtanh.f32 %v2132_v45  ;;  %v2780_v45 = vor.u32 %v3289_v47, %v2777_v25 }
 0x1cc   :  { %v1795_v34 = vpop.f32.mrf.mxu2 }
 0x1cd   :  { %v1796_v43 = vadd.f32 %v1795_v34, %v1627_v19  ;;  %v1964_v12 = vpop.f32.mrf.mxu3 }
 0x1ce   :  { %v1629_v40 = vpop.f32.mrf.mxu1 }
 0x1cf   :  { %v1965_v57 = vadd.f32 %v1964_v12, %v1796_v43  ;;  %v1630_v61 = vadd.f32 %v1629_v40, %v1461_v3  ;;  %v2803_v3 = vld [vmem:[%s5125_s0 + $0x350] sm:$0xf] }
 0x1d0   :  { %v2136_v14 = vpop.f32.mrf.mxu0 }
 0x1d1   :  { %v3451_v16 = vpop.eup %3450  ;;  %v2134_v8 = vadd.f32 %v2133_v53, %v1965_v57  ;;  %1668 = vmatmul.bf16.gmra.mxu1 %v2760_v26  ;;  %1837 = vmatmul.bf16.gmra.mxu2 %v2764_v62 }
 0x1d2   :  { %2325 = vst [vmem:[%s5126_s3 + $0xa0] sm:$0xff] %v3451_v16  ;;  %2006 = vmatmul.bf16.gmra.mxu3 %v2768_v41  ;;  %v2797_v16 = vld [vmem:[%s5125_s0 + $0x35c] sm:$0xf0] }
 0x1d3   :  { %3176 = vmatmul.msk.bf16.gmra.mxu0 %vm1299_vm0, %v2772_v55  ;;  %3452 = vtanh.f32 %v2134_v8 }
 0x1d4   :  { %v1798_v20 = vpop.f32.mrf.mxu2 }
 0x1d5   :  { %v1799_v13 = vadd.f32 %v1798_v20, %v1630_v61  ;;  %v1967_v36 = vpop.f32.mrf.mxu3  ;;  %v2805_v61 = vld [vmem:[%s5125_s0 + $0x364] sm:$0xf0]  ;;  %v2811_v20 = vld [vmem:[%s5125_s0 + $0x358] sm:$0xf] }
 0x1d6   :  { %v1631_v0 = vpop.f32.mrf.mxu1 }
 0x1d7   :  { %v1968_v49 = vadd.f32 %v1967_v36, %v1799_v13  ;;  %v1632_v63 = vadd.f32 %v1631_v0, %v1463_v10  ;;  %v3298_v13 = vld [vmem:[%s5125_s0 + $0x368] sm:$0xf0] }
 0x1d8   :  { %v2138_v32 = vpop.f32.mrf.mxu0  ;;  %v2812_v47 = vor.u32 %v3298_v13, %v2811_v20 }
 0x1d9   :  { %v3453_v9 = vpop.eup %3452  ;;  %v2137_v1 = vadd.f32 %v2136_v14, %v1968_v49  ;;  %v3294_v14 = vld [vmem:[%s5125_s0 + $0x34c] sm:$0xf] }
 0x1da   :  { %2326 = vst [vmem:[%s5126_s3 + $0xa8] sm:$0xff] %v3453_v9  ;;  %v2804_v9 = vor.u32 %v3297_v31, %v2803_v3  ;;  %v1476_v31 = vadd.f32 %v4669_v42, %v4130_v2  ;;  %v1478_v2 = vadd.f32 %v4669_v42, %v4139_v27  ;;  %v3307_v27 = vld [vmem:[%s5125_s0 + $0x3b0] sm:$0xf0] }
 0x1db   :  { %3454 = vtanh.f32 %v2137_v1  ;;  %v2808_v1 = vor.u32 %v3295_v52, %v2805_v61 }
 0x1dc   :  { %v1800_v53 = vpop.f32.mrf.mxu2 }
 0x1dd   :  { %v1801_v5 = vadd.f32 %v1800_v53, %v1632_v63  ;;  %v1969_v54 = vpop.f32.mrf.mxu3  ;;  %v1471_v63 = vadd.f32 %v4669_v42, %v4089_v11  ;;  %v1473_v11 = vadd.f32 %v4669_v42, %v4098_v28  ;;  %v3302_v28 = vld [vmem:[%s5125_s0 + $0x388] sm:$0xf0] }
 0x1de   :  { %v1634_v51 = vpop.f32.mrf.mxu1 }
 0x1df   :  { %v1970_v7 = vadd.f32 %v1969_v54, %v1801_v5  ;;  %v1635_v34 = vadd.f32 %v1634_v51, %v1466_v56 }
 0x1e0   :  { %v2141_v19 = vpop.f32.mrf.mxu0 }
 0x1e1   :  { %v3455_v21 = vpop.eup %3454  ;;  %v2139_v37 = vadd.f32 %v2138_v32, %v1970_v7  ;;  %1673 = vmatmul.bf16.gmra.mxu1 %v2780_v45  ;;  %1842 = vmatmul.bf16.gmra.mxu2 %v2784_v17  ;;  %v2800_v32 = vor.u32 %v3294_v14, %v2797_v16  ;;  %v2817_v7 = vld [vmem:[%s5125_s0 + $0x384] sm:$0xf0] }
 0x1e2   :  { %2327 = vst [vmem:[%s5126_s3 + $0xb0] sm:$0xff] %v3455_v21  ;;  %2011 = vmatmul.bf16.gmra.mxu3 %v2788_v39  ;;  %v3300_v21 = vld [vmem:[%s5125_s0 + $0x37c] sm:$0xf] }
 0x1e3   :  { %3177 = vmatmul.msk.bf16.gmra.mxu0 %vm1299_vm0, %v2792_v60  ;;  %3456 = vtanh.f32 %v2139_v37  ;;  %v3299_v60 = vld [vmem:[%s5125_s0 + $0x374] sm:$0xf]  ;;  %v2825_v37 = vld [vmem:[%s5125_s0 + $0x38c] sm:$0xf0] }
 0x1e4   :  { %v1803_v43 = vpop.f32.mrf.mxu2 }
 0x1e5   :  { %v1804_v12 = vadd.f32 %v1803_v43, %v1635_v34  ;;  %v1972_v26 = vpop.f32.mrf.mxu3  ;;  %v2831_v34 = vld [vmem:[%s5125_s0 + $0x380] sm:$0xf]  ;;  %v3303_v43 = vld [vmem:[%s5125_s0 + $0x390] sm:$0xf0] }
 0x1e6   :  { %v1636_v62 = vpop.f32.mrf.mxu1 }
 0x1e7   :  { %v1973_v40 = vadd.f32 %v1972_v26, %v1804_v12  ;;  %v1637_v8 = vadd.f32 %v1636_v62, %v1468_v44  ;;  %v2828_v44 = vor.u32 %v3300_v21, %v2825_v37 }
 0x1e8   :  { %v2143_v41 = vpop.f32.mrf.mxu0 }
 0x1e9   :  { %v3457_v55 = vpop.eup %3456  ;;  %v2142_v57 = vadd.f32 %v2141_v19, %v1973_v40  ;;  %v2823_v19 = vld [vmem:[%s5125_s0 + $0x378] sm:$0xf]  ;;  %v2820_v40 = vor.u32 %v3299_v60, %v2817_v7  ;;  %v1481_v7 = vadd.f32 %v4669_v42, %v4171_v24  ;;  %v1483_v24 = vadd.f32 %v4669_v42, %v4180_v59  ;;  %v3312_v59 = vld [vmem:[%s5125_s0 + $0x3d8] sm:$0xf0] }
 0x1ea   :  { %2328 = vst [vmem:[%s5126_s3 + $0xb8] sm:$0xff] %v3457_v55 }
 0x1eb   :  { %3458 = vtanh.f32 %v2142_v57  ;;  %v2832_v57 = vor.u32 %v3303_v43, %v2831_v34 }
 0x1ec   :  { %v1805_v36 = vpop.f32.mrf.mxu2 }
 0x1ed   :  { %v1806_v0 = vadd.f32 %v1805_v36, %v1637_v8  ;;  %v1974_v49 = vpop.f32.mrf.mxu3 }
 0x1ee   :  { %v1639_v10 = vpop.f32.mrf.mxu1 }
 0x1ef   :  { %v1975_v25 = vadd.f32 %v1974_v49, %v1806_v0  ;;  %v1640_v46 = vadd.f32 %v1639_v10, %v1471_v63  ;;  %v3304_v10 = vld [vmem:[%s5125_s0 + $0x39c] sm:$0xf]  ;;  %v2851_v63 = vld [vmem:[%s5125_s0 + $0x3a8] sm:$0xf] }
 0x1f0   :  { %v2146_v33 = vpop.f32.mrf.mxu0 }
 0x1f1   :  { %v3459_v22 = vpop.eup %3458  ;;  %v2144_v23 = vadd.f32 %v2143_v41, %v1975_v25  ;;  %1678 = vmatmul.bf16.gmra.mxu1 %v2800_v32  ;;  %1847 = vmatmul.bf16.gmra.mxu2 %v2804_v9  ;;  %v2824_v41 = vor.u32 %v3302_v28, %v2823_v19  ;;  %v3305_v25 = vld [vmem:[%s5125_s0 + $0x3a4] sm:$0xf] }
 0x1f2   :  { %2329 = vst [vmem:[%s5126_s3 + $0xc0] sm:$0xff] %v3459_v22  ;;  %2016 = vmatmul.bf16.gmra.mxu3 %v2808_v1  ;;  %v2837_v1 = vld [vmem:[%s5125_s0 + $0x3ac] sm:$0xf0]  ;;  %v2845_v22 = vld [vmem:[%s5125_s0 + $0x3b4] sm:$0xf0] }
 0x1f3   :  { %3178 = vmatmul.msk.bf16.gmra.mxu0 %vm1299_vm0, %v2812_v47  ;;  %3460 = vtanh.f32 %v2144_v23  ;;  %v2843_v47 = vld [vmem:[%s5125_s0 + $0x3a0] sm:$0xf]  ;;  %v3308_v23 = vld [vmem:[%s5125_s0 + $0x3b8] sm:$0xf0] }
 0x1f4   :  { %v1808_v29 = vpop.f32.mrf.mxu2 }
 0x1f5   :  { %v1809_v53 = vadd.f32 %v1808_v29, %v1640_v46  ;;  %v1977_v5 = vpop.f32.mrf.mxu3 }
 0x1f6   :  { %v1641_v54 = vpop.f32.mrf.mxu1 }
 0x1f7   :  { %v1978_v45 = vadd.f32 %v1977_v5, %v1809_v53  ;;  %v1642_v56 = vadd.f32 %v1641_v54, %v1473_v11  ;;  %v2840_v5 = vor.u32 %v3304_v10, %v2837_v1  ;;  %v2844_v54 = vor.u32 %v3307_v27, %v2843_v47 }
 0x1f8   :  { %v2148_v17 = vpop.f32.mrf.mxu0 }
 0x1f9   :  { %v3461_v51 = vpop.eup %3460  ;;  %v2147_v39 = vadd.f32 %v2146_v33, %v1978_v45 }
 0x1fa   :  { %2330 = vst [vmem:[%s5126_s3 + $0xc8] sm:$0xff] %v3461_v51  ;;  %v2852_v51 = vor.u32 %v3308_v23, %v2851_v63 }
 0x1fb   :  { %3462 = vtanh.f32 %v2147_v39 }
 0x1fc   :  { %v1810_v12 = vpop.f32.mrf.mxu2 }
 0x1fd   :  { %v1811_v26 = vadd.f32 %v1810_v12, %v1642_v56  ;;  %v1979_v62 = vpop.f32.mrf.mxu3 }
 0x1fe   :  { %v1644_v55 = vpop.f32.mrf.mxu1 }
 0x1ff   :  { %v1980_v14 = vadd.f32 %v1979_v62, %v1811_v26  ;;  %v1645_v8 = vadd.f32 %v1644_v55, %v1476_v31  ;;  %v2863_v55 = vld [vmem:[%s5125_s0 + $0x3c8] sm:$0xf] }
 0x200   :  { %v2151_v16 = vpop.f32.mrf.mxu0 }
 0x201   :  { %v3463_v3 = vpop.eup %3462  ;;  %v2149_v52 = vadd.f32 %v2148_v17, %v1980_v14  ;;  %1683 = vmatmul.bf16.gmra.mxu1 %v2820_v40  ;;  %1852 = vmatmul.bf16.gmra.mxu2 %v2824_v41  ;;  %v2848_v17 = vor.u32 %v3305_v25, %v2845_v22  ;;  %v3309_v40 = vld [vmem:[%s5125_s0 + $0x3c4] sm:$0xf]  ;;  %v2857_v41 = vld [vmem:[%s5125_s0 + $0x3d4] sm:$0xf0]  ;;  %v2865_v14 = vld [vmem:[%s5125_s0 + $0x3dc] sm:$0xf0] }
 0x202   :  { %2331 = vst [vmem:[%s5126_s3 + $0xd0] sm:$0xff] %v3463_v3  ;;  %2021 = vmatmul.bf16.gmra.mxu3 %v2828_v44  ;;  %v3310_v44 = vld [vmem:[%s5125_s0 + $0x3cc] sm:$0xf]  ;;  %v3313_v3 = vld [vmem:[%s5125_s0 + $0x3e0] sm:$0xf0] }
 0x203   :  { %3179 = vmatmul.msk.bf16.gmra.mxu0 %vm1299_vm0, %v2832_v57  ;;  %3464 = vtanh.f32 %v2149_v52 }
 0x204   :  { %v1813_v61 = vpop.f32.mrf.mxu2 }
 0x205   :  { %v1814_v20 = vadd.f32 %v1813_v61, %v1645_v8  ;;  %v1982_v13 = vpop.f32.mrf.mxu3  ;;  %v2860_v61 = vor.u32 %v3309_v40, %v2857_v41 }
 0x206   :  { %v1646_v36 = vpop.f32.mrf.mxu1 }
 0x207   :  { %v1983_v0 = vadd.f32 %v1982_v13, %v1814_v20  ;;  %v1647_v33 = vadd.f32 %v1646_v36, %v1478_v2  ;;  %v2864_v20 = vor.u32 %v3312_v59, %v2863_v55  ;;  %v2868_v36 = vor.u32 %v3310_v44, %v2865_v14 }
 0x208   :  { %v2153_v49 = vpop.f32.mrf.mxu0 }
 0x209   :  { %v3465_v32 = vpop.eup %3464  ;;  %v2152_v9 = vadd.f32 %v2151_v16, %v1983_v0  ;;  %v2871_v16 = vld [vmem:[%s5125_s0 + $0x3d0] sm:$0xf] }
 0x20a   :  { %2332 = vst [vmem:[%s5126_s3 + $0xd8] sm:$0xff] %v3465_v32  ;;  %v2872_v0 = vor.u32 %v3313_v3, %v2871_v16  ;;  %v3319_v3 = vld [vmem:[%s5125_s0 + $0x414] sm:$0xf] }
 0x20b   :  { %3466 = vtanh.f32 %v2152_v9  ;;  %v1486_v9 = vadd.f32 %v4669_v42, %v3889_v18  ;;  %v1488_v18 = vadd.f32 %v4669_v42, %v3921_v30  ;;  %v3317_v30 = vld [vmem:[%s5125_s0 + $0x400] sm:$0xf0] }
 0x20c   :  { %v1815_v46 = vpop.f32.mrf.mxu2 }
 0x20d   :  { %v1816_v29 = vadd.f32 %v1815_v46, %v1647_v33  ;;  %v1984_v53 = vpop.f32.mrf.mxu3 }
 0x20e   :  { %v1649_v45 = vpop.f32.mrf.mxu1 }
 0x20f   :  { %v1985_v11 = vadd.f32 %v1984_v53, %v1816_v29  ;;  %v1650_v28 = vadd.f32 %v1649_v45, %v1481_v7  ;;  %v3314_v29 = vld [vmem:[%s5125_s0 + $0x3ec] sm:$0xf]  ;;  %v2877_v53 = vld [vmem:[%s5125_s0 + $0x3fc] sm:$0xf0] }
 0x210   :  { %v2156_v39 = vpop.f32.mrf.mxu0 }
 0x211   :  { %v3467_v60 = vpop.eup %3466  ;;  %v2154_v19 = vadd.f32 %v2153_v49, %v1985_v11  ;;  %1688 = vmatmul.bf16.gmra.mxu1 %v2840_v5  ;;  %1857 = vmatmul.bf16.gmra.mxu2 %v2844_v54  ;;  %v2883_v5 = vld [vmem:[%s5125_s0 + $0x3f0] sm:$0xf]  ;;  %v3315_v54 = vld [vmem:[%s5125_s0 + $0x3f4] sm:$0xf]  ;;  %v3318_v11 = vld [vmem:[%s5125_s0 + $0x408] sm:$0xf0] }
 0x212   :  { %2333 = vst [vmem:[%s5126_s3 + $0xe0] sm:$0xff] %v3467_v60  ;;  %2026 = vmatmul.bf16.gmra.mxu3 %v2848_v17  ;;  %v2885_v17 = vld [vmem:[%s5125_s0 + $0x404] sm:$0xf0] }
 0x213   :  { %3180 = vmatmul.msk.bf16.gmra.mxu0 %vm1299_vm0, %v2852_v51  ;;  %3468 = vtanh.f32 %v2154_v19  ;;  %v2891_v51 = vld [vmem:[%s5125_s0 + $0x3f8] sm:$0xf]  ;;  %v2880_v19 = vor.u32 %v3314_v29, %v2877_v53 }
 0x214   :  { %v1818_v21 = vpop.f32.mrf.mxu2 }
 0x215   :  { %v1819_v56 = vadd.f32 %v1818_v21, %v1650_v28  ;;  %v1987_v37 = vpop.f32.mrf.mxu3  ;;  %v2884_v28 = vor.u32 %v3317_v30, %v2883_v5 }
 0x216   :  { %v1651_v34 = vpop.f32.mrf.mxu1 }
 0x217   :  { %v1988_v43 = vadd.f32 %v1987_v37, %v1819_v56  ;;  %v1652_v57 = vadd.f32 %v1651_v34, %v1483_v24  ;;  %v2888_v56 = vor.u32 %v3315_v54, %v2885_v17  ;;  %v2892_v37 = vor.u32 %v3318_v11, %v2891_v51  ;;  %v3324_v17 = vld [vmem:[%s5125_s0 + $0x43c] sm:$0xf]  ;;  %v2917_v51 = vld [vmem:[%s5125_s0 + $0x44c] sm:$0xf0]  ;;  %v2923_v11 = vld [vmem:[%s5125_s0 + $0x440] sm:$0xf] }
 0x218   :  { %v2158_v12 = vpop.f32.mrf.mxu0 }
 0x219   :  { %v3469_v26 = vpop.eup %3468  ;;  %v2157_v62 = vadd.f32 %v2156_v39, %v1988_v43 }
 0x21a   :  { %2334 = vst [vmem:[%s5126_s3 + $0xe8] sm:$0xff] %v3469_v26  ;;  %v1491_v26 = vadd.f32 %v4669_v42, %v3930_v38  ;;  %v1493_v38 = vadd.f32 %v4669_v42, %v3962_v50  ;;  %v3322_v50 = vld [vmem:[%s5125_s0 + $0x428] sm:$0xf0] }
 0x21b   :  { %3470 = vtanh.f32 %v2157_v62 }
 0x21c   :  { %v1820_v31 = vpop.f32.mrf.mxu2 }
 0x21d   :  { %v1821_v52 = vadd.f32 %v1820_v31, %v1652_v57  ;;  %v1989_v8 = vpop.f32.mrf.mxu3  ;;  %v2897_v31 = vld [vmem:[%s5125_s0 + $0x424] sm:$0xf0] }
 0x21e   :  { %v1654_v13 = vpop.f32.mrf.mxu1 }
 0x21f   :  { %v1990_v49 = vadd.f32 %v1989_v8, %v1821_v52  ;;  %v1655_v1 = vadd.f32 %v1654_v13, %v1486_v9  ;;  %v2903_v52 = vld [vmem:[%s5125_s0 + $0x418] sm:$0xf]  ;;  %v3320_v8 = vld [vmem:[%s5125_s0 + $0x41c] sm:$0xf]  ;;  %v2911_v13 = vld [vmem:[%s5125_s0 + $0x420] sm:$0xf] }
 0x220   :  { %v2161_v32 = vpop.f32.mrf.mxu0  ;;  %v2904_v9 = vor.u32 %v3322_v50, %v2903_v52 }
 0x221   :  { %v3471_v2 = vpop.eup %3470  ;;  %v2159_v10 = vadd.f32 %v2158_v12, %v1990_v49  ;;  %1693 = vmatmul.bf16.gmra.mxu1 %v2860_v61  ;;  %1862 = vmatmul.bf16.gmra.mxu2 %v2864_v20  ;;  %v2905_v20 = vld [vmem:[%s5125_s0 + $0x42c] sm:$0xf0] }
 0x222   :  { %2335 = vst [vmem:[%s5126_s3 + $0xf0] sm:$0xff] %v3471_v2  ;;  %2031 = vmatmul.bf16.gmra.mxu3 %v2868_v36  ;;  %v3323_v36 = vld [vmem:[%s5125_s0 + $0x430] sm:$0xf0]  ;;  %v2900_v2 = vor.u32 %v3319_v3, %v2897_v31 }
 0x223   :  { %3181 = vmatmul.msk.bf16.gmra.mxu0 %vm1299_vm0, %v2872_v0  ;;  %3472 = vtanh.f32 %v2159_v10 }
 0x224   :  { %v1823_v47 = vpop.f32.mrf.mxu2 }
 0x225   :  { %v1824_v27 = vadd.f32 %v1823_v47, %v1655_v1  ;;  %v1992_v25 = vpop.f32.mrf.mxu3  ;;  %v2908_v1 = vor.u32 %v3320_v8, %v2905_v20  ;;  %v2912_v47 = vor.u32 %v3323_v36, %v2911_v13  ;;  %v3329_v8 = vld [vmem:[%s5125_s0 + $0x464] sm:$0xf]  ;;  %v2943_v20 = vld [vmem:[%s5125_s0 + $0x468] sm:$0xf]  ;;  %v3330_v13 = vld [vmem:[%s5125_s0 + $0x46c] sm:$0xf] }
 0x226   :  { %v1656_v33 = vpop.f32.mrf.mxu1 }
 0x227   :  { %v1993_v22 = vadd.f32 %v1992_v25, %v1824_v27  ;;  %v1657_v45 = vadd.f32 %v1656_v33, %v1488_v18 }
 0x228   :  { %v2163_v63 = vpop.f32.mrf.mxu0 }
 0x229   :  { %v3473_v23 = vpop.eup %3472  ;;  %v2162_v46 = vadd.f32 %v2161_v32, %v1993_v22  ;;  %v1496_v22 = vadd.f32 %v4669_v42, %v3971_v58  ;;  %v1498_v58 = vadd.f32 %v4669_v42, %v4003_v6  ;;  %v3327_v6 = vld [vmem:[%s5125_s0 + $0x450] sm:$0xf0] }
 0x22a   :  { %2336 = vst [vmem:[%s5126_s3 + $0xf8] sm:$0xff] %v3473_v23 }
 0x22b   :  { %3474 = vtanh.f32 %v2162_v46 }
 0x22c   :  { %v1825_v39 = vpop.f32.mrf.mxu2 }
 0x22d   :  { %v1826_v60 = vadd.f32 %v1825_v39, %v1657_v45  ;;  %v1994_v7 = vpop.f32.mrf.mxu3  ;;  %v3325_v39 = vld [vmem:[%s5125_s0 + $0x444] sm:$0xf] }
 0x22e   :  { %v1659_v21 = vpop.f32.mrf.mxu1 }
 0x22f   :  { %v1995_v34 = vadd.f32 %v1994_v7, %v1826_v60  ;;  %v1660_v62 = vadd.f32 %v1659_v21, %v1491_v26  ;;  %v2925_v7 = vld [vmem:[%s5125_s0 + $0x454] sm:$0xf0] }
 0x230   :  { %v2166_v43 = vpop.f32.mrf.mxu0  ;;  %v2928_v26 = vor.u32 %v3325_v39, %v2925_v7  ;;  %v2963_v39 = vld [vmem:[%s5125_s0 + $0x490] sm:$0xf] }
 0x231   :  { %v3475_v12 = vpop.eup %3474  ;;  %v2164_v24 = vadd.f32 %v2163_v63, %v1995_v34  ;;  %1698 = vmatmul.bf16.gmra.mxu1 %v2880_v19  ;;  %1867 = vmatmul.bf16.gmra.mxu2 %v2884_v28  ;;  %v2931_v19 = vld [vmem:[%s5125_s0 + $0x448] sm:$0xf]  ;;  %v3328_v28 = vld [vmem:[%s5125_s0 + $0x458] sm:$0xf0]  ;;  %v2920_v34 = vor.u32 %v3324_v17, %v2917_v51 }
 0x232   :  { %2337 = vst [vmem:[%s5126_s3 + $0x100] sm:$0xff] %v3475_v12  ;;  %2036 = vmatmul.bf16.gmra.mxu3 %v2888_v56 }
 0x233   :  { %3182 = vmatmul.msk.bf16.gmra.mxu0 %vm1299_vm0, %v2892_v37  ;;  %3476 = vtanh.f32 %v2164_v24  ;;  %v2932_v24 = vor.u32 %v3328_v28, %v2931_v19  ;;  %v2965_v19 = vld [vmem:[%s5125_s0 + $0x4a4] sm:$0xf0]  ;;  %v2971_v28 = vld [vmem:[%s5125_s0 + $0x498] sm:$0xf] }
 0x234   :  { %v1828_v40 = vpop.f32.mrf.mxu2 }
 0x235   :  { %v1829_v41 = vadd.f32 %v1828_v40, %v1660_v62  ;;  %v1997_v55 = vpop.f32.mrf.mxu3 }
 0x236   :  { %v1661_v59 = vpop.f32.mrf.mxu1 }
 0x237   :  { %v1998_v44 = vadd.f32 %v1997_v55, %v1829_v41  ;;  %v1662_v61 = vadd.f32 %v1661_v59, %v1493_v38  ;;  %v1501_v55 = vadd.f32 %v4669_v42, %v4012_v15  ;;  %v1503_v15 = vadd.f32 %v4669_v42, %v4044_v35  ;;  %v3332_v35 = vld [vmem:[%s5125_s0 + $0x478] sm:$0xf0] }
 0x238   :  { %v2168_v57 = vpop.f32.mrf.mxu0 }
 0x239   :  { %v3477_v14 = vpop.eup %3476  ;;  %v2167_v16 = vadd.f32 %v2166_v43, %v1998_v44  ;;  %v2924_v43 = vor.u32 %v3327_v6, %v2923_v11  ;;  %v3334_v11 = vld [vmem:[%s5125_s0 + $0x48c] sm:$0xf]  ;;  %v2957_v6 = vld [vmem:[%s5125_s0 + $0x49c] sm:$0xf0] }
 0x23a   :  { %2338 = vst [vmem:[%s5126_s3 + $0x108] sm:$0xff] %v3477_v14 }
 0x23b   :  { %3478 = vtanh.f32 %v2167_v16 }
 0x23c   :  { %v1830_v0 = vpop.f32.mrf.mxu2 }
 0x23d   :  { %v1831_v49 = vadd.f32 %v1830_v0, %v1662_v61  ;;  %v1999_v32 = vpop.f32.mrf.mxu3  ;;  %v2937_v61 = vld [vmem:[%s5125_s0 + $0x474] sm:$0xf0]  ;;  %v2945_v0 = vld [vmem:[%s5125_s0 + $0x47c] sm:$0xf0] }
 0x23e   :  { %v1664_v10 = vpop.f32.mrf.mxu1 }
 0x23f   :  { %v2000_v27 = vadd.f32 %v1999_v32, %v1831_v49  ;;  %v1665_v23 = vadd.f32 %v1664_v10, %v1496_v22  ;;  %v2951_v49 = vld [vmem:[%s5125_s0 + $0x470] sm:$0xf]  ;;  %v3333_v32 = vld [vmem:[%s5125_s0 + $0x480] sm:$0xf0] }
 0x240   :  { %v2171_v25 = vpop.f32.mrf.mxu0 }
 0x241   :  { %v3479_v33 = vpop.eup %3478  ;;  %v2169_v63 = vadd.f32 %v2168_v57, %v2000_v27  ;;  %1703 = vmatmul.bf16.gmra.mxu1 %v2900_v2  ;;  %1872 = vmatmul.bf16.gmra.mxu2 %v2904_v9 }
 0x242   :  { %2339 = vst [vmem:[%s5126_s3 + $0x110] sm:$0xff] %v3479_v33  ;;  %2041 = vmatmul.bf16.gmra.mxu3 %v2908_v1  ;;  %v2940_v1 = vor.u32 %v3329_v8, %v2937_v61  ;;  %v2952_v33 = vor.u32 %v3333_v32, %v2951_v49  ;;  %v5150_v8 = vld [vmem:[#allocation14_spill] sm:$0xff]  ;;  %v3340_v49 = vld [vmem:[%s5125_s0 + $0x4bc] sm:$0xf] }
 0x243   :  { %3183 = vmatmul.msk.bf16.gmra.mxu0 %vm1299_vm0, %v2912_v47  ;;  %3480 = vtanh.f32 %v2169_v63  ;;  %v2944_v47 = vor.u32 %v3332_v35, %v2943_v20  ;;  %v1513_v61 = vadd.f32 %v4669_v42, %v5150_v8  ;;  %v3339_v35 = vld [vmem:[%s5125_s0 + $0x4b4] sm:$0xf] }
 0x244   :  { %v1833_v18 = vpop.f32.mrf.mxu2 }
 0x245   :  { %v1834_v46 = vadd.f32 %v1833_v18, %v1665_v23  ;;  %v2002_v29 = vpop.f32.mrf.mxu3  ;;  %v1506_v18 = vadd.f32 %v4669_v42, %v4053_v48  ;;  %v1508_v48 = vadd.f32 %v4669_v42, %v4085_v4  ;;  %v3337_v4 = vld [vmem:[%s5125_s0 + $0x4a0] sm:$0xf0] }
 0x246   :  { %v1666_v53 = vpop.f32.mrf.mxu1 }
 0x247   :  { %v2003_v5 = vadd.f32 %v2002_v29, %v1834_v46  ;;  %v1667_v60 = vadd.f32 %v1666_v53, %v1498_v58 }
 0x248   :  { %v2173_v30 = vpop.f32.mrf.mxu0 }
 0x249   :  { %v3481_v54 = vpop.eup %3480  ;;  %v2172_v45 = vadd.f32 %v2171_v25, %v2003_v5  ;;  %v2948_v25 = vor.u32 %v3330_v13, %v2945_v0  ;;  %v2977_v13 = vld [vmem:[%s5125_s0 + $0x4c4] sm:$0xf0]  ;;  %v3342_v0 = vld [vmem:[%s5125_s0 + $0x4c8] sm:$0xf0] }
 0x24a   :  { %2340 = vst [vmem:[%s5126_s3 + $0x118] sm:$0xff] %v3481_v54 }
 0x24b   :  { %3482 = vtanh.f32 %v2172_v45 }
 0x24c   :  { %v1835_v21 = vpop.f32.mrf.mxu2 }
 0x24d   :  { %v1836_v56 = vadd.f32 %v1835_v21, %v1667_v60  ;;  %v2004_v37 = vpop.f32.mrf.mxu3  ;;  %v3335_v60 = vld [vmem:[%s5125_s0 + $0x494] sm:$0xf]  ;;  %v3338_v21 = vld [vmem:[%s5125_s0 + $0x4a8] sm:$0xf0] }
 0x24e   :  { %v1669_v12 = vpop.f32.mrf.mxu1 }
 0x24f   :  { %v2005_v62 = vadd.f32 %v2004_v37, %v1836_v56  ;;  %v1670_v44 = vadd.f32 %v1669_v12, %v1501_v55  ;;  %v2964_v12 = vor.u32 %v3337_v4, %v2963_v39  ;;  %v5152_v39 = vld [vmem:[#allocation18_spill] sm:$0xff] }
 0x250   :  { %v2176_v40 = vpop.f32.mrf.mxu0  ;;  %v1518_v4 = vadd.f32 %v4669_v42, %v5152_v39 }
 0x251   :  { %v3483_v41 = vpop.eup %3482  ;;  %v2174_v59 = vadd.f32 %v2173_v30, %v2005_v62  ;;  %1708 = vmatmul.bf16.gmra.mxu1 %v2920_v34  ;;  %1877 = vmatmul.bf16.gmra.mxu2 %v2924_v43  ;;  %v2960_v43 = vor.u32 %v3334_v11, %v2957_v6  ;;  %v2972_v62 = vor.u32 %v3338_v21, %v2971_v28  ;;  %v3003_v28 = vld [vmem:[%s5125_s0 + $0x4e0] sm:$0xf]  ;;  %v3347_v21 = vld [vmem:[%s5125_s0 + $0x4f0] sm:$0xf0] }
 0x252   :  { %2341 = vst [vmem:[%s5126_s3 + $0x120] sm:$0xff] %v3483_v41  ;;  %2046 = vmatmul.bf16.gmra.mxu3 %v2928_v26 }
 0x253   :  { %3184 = vmatmul.msk.bf16.gmra.mxu0 %vm1299_vm0, %v2932_v24  ;;  %3484 = vtanh.f32 %v2174_v59  ;;  %v2968_v24 = vor.u32 %v3335_v60, %v2965_v19  ;;  %v5149_v59 = vld [vmem:[#allocation12_spill] sm:$0xff] }
 0x254   :  { %v1838_v57 = vpop.f32.mrf.mxu2  ;;  %v2997_v19 = vld [vmem:[%s5125_s0 + $0x4ec] sm:$0xf0] }
 0x255   :  { %v1839_v14 = vadd.f32 %v1838_v57, %v1670_v44  ;;  %v2007_v38 = vpop.f32.mrf.mxu3  ;;  %v1511_v44 = vadd.f32 %v4669_v42, %v5149_v59 }
 0x256   :  { %v1671_v16 = vpop.f32.mrf.mxu1 }
 0x257   :  { %v2008_v3 = vadd.f32 %v2007_v38, %v1839_v14  ;;  %v1672_v36 = vadd.f32 %v1671_v16, %v1503_v15 }
 0x258   :  { %v2178_v31 = vpop.f32.mrf.mxu0 }
 0x259   :  { %v3485_v52 = vpop.eup %3484  ;;  %v2177_v50 = vadd.f32 %v2176_v40, %v2008_v3 }
 0x25a   :  { %2342 = vst [vmem:[%s5126_s3 + $0x128] sm:$0xff] %v3485_v52 }
 0x25b   :  { %3486 = vtanh.f32 %v2177_v50 }
 0x25c   :  { %v1840_v2 = vpop.f32.mrf.mxu2 }
 0x25d   :  { %v1841_v9 = vadd.f32 %v1840_v2, %v1672_v36  ;;  %v2009_v10 = vpop.f32.mrf.mxu3  ;;  %v2983_v36 = vld [vmem:[%s5125_s0 + $0x4b8] sm:$0xf]  ;;  %v2985_v2 = vld [vmem:[%s5125_s0 + $0x4cc] sm:$0xf0] }
 0x25e   :  { %v1674_v27 = vpop.f32.mrf.mxu1 }
 0x25f   :  { %v2010_v22 = vadd.f32 %v2009_v10, %v1841_v9  ;;  %v1675_v29 = vadd.f32 %v1674_v27, %v1506_v18  ;;  %v2991_v9 = vld [vmem:[%s5125_s0 + $0x4c0] sm:$0xf]  ;;  %v3343_v10 = vld [vmem:[%s5125_s0 + $0x4d0] sm:$0xf0] }
 0x260   :  { %v2181_v63 = vpop.f32.mrf.mxu0 }
 0x261   :  { %v3487_v23 = vpop.eup %3486  ;;  %v2179_v46 = vadd.f32 %v2178_v31, %v2010_v22  ;;  %1713 = vmatmul.bf16.gmra.mxu1 %v2940_v1  ;;  %1882 = vmatmul.bf16.gmra.mxu2 %v2944_v47 }
 0x262   :  { %2343 = vst [vmem:[%s5126_s3 + $0x130] sm:$0xff] %v3487_v23  ;;  %2051 = vmatmul.bf16.gmra.mxu3 %v2948_v25  ;;  %v2980_v25 = vor.u32 %v3339_v35, %v2977_v13  ;;  %v2992_v23 = vor.u32 %v3343_v10, %v2991_v9 }
 0x263   :  { %3185 = vmatmul.msk.bf16.gmra.mxu0 %vm1299_vm0, %v2952_v33  ;;  %3488 = vtanh.f32 %v2179_v46  ;;  %v2984_v33 = vor.u32 %v3342_v0, %v2983_v36  ;;  %v5154_v36 = vld [vmem:[#allocation22_spill] sm:$0xff] }
 0x264   :  { %v1843_v53 = vpop.f32.mrf.mxu2  ;;  %v1523_v0 = vadd.f32 %v4669_v42, %v5154_v36 }
 0x265   :  { %v1844_v5 = vadd.f32 %v1843_v53, %v1675_v29  ;;  %v2012_v30 = vpop.f32.mrf.mxu3  ;;  %v5151_v53 = vld [vmem:[#allocation16_spill] sm:$0xff] }
 0x266   :  { %v1676_v54 = vpop.f32.mrf.mxu1 }
 0x267   :  { %v2013_v58 = vadd.f32 %v2012_v30, %v1844_v5  ;;  %v1677_v7 = vadd.f32 %v1676_v54, %v1508_v48  ;;  %v1516_v5 = vadd.f32 %v4669_v42, %v5151_v53 }
 0x268   :  { %v2183_v45 = vpop.f32.mrf.mxu0 }
 0x269   :  { %v3489_v17 = vpop.eup %3488  ;;  %v2182_v51 = vadd.f32 %v2181_v63, %v2013_v58  ;;  %v2988_v63 = vor.u32 %v3340_v49, %v2985_v2 }
 0x26a   :  { %2344 = vst [vmem:[%s5126_s3 + $0x138] sm:$0xff] %v3489_v17 }
 0x26b   :  { %3490 = vtanh.f32 %v2182_v51 }
 0x26c   :  { %v1845_v56 = vpop.f32.mrf.mxu2 }
 0x26d   :  { %v1846_v37 = vadd.f32 %v1845_v56, %v1677_v7  ;;  %v2014_v34 = vpop.f32.mrf.mxu3  ;;  %v3344_v7 = vld [vmem:[%s5125_s0 + $0x4dc] sm:$0xf]  ;;  %v3345_v56 = vld [vmem:[%s5125_s0 + $0x4e4] sm:$0xf] }
 0x26e   :  { %v1679_v26 = vpop.f32.mrf.mxu1 }
 0x26f   :  { %v2015_v40 = vadd.f32 %v2014_v34, %v1846_v37  ;;  %v1680_v14 = vadd.f32 %v1679_v26, %v1511_v44  ;;  %v3005_v34 = vld [vmem:[%s5125_s0 + $0x4f4] sm:$0xf0] }
 0x270   :  { %v2186_v41 = vpop.f32.mrf.mxu0  ;;  %v3008_v59 = vor.u32 %v3345_v56, %v3005_v34 }
 0x271   :  { %v3491_v55 = vpop.eup %3490  ;;  %v2184_v57 = vadd.f32 %v2183_v45, %v2015_v40  ;;  %1718 = vmatmul.bf16.gmra.mxu1 %v2960_v43  ;;  %1887 = vmatmul.bf16.gmra.mxu2 %v2964_v12  ;;  %v3011_v43 = vld [vmem:[%s5125_s0 + $0x4e8] sm:$0xf]  ;;  %v3348_v12 = vld [vmem:[%s5125_s0 + $0x4f8] sm:$0xf0]  ;;  %v3000_v40 = vor.u32 %v3344_v7, %v2997_v19  ;;  %v5157_v19 = vld [vmem:[#allocation4_spill] sm:$0xff] }
 0x272   :  { %2345 = vst [vmem:[%s5126_s3 + $0x140] sm:$0xff] %v3491_v55  ;;  %2056 = vmatmul.bf16.gmra.mxu3 %v2968_v24  ;;  %v3012_v44 = vor.u32 %v3348_v12, %v3011_v43 }
 0x273   :  { %3186 = vmatmul.msk.bf16.gmra.mxu0 %vm1299_vm0, %v2972_v62  ;;  %3492 = vtanh.f32 %v2184_v57 }
 0x274   :  { %v1848_v38 = vpop.f32.mrf.mxu2 }
 0x275   :  { %v1849_v16 = vadd.f32 %v1848_v38, %v1680_v14  ;;  %v2017_v3 = vpop.f32.mrf.mxu3 }
 0x276   :  { %v1681_v31 = vpop.f32.mrf.mxu1 }
 0x277   :  { %v2018_v52 = vadd.f32 %v2017_v3, %v1849_v16  ;;  %v1682_v32 = vadd.f32 %v1681_v31, %v1513_v61  ;;  %v5153_v16 = vld [vmem:[#allocation20_spill] sm:$0xff] }
 0x278   :  { %v2188_v15 = vpop.f32.mrf.mxu0  ;;  %v1521_v3 = vadd.f32 %v4669_v42, %v5153_v16 }
 0x279   :  { %v3493_v50 = vpop.eup %3492  ;;  %v2187_v20 = vadd.f32 %v2186_v41, %v2018_v52  ;;  %v3004_v41 = vor.u32 %v3347_v21, %v3003_v28  ;;  %v1531_v28 = vadd.f32 %v4669_v42, %v5157_v19 }
 0x27a   :  { %2346 = vst [vmem:[%s5126_s3 + $0x148] sm:$0xff] %v3493_v50 }
 0x27b   :  { %3494 = vtanh.f32 %v2187_v20 }
 0x27c   :  { %v1850_v1 = vpop.f32.mrf.mxu2 }
 0x27d   :  { %v1851_v47 = vadd.f32 %v1850_v1, %v1682_v32  ;;  %v2019_v27 = vpop.f32.mrf.mxu3 }
 0x27e   :  { %v1684_v22 = vpop.f32.mrf.mxu1 }
 0x27f   :  { %v2020_v18 = vadd.f32 %v2019_v27, %v1851_v47  ;;  %v1685_v54 = vadd.f32 %v1684_v22, %v1516_v5 }
 0x280   :  { %v2191_v46 = vpop.f32.mrf.mxu0 }
 0x281   :  { %v3495_v29 = vpop.eup %3494  ;;  %v2189_v30 = vadd.f32 %v2188_v15, %v2020_v18  ;;  %1723 = vmatmul.bf16.gmra.mxu1 %v2980_v25  ;;  %1892 = vmatmul.bf16.gmra.mxu2 %v2984_v33  ;;  %v5155_v33 = vld [vmem:[#allocation2_spill] sm:$0xff] }
 0x282   :  { %2347 = vst [vmem:[%s5126_s3 + $0x150] sm:$0xff] %v3495_v29  ;;  %2061 = vmatmul.bf16.gmra.mxu3 %v2988_v63  ;;  %v1526_v22 = vadd.f32 %v4669_v42, %v5155_v33 }
 0x283   :  { %3187 = vmatmul.msk.bf16.gmra.mxu0 %vm1299_vm0, %v2992_v23  ;;  %3496 = vtanh.f32 %v2189_v30 }
 0x284   :  { %v1853_v58 = vpop.f32.mrf.mxu2 }
 0x285   :  { %v1854_v45 = vadd.f32 %v1853_v58, %v1685_v54  ;;  %v2022_v17 = vpop.f32.mrf.mxu3  ;;  %v5156_v58 = vld [vmem:[#allocation3_spill] sm:$0xff] }
 0x286   :  { %v1686_v48 = vpop.f32.mrf.mxu1 }
 0x287   :  { %v2023_v51 = vadd.f32 %v2022_v17, %v1854_v45  ;;  %v1687_v37 = vadd.f32 %v1686_v48, %v1518_v4  ;;  %v1528_v45 = vadd.f32 %v4669_v42, %v5156_v58 }
 0x288   :  { %v2193_v11 = vpop.f32.mrf.mxu0 }
 0x289   :  { %v3497_v6 = vpop.eup %3496  ;;  %v2192_v60 = vadd.f32 %v2191_v46, %v2023_v51 }
 0x28a   :  { %2348 = vst [vmem:[%s5126_s3 + $0x158] sm:$0xff] %v3497_v6 }
 0x28b   :  { %3498 = vtanh.f32 %v2192_v60 }
 0x28c   :  { %v1855_v26 = vpop.f32.mrf.mxu2 }
 0x28d   :  { %v1856_v24 = vadd.f32 %v1855_v26, %v1687_v37  ;;  %v2024_v62 = vpop.f32.mrf.mxu3 }
 0x28e   :  { %v1689_v55 = vpop.f32.mrf.mxu1 }
 0x28f   :  { %v2025_v57 = vadd.f32 %v2024_v62, %v1856_v24  ;;  %v1690_v52 = vadd.f32 %v1689_v55, %v1521_v3 }
 0x290   :  { %v2196_v14 = vpop.f32.mrf.mxu0 }
 0x291   :  { %v3499_v38 = vpop.eup %3498  ;;  %v2194_v31 = vadd.f32 %v2193_v11, %v2025_v57  ;;  %1728 = vmatmul.bf16.gmra.mxu1 %v3000_v40  ;;  %1897 = vmatmul.bf16.gmra.mxu2 %v3004_v41  ;;  %v5158_v40 = vld [vmem:[#allocation5_spill] sm:$0xff] }
 0x292   :  { %2349 = vst [vmem:[%s5126_s3 + $0x160] sm:$0xff] %v3499_v38  ;;  %2066 = vmatmul.bf16.gmra.mxu3 %v3008_v59  ;;  %v1533_v41 = vadd.f32 %v4669_v42, %v5158_v40 }
 0x293   :  { %3188 = vmatmul.msk.bf16.gmra.mxu0 %vm1299_vm0, %v3012_v44  ;;  %3500 = vtanh.f32 %v2194_v31 }
 0x294   :  { %v1858_v15 = vpop.f32.mrf.mxu2 }
 0x295   :  { %v1859_v50 = vadd.f32 %v1858_v15, %v1690_v52  ;;  %v2027_v8 = vpop.f32.mrf.mxu3  ;;  %v5159_v52 = vld [vmem:[#allocation6_spill] sm:$0xff] }
 0x296   :  { %v1691_v61 = vpop.f32.mrf.mxu1  ;;  %v1536_v15 = vadd.f32 %v4669_v42, %v5159_v52 }
 0x297   :  { %v2028_v20 = vadd.f32 %v2027_v8, %v1859_v50  ;;  %v1692_v32 = vadd.f32 %v1691_v61, %v1523_v0 }
 0x298   :  { %v2198_v35 = vpop.f32.mrf.mxu0 }
 0x299   :  { %v3501_v13 = vpop.eup %3500  ;;  %v2197_v49 = vadd.f32 %v2196_v14, %v2028_v20 }
 0x29a   :  { %2350 = vst [vmem:[%s5126_s3 + $0x168] sm:$0xff] %v3501_v13 }
 0x29b   :  { %3502 = vtanh.f32 %v2197_v49 }
 0x29c   :  { %v1860_v2 = vpop.f32.mrf.mxu2 }
 0x29d   :  { %v1861_v9 = vadd.f32 %v1860_v2, %v1692_v32  ;;  %v2029_v10 = vpop.f32.mrf.mxu3  ;;  %v5160_v32 = vld [vmem:[#allocation7_spill] sm:$0xff] }
 0x29e   :  { %v1694_v1 = vpop.f32.mrf.mxu1  ;;  %v1538_v2 = vadd.f32 %v4669_v42, %v5160_v32 }
 0x29f   :  { %v2030_v47 = vadd.f32 %v2029_v10, %v1861_v9  ;;  %v1695_v23 = vadd.f32 %v1694_v1, %v1526_v22 }
 0x2a0   :  { %v2201_v27 = vpop.f32.mrf.mxu0 }
 0x2a1   :  { %v3503_v25 = vpop.eup %3502  ;;  %v2199_v63 = vadd.f32 %v2198_v35, %v2030_v47 }
 0x2a2   :  { %2351 = vst [vmem:[%s5126_s3 + $0x170] sm:$0xff] %v3503_v25 }
 0x2a3   :  { %3504 = vtanh.f32 %v2199_v63 }
 0x2a4   :  { %v1863_v18 = vpop.f32.mrf.mxu2 }
 0x2a5   :  { %v1864_v46 = vadd.f32 %v1863_v18, %v1695_v23  ;;  %v2032_v29 = vpop.f32.mrf.mxu3  ;;  %v5161_v23 = vld [vmem:[#allocation8_spill] sm:$0xff] }
 0x2a6   :  { %v1696_v53 = vpop.f32.mrf.mxu1  ;;  %v1541_v18 = vadd.f32 %v4669_v42, %v5161_v23  ;;  %v5162_v42 = vld [vmem:[#allocation9_spill] sm:$0xff] }
 0x2a7   :  { %v2033_v5 = vadd.f32 %v2032_v29, %v1864_v46  ;;  %v1697_v48 = vadd.f32 %v1696_v53, %v1528_v45 }
 0x2a8   :  { %v2203_v30 = vpop.f32.mrf.mxu0 }
 0x2a9   :  { %v3505_v54 = vpop.eup %3504  ;;  %v2202_v17 = vadd.f32 %v2201_v27, %v2033_v5 }
 0x2aa   :  { %2352 = vst [vmem:[%s5126_s3 + $0x178] sm:$0xff] %v3505_v54 }
 0x2ab   :  { %3506 = vtanh.f32 %v2202_v17 }
 0x2ac   :  { %v1865_v51 = vpop.f32.mrf.mxu2 }
 0x2ad   :  { %v1866_v11 = vadd.f32 %v1865_v51, %v1697_v48  ;;  %v2034_v6 = vpop.f32.mrf.mxu3  ;;  %v5070_v48 = vld [vmem:[%s5124_s2] ss:$0 sm:$0xff] }
 0x2ae   :  { %v1699_v39 = vpop.f32.mrf.mxu1  ;;  %v1543_v51 = vadd.f32 %v5070_v48, %v5162_v42 }
 0x2af   :  { %v2035_v4 = vadd.f32 %v2034_v6, %v1866_v11  ;;  %v1700_v56 = vadd.f32 %v1699_v39, %v1531_v28 }
 0x2b0   :  { %v2206_v60 = vpop.f32.mrf.mxu0 }
 0x2b1   :  { %v3507_v7 = vpop.eup %3506  ;;  %v2204_v21 = vadd.f32 %v2203_v30, %v2035_v4 }
 0x2b2   :  { %2353 = vst [vmem:[%s5126_s3 + $0x180] sm:$0xff] %v3507_v7 }
 0x2b3   :  { %3508 = vtanh.f32 %v2204_v21 }
 0x2b4   :  { %v1868_v37 = vpop.f32.mrf.mxu2 }
 0x2b5   :  { %v1869_v34 = vadd.f32 %v1868_v37, %v1700_v56  ;;  %v2037_v43 = vpop.f32.mrf.mxu3  ;;  %v5163_v56 = vld [vmem:[#allocation10_spill] sm:$0xff] }
 0x2b6   :  { %v1701_v12 = vpop.f32.mrf.mxu1  ;;  %v1546_v37 = vadd.f32 %v5070_v48, %v5163_v56 }
 0x2b7   :  { %v2038_v26 = vadd.f32 %v2037_v43, %v1869_v34  ;;  %v1702_v59 = vadd.f32 %v1701_v12, %v1533_v41 }
 0x2b8   :  { %v2208_v24 = vpop.f32.mrf.mxu0 }
 0x2b9   :  { %v3509_v62 = vpop.eup %3508  ;;  %v2207_v55 = vadd.f32 %v2206_v60, %v2038_v26 }
 0x2ba   :  { %2354 = vst [vmem:[%s5126_s3 + $0x188] sm:$0xff] %v3509_v62 }
 0x2bb   :  { %3510 = vtanh.f32 %v2207_v55 }
 0x2bc   :  { %v1870_v44 = vpop.f32.mrf.mxu2 }
 0x2bd   :  { %v1871_v57 = vadd.f32 %v1870_v44, %v1702_v59  ;;  %v2039_v14 = vpop.f32.mrf.mxu3  ;;  %v5164_v59 = vld [vmem:[#allocation11_spill] sm:$0xff] }
 0x2be   :  { %v1704_v38 = vpop.f32.mrf.mxu1  ;;  %v1548_v44 = vadd.f32 %v5070_v48, %v5164_v59 }
 0x2bf   :  { %v2040_v16 = vadd.f32 %v2039_v14, %v1871_v57  ;;  %v1705_v8 = vadd.f32 %v1704_v38, %v1536_v15 }
 0x2c0   :  { %v2211_v3 = vpop.f32.mrf.mxu0 }
 0x2c1   :  { %v3511_v31 = vpop.eup %3510  ;;  %v2209_v50 = vadd.f32 %v2208_v24, %v2040_v16 }
 0x2c2   :  { %2355 = vst [vmem:[%s5126_s3 + $0x190] sm:$0xff] %v3511_v31 }
 0x2c3   :  { %3512 = vtanh.f32 %v2209_v50 }
 0x2c4   :  { %v1873_v61 = vpop.f32.mrf.mxu2 }
 0x2c5   :  { %v1874_v20 = vadd.f32 %v1873_v61, %v1705_v8  ;;  %v2042_v35 = vpop.f32.mrf.mxu3  ;;  %v5165_v8 = vld [vmem:[#allocation13_spill] sm:$0xff] }
 0x2c6   :  { %v1706_v13 = vpop.f32.mrf.mxu1  ;;  %v1551_v61 = vadd.f32 %v5070_v48, %v5165_v8 }
 0x2c7   :  { %v2043_v36 = vadd.f32 %v2042_v35, %v1874_v20  ;;  %v1707_v10 = vadd.f32 %v1706_v13, %v1538_v2 }
 0x2c8   :  { %v2213_v0 = vpop.f32.mrf.mxu0 }
 0x2c9   :  { %v3513_v49 = vpop.eup %3512  ;;  %v2212_v9 = vadd.f32 %v2211_v3, %v2043_v36 }
 0x2ca   :  { %2356 = vst [vmem:[%s5126_s3 + $0x198] sm:$0xff] %v3513_v49 }
 0x2cb   :  { %3514 = vtanh.f32 %v2212_v9 }
 0x2cc   :  { %v1875_v1 = vpop.f32.mrf.mxu2 }
 0x2cd   :  { %v1876_v47 = vadd.f32 %v1875_v1, %v1707_v10  ;;  %v2044_v27 = vpop.f32.mrf.mxu3  ;;  %v5166_v10 = vld [vmem:[#allocation15_spill] sm:$0xff] }
 0x2ce   :  { %v1709_v25 = vpop.f32.mrf.mxu1  ;;  %v1553_v1 = vadd.f32 %v5070_v48, %v5166_v10 }
 0x2cf   :  { %v2045_v33 = vadd.f32 %v2044_v27, %v1876_v47  ;;  %v1710_v29 = vadd.f32 %v1709_v25, %v1541_v18 }
 0x2d0   :  { %v2216_v22 = vpop.f32.mrf.mxu0 }
 0x2d1   :  { %v3515_v63 = vpop.eup %3514  ;;  %v2214_v46 = vadd.f32 %v2213_v0, %v2045_v33 }
 0x2d2   :  { %2357 = vst [vmem:[%s5126_s3 + $0x1a0] sm:$0xff] %v3515_v63 }
 0x2d3   :  { %3516 = vtanh.f32 %v2214_v46  ;;  %v5167_v46 = vld [vmem:[#allocation17_spill] sm:$0xff] }
 0x2d4   :  { %v1878_v53 = vpop.f32.mrf.mxu2 }
 0x2d5   :  { %v1879_v5 = vadd.f32 %v1878_v53, %v1710_v29  ;;  %v2047_v30 = vpop.f32.mrf.mxu3  ;;  %v1556_v29 = vadd.f32 %v5070_v48, %v5167_v46 }
 0x2d6   :  { %v1711_v54 = vpop.f32.mrf.mxu1 }
 0x2d7   :  { %v2048_v58 = vadd.f32 %v2047_v30, %v1879_v5  ;;  %v1712_v6 = vadd.f32 %v1711_v54, %v1543_v51 }
 0x2d8   :  { %v2218_v45 = vpop.f32.mrf.mxu0 }
 0x2d9   :  { %v3517_v17 = vpop.eup %3516  ;;  %v2217_v11 = vadd.f32 %v2216_v22, %v2048_v58 }
 0x2da   :  { %2358 = vst [vmem:[%s5126_s3 + $0x1a8] sm:$0xff] %v3517_v17 }
 0x2db   :  { %3518 = vtanh.f32 %v2217_v11  ;;  %v5168_v11 = vld [vmem:[#allocation19_spill] sm:$0xff] }
 0x2dc   :  { %v1880_v39 = vpop.f32.mrf.mxu2 }
 0x2dd   :  { %v1881_v4 = vadd.f32 %v1880_v39, %v1712_v6  ;;  %v2049_v60 = vpop.f32.mrf.mxu3  ;;  %v1558_v6 = vadd.f32 %v5070_v48, %v5168_v11 }
 0x2de   :  { %v1714_v7 = vpop.f32.mrf.mxu1 }
 0x2df   :  { %v2050_v19 = vadd.f32 %v2049_v60, %v1881_v4  ;;  %v1715_v43 = vadd.f32 %v1714_v7, %v1546_v37 }
 0x2e0   :  { %v2221_v28 = vpop.f32.mrf.mxu0 }
 0x2e1   :  { %v3519_v21 = vpop.eup %3518  ;;  %v2219_v34 = vadd.f32 %v2218_v45, %v2050_v19 }
 0x2e2   :  { %2359 = vst [vmem:[%s5126_s3 + $0x1b0] sm:$0xff] %v3519_v21 }
 0x2e3   :  { %3520 = vtanh.f32 %v2219_v34  ;;  %v5169_v34 = vld [vmem:[#allocation21_spill] sm:$0xff] }
 0x2e4   :  { %v1883_v12 = vpop.f32.mrf.mxu2 }
 0x2e5   :  { %v1884_v26 = vadd.f32 %v1883_v12, %v1715_v43  ;;  %v2052_v24 = vpop.f32.mrf.mxu3  ;;  %v1561_v43 = vadd.f32 %v5070_v48, %v5169_v34 }
 0x2e6   :  { %v1716_v62 = vpop.f32.mrf.mxu1 }
 0x2e7   :  { %v2053_v40 = vadd.f32 %v2052_v24, %v1884_v26  ;;  %v1717_v14 = vadd.f32 %v1716_v62, %v1548_v44 }
 0x2e8   :  { %v2223_v41 = vpop.f32.mrf.mxu0 }
 0x2e9   :  { %v3521_v55 = vpop.eup %3520  ;;  %v2222_v57 = vadd.f32 %v2221_v28, %v2053_v40 }
 0x2ea   :  { %2360 = vst [vmem:[%s5126_s3 + $0x1b8] sm:$0xff] %v3521_v55 }
 0x2eb   :  { %3522 = vtanh.f32 %v2222_v57  ;;  %v5170_v57 = vld [vmem:[#allocation23_spill] sm:$0xff] }
 0x2ec   :  { %v1885_v38 = vpop.f32.mrf.mxu2 }
 0x2ed   :  { %v1886_v16 = vadd.f32 %v1885_v38, %v1717_v14  ;;  %v2054_v3 = vpop.f32.mrf.mxu3  ;;  %v1563_v14 = vadd.f32 %v5070_v48, %v5170_v57 }
 0x2ee   :  { %v1719_v31 = vpop.f32.mrf.mxu1 }
 0x2ef   :  { %v2055_v52 = vadd.f32 %v2054_v3, %v1886_v16  ;;  %v1720_v35 = vadd.f32 %v1719_v31, %v1551_v61 }
 0x2f0   :  { %v2226_v15 = vpop.f32.mrf.mxu0 }
 0x2f1   :  { %v3523_v50 = vpop.eup %3522  ;;  %v2224_v20 = vadd.f32 %v2223_v41, %v2055_v52 }
 0x2f2   :  { %2361 = vst [vmem:[%s5126_s3 + $0x1c0] sm:$0xff] %v3523_v50 }
 0x2f3   :  { %3524 = vtanh.f32 %v2224_v20 }
 0x2f4   :  { %v1888_v13 = vpop.f32.mrf.mxu2 }
 0x2f5   :  { %v1889_v36 = vadd.f32 %v1888_v13, %v1720_v35  ;;  %v2057_v0 = vpop.f32.mrf.mxu3 }
 0x2f6   :  { %v1721_v49 = vpop.f32.mrf.mxu1 }
 0x2f7   :  { %v2058_v32 = vadd.f32 %v2057_v0, %v1889_v36  ;;  %v1722_v27 = vadd.f32 %v1721_v49, %v1553_v1 }
 0x2f8   :  { %v2228_v2 = vpop.f32.mrf.mxu0 }
 0x2f9   :  { %v3525_v9 = vpop.eup %3524  ;;  %v2227_v47 = vadd.f32 %v2226_v15, %v2058_v32 }
 0x2fa   :  { %2362 = vst [vmem:[%s5126_s3 + $0x1c8] sm:$0xff] %v3525_v9 }
 0x2fb   :  { %3526 = vtanh.f32 %v2227_v47 }
 0x2fc   :  { %v1890_v25 = vpop.f32.mrf.mxu2 }
 0x2fd   :  { %v1891_v33 = vadd.f32 %v1890_v25, %v1722_v27  ;;  %v2059_v22 = vpop.f32.mrf.mxu3 }
 0x2fe   :  { %v1724_v63 = vpop.f32.mrf.mxu1 }
 0x2ff   :  { %v2060_v23 = vadd.f32 %v2059_v22, %v1891_v33  ;;  %v1725_v30 = vadd.f32 %v1724_v63, %v1556_v29 }
 0x300   :  { %v2231_v5 = vpop.f32.mrf.mxu0 }
 0x301   :  { %v3527_v18 = vpop.eup %3526  ;;  %v2229_v53 = vadd.f32 %v2228_v2, %v2060_v23 }
 0x302   :  { %2363 = vst [vmem:[%s5126_s3 + $0x1d0] sm:$0xff] %v3527_v18 }
 0x303   :  { %3528 = vtanh.f32 %v2229_v53 }
 0x304   :  { %v1893_v54 = vpop.f32.mrf.mxu2 }
 0x305   :  { %v1894_v58 = vadd.f32 %v1893_v54, %v1725_v30  ;;  %v2062_v45 = vpop.f32.mrf.mxu3 }
 0x306   :  { %v1726_v17 = vpop.f32.mrf.mxu1 }
 0x307   :  { %v2063_v42 = vadd.f32 %v2062_v45, %v1894_v58  ;;  %v1727_v4 = vadd.f32 %v1726_v17, %v1558_v6 }
 0x308   :  { %v2233_v60 = vpop.f32.mrf.mxu0 }
 0x309   :  { %v3529_v51 = vpop.eup %3528  ;;  %v2232_v39 = vadd.f32 %v2231_v5, %v2063_v42 }
 0x30a   :  { %2364 = vst [vmem:[%s5126_s3 + $0x1d8] sm:$0xff] %v3529_v51 }
 0x30b   :  { %3530 = vtanh.f32 %v2232_v39 }
 0x30c   :  { %v1895_v7 = vpop.f32.mrf.mxu2 }
 0x30d   :  { %v1896_v19 = vadd.f32 %v1895_v7, %v1727_v4  ;;  %v2064_v28 = vpop.f32.mrf.mxu3 }
 0x30e   :  { %v1729_v21 = vpop.f32.mrf.mxu1 }
 0x30f   :  { %v2065_v56 = vadd.f32 %v2064_v28, %v1896_v19  ;;  %v1730_v26 = vadd.f32 %v1729_v21, %v1561_v43 }
 0x310   :  { %v2236_v41 = vpop.f32.mrf.mxu0 }
 0x311   :  { %v3531_v37 = vpop.eup %3530  ;;  %v2234_v12 = vadd.f32 %v2233_v60, %v2065_v56 }
 0x312   :  { %2365 = vst [vmem:[%s5126_s3 + $0x1e0] sm:$0xff] %v3531_v37 }
 0x313   :  { %3532 = vtanh.f32 %v2234_v12 }
 0x314   :  { %v1898_v24 = vpop.f32.mrf.mxu2 }
 0x315   :  { %v1899_v62 = vadd.f32 %v1898_v24, %v1730_v26  ;;  %v2067_v40 = vpop.f32.mrf.mxu3 }
 0x316   :  { %v1731_v59 = vpop.f32.mrf.mxu1 }
 0x317   :  { %v2068_v55 = vadd.f32 %v2067_v40, %v1899_v62  ;;  %v1732_v16 = vadd.f32 %v1731_v59, %v1563_v14 }
 0x318   :  { %v2238_v50 = vpop.f32.mrf.mxu0 }
 0x319   :  { %v3533_v44 = vpop.eup %3532  ;;  %v2237_v38 = vadd.f32 %v2236_v41, %v2068_v55 }
 0x31a   :  { %2366 = vst [vmem:[%s5126_s3 + $0x1e8] sm:$0xff] %v3533_v44 }
 0x31b   :  { %3534 = vtanh.f32 %v2237_v38 }
 0x31c   :  { %v1900_v3 = vpop.f32.mrf.mxu2 }
 0x31d   :  { %v1901_v31 = vadd.f32 %v1900_v3, %v1732_v16  ;;  %v2069_v52 = vpop.f32.mrf.mxu3 }
 0x31f   :  { %v2070_v15 = vadd.f32 %v2069_v52, %v1901_v31 }
 0x321   :  { %v3535_v8 = vpop.eup %3534  ;;  %v2239_v61 = vadd.f32 %v2238_v50, %v2070_v15 }
 0x322   :  { %2367 = vst [vmem:[%s5126_s3 + $0x1f0] sm:$0xff] %v3535_v8 }
 0x323   :  { %3536 = vtanh.f32 %v2239_v61 }
 0x329   :  { %v3537_v48 = vpop.eup %3536 }
 0x32a   :  { %2368 = vst [vmem:[%s5126_s3 + $0x1f8] sm:$0xff] %v3537_v48 }

</bundles_post_ra>
